<compile_context>
chip_gen: v6e
topology: v6e:2x2x1
jax: 0.10.0
libtpu: 0.0.40
codegen_flags: <defaults>
</compile_context>

<pallas_src>
import functools

import jax
import jax.numpy as jnp
from jax.experimental import pallas as pl
from jax.experimental.pallas import tpu as pltpu


# --------------------------------- fused kernel ------------------------------

def _fused_kernel(p_ref, w1_ref, s1_ref, b1_ref, w2_ref, s2_ref, b2_ref,
                  w3_ref, s3_ref, b3_ref, wfc_ref, bfc_ref, o_ref,
                  *, Bb, Hc, Wc):
    """conv1+pool1 -> conv2+pool2 -> conv3+pool3 -> avgpool -> fc, all in VMEM."""
    f32 = jnp.float32
    C1 = w1_ref.shape[-1]            # 128 (conv1 out channels, zero-padded 64->128)
    C2 = w2_ref.shape[-1]            # 128
    C3 = w3_ref.shape[-1]            # 256
    Hp1, Wp1 = Hc // 2, Wc // 2      # after maxpool1 (3x3, s2, p1)
    Hp2, Wp2 = Hp1 // 2, Wp1 // 2    # after maxpool2 (2x2, s2)
    Hp3, Wp3 = Hp2 // 2, Wp2 // 2    # after maxpool3 (2x2, s2)

    def pool2x2(x, h, w, c):
        # 2x2 stride-2 max pool via pair-split reshapes (no strided slices,
        # no per-element stores).
        xw = x.reshape(Bb, h, w // 2, 2, c)
        m = jnp.maximum(xw[:, :, :, 0, :], xw[:, :, :, 1, :])
        xh = m.reshape(Bb, h // 2, 2, w // 2, c)
        return jnp.maximum(xh[:, :, 0, :, :], xh[:, :, 1, :, :])

    def conv3x3_bn_relu(a, h, w, cin, cout, w_ref, s_ref, b_ref):
        # Implicit GEMM with sublane-offset addressing on the flattened,
        # zero-padded activation: tap (ky,kx) is the contiguous row slice at
        # offset ky*(w+2)+kx.  Computed at padded width; the two garbage
        # columns per row are dropped after BN/ReLU.
        wp = w + 2
        mp = h * wp
        zc = jnp.zeros((Bb, h, 1, cin), f32)
        aw = jnp.concatenate([zc, a, zc], axis=2).reshape(Bb, mp, cin)
        ztop = jnp.zeros((Bb, wp, cin), f32)
        zbot = jnp.zeros((Bb, wp + 8, cin), f32)   # bottom pad row + tap-offset slack
        flat = jnp.concatenate([ztop, aw, zbot], axis=1)    # (Bb, (h+2)*wp+8, cin)
        acc = jnp.zeros((Bb * mp, cout), f32)
        for t in range(9):                                  # 9 contiguous row slices
            ky, kx = divmod(t, 3)
            off = ky * wp + kx
            xt = flat[:, off:off + mp, :].reshape(Bb * mp, cin)
            acc = acc + jnp.dot(xt, w_ref[t], preferred_element_type=f32)
        y = jnp.maximum(acc * s_ref[...] + b_ref[...], 0.0)
        return y.reshape(Bb, h, wp, cout)[:, :, :w, :]      # drop padded-width cols

    # ---- stage 1: conv1 (7x7, s2, p3) as one GEMM + BN + ReLU ---------------
    k1 = p_ref.shape[-1]
    y1 = jnp.dot(p_ref[...].reshape(Bb * Hc * Wc, k1), w1_ref[...],
                 preferred_element_type=f32)
    y1 = jnp.maximum(y1 * s1_ref[...] + b1_ref[...], 0.0)
    y1 = y1.reshape(Bb, Hc, Wc, C1)

    # ---- maxpool1: 3x3, stride 2, pad 1 (zero pad exact: inputs >= 0) -------
    # width pass: out col q covers cols {2q-1, 2q, 2q+1} = {odd[q-1], even[q], odd[q]}
    xw = y1.reshape(Bb, Hc, Wc // 2, 2, C1)
    ev, od = xw[:, :, :, 0, :], xw[:, :, :, 1, :]
    prev_od = jnp.concatenate(
        [jnp.zeros((Bb, Hc, 1, C1), f32), od[:, :, :-1, :]], axis=2)
    cm = jnp.maximum(jnp.maximum(ev, od), prev_od)          # (Bb, Hc, Wp1, C1)
    # height pass
    xh = cm.reshape(Bb, Hc // 2, 2, Wp1, C1)
    ev_h, od_h = xh[:, :, 0, :, :], xh[:, :, 1, :, :]
    prev_od_h = jnp.concatenate(
        [jnp.zeros((Bb, 1, Wp1, C1), f32), od_h[:, :-1, :, :]], axis=1)
    a1 = jnp.maximum(jnp.maximum(ev_h, od_h), prev_od_h)    # (Bb, Hp1, Wp1, C1)

    # ---- stage 2: conv2 + BN + ReLU + maxpool2 ------------------------------
    y2 = conv3x3_bn_relu(a1, Hp1, Wp1, C1, C2, w2_ref, s2_ref, b2_ref)
    a2 = pool2x2(y2, Hp1, Wp1, C2)                          # (Bb, Hp2, Wp2, C2)

    # ---- stage 3: conv3 + BN + ReLU + maxpool3 ------------------------------
    y3 = conv3x3_bn_relu(a2, Hp2, Wp2, C2, C3, w3_ref, s3_ref, b3_ref)
    a3 = pool2x2(y3, Hp2, Wp2, C3)                          # (Bb, Hp3, Wp3, C3)

    # ---- global average pool + (identity dropout) + fc ----------------------
    emb = jnp.mean(a3.reshape(Bb, Hp3 * Wp3, C3), axis=1)   # (Bb, 256)
    logits = jnp.dot(emb, wfc_ref[...], preferred_element_type=f32) + bfc_ref[...]
    o_ref[...] = logits.reshape(Bb, 1, logits.shape[-1])


# ------------------------------ wrapper / forward ----------------------------

def _conv1_patches(x, Hc, Wc):
    """(B, H, W) -> (B, Hc*Wc, 56) unique conv1 im2col patches (cheap slices)."""
    B = x.shape[0]
    xp = jnp.pad(x, ((0, 0), (3, 3), (3, 3)))               # conv1 zero padding
    cols = []
    for ky in range(7):
        for kx in range(7):
            cols.append(jax.lax.slice(
                xp, (0, ky, kx), (B, ky + 2 * Hc - 1, kx + 2 * Wc - 1), (1, 2, 2)))
    patches = jnp.stack(cols, axis=-1).reshape(B, Hc * Wc, 49)
    return jnp.pad(patches, ((0, 0), (0, 0), (0, 7)))       # K: 49 -> 56


def resnet_mel_forward(x_nchw, kp, num_classes=10, block_b=None):
    x = x_nchw[:, 0].astype(jnp.float32)                    # Cin = 1 -> (B, H, W)
    B, H, W = x.shape
    Hc = (H + 6 - 7) // 2 + 1                                # conv1 output size
    Wc = (W + 6 - 7) // 2 + 1
    assert Hc % 8 == 0 and Wc % 8 == 0, (
        "input spatial size must give a conv1 output divisible by 8 "
        "(e.g. 32x32 or 16x16 inputs)")

    if block_b is None:
        block_b = 1
        for cand in (8, 4, 2):                               # keep >= 2 grid steps (v7x)
            if B % cand == 0 and B // cand >= 2:
                block_b = cand
                break
    assert B % block_b == 0

    patches = _conv1_patches(x, Hc, Wc)                      # (B, Hc*Wc, 56)
    m1, k1 = patches.shape[1], patches.shape[2]
    nc_pad = kp["w_fc"].shape[-1]                            # 128

    kernel = functools.partial(_fused_kernel, Bb=block_b, Hc=Hc, Wc=Wc)
    out = pl.pallas_call(
        kernel,
        grid=(B // block_b,),
        in_specs=[
            pl.BlockSpec((block_b, m1, k1), lambda i: (i, 0, 0)),
            pl.BlockSpec(kp["w1"].shape, lambda i: (0, 0)),
            pl.BlockSpec(kp["s1"].shape, lambda i: (0, 0)),
            pl.BlockSpec(kp["b1"].shape, lambda i: (0, 0)),
            pl.BlockSpec(kp["w2"].shape, lambda i: (0, 0, 0)),
            pl.BlockSpec(kp["s2"].shape, lambda i: (0, 0)),
            pl.BlockSpec(kp["b2"].shape, lambda i: (0, 0)),
            pl.BlockSpec(kp["w3"].shape, lambda i: (0, 0, 0)),
            pl.BlockSpec(kp["s3"].shape, lambda i: (0, 0)),
            pl.BlockSpec(kp["b3"].shape, lambda i: (0, 0)),
            pl.BlockSpec(kp["w_fc"].shape, lambda i: (0, 0)),
            pl.BlockSpec(kp["b_fc"].shape, lambda i: (0, 0)),
        ],
        out_specs=pl.BlockSpec((block_b, 1, nc_pad), lambda i: (i, 0, 0)),
        out_shape=jax.ShapeDtypeStruct((B, 1, nc_pad), jnp.float32),
        compiler_params=pltpu.CompilerParams(dimension_semantics=("parallel",)),
    )(patches, kp["w1"], kp["s1"], kp["b1"], kp["w2"], kp["s2"], kp["b2"],
      kp["w3"], kp["s3"], kp["b3"], kp["w_fc"], kp["b_fc"])
    return out[:, 0, :num_classes]


# --------------------------- deterministic parameters ------------------------

def init_params(key, num_classes=10):
    keys = iter(jax.random.split(key, 17))
    eps = 1e-5

    def conv_w(k, kh, kw, cin, cout):
        fan_in = kh * kw * cin
        return jax.random.normal(k, (kh, kw, cin, cout), jnp.float32) / jnp.sqrt(
            float(fan_in))

    def bn_affine(c):
        gamma = 1.0 + 0.1 * jax.random.normal(next(keys), (c,), jnp.float32)
        beta = 0.1 * jax.random.normal(next(keys), (c,), jnp.float32)
        mean = 0.1 * jax.random.normal(next(keys), (c,), jnp.float32)
        var = jnp.abs(1.0 + 0.1 * jax.random.normal(next(keys), (c,), jnp.float32))
        scale = gamma * jax.lax.rsqrt(var + eps)
        shift = beta - mean * scale
        return scale, shift

    p = {}
    p["w1"] = conv_w(next(keys), 7, 7, 1, 64)
    p["s1"], p["b1"] = bn_affine(64)
    p["w2"] = conv_w(next(keys), 3, 3, 64, 128)
    p["s2"], p["b2"] = bn_affine(128)
    p["w3"] = conv_w(next(keys), 3, 3, 128, 256)
    p["s3"], p["b3"] = bn_affine(256)
    p["w_fc"] = jax.random.normal(next(keys), (256, num_classes), jnp.float32) / 16.0
    p["b_fc"] = 0.1 * jax.random.normal(next(keys), (num_classes,), jnp.float32)
    return p


def prepare_kernel_params(p):
    """Reshape / zero-pad parameters into the lane-dense layouts the kernel expects."""
    n = p["w_fc"].shape[1]
    assert n <= 128, "num_classes > 128 not supported by the lane-padded FC"
    kp = {}
    # conv1: (7,7,1,64) -> (49,64); K 49->56, Cout 64->128 (zero lanes).
    kp["w1"] = jnp.pad(p["w1"].reshape(49, 64), ((0, 7), (0, 64)))
    kp["s1"] = jnp.pad(p["s1"], (0, 64)).reshape(1, 128)
    kp["b1"] = jnp.pad(p["b1"], (0, 64)).reshape(1, 128)
    # conv2: Cin padded 64->128 (stage-1 lanes 64..127 are zero) -> (9,128,128).
    kp["w2"] = jnp.pad(p["w2"], ((0, 0), (0, 0), (0, 64), (0, 0))).reshape(9, 128, 128)
    kp["s2"] = p["s2"].reshape(1, 128)
    kp["b2"] = p["b2"].reshape(1, 128)
    # conv3: (3,3,128,256) -> (9,128,256).
    kp["w3"] = p["w3"].reshape(9, 128, 256)
    kp["s3"] = p["s3"].reshape(1, 256)
    kp["b3"] = p["b3"].reshape(1, 256)
    # fc: pad num_classes -> 128 lanes (unmasked store); sliced in the wrapper.
    kp["w_fc"] = jnp.pad(p["w_fc"], ((0, 0), (0, 128 - n)))
    kp["b_fc"] = jnp.pad(p["b_fc"], (0, 128 - n)).reshape(1, 128)
    return kp


# ------------------------------ pure-JAX reference ---------------------------

def reference_forward(x_nchw, p):
    x = jnp.transpose(x_nchw, (0, 2, 3, 1)).astype(jnp.float32)

    def conv(x, w, s, b, stride, pad):
        y = jax.lax.conv_general_dilated(
            x, w, window_strides=(stride, stride),
            padding=((pad, pad), (pad, pad)),
            dimension_numbers=("NHWC", "HWIO", "NHWC"),
            precision=jax.lax.Precision.HIGHEST)
        return jnp.maximum(y * s + b, 0.0)

    def maxpool(x, k, stride, pad):
        return jax.lax.reduce_window(
            x, -jnp.inf, jax.lax.max, (1, k, k, 1), (1, stride, stride, 1),
            ((0, 0), (pad, pad), (pad, pad), (0, 0)))

    x = conv(x, p["w1"], p["s1"], p["b1"], 2, 3)
    x = maxpool(x, 3, 2, 1)
    x = conv(x, p["w2"], p["s2"], p["b2"], 1, 1)
    x = maxpool(x, 2, 2, 0)
    x = conv(x, p["w3"], p["s3"], p["b3"], 1, 1)
    x = maxpool(x, 2, 2, 0)
    emb = jnp.mean(x, axis=(1, 2))
    return emb @ p["w_fc"] + p["b_fc"]


# ------------------------------------- main ----------------------------------

if __name__ == "__main__":
    key = jax.random.PRNGKey(0)
    pkey, xkey = jax.random.split(key)

    num_classes = 10
    params = init_params(pkey, num_classes=num_classes)
    kparams = prepare_kernel_params(params)

    # Mel-spectrogram-like input: (B, 1, H, W)
    x = jax.random.normal(xkey, (2, 1, 32, 32), jnp.float32)

    fwd = jax.jit(functools.partial(resnet_mel_forward, num_classes=num_classes))
    logits = jax.block_until_ready(fwd(x, kparams))

    assert logits.shape == (2, num_classes), logits.shape
    assert bool(jnp.all(jnp.isfinite(logits)))

    ref = reference_forward(x, params)
    max_err = float(jnp.max(jnp.abs(logits - ref)))
    if max_err > 5e-2:
        raise SystemExit(f"numerical mismatch vs reference: max abs err = {max_err}")

    print("KERNEL_OK")
</pallas_src>

<mosaic_0001>
module attributes {stable_mosaic.version = 11 : i64} {
  func.func @_fused_kernel(%arg0: i32, %arg1: memref<1x256x56xf32, #tpu.memory_space<vmem>>, %arg2: memref<56x128xf32, #tpu.memory_space<vmem>>, %arg3: memref<1x128xf32, #tpu.memory_space<vmem>>, %arg4: memref<1x128xf32, #tpu.memory_space<vmem>>, %arg5: memref<9x128x128xf32, #tpu.memory_space<vmem>>, %arg6: memref<1x128xf32, #tpu.memory_space<vmem>>, %arg7: memref<1x128xf32, #tpu.memory_space<vmem>>, %arg8: memref<9x128x256xf32, #tpu.memory_space<vmem>>, %arg9: memref<1x256xf32, #tpu.memory_space<vmem>>, %arg10: memref<1x256xf32, #tpu.memory_space<vmem>>, %arg11: memref<256x128xf32, #tpu.memory_space<vmem>>, %arg12: memref<1x128xf32, #tpu.memory_space<vmem>>, %arg13: memref<1x1x128xf32, #tpu.memory_space<vmem>>) attributes {dimension_semantics = [#tpu.dimension_semantics<parallel>], iteration_bounds = array<i64: 2>, scalar_prefetch = 0 : i64, scratch_operands = 0 : i64, tpu.core_type = #tpu.core_type<tc>, window_params = [{transform_indices = @transform_0, window_bounds = array<i64: 1, 256, 56>}, {pipeline_mode = #tpu.pipeline_mode<synchronous>, transform_indices = @transform_1, window_bounds = array<i64: 56, 128>}, {pipeline_mode = #tpu.pipeline_mode<synchronous>, transform_indices = @transform_2, window_bounds = array<i64: 1, 128>}, {pipeline_mode = #tpu.pipeline_mode<synchronous>, transform_indices = @transform_3, window_bounds = array<i64: 1, 128>}, {pipeline_mode = #tpu.pipeline_mode<synchronous>, transform_indices = @transform_4, window_bounds = array<i64: 9, 128, 128>}, {pipeline_mode = #tpu.pipeline_mode<synchronous>, transform_indices = @transform_5, window_bounds = array<i64: 1, 128>}, {pipeline_mode = #tpu.pipeline_mode<synchronous>, transform_indices = @transform_6, window_bounds = array<i64: 1, 128>}, {pipeline_mode = #tpu.pipeline_mode<synchronous>, transform_indices = @transform_7, window_bounds = array<i64: 9, 128, 256>}, {pipeline_mode = #tpu.pipeline_mode<synchronous>, transform_indices = @transform_8, window_bounds = array<i64: 1, 256>}, {pipeline_mode = #tpu.pipeline_mode<synchronous>, transform_indices = @transform_9, window_bounds = array<i64: 1, 256>}, {pipeline_mode = #tpu.pipeline_mode<synchronous>, transform_indices = @transform_10, window_bounds = array<i64: 256, 128>}, {pipeline_mode = #tpu.pipeline_mode<synchronous>, transform_indices = @transform_11, window_bounds = array<i64: 1, 128>}, {transform_indices = @transform_12, window_bounds = array<i64: 1, 1, 128>}]} {
    %c0 = arith.constant 0 : index
    %c0_0 = arith.constant 0 : index
    %c0_1 = arith.constant 0 : index
    %0 = vector.load %arg1[%c0, %c0_0, %c0_1] : memref<1x256x56xf32, #tpu.memory_space<vmem>>, vector<1x256x56xf32>
    %1 = vector.shape_cast %0 : vector<1x256x56xf32> to vector<256x56xf32>
    %c0_2 = arith.constant 0 : index
    %c0_3 = arith.constant 0 : index
    %2 = vector.load %arg2[%c0_2, %c0_3] : memref<56x128xf32, #tpu.memory_space<vmem>>, vector<56x128xf32>
    %cst = arith.constant dense<0.000000e+00> : vector<256x128xf32>
    %3 = tpu.matmul %1, %2, %cst {dimension_numbers = #tpu.dot_dimension_numbers<[1], [0], [0], [1], [0, 0, 1, 1], [], []>} : vector<256x56xf32>, vector<56x128xf32>, vector<256x128xf32> -> vector<256x128xf32>
    %c0_4 = arith.constant 0 : index
    %c0_5 = arith.constant 0 : index
    %4 = vector.load %arg3[%c0_4, %c0_5] : memref<1x128xf32, #tpu.memory_space<vmem>>, vector<1x128xf32>
    %5 = vector.broadcast %4 : vector<1x128xf32> to vector<256x128xf32>
    %6 = arith.mulf %3, %5 : vector<256x128xf32>
    %c0_6 = arith.constant 0 : index
    %c0_7 = arith.constant 0 : index
    %7 = vector.load %arg4[%c0_6, %c0_7] : memref<1x128xf32, #tpu.memory_space<vmem>>, vector<1x128xf32>
    %8 = vector.broadcast %7 : vector<1x128xf32> to vector<256x128xf32>
    %9 = arith.addf %6, %8 : vector<256x128xf32>
    %cst_8 = arith.constant 0.000000e+00 : f32
    %10 = vector.broadcast %cst_8 : f32 to vector<256x128xf32>
    %11 = arith.maximumf %9, %10 : vector<256x128xf32>
    %12 = vector.shape_cast %11 : vector<256x128xf32> to vector<1x16x16x128xf32>
    %13 = vector.shape_cast %12 : vector<1x16x16x128xf32> to vector<1x16x8x2x128xf32>
    %14 = vector.extract_strided_slice %13 {offsets = [0, 0, 0, 0, 0], sizes = [1, 16, 8, 1, 128], strides = [1, 1, 1, 1, 1]} : vector<1x16x8x2x128xf32> to vector<1x16x8x1x128xf32>
    %15 = vector.shape_cast %14 : vector<1x16x8x1x128xf32> to vector<1x16x8x128xf32>
    %16 = vector.extract_strided_slice %13 {offsets = [0, 0, 0, 1, 0], sizes = [1, 16, 8, 1, 128], strides = [1, 1, 1, 1, 1]} : vector<1x16x8x2x128xf32> to vector<1x16x8x1x128xf32>
    %17 = vector.shape_cast %16 : vector<1x16x8x1x128xf32> to vector<1x16x8x128xf32>
    %cst_9 = arith.constant 0.000000e+00 : f32
    %18 = vector.broadcast %cst_9 : f32 to vector<1x16x1x128xf32>
    %19 = vector.extract_strided_slice %17 {offsets = [0, 0, 0, 0], sizes = [1, 16, 7, 128], strides = [1, 1, 1, 1]} : vector<1x16x8x128xf32> to vector<1x16x7x128xf32>
    %20 = tpu.concatenate %18, %19 in 2 : vector<1x16x1x128xf32>, vector<1x16x7x128xf32> -> vector<1x16x8x128xf32>
    %21 = arith.maximumf %15, %17 : vector<1x16x8x128xf32>
    %22 = arith.maximumf %21, %20 : vector<1x16x8x128xf32>
    %23 = vector.shape_cast %22 : vector<1x16x8x128xf32> to vector<1x8x2x8x128xf32>
    %24 = vector.extract_strided_slice %23 {offsets = [0, 0, 0, 0, 0], sizes = [1, 8, 1, 8, 128], strides = [1, 1, 1, 1, 1]} : vector<1x8x2x8x128xf32> to vector<1x8x1x8x128xf32>
    %25 = vector.shape_cast %24 : vector<1x8x1x8x128xf32> to vector<1x8x8x128xf32>
    %26 = vector.extract_strided_slice %23 {offsets = [0, 0, 1, 0, 0], sizes = [1, 8, 1, 8, 128], strides = [1, 1, 1, 1, 1]} : vector<1x8x2x8x128xf32> to vector<1x8x1x8x128xf32>
    %27 = vector.shape_cast %26 : vector<1x8x1x8x128xf32> to vector<1x8x8x128xf32>
    %cst_10 = arith.constant 0.000000e+00 : f32
    %28 = vector.broadcast %cst_10 : f32 to vector<1x1x8x128xf32>
    %29 = vector.extract_strided_slice %27 {offsets = [0, 0, 0, 0], sizes = [1, 7, 8, 128], strides = [1, 1, 1, 1]} : vector<1x8x8x128xf32> to vector<1x7x8x128xf32>
    %30 = tpu.concatenate %28, %29 in 1 : vector<1x1x8x128xf32>, vector<1x7x8x128xf32> -> vector<1x8x8x128xf32>
    %31 = arith.maximumf %25, %27 : vector<1x8x8x128xf32>
    %32 = arith.maximumf %31, %30 : vector<1x8x8x128xf32>
    %cst_11 = arith.constant 0.000000e+00 : f32
    %33 = vector.broadcast %cst_11 : f32 to vector<1x8x1x128xf32>
    %34 = tpu.concatenate %33, %32, %33 in 2 : vector<1x8x1x128xf32>, vector<1x8x8x128xf32>, vector<1x8x1x128xf32> -> vector<1x8x10x128xf32>
    %35 = vector.shape_cast %34 : vector<1x8x10x128xf32> to vector<1x80x128xf32>
    %cst_12 = arith.constant 0.000000e+00 : f32
    %36 = vector.broadcast %cst_12 : f32 to vector<1x10x128xf32>
    %cst_13 = arith.constant 0.000000e+00 : f32
    %37 = vector.broadcast %cst_13 : f32 to vector<1x18x128xf32>
    %38 = tpu.concatenate %36, %35, %37 in 1 : vector<1x10x128xf32>, vector<1x80x128xf32>, vector<1x18x128xf32> -> vector<1x108x128xf32>
    %cst_14 = arith.constant 0.000000e+00 : f32
    %39 = vector.broadcast %cst_14 : f32 to vector<80x128xf32>
    %40 = vector.extract_strided_slice %38 {offsets = [0, 0, 0], sizes = [1, 80, 128], strides = [1, 1, 1]} : vector<1x108x128xf32> to vector<1x80x128xf32>
    %41 = vector.shape_cast %40 : vector<1x80x128xf32> to vector<80x128xf32>
    %c0_15 = arith.constant 0 : index
    %c0_16 = arith.constant 0 : index
    %c0_17 = arith.constant 0 : index
    %42 = vector.load %arg5[%c0_15, %c0_16, %c0_17] : memref<9x128x128xf32, #tpu.memory_space<vmem>>, vector<1x128x128xf32>
    %43 = vector.shape_cast %42 : vector<1x128x128xf32> to vector<128x128xf32>
    %cst_18 = arith.constant dense<0.000000e+00> : vector<80x128xf32>
    %44 = tpu.matmul %41, %43, %cst_18 {dimension_numbers = #tpu.dot_dimension_numbers<[1], [0], [0], [1], [0, 0, 1, 1], [], []>} : vector<80x128xf32>, vector<128x128xf32>, vector<80x128xf32> -> vector<80x128xf32>
    %45 = arith.addf %39, %44 : vector<80x128xf32>
    %46 = vector.extract_strided_slice %38 {offsets = [0, 1, 0], sizes = [1, 80, 128], strides = [1, 1, 1]} : vector<1x108x128xf32> to vector<1x80x128xf32>
    %47 = vector.shape_cast %46 : vector<1x80x128xf32> to vector<80x128xf32>
    %c1 = arith.constant 1 : index
    %c0_19 = arith.constant 0 : index
    %c0_20 = arith.constant 0 : index
    %48 = vector.load %arg5[%c1, %c0_19, %c0_20] : memref<9x128x128xf32, #tpu.memory_space<vmem>>, vector<1x128x128xf32>
    %49 = vector.shape_cast %48 : vector<1x128x128xf32> to vector<128x128xf32>
    %cst_21 = arith.constant dense<0.000000e+00> : vector<80x128xf32>
    %50 = tpu.matmul %47, %49, %cst_21 {dimension_numbers = #tpu.dot_dimension_numbers<[1], [0], [0], [1], [0, 0, 1, 1], [], []>} : vector<80x128xf32>, vector<128x128xf32>, vector<80x128xf32> -> vector<80x128xf32>
    %51 = arith.addf %45, %50 : vector<80x128xf32>
    %52 = vector.extract_strided_slice %38 {offsets = [0, 2, 0], sizes = [1, 80, 128], strides = [1, 1, 1]} : vector<1x108x128xf32> to vector<1x80x128xf32>
    %53 = vector.shape_cast %52 : vector<1x80x128xf32> to vector<80x128xf32>
    %c2 = arith.constant 2 : index
    %c0_22 = arith.constant 0 : index
    %c0_23 = arith.constant 0 : index
    %54 = vector.load %arg5[%c2, %c0_22, %c0_23] : memref<9x128x128xf32, #tpu.memory_space<vmem>>, vector<1x128x128xf32>
    %55 = vector.shape_cast %54 : vector<1x128x128xf32> to vector<128x128xf32>
    %cst_24 = arith.constant dense<0.000000e+00> : vector<80x128xf32>
    %56 = tpu.matmul %53, %55, %cst_24 {dimension_numbers = #tpu.dot_dimension_numbers<[1], [0], [0], [1], [0, 0, 1, 1], [], []>} : vector<80x128xf32>, vector<128x128xf32>, vector<80x128xf32> -> vector<80x128xf32>
    %57 = arith.addf %51, %56 : vector<80x128xf32>
    %58 = vector.extract_strided_slice %38 {offsets = [0, 10, 0], sizes = [1, 80, 128], strides = [1, 1, 1]} : vector<1x108x128xf32> to vector<1x80x128xf32>
    %59 = vector.shape_cast %58 : vector<1x80x128xf32> to vector<80x128xf32>
    %c3 = arith.constant 3 : index
    %c0_25 = arith.constant 0 : index
    %c0_26 = arith.constant 0 : index
    %60 = vector.load %arg5[%c3, %c0_25, %c0_26] : memref<9x128x128xf32, #tpu.memory_space<vmem>>, vector<1x128x128xf32>
    %61 = vector.shape_cast %60 : vector<1x128x128xf32> to vector<128x128xf32>
    %cst_27 = arith.constant dense<0.000000e+00> : vector<80x128xf32>
    %62 = tpu.matmul %59, %61, %cst_27 {dimension_numbers = #tpu.dot_dimension_numbers<[1], [0], [0], [1], [0, 0, 1, 1], [], []>} : vector<80x128xf32>, vector<128x128xf32>, vector<80x128xf32> -> vector<80x128xf32>
    %63 = arith.addf %57, %62 : vector<80x128xf32>
    %64 = vector.extract_strided_slice %38 {offsets = [0, 11, 0], sizes = [1, 80, 128], strides = [1, 1, 1]} : vector<1x108x128xf32> to vector<1x80x128xf32>
    %65 = vector.shape_cast %64 : vector<1x80x128xf32> to vector<80x128xf32>
    %c4 = arith.constant 4 : index
    %c0_28 = arith.constant 0 : index
    %c0_29 = arith.constant 0 : index
    %66 = vector.load %arg5[%c4, %c0_28, %c0_29] : memref<9x128x128xf32, #tpu.memory_space<vmem>>, vector<1x128x128xf32>
    %67 = vector.shape_cast %66 : vector<1x128x128xf32> to vector<128x128xf32>
    %cst_30 = arith.constant dense<0.000000e+00> : vector<80x128xf32>
    %68 = tpu.matmul %65, %67, %cst_30 {dimension_numbers = #tpu.dot_dimension_numbers<[1], [0], [0], [1], [0, 0, 1, 1], [], []>} : vector<80x128xf32>, vector<128x128xf32>, vector<80x128xf32> -> vector<80x128xf32>
    %69 = arith.addf %63, %68 : vector<80x128xf32>
    %70 = vector.extract_strided_slice %38 {offsets = [0, 12, 0], sizes = [1, 80, 128], strides = [1, 1, 1]} : vector<1x108x128xf32> to vector<1x80x128xf32>
    %71 = vector.shape_cast %70 : vector<1x80x128xf32> to vector<80x128xf32>
    %c5 = arith.constant 5 : index
    %c0_31 = arith.constant 0 : index
    %c0_32 = arith.constant 0 : index
    %72 = vector.load %arg5[%c5, %c0_31, %c0_32] : memref<9x128x128xf32, #tpu.memory_space<vmem>>, vector<1x128x128xf32>
    %73 = vector.shape_cast %72 : vector<1x128x128xf32> to vector<128x128xf32>
    %cst_33 = arith.constant dense<0.000000e+00> : vector<80x128xf32>
    %74 = tpu.matmul %71, %73, %cst_33 {dimension_numbers = #tpu.dot_dimension_numbers<[1], [0], [0], [1], [0, 0, 1, 1], [], []>} : vector<80x128xf32>, vector<128x128xf32>, vector<80x128xf32> -> vector<80x128xf32>
    %75 = arith.addf %69, %74 : vector<80x128xf32>
    %76 = vector.extract_strided_slice %38 {offsets = [0, 20, 0], sizes = [1, 80, 128], strides = [1, 1, 1]} : vector<1x108x128xf32> to vector<1x80x128xf32>
    %77 = vector.shape_cast %76 : vector<1x80x128xf32> to vector<80x128xf32>
    %c6 = arith.constant 6 : index
    %c0_34 = arith.constant 0 : index
    %c0_35 = arith.constant 0 : index
    %78 = vector.load %arg5[%c6, %c0_34, %c0_35] : memref<9x128x128xf32, #tpu.memory_space<vmem>>, vector<1x128x128xf32>
    %79 = vector.shape_cast %78 : vector<1x128x128xf32> to vector<128x128xf32>
    %cst_36 = arith.constant dense<0.000000e+00> : vector<80x128xf32>
    %80 = tpu.matmul %77, %79, %cst_36 {dimension_numbers = #tpu.dot_dimension_numbers<[1], [0], [0], [1], [0, 0, 1, 1], [], []>} : vector<80x128xf32>, vector<128x128xf32>, vector<80x128xf32> -> vector<80x128xf32>
    %81 = arith.addf %75, %80 : vector<80x128xf32>
    %82 = vector.extract_strided_slice %38 {offsets = [0, 21, 0], sizes = [1, 80, 128], strides = [1, 1, 1]} : vector<1x108x128xf32> to vector<1x80x128xf32>
    %83 = vector.shape_cast %82 : vector<1x80x128xf32> to vector<80x128xf32>
    %c7 = arith.constant 7 : index
    %c0_37 = arith.constant 0 : index
    %c0_38 = arith.constant 0 : index
    %84 = vector.load %arg5[%c7, %c0_37, %c0_38] : memref<9x128x128xf32, #tpu.memory_space<vmem>>, vector<1x128x128xf32>
    %85 = vector.shape_cast %84 : vector<1x128x128xf32> to vector<128x128xf32>
    %cst_39 = arith.constant dense<0.000000e+00> : vector<80x128xf32>
    %86 = tpu.matmul %83, %85, %cst_39 {dimension_numbers = #tpu.dot_dimension_numbers<[1], [0], [0], [1], [0, 0, 1, 1], [], []>} : vector<80x128xf32>, vector<128x128xf32>, vector<80x128xf32> -> vector<80x128xf32>
    %87 = arith.addf %81, %86 : vector<80x128xf32>
    %88 = vector.extract_strided_slice %38 {offsets = [0, 22, 0], sizes = [1, 80, 128], strides = [1, 1, 1]} : vector<1x108x128xf32> to vector<1x80x128xf32>
    %89 = vector.shape_cast %88 : vector<1x80x128xf32> to vector<80x128xf32>
    %c8 = arith.constant 8 : index
    %c0_40 = arith.constant 0 : index
    %c0_41 = arith.constant 0 : index
    %90 = vector.load %arg5[%c8, %c0_40, %c0_41] : memref<9x128x128xf32, #tpu.memory_space<vmem>>, vector<1x128x128xf32>
    %91 = vector.shape_cast %90 : vector<1x128x128xf32> to vector<128x128xf32>
    %cst_42 = arith.constant dense<0.000000e+00> : vector<80x128xf32>
    %92 = tpu.matmul %89, %91, %cst_42 {dimension_numbers = #tpu.dot_dimension_numbers<[1], [0], [0], [1], [0, 0, 1, 1], [], []>} : vector<80x128xf32>, vector<128x128xf32>, vector<80x128xf32> -> vector<80x128xf32>
    %93 = arith.addf %87, %92 : vector<80x128xf32>
    %c0_43 = arith.constant 0 : index
    %c0_44 = arith.constant 0 : index
    %94 = vector.load %arg6[%c0_43, %c0_44] : memref<1x128xf32, #tpu.memory_space<vmem>>, vector<1x128xf32>
    %95 = vector.broadcast %94 : vector<1x128xf32> to vector<80x128xf32>
    %96 = arith.mulf %93, %95 : vector<80x128xf32>
    %c0_45 = arith.constant 0 : index
    %c0_46 = arith.constant 0 : index
    %97 = vector.load %arg7[%c0_45, %c0_46] : memref<1x128xf32, #tpu.memory_space<vmem>>, vector<1x128xf32>
    %98 = vector.broadcast %97 : vector<1x128xf32> to vector<80x128xf32>
    %99 = arith.addf %96, %98 : vector<80x128xf32>
    %cst_47 = arith.constant 0.000000e+00 : f32
    %100 = vector.broadcast %cst_47 : f32 to vector<80x128xf32>
    %101 = arith.maximumf %99, %100 : vector<80x128xf32>
    %102 = vector.shape_cast %101 : vector<80x128xf32> to vector<1x8x10x128xf32>
    %103 = vector.extract_strided_slice %102 {offsets = [0, 0, 0, 0], sizes = [1, 8, 8, 128], strides = [1, 1, 1, 1]} : vector<1x8x10x128xf32> to vector<1x8x8x128xf32>
    %104 = vector.shape_cast %103 : vector<1x8x8x128xf32> to vector<1x8x4x2x128xf32>
    %105 = vector.extract_strided_slice %104 {offsets = [0, 0, 0, 0, 0], sizes = [1, 8, 4, 1, 128], strides = [1, 1, 1, 1, 1]} : vector<1x8x4x2x128xf32> to vector<1x8x4x1x128xf32>
    %106 = vector.shape_cast %105 : vector<1x8x4x1x128xf32> to vector<1x8x4x128xf32>
    %107 = vector.extract_strided_slice %104 {offsets = [0, 0, 0, 1, 0], sizes = [1, 8, 4, 1, 128], strides = [1, 1, 1, 1, 1]} : vector<1x8x4x2x128xf32> to vector<1x8x4x1x128xf32>
    %108 = vector.shape_cast %107 : vector<1x8x4x1x128xf32> to vector<1x8x4x128xf32>
    %109 = arith.maximumf %106, %108 : vector<1x8x4x128xf32>
    %110 = vector.shape_cast %109 : vector<1x8x4x128xf32> to vector<1x4x2x4x128xf32>
    %111 = vector.extract_strided_slice %110 {offsets = [0, 0, 0, 0, 0], sizes = [1, 4, 1, 4, 128], strides = [1, 1, 1, 1, 1]} : vector<1x4x2x4x128xf32> to vector<1x4x1x4x128xf32>
    %112 = vector.shape_cast %111 : vector<1x4x1x4x128xf32> to vector<1x4x4x128xf32>
    %113 = vector.extract_strided_slice %110 {offsets = [0, 0, 1, 0, 0], sizes = [1, 4, 1, 4, 128], strides = [1, 1, 1, 1, 1]} : vector<1x4x2x4x128xf32> to vector<1x4x1x4x128xf32>
    %114 = vector.shape_cast %113 : vector<1x4x1x4x128xf32> to vector<1x4x4x128xf32>
    %115 = arith.maximumf %112, %114 : vector<1x4x4x128xf32>
    %cst_48 = arith.constant 0.000000e+00 : f32
    %116 = vector.broadcast %cst_48 : f32 to vector<1x4x1x128xf32>
    %117 = tpu.concatenate %116, %115, %116 in 2 : vector<1x4x1x128xf32>, vector<1x4x4x128xf32>, vector<1x4x1x128xf32> -> vector<1x4x6x128xf32>
    %118 = vector.shape_cast %117 : vector<1x4x6x128xf32> to vector<1x24x128xf32>
    %cst_49 = arith.constant 0.000000e+00 : f32
    %119 = vector.broadcast %cst_49 : f32 to vector<1x6x128xf32>
    %cst_50 = arith.constant 0.000000e+00 : f32
    %120 = vector.broadcast %cst_50 : f32 to vector<1x14x128xf32>
    %121 = tpu.concatenate %119, %118, %120 in 1 : vector<1x6x128xf32>, vector<1x24x128xf32>, vector<1x14x128xf32> -> vector<1x44x128xf32>
    %cst_51 = arith.constant 0.000000e+00 : f32
    %122 = vector.broadcast %cst_51 : f32 to vector<24x256xf32>
    %123 = vector.extract_strided_slice %121 {offsets = [0, 0, 0], sizes = [1, 24, 128], strides = [1, 1, 1]} : vector<1x44x128xf32> to vector<1x24x128xf32>
    %124 = vector.shape_cast %123 : vector<1x24x128xf32> to vector<24x128xf32>
    %c0_52 = arith.constant 0 : index
    %c0_53 = arith.constant 0 : index
    %c0_54 = arith.constant 0 : index
    %125 = vector.load %arg8[%c0_52, %c0_53, %c0_54] : memref<9x128x256xf32, #tpu.memory_space<vmem>>, vector<1x128x256xf32>
    %126 = vector.shape_cast %125 : vector<1x128x256xf32> to vector<128x256xf32>
    %cst_55 = arith.constant dense<0.000000e+00> : vector<24x256xf32>
    %127 = tpu.matmul %124, %126, %cst_55 {dimension_numbers = #tpu.dot_dimension_numbers<[1], [0], [0], [1], [0, 0, 1, 1], [], []>} : vector<24x128xf32>, vector<128x256xf32>, vector<24x256xf32> -> vector<24x256xf32>
    %128 = arith.addf %122, %127 : vector<24x256xf32>
    %129 = vector.extract_strided_slice %121 {offsets = [0, 1, 0], sizes = [1, 24, 128], strides = [1, 1, 1]} : vector<1x44x128xf32> to vector<1x24x128xf32>
    %130 = vector.shape_cast %129 : vector<1x24x128xf32> to vector<24x128xf32>
    %c1_56 = arith.constant 1 : index
    %c0_57 = arith.constant 0 : index
    %c0_58 = arith.constant 0 : index
    %131 = vector.load %arg8[%c1_56, %c0_57, %c0_58] : memref<9x128x256xf32, #tpu.memory_space<vmem>>, vector<1x128x256xf32>
    %132 = vector.shape_cast %131 : vector<1x128x256xf32> to vector<128x256xf32>
    %cst_59 = arith.constant dense<0.000000e+00> : vector<24x256xf32>
    %133 = tpu.matmul %130, %132, %cst_59 {dimension_numbers = #tpu.dot_dimension_numbers<[1], [0], [0], [1], [0, 0, 1, 1], [], []>} : vector<24x128xf32>, vector<128x256xf32>, vector<24x256xf32> -> vector<24x256xf32>
    %134 = arith.addf %128, %133 : vector<24x256xf32>
    %135 = vector.extract_strided_slice %121 {offsets = [0, 2, 0], sizes = [1, 24, 128], strides = [1, 1, 1]} : vector<1x44x128xf32> to vector<1x24x128xf32>
    %136 = vector.shape_cast %135 : vector<1x24x128xf32> to vector<24x128xf32>
    %c2_60 = arith.constant 2 : index
    %c0_61 = arith.constant 0 : index
    %c0_62 = arith.constant 0 : index
    %137 = vector.load %arg8[%c2_60, %c0_61, %c0_62] : memref<9x128x256xf32, #tpu.memory_space<vmem>>, vector<1x128x256xf32>
    %138 = vector.shape_cast %137 : vector<1x128x256xf32> to vector<128x256xf32>
    %cst_63 = arith.constant dense<0.000000e+00> : vector<24x256xf32>
    %139 = tpu.matmul %136, %138, %cst_63 {dimension_numbers = #tpu.dot_dimension_numbers<[1], [0], [0], [1], [0, 0, 1, 1], [], []>} : vector<24x128xf32>, vector<128x256xf32>, vector<24x256xf32> -> vector<24x256xf32>
    %140 = arith.addf %134, %139 : vector<24x256xf32>
    %141 = vector.extract_strided_slice %121 {offsets = [0, 6, 0], sizes = [1, 24, 128], strides = [1, 1, 1]} : vector<1x44x128xf32> to vector<1x24x128xf32>
    %142 = vector.shape_cast %141 : vector<1x24x128xf32> to vector<24x128xf32>
    %c3_64 = arith.constant 3 : index
    %c0_65 = arith.constant 0 : index
    %c0_66 = arith.constant 0 : index
    %143 = vector.load %arg8[%c3_64, %c0_65, %c0_66] : memref<9x128x256xf32, #tpu.memory_space<vmem>>, vector<1x128x256xf32>
    %144 = vector.shape_cast %143 : vector<1x128x256xf32> to vector<128x256xf32>
    %cst_67 = arith.constant dense<0.000000e+00> : vector<24x256xf32>
    %145 = tpu.matmul %142, %144, %cst_67 {dimension_numbers = #tpu.dot_dimension_numbers<[1], [0], [0], [1], [0, 0, 1, 1], [], []>} : vector<24x128xf32>, vector<128x256xf32>, vector<24x256xf32> -> vector<24x256xf32>
    %146 = arith.addf %140, %145 : vector<24x256xf32>
    %147 = vector.extract_strided_slice %121 {offsets = [0, 7, 0], sizes = [1, 24, 128], strides = [1, 1, 1]} : vector<1x44x128xf32> to vector<1x24x128xf32>
    %148 = vector.shape_cast %147 : vector<1x24x128xf32> to vector<24x128xf32>
    %c4_68 = arith.constant 4 : index
    %c0_69 = arith.constant 0 : index
    %c0_70 = arith.constant 0 : index
    %149 = vector.load %arg8[%c4_68, %c0_69, %c0_70] : memref<9x128x256xf32, #tpu.memory_space<vmem>>, vector<1x128x256xf32>
    %150 = vector.shape_cast %149 : vector<1x128x256xf32> to vector<128x256xf32>
    %cst_71 = arith.constant dense<0.000000e+00> : vector<24x256xf32>
    %151 = tpu.matmul %148, %150, %cst_71 {dimension_numbers = #tpu.dot_dimension_numbers<[1], [0], [0], [1], [0, 0, 1, 1], [], []>} : vector<24x128xf32>, vector<128x256xf32>, vector<24x256xf32> -> vector<24x256xf32>
    %152 = arith.addf %146, %151 : vector<24x256xf32>
    %153 = vector.extract_strided_slice %121 {offsets = [0, 8, 0], sizes = [1, 24, 128], strides = [1, 1, 1]} : vector<1x44x128xf32> to vector<1x24x128xf32>
    %154 = vector.shape_cast %153 : vector<1x24x128xf32> to vector<24x128xf32>
    %c5_72 = arith.constant 5 : index
    %c0_73 = arith.constant 0 : index
    %c0_74 = arith.constant 0 : index
    %155 = vector.load %arg8[%c5_72, %c0_73, %c0_74] : memref<9x128x256xf32, #tpu.memory_space<vmem>>, vector<1x128x256xf32>
    %156 = vector.shape_cast %155 : vector<1x128x256xf32> to vector<128x256xf32>
    %cst_75 = arith.constant dense<0.000000e+00> : vector<24x256xf32>
    %157 = tpu.matmul %154, %156, %cst_75 {dimension_numbers = #tpu.dot_dimension_numbers<[1], [0], [0], [1], [0, 0, 1, 1], [], []>} : vector<24x128xf32>, vector<128x256xf32>, vector<24x256xf32> -> vector<24x256xf32>
    %158 = arith.addf %152, %157 : vector<24x256xf32>
    %159 = vector.extract_strided_slice %121 {offsets = [0, 12, 0], sizes = [1, 24, 128], strides = [1, 1, 1]} : vector<1x44x128xf32> to vector<1x24x128xf32>
    %160 = vector.shape_cast %159 : vector<1x24x128xf32> to vector<24x128xf32>
    %c6_76 = arith.constant 6 : index
    %c0_77 = arith.constant 0 : index
    %c0_78 = arith.constant 0 : index
    %161 = vector.load %arg8[%c6_76, %c0_77, %c0_78] : memref<9x128x256xf32, #tpu.memory_space<vmem>>, vector<1x128x256xf32>
    %162 = vector.shape_cast %161 : vector<1x128x256xf32> to vector<128x256xf32>
    %cst_79 = arith.constant dense<0.000000e+00> : vector<24x256xf32>
    %163 = tpu.matmul %160, %162, %cst_79 {dimension_numbers = #tpu.dot_dimension_numbers<[1], [0], [0], [1], [0, 0, 1, 1], [], []>} : vector<24x128xf32>, vector<128x256xf32>, vector<24x256xf32> -> vector<24x256xf32>
    %164 = arith.addf %158, %163 : vector<24x256xf32>
    %165 = vector.extract_strided_slice %121 {offsets = [0, 13, 0], sizes = [1, 24, 128], strides = [1, 1, 1]} : vector<1x44x128xf32> to vector<1x24x128xf32>
    %166 = vector.shape_cast %165 : vector<1x24x128xf32> to vector<24x128xf32>
    %c7_80 = arith.constant 7 : index
    %c0_81 = arith.constant 0 : index
    %c0_82 = arith.constant 0 : index
    %167 = vector.load %arg8[%c7_80, %c0_81, %c0_82] : memref<9x128x256xf32, #tpu.memory_space<vmem>>, vector<1x128x256xf32>
    %168 = vector.shape_cast %167 : vector<1x128x256xf32> to vector<128x256xf32>
    %cst_83 = arith.constant dense<0.000000e+00> : vector<24x256xf32>
    %169 = tpu.matmul %166, %168, %cst_83 {dimension_numbers = #tpu.dot_dimension_numbers<[1], [0], [0], [1], [0, 0, 1, 1], [], []>} : vector<24x128xf32>, vector<128x256xf32>, vector<24x256xf32> -> vector<24x256xf32>
    %170 = arith.addf %164, %169 : vector<24x256xf32>
    %171 = vector.extract_strided_slice %121 {offsets = [0, 14, 0], sizes = [1, 24, 128], strides = [1, 1, 1]} : vector<1x44x128xf32> to vector<1x24x128xf32>
    %172 = vector.shape_cast %171 : vector<1x24x128xf32> to vector<24x128xf32>
    %c8_84 = arith.constant 8 : index
    %c0_85 = arith.constant 0 : index
    %c0_86 = arith.constant 0 : index
    %173 = vector.load %arg8[%c8_84, %c0_85, %c0_86] : memref<9x128x256xf32, #tpu.memory_space<vmem>>, vector<1x128x256xf32>
    %174 = vector.shape_cast %173 : vector<1x128x256xf32> to vector<128x256xf32>
    %cst_87 = arith.constant dense<0.000000e+00> : vector<24x256xf32>
    %175 = tpu.matmul %172, %174, %cst_87 {dimension_numbers = #tpu.dot_dimension_numbers<[1], [0], [0], [1], [0, 0, 1, 1], [], []>} : vector<24x128xf32>, vector<128x256xf32>, vector<24x256xf32> -> vector<24x256xf32>
    %176 = arith.addf %170, %175 : vector<24x256xf32>
    %c0_88 = arith.constant 0 : index
    %c0_89 = arith.constant 0 : index
    %177 = vector.load %arg9[%c0_88, %c0_89] : memref<1x256xf32, #tpu.memory_space<vmem>>, vector<1x256xf32>
    %178 = vector.broadcast %177 : vector<1x256xf32> to vector<24x256xf32>
    %179 = arith.mulf %176, %178 : vector<24x256xf32>
    %c0_90 = arith.constant 0 : index
    %c0_91 = arith.constant 0 : index
    %180 = vector.load %arg10[%c0_90, %c0_91] : memref<1x256xf32, #tpu.memory_space<vmem>>, vector<1x256xf32>
    %181 = vector.broadcast %180 : vector<1x256xf32> to vector<24x256xf32>
    %182 = arith.addf %179, %181 : vector<24x256xf32>
    %cst_92 = arith.constant 0.000000e+00 : f32
    %183 = vector.broadcast %cst_92 : f32 to vector<24x256xf32>
    %184 = arith.maximumf %182, %183 : vector<24x256xf32>
    %185 = vector.shape_cast %184 : vector<24x256xf32> to vector<1x4x6x256xf32>
    %186 = vector.extract_strided_slice %185 {offsets = [0, 0, 0, 0], sizes = [1, 4, 4, 256], strides = [1, 1, 1, 1]} : vector<1x4x6x256xf32> to vector<1x4x4x256xf32>
    %187 = vector.shape_cast %186 : vector<1x4x4x256xf32> to vector<1x4x2x2x256xf32>
    %188 = vector.extract_strided_slice %187 {offsets = [0, 0, 0, 0, 0], sizes = [1, 4, 2, 1, 256], strides = [1, 1, 1, 1, 1]} : vector<1x4x2x2x256xf32> to vector<1x4x2x1x256xf32>
    %189 = vector.shape_cast %188 : vector<1x4x2x1x256xf32> to vector<1x4x2x256xf32>
    %190 = vector.extract_strided_slice %187 {offsets = [0, 0, 0, 1, 0], sizes = [1, 4, 2, 1, 256], strides = [1, 1, 1, 1, 1]} : vector<1x4x2x2x256xf32> to vector<1x4x2x1x256xf32>
    %191 = vector.shape_cast %190 : vector<1x4x2x1x256xf32> to vector<1x4x2x256xf32>
    %192 = arith.maximumf %189, %191 : vector<1x4x2x256xf32>
    %193 = vector.shape_cast %192 : vector<1x4x2x256xf32> to vector<1x2x2x2x256xf32>
    %194 = vector.extract_strided_slice %193 {offsets = [0, 0, 0, 0, 0], sizes = [1, 2, 1, 2, 256], strides = [1, 1, 1, 1, 1]} : vector<1x2x2x2x256xf32> to vector<1x2x1x2x256xf32>
    %195 = vector.shape_cast %194 : vector<1x2x1x2x256xf32> to vector<1x2x2x256xf32>
    %196 = vector.extract_strided_slice %193 {offsets = [0, 0, 1, 0, 0], sizes = [1, 2, 1, 2, 256], strides = [1, 1, 1, 1, 1]} : vector<1x2x2x2x256xf32> to vector<1x2x1x2x256xf32>
    %197 = vector.shape_cast %196 : vector<1x2x1x2x256xf32> to vector<1x2x2x256xf32>
    %198 = arith.maximumf %195, %197 : vector<1x2x2x256xf32>
    %199 = vector.shape_cast %198 : vector<1x2x2x256xf32> to vector<1x4x256xf32>
    %cst_93 = arith.constant dense<0.000000e+00> : vector<1x256xf32>
    %200 = vector.multi_reduction <add>, %199, %cst_93 [1] : vector<1x4x256xf32> to vector<1x256xf32>
    %cst_94 = arith.constant 4.000000e+00 : f32
    %201 = vector.broadcast %cst_94 : f32 to vector<1x256xf32>
    %202 = arith.divf %200, %201 : vector<1x256xf32>
    %c0_95 = arith.constant 0 : index
    %c0_96 = arith.constant 0 : index
    %203 = vector.load %arg11[%c0_95, %c0_96] : memref<256x128xf32, #tpu.memory_space<vmem>>, vector<256x128xf32>
    %cst_97 = arith.constant dense<0.000000e+00> : vector<1x128xf32>
    %204 = tpu.matmul %202, %203, %cst_97 {dimension_numbers = #tpu.dot_dimension_numbers<[1], [0], [0], [1], [0, 0, 1, 1], [], []>} : vector<1x256xf32>, vector<256x128xf32>, vector<1x128xf32> -> vector<1x128xf32>
    %c0_98 = arith.constant 0 : index
    %c0_99 = arith.constant 0 : index
    %205 = vector.load %arg12[%c0_98, %c0_99] : memref<1x128xf32, #tpu.memory_space<vmem>>, vector<1x128xf32>
    %206 = arith.addf %204, %205 : vector<1x128xf32>
    %207 = vector.shape_cast %206 : vector<1x128xf32> to vector<1x1x128xf32>
    %c0_100 = arith.constant 0 : index
    %c0_101 = arith.constant 0 : index
    %c0_102 = arith.constant 0 : index
    %208 = vector.load %arg13[%c0_100, %c0_101, %c0_102] : memref<1x1x128xf32, #tpu.memory_space<vmem>>, vector<1x1x128xf32>
    tpu.vector_store %arg13[%c0_100, %c0_101, %c0_102], %207 {strides = array<i32>} : memref<1x1x128xf32, #tpu.memory_space<vmem>>, vector<1x1x128xf32>,
    return
  }
  func.func @transform_0(%arg0: i32) -> (i32, i32, i32) {
    %c0_i32 = arith.constant 0 : i32
    %c0_i32_0 = arith.constant 0 : i32
    %c0_i32_1 = arith.constant 0 : i32
    return %arg0, %c0_i32, %c0_i32_0 : i32, i32, i32
  }
  func.func @transform_1(%arg0: i32) -> (i32, i32) {
    %c0_i32 = arith.constant 0 : i32
    %c0_i32_0 = arith.constant 0 : i32
    %c0_i32_1 = arith.constant 0 : i32
    return %c0_i32, %c0_i32_0 : i32, i32
  }
  func.func @transform_2(%arg0: i32) -> (i32, i32) {
    %c0_i32 = arith.constant 0 : i32
    %c0_i32_0 = arith.constant 0 : i32
    %c0_i32_1 = arith.constant 0 : i32
    return %c0_i32, %c0_i32_0 : i32, i32
  }
  func.func @transform_3(%arg0: i32) -> (i32, i32) {
    %c0_i32 = arith.constant 0 : i32
    %c0_i32_0 = arith.constant 0 : i32
    %c0_i32_1 = arith.constant 0 : i32
    return %c0_i32, %c0_i32_0 : i32, i32
  }
  func.func @transform_4(%arg0: i32) -> (i32, i32, i32) {
    %c0_i32 = arith.constant 0 : i32
    %c0_i32_0 = arith.constant 0 : i32
    %c0_i32_1 = arith.constant 0 : i32
    %c0_i32_2 = arith.constant 0 : i32
    return %c0_i32, %c0_i32_0, %c0_i32_1 : i32, i32, i32
  }
  func.func @transform_5(%arg0: i32) -> (i32, i32) {
    %c0_i32 = arith.constant 0 : i32
    %c0_i32_0 = arith.constant 0 : i32
    %c0_i32_1 = arith.constant 0 : i32
    return %c0_i32, %c0_i32_0 : i32, i32
  }
  func.func @transform_6(%arg0: i32) -> (i32, i32) {
    %c0_i32 = arith.constant 0 : i32
    %c0_i32_0 = arith.constant 0 : i32
    %c0_i32_1 = arith.constant 0 : i32
    return %c0_i32, %c0_i32_0 : i32, i32
  }
  func.func @transform_7(%arg0: i32) -> (i32, i32, i32) {
    %c0_i32 = arith.constant 0 : i32
    %c0_i32_0 = arith.constant 0 : i32
    %c0_i32_1 = arith.constant 0 : i32
    %c0_i32_2 = arith.constant 0 : i32
    return %c0_i32, %c0_i32_0, %c0_i32_1 : i32, i32, i32
  }
  func.func @transform_8(%arg0: i32) -> (i32, i32) {
    %c0_i32 = arith.constant 0 : i32
    %c0_i32_0 = arith.constant 0 : i32
    %c0_i32_1 = arith.constant 0 : i32
    return %c0_i32, %c0_i32_0 : i32, i32
  }
  func.func @transform_9(%arg0: i32) -> (i32, i32) {
    %c0_i32 = arith.constant 0 : i32
    %c0_i32_0 = arith.constant 0 : i32
    %c0_i32_1 = arith.constant 0 : i32
    return %c0_i32, %c0_i32_0 : i32, i32
  }
  func.func @transform_10(%arg0: i32) -> (i32, i32) {
    %c0_i32 = arith.constant 0 : i32
    %c0_i32_0 = arith.constant 0 : i32
    %c0_i32_1 = arith.constant 0 : i32
    return %c0_i32, %c0_i32_0 : i32, i32
  }
  func.func @transform_11(%arg0: i32) -> (i32, i32) {
    %c0_i32 = arith.constant 0 : i32
    %c0_i32_0 = arith.constant 0 : i32
    %c0_i32_1 = arith.constant 0 : i32
    return %c0_i32, %c0_i32_0 : i32, i32
  }
  func.func @transform_12(%arg0: i32) -> (i32, i32, i32) {
    %c0_i32 = arith.constant 0 : i32
    %c0_i32_0 = arith.constant 0 : i32
    %c0_i32_1 = arith.constant 0 : i32
    return %arg0, %c0_i32, %c0_i32_0 : i32, i32, i32
  }
}

</mosaic_0001>

<bundles_post_ra>
// kernel: resnet_mel_forward.1
= control target key start
LH: loop header
LB: loop body
LE: loop exit
PB: predicated region body
PF: predicated region fallthrough
CT: control target
= control target key end

     0   :  { %s14370_s0 = inlined_call_operand.vmem [shape: f32[2,256,56], index: 0, kind: input, shape index: {}]   ;;  %s14371_s1 = inlined_call_operand.vmem [shape: f32[56,128], index: 1, kind: input, shape index: {}]   ;;  %s14372_s2 = inlined_call_operand.vmem [shape: f32[1,128], index: 2, kind: input, shape index: {}]   ;;  %s14373_s3 = inlined_call_operand.vmem [shape: f32[1,128], index: 3, kind: input, shape index: {}]   ;;  %s14374_s4 = inlined_call_operand.vmem [shape: f32[9,128,128], index: 4, kind: input, shape index: {}]   ;;  %s14375_s5 = inlined_call_operand.vmem [shape: f32[1,128], index: 5, kind: input, shape index: {}]   ;;  %s14376_s6 = inlined_call_operand.vmem [shape: f32[1,128], index: 6, kind: input, shape index: {}]   ;;  %s14377_s7 = inlined_call_operand.vmem [shape: f32[9,128,256], index: 7, kind: input, shape index: {}]   ;;  %s14378_s8 = inlined_call_operand.vmem [shape: f32[1,256], index: 8, kind: input, shape index: {}]   ;;  %s14379_s9 = inlined_call_operand.vmem [shape: f32[1,256], index: 9, kind: input, shape index: {}]   ;;  %s14380_s10 = inlined_call_operand.vmem [shape: f32[256,128], index: 10, kind: input, shape index: {}]   ;;  %s14381_s11 = inlined_call_operand.vmem [shape: f32[1,128], index: 11, kind: input, shape index: {}]   ;;  %s14382_s12 = inlined_call_operand.hbm [shape: f32[2,1,128], index: 12, kind: output, shape index: {}]  }
   0x1   :  { %14411 = sst [smem:[#allocation20_spill]] %s14370_s0 }
   0x2   :  { %14412 = sst [smem:[#allocation21_spill]] %s14371_s1 }
   0x3   :  { %14413 = sst [smem:[#allocation22_spill]] %s14372_s2 }
   0x4   :  { %17 = vsyncpa [#allocation3], 0 }
   0x5   :  { %19 = vsyncpa [#allocation3 + $0x1], 0  ;;  %s9962_s21 = smov 0   ;;  %s9964_s22 = smov 0  }
   0x6   :  { %s9966_s23 = smov 0   ;;  %s9968_s24 = smov 0  }
   0x7 LB: > { %s9983_s25 = sadd.s32 4294967295, %s9892_s24   ;;  %s8391_s26 = sadd.s32 4294967294, %s9892_s24   ;;  %s9892_s24 = sphi %s9968_s24, %s14513_s24   ;;  %s9888_s23 = sphi %s9966_s23, %s14512_s23   ;;  %s9884_s22 = sphi %s9964_s22, %s14511_s22   ;;  %s9880_s21 = sphi %s9962_s21, %s14510_s21  }
   0x8   : > { %s9987_s27 = sadd.s32 1, %s9892_s24   ;;  %s289_s28 = sadd.s32 1, %s9888_s23 }
   0x9   : > { %s286_s29 = ssub.s32 %s9892_s24, %s9987_s27  ;;  %p299_p0 = scmp.ne.s32.totalorder %s9888_s23, %s9884_s22 }
   0xa   : > { %p287_p1 = scmp.eq.s32.totalorder %s286_s29, 0  ;;  %p300_p2 = scmp.eq.s32.totalorder %s9983_s25, 1 }
   0xb   : > { %p305_p3 = scmp.ne.s32.totalorder %s9884_s22, %s9880_s21  ;;  %p306_p4 = scmp.eq.s32.totalorder %s8391_s26, 1 }
   0xc   : > { %s9998_s30 = scalar_select %p287_p1, %s9888_s23, %s289_s28  }
   0xd   : > { %p10000_p5 = por %p300_p2, %p299_p0  ;;  %p10004_p6 = por %p306_p4, %p305_p3 }
   0xe   : > { %p8394_p7 = scmp.ge.s32.totalorder %s9892_s24, 1  ;;  %p365_p8 = scmp.lt.s32.totalorder %s9892_s24, 3 }
  0x10   : > { %p366_p9 = pnand %p8394_p7, %p365_p8 }
  0x12   : > { %369 = sbr.rel (%p366_p9) target bundleno = 1632 (0x660), region = 68 }
  0x17   : > { %s14416_s1 = sld [smem:[#allocation21_spill]]  ;;  %p406_p10 = scmp.lt.s32.totalorder %s9983_s25, 1  ;;  %vm450_vm0 = vcmask 457728   ;;  %v9894_v39 = vmov 1983009808   ;;  %v918_v41 = vlaneseq  ;;  %v14383_v53 = vmov 0.0  }
  0x18   : > { %s14417_s0 = sld [smem:[#allocation20_spill]]  ;;  %v916_v40 = vunpack.c.l.s4 %v9894_v39  ;;  %v10112_v46 = vld [vmem:[%s14373_s3] ss:$0 sm:$0xff]  ;;  %vm2034_vm1 = vcmask 1042434   ;;  %vm2036_vm2 = vcmask 1043459   ;;  %vm2038_vm3 = vcmask 1044484  }
  0x19   : > { %s407_s26 = scalar_select %p406_p10, %s9983_s25, 1  ;;  %v10107_v44 = vshrl.u32 %v918_v41, 7  ;;  %vm2040_vm4 = vcmask 1045509   ;;  %vm2042_vm5 = vcmask 1046534   ;;  %vm2044_vm6 = vcmask 1047559  }
  0x1a   : > { %s14418_s2 = sld [smem:[#allocation22_spill]]  ;;  %v917_v43 = vunpack.c.0.s8 %v916_v40  ;;  %vm2152_vm7 = vcmask 1040384   ;;  %vm3569_vm8 = vcmask 1041409   ;;  %vm4775_vm9 = vcmask 1041408   ;;  %s8990_s28 = sshll.u32 %s9983_s25, 4 }
  0x1b   : > { %s8993_s15 = sshll.u32 %s407_s26, 8  ;;  %14419 = vst [vmem:[#allocation5_spill] sm:$0xff] %v10107_v44  ;;  %v10127_v58 = vsub.s32 1, %v10107_v44  ;;  %vm4812_vm10 = vcmask 1046528   ;;  %vm5091_vm11 = vcmask 1045504   ;;  %vm5411_vm12 = vcmask 1044480   ;;  %vm8575_vm14 = vmneg %vm4775_vm9  ;;  %s8334_s19 = scalar_lea.hbm %s14382_s12, %s8990_s28 }
  0x1c   : > { %v10116_v48 = vsub.s32 %v917_v43, %v10107_v44  ;;  %vm5585_vm13 = vcmask 1043456   ;;  %vm5904_vm15 = vcmask 1042432  }
  0x1d   : > { %v449_v0 = vld [vmem:[%s14416_s1 + $0x30] sm:$0xff]  ;;  %v448_v1 = vld [vmem:[%s14416_s1 + $0x28] sm:$0xff]  ;;  %v447_v2 = vld [vmem:[%s14416_s1 + $0x20] sm:$0xff]  ;;  %14421 = vst [vmem:[#allocation7_spill] sm:$0xff] %v10127_v58 }
  0x1e   : > { %9302 = vmatprep.subr.mxu0 %v449_v0  ;;  %v446_v3 = vld [vmem:[%s14416_s1 + $0x18] sm:$0xff]  ;;  %s10027_s18 = scalar_lea.vmem %s14417_s0, %s8993_s15  ;;  %v445_v4 = vld [vmem:[%s14416_s1 + $0x10] sm:$0xff]  ;;  %v444_v6 = vld [vmem:[%s14416_s1 + $0x8] sm:$0xff]  ;;  %14420 = vst [vmem:[#allocation6_spill] sm:$0xff] %v10116_v48  ;;  %v10122_v54 = vrot.slane %v14383_v53, %v10116_v48  ;;  %s404_s0 = sand.u32 1, %s9884_s22  }
  0x1f   : > { %9303 = vmatpush3.msra.mxu0 %v449_v0  ;;  %v411_v5 = vld [vmem:[%s10027_s18] sm:$0xff]  ;;  %v412_v8 = vld [vmem:[%s10027_s18 + $0x8] sm:$0xff]  ;;  %v413_v9 = vld [vmem:[%s10027_s18 + $0x10] sm:$0xff]  ;;  %s405_s29 = scalar_lea.vmem [#allocation2], %s404_s0  ;;  %s8324_s20 = scalar_lea.sflag [#allocation3], %s404_s0 }
  0x20   : > { %9304 = vmatprep.subr.mxu0 %v448_v1  ;;  %9316 = vmatprep.mubr.msk.f32.mxu0 %vm450_vm0, %v411_v5  ;;  %v443_v7 = vld [vmem:[%s14416_s1] sm:$0xff]  ;;  %v414_v10 = vld [vmem:[%s10027_s18 + $0x18] sm:$0xff]  ;;  %v416_v12 = vld [vmem:[%s10027_s18 + $0x28] sm:$0xff]  ;;  %v10133_v0 = vcombine.high %v10122_v54, %v10122_v54  ;;  %s8336_s15 = sshll.u32 %s405_s29, 4  ;;  %s8337_s15 = int_to_ptr.vmem [resolvable:$true] %s8336_s15 }
  0x21   : > { %9305 = vmatpush3.msra.mxu0 %v448_v1  ;;  %v415_v11 = vld [vmem:[%s10027_s18 + $0x20] sm:$0xff]  ;;  %v417_v13 = vld [vmem:[%s10027_s18 + $0x30] sm:$0xff]  ;;  %v418_v14 = vld [vmem:[%s10027_s18 + $0x38] sm:$0xff]  ;;  %s9832_s1 = scalar_lea.vmem %s8337_s15, 16 }
  0x22   : > { %9306 = vmatprep.subr.mxu0 %v447_v2  ;;  %v419_v15 = vld [vmem:[%s10027_s18 + $0x40] sm:$0xff]  ;;  %v420_v16 = vld [vmem:[%s10027_s18 + $0x48] sm:$0xff]  ;;  %v421_v17 = vld [vmem:[%s10027_s18 + $0x50] sm:$0xff]  ;;  %p9833_p11 = scmp.ne.s32.totalorder %s8337_s15, %s9832_s1 }
  0x23   : > { %9307 = vmatpush3.msra.mxu0 %v447_v2  ;;  %v422_v18 = vld [vmem:[%s10027_s18 + $0x58] sm:$0xff]  ;;  %v423_v19 = vld [vmem:[%s10027_s18 + $0x60] sm:$0xff]  ;;  %v424_v20 = vld [vmem:[%s10027_s18 + $0x68] sm:$0xff] }
  0x24   : > { %9308 = vmatprep.subr.mxu0 %v446_v3  ;;  %v425_v21 = vld [vmem:[%s10027_s18 + $0x70] sm:$0xff]  ;;  %v426_v22 = vld [vmem:[%s10027_s18 + $0x78] sm:$0xff]  ;;  %v427_v23 = vld [vmem:[%s10027_s18 + $0x80] sm:$0xff]  ;;  %p9834_p12 = pnand %p9833_p11, %p10000_p5 }
  0x25   : > { %9309 = vmatpush3.msra.mxu0 %v446_v3  ;;  %v428_v24 = vld [vmem:[%s10027_s18 + $0x88] sm:$0xff]  ;;  %v429_v25 = vld [vmem:[%s10027_s18 + $0x90] sm:$0xff]  ;;  %v430_v26 = vld [vmem:[%s10027_s18 + $0x98] sm:$0xff] }
  0x26   : > { %9310 = vmatprep.subr.mxu0 %v445_v4  ;;  %v431_v27 = vld [vmem:[%s10027_s18 + $0xa0] sm:$0xff]  ;;  %v432_v28 = vld [vmem:[%s10027_s18 + $0xa8] sm:$0xff]  ;;  %v433_v29 = vld [vmem:[%s10027_s18 + $0xb0] sm:$0xff]  ;;  %p9835_p13 = pneg %p9834_p12 }
  0x27   : > { %9311 = vmatpush3.msra.mxu0 %v445_v4  ;;  %v434_v30 = vld [vmem:[%s10027_s18 + $0xb8] sm:$0xff]  ;;  %v435_v31 = vld [vmem:[%s10027_s18 + $0xc0] sm:$0xff]  ;;  %v436_v32 = vld [vmem:[%s10027_s18 + $0xc8] sm:$0xff] }
  0x28   : > { %9312 = vmatprep.subr.mxu0 %v444_v6  ;;  %v437_v33 = vld [vmem:[%s10027_s18 + $0xd0] sm:$0xff]  ;;  %v438_v34 = vld [vmem:[%s10027_s18 + $0xd8] sm:$0xff]  ;;  %v439_v35 = vld [vmem:[%s10027_s18 + $0xe0] sm:$0xff] }
  0x29   : > { %9313 = vmatpush3.msra.mxu0 %v444_v6  ;;  %v440_v36 = vld [vmem:[%s10027_s18 + $0xe8] sm:$0xff]  ;;  %v441_v37 = vld [vmem:[%s10027_s18 + $0xf0] sm:$0xff]  ;;  %v442_v38 = vld [vmem:[%s10027_s18 + $0xf8] sm:$0xff]  ;;  %s9896_s18 = smov [#allocation2]  }
  0x2a   : > { %9314 = vmatprep.subr.mxu0 %v443_v7  ;;  %v10105_v42 = vld [vmem:[%s14418_s2] ss:$0 sm:$0xff]  ;;  %s9836_s26 = sshll.u32 %s9896_s18, 4  ;;  %s9837_s26 = int_to_ptr.vmem [resolvable:$false] %s9836_s26 }
  0x2b   : > { %9315 = vmatpush3.msra.mxu0 %v443_v7  ;;  %s9838_s25 = scalar_lea.vmem %s9837_s26, 32  ;;  %p9839_p0 = scmp.lt.s32.totalorder %s8337_s15, %s9837_s26 }
  0x2c   : > { %9317 = vmatmul.mubr.msk.f32.vlgmr.msra.gmra.mxu0 %vm450_vm0, %v412_v8  ;;  %v10139_v8 = vsub.s32 0, %v10107_v44  ;;  %p9840_p1 = scmp.lt.s32.totalorder %s9838_s25, %s9832_s1 }
  0x2d   : > { %9319 = vmatprep.mubr.msk.f32.mxu0 %vm450_vm0, %v413_v9  ;;  %v3820_v9 = vrot.slane %v10122_v54, 1 }
  0x2e   : > { %14422 = vst [vmem:[#allocation8_spill] sm:$0xff] %v10139_v8  ;;  %p9841_p2 = por %p9840_p1, %p9839_p0 }
  0x30   : > { %9320 = vmatmul.mubr.msk.f32.gmra.mxu0 %vm450_vm0, %v414_v10  ;;  %p9842_p3 = pnand %p9841_p2, %p9835_p13 }
  0x31   : > { %9322 = vmatprep.mubr.msk.f32.mxu0 %vm450_vm0, %v415_v11 }
  0x34   : > { %9323 = vmatmul.mubr.msk.f32.gmra.mxu0 %vm450_vm0, %v416_v12 }
  0x35   : > { %9325 = vmatprep.mubr.msk.f32.mxu0 %vm450_vm0, %v417_v13  ;;  %v3821_v13 = vrot.slane %v10133_v0, 1 }
  0x38   : > { %9326 = vmatmul.mubr.msk.f32.gmra.mxu0 %vm450_vm0, %v418_v14 }
  0x39   : > { %9328 = vmatprep.mubr.msk.f32.mxu0 %vm450_vm0, %v419_v15 }
  0x3c   : > { %9329 = vmatmul.mubr.msk.f32.gmra.mxu0 %vm450_vm0, %v420_v16 }
  0x3d   : > { %9331 = vmatprep.mubr.msk.f32.mxu0 %vm450_vm0, %v421_v17 }
  0x40   : > { %9332 = vmatmul.mubr.msk.f32.gmra.mxu0 %vm450_vm0, %v422_v18 }
  0x41   : > { %9334 = vmatprep.mubr.msk.f32.mxu0 %vm450_vm0, %v423_v19 }
  0x44   : > { %9335 = vmatmul.mubr.msk.f32.gmra.mxu0 %vm450_vm0, %v424_v20 }
  0x45   : > { %9337 = vmatprep.mubr.msk.f32.mxu0 %vm450_vm0, %v425_v21 }
  0x48   : > { %9338 = vmatmul.mubr.msk.f32.gmra.mxu0 %vm450_vm0, %v426_v22 }
  0x49   : > { %9340 = vmatprep.mubr.msk.f32.mxu0 %vm450_vm0, %v427_v23 }
  0x4c   : > { %9341 = vmatmul.mubr.msk.f32.gmra.mxu0 %vm450_vm0, %v428_v24 }
  0x4d   : > { %9343 = vmatprep.mubr.msk.f32.mxu0 %vm450_vm0, %v429_v25 }
  0x50   : > { %9344 = vmatmul.mubr.msk.f32.gmra.mxu0 %vm450_vm0, %v430_v26 }
  0x51   : > { %9346 = vmatprep.mubr.msk.f32.mxu0 %vm450_vm0, %v431_v27 }
  0x54   : > { %9347 = vmatmul.mubr.msk.f32.gmra.mxu0 %vm450_vm0, %v432_v28 }
  0x55   : > { %9349 = vmatprep.mubr.msk.f32.mxu0 %vm450_vm0, %v433_v29 }
  0x58   : > { %9350 = vmatmul.mubr.msk.f32.gmra.mxu0 %vm450_vm0, %v434_v30 }
  0x59   : > { %9352 = vmatprep.mubr.msk.f32.mxu0 %vm450_vm0, %v435_v31 }
  0x5c   : > { %9353 = vmatmul.mubr.msk.f32.gmra.mxu0 %vm450_vm0, %v436_v32 }
  0x5d   : > { %9355 = vmatprep.mubr.msk.f32.mxu0 %vm450_vm0, %v437_v33 }
  0x60   : > { %9356 = vmatmul.mubr.msk.f32.gmra.mxu0 %vm450_vm0, %v438_v34 }
  0x61   : > { %9358 = vmatprep.mubr.msk.f32.mxu0 %vm450_vm0, %v439_v35 }
  0x64   : > { %9359 = vmatmul.mubr.msk.f32.gmra.mxu0 %vm450_vm0, %v440_v36 }
  0x65   : > { %9361 = vmatprep.mubr.msk.f32.mxu0 %vm450_vm0, %v441_v37 }
  0x68   : > { %9362 = vmatmul.mubr.msk.f32.gmra.mxu0 %vm450_vm0, %v442_v38  ;;  %vm8755_vm0 = vmneg %vm5091_vm11 }
  0xec   : > { %v9318_v45 = vpop.f32.mrf.mxu0 }
  0xed   : > { %v780_v47 = vmul.f32 %v9318_v45, %v10105_v42 }
  0xee   : > { %v613_v49 = vpop.f32.mrf.mxu0 }
  0xef   : > { %v819_v50 = vadd.f32 %v10112_v46, %v780_v47  ;;  %v779_v51 = vmul.f32 %v10105_v42, %v613_v49 }
  0xf0   : > { %v9321_v52 = vpop.f32.mrf.mxu0 }
  0xf1   : > { %v851_v55 = vmax.f32 %v819_v50, 0.0  ;;  %v818_v56 = vadd.f32 %v10112_v46, %v779_v51  ;;  %v782_v57 = vmul.f32 %v9321_v52, %v10105_v42 }
  0xf2   : > { %v623_v59 = vpop.f32.mrf.mxu0 }
  0xf3   : > { %v931_v60 = vcombine.high %v851_v55, %v851_v55  ;;  %v938_v61 = vrot.slane %v851_v55, %v10116_v48  ;;  %v850_v62 = vmax.f32 %v818_v56, 0.0  ;;  %v821_v63 = vadd.f32 %v10112_v46, %v782_v57 }
  0xf4   : > { %v781_v3 = vmul.f32 %v10105_v42, %v623_v59  ;;  %v9324_v26 = vpop.f32.mrf.mxu0 }
  0xf5   : > { %v945_v1 = vrot.slane %v931_v60, %v10116_v48  ;;  %v946_v2 = vcombine.high %v938_v61, %v938_v61  ;;  %v914_v4 = vcombine.high %v850_v62, %v850_v62  ;;  %v921_v5 = vrot.slane %v850_v62, %v10116_v48 }
  0xf6   : > { %v8435_v7 = vrot.slane %v938_v61, 9  ;;  %v853_v12 = vmax.f32 %v821_v63, 0.0  ;;  %v1605_v14 = vrot.slane %v938_v61, %v10127_v58  ;;  %v820_v17 = vadd.f32 %v10112_v46, %v781_v3  ;;  %v633_v45 = vpop.f32.mrf.mxu0 }
  0xf7   : > { %v947_v6 = vcombine.high %v945_v1, %v945_v1  ;;  %v928_v10 = vrot.slane %v914_v4, %v10116_v48  ;;  %v929_v11 = vcombine.high %v921_v5, %v921_v5  ;;  %v1609_v15 = vrot.slane %v946_v2, %v10127_v58 }
  0xf8   : > { %v1613_v16 = vrot.slane %v945_v1, %v10127_v58  ;;  %v1589_v19 = vrot.slane %v921_v5, %v10127_v58  ;;  %v8436_v22 = vrot.slane %v946_v2, 9  ;;  %v8437_v23 = vrot.slane %v945_v1, 9  ;;  %v9327_v4 = vpop.f32.mrf.mxu0 }
  0xf9   : > { %v930_v18 = vcombine.high %v928_v10, %v928_v10  ;;  %v1593_v20 = vrot.slane %v929_v11, %v10127_v58  ;;  %v1597_v21 = vrot.slane %v928_v10, %v10127_v58  ;;  %v8438_v24 = vrot.slane %v947_v6, 9 }
  0xfa   : > { %v10151_v25 = vmax.f32 %v938_v61, %v8435_v7  ;;  %v8431_v29 = vrot.slane %v921_v5, 9  ;;  %v965_v30 = vcombine.high %v853_v12, %v853_v12  ;;  %v8432_v32 = vrot.slane %v929_v11, 9 }
  0xfb   : > { %v1601_v27 = vrot.slane %v930_v18, %v10127_v58  ;;  %v2035_v28 = vsel %vm2034_vm1, %v1593_v20, %v1589_v19  ;;  %v8433_v33 = vrot.slane %v928_v10, 9  ;;  %v10157_v34 = vrot.slane %v853_v12, %v10116_v48 }
  0xfc   : > { %v2037_v31 = vsel %vm2036_vm2, %v1597_v21, %v2035_v28  ;;  %v8434_v36 = vrot.slane %v930_v18, 9  ;;  %v10161_v37 = vrot.slane %v965_v30, %v10116_v48  ;;  %v852_v38 = vmax.f32 %v820_v17, 0.0 }
  0xfd   : > { %v2039_v35 = vsel %vm2038_vm3, %v1601_v27, %v2037_v31  ;;  %v10163_v39 = vmax.f32 %v946_v2, %v8436_v22  ;;  %v10165_v40 = vmax.f32 %v945_v1, %v8437_v23  ;;  %v10170_v43 = vcombine.high %v10157_v34, %v10157_v34 }
  0xfe   : > { %v2041_v41 = vsel %vm2040_vm4, %v1605_v14, %v2039_v35  ;;  %v10172_v47 = vmax.f32 %v947_v6, %v8438_v24  ;;  %v10175_v50 = vmax.f32 %v921_v5, %v8431_v29  ;;  %v981_v51 = vcombine.high %v10161_v37, %v10161_v37  ;;  %v643_v24 = vpop.f32.mrf.mxu0 }
  0xff   : > { %v2043_v49 = vsel %vm2042_vm5, %v1609_v15, %v2041_v41  ;;  %v2554_v55 = vmax.f32 %v929_v11, %v8432_v32  ;;  %v10180_v56 = vmax.f32 %v928_v10, %v8433_v33  ;;  %v8443_v57 = vrot.slane %v10157_v34, 9 }
 0x100   : > { %v2045_v52 = vsel %vm2044_vm6, %v1613_v16, %v2043_v49  ;;  %v2556_v60 = vmax.f32 %v930_v18, %v8434_v36  ;;  %v8445_v61 = vrot.slane %v10161_v37, 9  ;;  %v948_v62 = vcombine.high %v852_v38, %v852_v38  ;;  %v9330_v49 = vpop.f32.mrf.mxu0 }
 0x101   : > { %v2153_v59 = vsel %vm2152_vm7, 0.0, %v2045_v52  ;;  %v8444_v2 = vrot.slane %v10170_v43, 9  ;;  %v955_v3 = vrot.slane %v852_v38, %v10116_v48  ;;  %v1633_v5 = vrot.slane %v10157_v34, %v10127_v58 }
 0x102   : > { %v2697_v63 = vcombine.high %v2153_v59, %v2153_v59  ;;  %v10186_v1 = vrot.slane %v2153_v59, %v10116_v48  ;;  %v1641_v6 = vrot.slane %v10161_v37, %v10127_v58  ;;  %v8446_v7 = vrot.slane %v981_v51, 9 }
 0x103   : > { %v962_v10 = vrot.slane %v948_v62, %v10116_v48  ;;  %v1637_v14 = vrot.slane %v10170_v43, %v10127_v58  ;;  %v10205_v15 = vmax.f32 %v10157_v34, %v8443_v57  ;;  %v10209_v17 = vmax.f32 %v10161_v37, %v8445_v61 }
 0x104   : > { %v10196_v11 = vrot.slane %v2697_v63, %v10116_v48  ;;  %v10200_v12 = vcombine.high %v10186_v1, %v10186_v1  ;;  %v2969_v16 = vrot.slane %v10186_v1, 1  ;;  %v963_v18 = vcombine.high %v955_v3, %v955_v3 }
 0x105   : > { %v964_v19 = vcombine.high %v962_v10, %v962_v10  ;;  %v10212_v20 = vmax.f32 %v10170_v43, %v8444_v2  ;;  %v1625_v21 = vrot.slane %v962_v10, %v10127_v58  ;;  %v784_v22 = vmul.f32 %v9324_v26, %v10105_v42 }
 0x106   : > { %v783_v23 = vmul.f32 %v10105_v42, %v633_v45  ;;  %v10217_v27 = vmax.f32 %v981_v51, %v8446_v7  ;;  %v1617_v28 = vrot.slane %v955_v3, %v10127_v58  ;;  %v1621_v29 = vrot.slane %v963_v18, %v10127_v58 }
 0x107   : > { %v1629_v30 = vrot.slane %v964_v19, %v10127_v58  ;;  %v10224_v31 = vcombine.high %v10196_v11, %v10196_v11  ;;  %v2970_v32 = vrot.slane %v10200_v12, 1  ;;  %v2971_v33 = vrot.slane %v10196_v11, 1 }
 0x108   : > { %v3161_v26 = vmax.f32 %v10175_v50, %v10186_v1  ;;  %v10230_v34 = vmax.f32 %v2554_v55, %v2969_v16  ;;  %v2046_v35 = vsel %vm2034_vm1, %v1621_v29, %v1617_v28  ;;  %v8439_v36 = vrot.slane %v955_v3, 9 }
 0x109   : > { %v8440_v37 = vrot.slane %v963_v18, 9  ;;  %v2047_v38 = vsel %vm2036_vm2, %v1625_v21, %v2046_v35  ;;  %v8441_v41 = vrot.slane %v962_v10, 9  ;;  %v823_v43 = vadd.f32 %v10112_v46, %v784_v22 }
 0x10a   : > { %v822_v45 = vadd.f32 %v10112_v46, %v783_v23  ;;  %v3163_v51 = vmax.f32 %v10180_v56, %v10200_v12  ;;  %v3165_v50 = vmax.f32 %v10151_v25, %v10196_v11  ;;  %v2048_v52 = vsel %vm2038_vm3, %v1629_v30, %v2047_v38 }
 0x10b   : > { %v8442_v55 = vrot.slane %v964_v19, 9  ;;  %v10241_v57 = vmax.f32 %v2556_v60, %v2970_v32  ;;  %v2049_v59 = vsel %vm2040_vm4, %v1633_v5, %v2048_v52  ;;  %v855_v61 = vmax.f32 %v823_v43, 0.0  ;;  %v653_v60 = vpop.f32.mrf.mxu0 }
 0x10c   : > { %v854_v62 = vmax.f32 %v822_v45, 0.0  ;;  %v10245_v63 = vmax.f32 %v10163_v39, %v2971_v33  ;;  %v2050_v1 = vsel %vm2042_vm5, %v1637_v14, %v2049_v59  ;;  %v2561_v2 = vmax.f32 %v955_v3, %v8439_v36 }
 0x10d   : > { %v2562_v7 = vmax.f32 %v963_v18, %v8440_v37  ;;  %v2051_v56 = vsel %vm2044_vm6, %v1641_v6, %v2050_v1  ;;  %v2563_v12 = vmax.f32 %v962_v10, %v8441_v41  ;;  %v999_v16 = vcombine.high %v855_v61, %v855_v61 }
 0x10e   : > { %v10250_v21 = vrot.slane %v855_v61, %v10116_v48  ;;  %v2154_v5 = vsel %vm2152_vm7, 0.0, %v2051_v56  ;;  %v2564_v22 = vmax.f32 %v964_v19, %v8442_v55  ;;  %v786_v23 = vmul.f32 %v9327_v4, %v10105_v42 }
 0x10f   : > { %v785_v39 = vmul.f32 %v10105_v42, %v643_v24  ;;  %v2714_v28 = vcombine.high %v2154_v5, %v2154_v5  ;;  %v2721_v3 = vrot.slane %v2154_v5, %v10116_v48  ;;  %v982_v14 = vcombine.high %v854_v62, %v854_v62 }
 0x110   : > { %v10257_v6 = vmul.f32 %v9330_v49, %v10105_v42  ;;  %v10260_v10 = vrot.slane %v999_v16, %v10116_v48  ;;  %v10264_v18 = vcombine.high %v10250_v21, %v10250_v21  ;;  %v10267_v19 = vrot.slane %v854_v62, %v10116_v48 }
 0x111   : > { %v10270_v4 = vmul.f32 %v10105_v42, %v653_v60  ;;  %v2728_v24 = vrot.slane %v2714_v28, %v10116_v48  ;;  %v2729_v29 = vcombine.high %v2721_v3, %v2721_v3  ;;  %v2973_v30 = vrot.slane %v2721_v3, 1 }
 0x112   : > { %v3169_v32 = vmax.f32 %v2561_v2, %v2721_v3  ;;  %v1661_v33 = vrot.slane %v10250_v21, %v10127_v58  ;;  %v8451_v35 = vrot.slane %v10250_v21, 9  ;;  %v825_v36 = vadd.f32 %v10112_v46, %v786_v23 }
 0x113   : > { %v824_v37 = vadd.f32 %v10112_v46, %v785_v39  ;;  %v2974_v38 = vrot.slane %v2729_v29, 1  ;;  %v2975_v41 = vrot.slane %v2728_v24, 1  ;;  %v3170_v43 = vmax.f32 %v2562_v7, %v2973_v30 }
 0x114   : > { %v10279_v45 = vrot.slane %v982_v14, %v10116_v48  ;;  %v3171_v49 = vmax.f32 %v2563_v12, %v2729_v29  ;;  %v3619_v52 = vmax.f32 %v3161_v26, %v3169_v32  ;;  %v1015_v55 = vcombine.high %v10260_v10, %v10260_v10 }
 0x115   : > { %v10285_v59 = vcombine.high %v10267_v19, %v10267_v19  ;;  %v10287_v61 = vcombine.high %v2728_v24, %v2728_v24  ;;  %v3172_v62 = vmax.f32 %v2564_v22, %v2974_v38  ;;  %v3173_v1 = vmax.f32 %v10205_v15, %v2728_v24 }
 0x116   : > { %v1665_v2 = vrot.slane %v10264_v18, %v10127_v58  ;;  %v3348_v7 = vrot.slane %v3169_v32, %v10139_v8  ;;  %v3352_v56 = vrot.slane %v3170_v43, %v10139_v8  ;;  %v3356_v26 = vrot.slane %v3171_v49, %v10139_v8 }
 0x117   : > { %v3620_v12 = vmax.f32 %v10230_v34, %v3170_v43  ;;  %v10297_v16 = vmax.f32 %v10212_v20, %v2975_v41  ;;  %v3360_v60 = vrot.slane %v3172_v62, %v10139_v8  ;;  %v3621_v5 = vmax.f32 %v3163_v51, %v3171_v49 }
 0x118   : > { %v3622_v22 = vmax.f32 %v10241_v57, %v3172_v62  ;;  %v3570_v15 = vsel %vm3569_vm8, %v3352_v56, %v3348_v7  ;;  %v3916_v23 = vmax.f32 %v3619_v52, %v10122_v54  ;;  %v1669_v28 = vrot.slane %v10260_v10, %v10127_v58 }
 0x119   : > { %v3917_v39 = vmax.f32 %v3620_v12, %v3820_v9  ;;  %v2976_v34 = vrot.slane %v10287_v61, 1  ;;  %v3571_v20 = vsel %vm2034_vm1, %v3356_v26, %v3570_v15  ;;  %v3918_v3 = vmax.f32 %v3621_v5, %v10133_v0 }
 0x11a   : > { %v8452_v51 = vrot.slane %v10264_v18, 9  ;;  %v3364_v57 = vrot.slane %v3173_v1, %v10139_v8  ;;  %v3572_v14 = vsel %vm2036_vm2, %v3360_v60, %v3571_v20  ;;  %v10315_v24 = vmax.f32 %v3622_v22, %v3821_v13 }
 0x11b   : > { %v4051_v54 = vrot.slane %v3917_v39, %v10139_v8  ;;  %v10320_v9 = vmax.f32 %v10209_v17, %v10287_v61  ;;  %v3368_v29 = vrot.slane %v10297_v16, %v10139_v8  ;;  %v10327_v30 = vmax.f32 %v3165_v50, %v3173_v1 }
 0x11c   : > { %14423 = vst [vmem:[#allocation9_spill] sm:$0xff] %v10315_v24  ;;  %v8453_v32 = vrot.slane %v10260_v10, 9  ;;  %v10331_v0 = vsel %vm2038_vm3, %v3364_v57, %v3572_v14  ;;  %v4047_v13 = vrot.slane %v3916_v23, %v10139_v8  ;;  %v10335_v38 = vrot.slane %v3918_v3, %v10139_v8 }
 0x11d   : > { %14424 = vst [vmem:[#allocation10_spill] sm:$0xff] %v10327_v30  ;;  %v8454_v17 = vrot.slane %v1015_v55, 9  ;;  %v998_v41 = vcombine.high %v10279_v45, %v10279_v45  ;;  %v1645_v43 = vrot.slane %v10267_v19, %v10127_v58  ;;  %v1649_v25 = vrot.slane %v10285_v59, %v10127_v58 }
 0x11e   : > { %v1653_v11 = vrot.slane %v10279_v45, %v10127_v58  ;;  %v10348_v49 = vsel %vm2034_vm1, %v4051_v54, %v4047_v13  ;;  %v10351_v52 = vmax.f32 %v10250_v21, %v8451_v35  ;;  %v857_v62 = vmax.f32 %v825_v36, 0.0  ;;  %v8574_v35 = vld [vmem:[%s14374_s4 + $0xf8] sm:$0xff] }
 0x11f   : > { %v10354_v1 = vmax.f32 %v10264_v18, %v8452_v51  ;;  %v1657_v7 = vrot.slane %v998_v41, %v10127_v58  ;;  %v2052_v56 = vsel %vm2034_vm1, %v1649_v25, %v1645_v43  ;;  %v856_v26 = vmax.f32 %v824_v37, 0.0  ;;  %v8592_v18 = vld [vmem:[%s14374_s4 + $0x178] sm:$0xff]  ;;  %9364 = vmatprep.subr.mxu1 %v8574_v35 }
 0x120   : > { %v10359_v12 = vmax.f32 %v10260_v10, %v8453_v32  ;;  %v2053_v60 = vsel %vm2036_vm2, %v1653_v11, %v2052_v56  ;;  %v8447_v5 = vrot.slane %v10267_v19, 9  ;;  %v8448_v22 = vrot.slane %v10285_v59, 9  ;;  %9458 = vmatprep.subr.mxu0 %v8592_v18  ;;  %9365 = vmatpush3.msra.mxu1 %v8574_v35 }
 0x121   : > { %v2054_v36 = vsel %vm2038_vm3, %v1657_v7, %v2053_v60  ;;  %v8449_v37 = vrot.slane %v10279_v45, 9  ;;  %v1033_v10 = vcombine.high %v857_v62, %v857_v62  ;;  %v10373_v15 = vrot.slane %v857_v62, %v10116_v48  ;;  %9459 = vmatpush3.msra.mxu0 %v8592_v18 }
 0x122   : > { %v2055_v23 = vsel %vm2040_vm4, %v1661_v33, %v2054_v36  ;;  %v8450_v39 = vrot.slane %v998_v41, 9  ;;  %v1016_v20 = vcombine.high %v856_v26, %v856_v26  ;;  %v10380_v3 = vrot.slane %v856_v26, %v10116_v48 }
 0x123   : > { %v10382_v51 = vmax.f32 %v1015_v55, %v8454_v17  ;;  %v2056_v57 = vsel %vm2042_vm5, %v1665_v2, %v2055_v23  ;;  %v10386_v14 = vrot.slane %v1033_v10, %v10116_v48  ;;  %v10390_v54 = vcombine.high %v10373_v15, %v10373_v15 }
 0x124   : > { %v2057_v21 = vsel %vm2044_vm6, %v1669_v28, %v2056_v57  ;;  %v10394_v33 = vmax.f32 %v10267_v19, %v8447_v5  ;;  %v2570_v32 = vmax.f32 %v10285_v59, %v8448_v22  ;;  %v10398_v55 = vrot.slane %v1016_v20, %v10116_v48 }
 0x125   : > { %v2155_v2 = vsel %vm2152_vm7, 0.0, %v2057_v21  ;;  %v10402_v13 = vmax.f32 %v10279_v45, %v8449_v37  ;;  %v1049_v17 = vcombine.high %v10386_v14, %v10386_v14  ;;  %v10408_v28 = vcombine.high %v10380_v3, %v10380_v3 }
 0x126   : > { %v2572_v19 = vmax.f32 %v998_v41, %v8450_v39  ;;  %v2731_v43 = vcombine.high %v2155_v2, %v2155_v2  ;;  %v10411_v59 = vrot.slane %v2155_v2, %v10116_v48  ;;  %v8459_v25 = vrot.slane %v10373_v15, 9  ;;  %v8573_v2 = vld [vmem:[%s14374_s4 + $0xf0] sm:$0xff] }
 0x127   : > { %v8460_v11 = vrot.slane %v10390_v54, 9  ;;  %v8461_v62 = vrot.slane %v10386_v14, 9  ;;  %v1032_v45 = vcombine.high %v10398_v55, %v10398_v55  ;;  %v10421_v7 = vmax.f32 %v10217_v27, %v2976_v34  ;;  %9366 = vmatprep.subr.mxu1 %v8573_v2 }
 0x128   : > { %v10424_v41 = vrot.slane %v2731_v43, %v10116_v48  ;;  %v10428_v56 = vcombine.high %v10411_v59, %v10411_v59  ;;  %v2977_v26 = vrot.slane %v10411_v59, 1  ;;  %v8462_v60 = vrot.slane %v1049_v17, 9  ;;  %v8591_v43 = vld [vmem:[%s14374_s4 + $0x170] sm:$0xff]  ;;  %9367 = vmatpush3.msra.mxu1 %v8573_v2 }
 0x129   : > { %14425 = vst [vmem:[#allocation11_spill] sm:$0xff] %v10421_v7  ;;  %v1689_v5 = vrot.slane %v10373_v15, %v10127_v58  ;;  %v1693_v22 = vrot.slane %v10390_v54, %v10127_v58  ;;  %v1697_v27 = vrot.slane %v10386_v14, %v10127_v58  ;;  %v1677_v61 = vrot.slane %v10408_v28, %v10127_v58 }
 0x12a   : > { %v10441_v34 = vcombine.high %v10424_v41, %v10424_v41  ;;  %v2978_v35 = vrot.slane %v10428_v56, 1  ;;  %v2979_v18 = vrot.slane %v10424_v41, 1  ;;  %v10446_v36 = vmax.f32 %v10373_v15, %v8459_v25  ;;  %9460 = vmatprep.subr.mxu0 %v8591_v43 }
 0x12b   : > { %v3177_v37 = vmax.f32 %v10394_v33, %v10411_v59  ;;  %v1673_v10 = vrot.slane %v10380_v3, %v10127_v58  ;;  %v1681_v23 = vrot.slane %v10398_v55, %v10127_v58  ;;  %v1685_v39 = vrot.slane %v1032_v45, %v10127_v58  ;;  %9461 = vmatpush3.msra.mxu0 %v8591_v43 }
 0x12c   : > { %v10455_v20 = vmax.f32 %v2570_v32, %v2977_v26  ;;  %v10458_v57 = vmax.f32 %v10390_v54, %v8460_v11  ;;  %v10461_v21 = vmax.f32 %v10386_v14, %v8461_v62  ;;  %v10463_v15 = vmax.f32 %v1049_v17, %v8462_v60 }
 0x12d   : > { %v2980_v25 = vrot.slane %v10441_v34, 1  ;;  %v3179_v32 = vmax.f32 %v10402_v13, %v10428_v56  ;;  %v3181_v54 = vmax.f32 %v10351_v52, %v10424_v41  ;;  %v2058_v14 = vsel %vm2034_vm1, %v1677_v61, %v1673_v10 }
 0x12e   : > { %v10477_v17 = vmax.f32 %v2572_v19, %v2978_v35  ;;  %v10480_v11 = vmax.f32 %v10354_v1, %v2979_v18  ;;  %v2059_v62 = vsel %vm2036_vm2, %v1681_v23, %v2058_v14  ;;  %v8455_v26 = vrot.slane %v10380_v3, 9  ;;  %v9333_v23 = vpop.f32.mrf.mxu0 }
 0x12f   : > { %v2060_v50 = vsel %vm2038_vm3, %v1685_v39, %v2059_v62  ;;  %v8456_v61 = vrot.slane %v10408_v28, 9  ;;  %v3372_v19 = vrot.slane %v10320_v9, %v10139_v8  ;;  %v8457_v1 = vrot.slane %v10398_v55, 9 }
 0x130   : > { %v2061_v35 = vsel %vm2040_vm4, %v1689_v5, %v2060_v50  ;;  %v3376_v18 = vrot.slane %v10421_v7, %v10139_v8  ;;  %v3574_v10 = vsel %vm2040_vm4, %v3368_v29, %v10331_v0  ;;  %v8458_v2 = vrot.slane %v1032_v45, 9 }
 0x131   : > { %v2062_v39 = vsel %vm2042_vm5, %v1693_v22, %v2061_v35  ;;  %v3575_v43 = vsel %vm2042_vm5, %v3372_v19, %v3574_v10  ;;  %v827_v50 = vadd.f32 %v10112_v46, %v10257_v6  ;;  %v10504_v5 = vmax.f32 %v10382_v51, %v2980_v25  ;;  %v663_v25 = vpop.f32.mrf.mxu0 }
 0x132   : > { %v2063_v14 = vsel %vm2044_vm6, %v1697_v27, %v2062_v39  ;;  %v2577_v62 = vmax.f32 %v10380_v3, %v8455_v26  ;;  %v3576_v53 = vsel %vm2044_vm6, %v3376_v18, %v3575_v43  ;;  %v2578_v19 = vmax.f32 %v10408_v28, %v8456_v61 }
 0x133   : > { %v2156_v29 = vsel %vm2152_vm7, 0.0, %v2063_v14  ;;  %v3701_v0 = vcombine.high %v3576_v53, %v3576_v53  ;;  %v3708_v22 = vrot.slane %v3576_v53, %v10116_v48  ;;  %v859_v35 = vmax.f32 %v827_v50, 0.0 }
 0x134   : > { %v2579_v10 = vmax.f32 %v10398_v55, %v8457_v1  ;;  %v2748_v6 = vcombine.high %v2156_v29, %v2156_v29  ;;  %v2755_v51 = vrot.slane %v2156_v29, %v10116_v48  ;;  %v2580_v60 = vmax.f32 %v1032_v45, %v8458_v2 }
 0x135   : > { %v10515_v27 = vrot.slane %v3701_v0, %v10116_v48  ;;  %v3716_v3 = vcombine.high %v3708_v22, %v3708_v22  ;;  %v826_v26 = vadd.f32 %v10112_v46, %v10270_v4  ;;  %v790_v28 = vmul.f32 %v9333_v23, %v10105_v42 }
 0x136   : > { %v2762_v18 = vrot.slane %v2748_v6, %v10116_v48  ;;  %v2763_v53 = vcombine.high %v2755_v51, %v2755_v51  ;;  %v2981_v39 = vrot.slane %v2755_v51, 1  ;;  %v3185_v61 = vmax.f32 %v2577_v62, %v2755_v51 }
 0x137   : > { %v3824_v55 = vrot.slane %v3708_v22, 1  ;;  %v1067_v1 = vcombine.high %v859_v35, %v859_v35  ;;  %v10522_v43 = vmul.f32 %v10105_v42, %v663_v25  ;;  %v10529_v0 = vcombine.high %v10515_v27, %v10515_v27 }
 0x138   : > { %v10524_v45 = vcombine.high %v2762_v18, %v2762_v18  ;;  %v2982_v2 = vrot.slane %v2763_v53, 1  ;;  %v2983_v50 = vrot.slane %v2762_v18, 1  ;;  %v3186_v14 = vmax.f32 %v2578_v19, %v2981_v39 }
 0x139   : > { %v3187_v29 = vmax.f32 %v2579_v10, %v2763_v53  ;;  %v3189_v4 = vmax.f32 %v10446_v36, %v2762_v18  ;;  %v3825_v6 = vrot.slane %v3716_v3, 1  ;;  %v3826_v25 = vrot.slane %v10515_v27, 1 }
 0x13a   : > { %v3188_v23 = vmax.f32 %v2580_v60, %v2982_v2  ;;  %v10532_v62 = vmax.f32 %v10458_v57, %v2983_v50  ;;  %v10536_v51 = vmax.f32 %v10461_v21, %v10524_v45  ;;  %v3380_v19 = vrot.slane %v3185_v61, %v10139_v8 }
 0x13b   : > { %v3384_v10 = vrot.slane %v3186_v14, %v10139_v8  ;;  %v3388_v36 = vrot.slane %v3187_v29, %v10139_v8  ;;  %v10543_v18 = vrot.slane %v859_v35, %v10116_v48  ;;  %v3627_v57 = vmax.f32 %v3177_v37, %v3185_v61 }
 0x13c   : > { %v3392_v60 = vrot.slane %v3188_v23, %v10139_v8  ;;  %v3628_v21 = vmax.f32 %v10455_v20, %v3186_v14  ;;  %v3629_v53 = vmax.f32 %v3179_v32, %v3187_v29  ;;  %v3630_v2 = vmax.f32 %v10477_v17, %v3188_v23 }
 0x13d   : > { %v3577_v39 = vsel %vm3569_vm8, %v3384_v10, %v3380_v19  ;;  %v3631_v35 = vmax.f32 %v3181_v54, %v3189_v4  ;;  %v3632_v50 = vmax.f32 %v10480_v11, %v10532_v62  ;;  %v14426_v59 = vmax.f32 %v10359_v12, %v10441_v34 }
 0x13e   : > { %v3578_v33 = vsel %vm2034_vm1, %v3388_v36, %v3577_v39  ;;  %v3924_v13 = vmax.f32 %v3627_v57, %v3708_v22  ;;  %v3925_v56 = vmax.f32 %v3628_v21, %v3824_v55  ;;  %v3396_v20 = vrot.slane %v3189_v4, %v10139_v8  ;;  %v8572_v55 = vld [vmem:[%s14374_s4 + $0xe8] sm:$0xff] }
 0x13f   : > { %v3633_v37 = vmax.f32 %v14426_v59, %v10536_v51  ;;  %v3926_v32 = vmax.f32 %v3629_v53, %v3716_v3  ;;  %v3927_v17 = vmax.f32 %v3630_v2, %v3825_v6  ;;  %v858_v61 = vmax.f32 %v826_v26, 0.0  ;;  %v8590_v4 = vld [vmem:[%s14374_s4 + $0x168] sm:$0xff]  ;;  %9368 = vmatprep.subr.mxu1 %v8572_v55 }
 0x140   : > { %v3579_v52 = vsel %vm2036_vm2, %v3392_v60, %v3578_v33  ;;  %v3928_v41 = vmax.f32 %v3631_v35, %v10515_v27  ;;  %v3929_v54 = vmax.f32 %v3632_v50, %v3826_v25  ;;  %v4079_v14 = vrot.slane %v3924_v13, %v10139_v8  ;;  %9462 = vmatprep.subr.mxu0 %v8590_v4 }
 0x141   : > { %v3930_v11 = vmax.f32 %v3633_v37, %v10529_v0  ;;  %v4083_v29 = vrot.slane %v3925_v56, %v10139_v8  ;;  %v4087_v12 = vrot.slane %v3926_v32, %v10139_v8  ;;  %v4091_v34 = vrot.slane %v3927_v17, %v10139_v8  ;;  %9369 = vmatpush3.msra.mxu1 %v8572_v55 }
 0x142   : > { %v3400_v22 = vrot.slane %v10532_v62, %v10139_v8  ;;  %v10576_v3 = vrot.slane %v1067_v1, %v10116_v48  ;;  %v10580_v27 = vcombine.high %v10543_v18, %v10543_v18  ;;  %v829_v26 = vadd.f32 %v10112_v46, %v790_v28  ;;  %9463 = vmatpush3.msra.mxu0 %v8590_v4 }
 0x143   : > { %v2984_v6 = vrot.slane %v10524_v45, 1  ;;  %v10591_v23 = vsel %vm2038_vm3, %v3396_v20, %v3579_v52  ;;  %v4306_v1 = vsel %vm2034_vm1, %v4083_v29, %v4079_v14  ;;  %v1050_v25 = vcombine.high %v858_v61, %v858_v61  ;;  %v8589_v52 = vld [vmem:[%s14374_s4 + $0x160] sm:$0xff] }
 0x144   : > { %v4095_v28 = vrot.slane %v3928_v41, %v10139_v8  ;;  %v4099_v19 = vrot.slane %v3929_v54, %v10139_v8  ;;  %v4307_v10 = vsel %vm2036_vm2, %v4087_v12, %v4306_v1  ;;  %v8467_v36 = vrot.slane %v10543_v18, 9  ;;  %9464 = vmatprep.subr.mxu0 %v8589_v52 }
 0x145   : > { %v10599_v60 = vrot.slane %v3930_v11, %v10139_v8  ;;  %v4308_v57 = vsel %vm2038_vm3, %v4091_v34, %v4307_v10  ;;  %v1083_v21 = vcombine.high %v10576_v3, %v10576_v3  ;;  %v1717_v53 = vrot.slane %v10543_v18, %v10127_v58  ;;  %9465 = vmatpush3.msra.mxu0 %v8589_v52 }
 0x146   : > { %v4309_v39 = vsel %vm2040_vm4, %v4095_v28, %v4308_v57  ;;  %v1721_v2 = vrot.slane %v10580_v27, %v10127_v58  ;;  %v1057_v35 = vrot.slane %v858_v61, %v10116_v48  ;;  %v1064_v50 = vrot.slane %v1050_v25, %v10116_v48  ;;  %v8571_v61 = vld [vmem:[%s14374_s4 + $0xe0] sm:$0xff] }
 0x147   : > { %v1725_v33 = vrot.slane %v10576_v3, %v10127_v58  ;;  %v8468_v59 = vrot.slane %v10580_v27, 9  ;;  %v8469_v37 = vrot.slane %v10576_v3, 9  ;;  %v861_v13 = vmax.f32 %v829_v26, 0.0  ;;  %9370 = vmatprep.subr.mxu1 %v8571_v61 }
 0x148   : > { %v10616_v56 = vsel %vm2042_vm5, %v4099_v19, %v4309_v39  ;;  %v10619_v20 = vmax.f32 %v10543_v18, %v8467_v36  ;;  %v1065_v32 = vcombine.high %v1057_v35, %v1057_v35  ;;  %v1066_v17 = vcombine.high %v1064_v50, %v1064_v50  ;;  %9371 = vmatpush3.msra.mxu1 %v8571_v61 }
 0x149   : > { %v8470_v41 = vrot.slane %v1083_v21, 9  ;;  %v1701_v54 = vrot.slane %v1057_v35, %v10127_v58  ;;  %v1709_v11 = vrot.slane %v1064_v50, %v10127_v58  ;;  %v1101_v14 = vcombine.high %v861_v13, %v861_v13 }
 0x14a   : > { %v1705_v18 = vrot.slane %v1065_v32, %v10127_v58  ;;  %v1713_v29 = vrot.slane %v1066_v17, %v10127_v58  ;;  %v8463_v12 = vrot.slane %v1057_v35, 9  ;;  %v8465_v34 = vrot.slane %v1064_v50, 9 }
 0x14b   : > { %v10632_v26 = vmax.f32 %v10580_v27, %v8468_v59  ;;  %v8464_v55 = vrot.slane %v1065_v32, 9  ;;  %v10635_v4 = vrot.slane %v861_v13, %v10116_v48  ;;  %v10638_v1 = vrot.slane %v1101_v14, %v10116_v48  ;;  %v8588_v59 = vld [vmem:[%s14374_s4 + $0x158] sm:$0xff] }
 0x14c   : > { %v10641_v25 = vmax.f32 %v10576_v3, %v8469_v37  ;;  %v2064_v28 = vsel %vm2034_vm1, %v1705_v18, %v1701_v54  ;;  %v8466_v19 = vrot.slane %v1066_v17, 9  ;;  %v828_v10 = vadd.f32 %v10112_v46, %v10522_v43  ;;  %v8570_v3 = vld [vmem:[%s14374_s4 + $0xd8] sm:$0xff]  ;;  %9466 = vmatprep.subr.mxu0 %v8588_v59 }
 0x14d   : > { %v10646_v36 = vmax.f32 %v1083_v21, %v8470_v41  ;;  %v2065_v27 = vsel %vm2036_vm2, %v1709_v11, %v2064_v28  ;;  %v10651_v57 = vcombine.high %v10635_v4, %v10635_v4  ;;  %v1117_v39 = vcombine.high %v10638_v1, %v10638_v1  ;;  %9372 = vmatprep.subr.mxu1 %v8570_v3 }
 0x14e   : > { %v2066_v43 = vsel %vm2038_vm3, %v1713_v29, %v2065_v27  ;;  %v10663_v21 = vmax.f32 %v1057_v35, %v8463_v12  ;;  %v10665_v37 = vmax.f32 %v1064_v50, %v8465_v34  ;;  %v2586_v61 = vmax.f32 %v1065_v32, %v8464_v55  ;;  %9373 = vmatpush3.msra.mxu1 %v8570_v3 }
 0x14f   : > { %v2067_v13 = vsel %vm2040_vm4, %v1717_v53, %v2066_v43  ;;  %v8475_v52 = vrot.slane %v10635_v4, 9  ;;  %v8477_v41 = vrot.slane %v10638_v1, 9  ;;  %9467 = vmatpush3.msra.mxu0 %v8588_v59  ;;  %v2588_v11 = vmax.f32 %v1066_v17, %v8466_v19 }
 0x150   : > { %v2068_v54 = vsel %vm2042_vm5, %v1721_v2, %v2067_v13  ;;  %v8476_v14 = vrot.slane %v10651_v57, 9  ;;  %v860_v35 = vmax.f32 %v828_v10, 0.0  ;;  %v1745_v18 = vrot.slane %v10635_v4, %v10127_v58 }
 0x151   : > { %v2069_v50 = vsel %vm2044_vm6, %v1725_v33, %v2068_v54  ;;  %v1753_v53 = vrot.slane %v10638_v1, %v10127_v58  ;;  %v8478_v32 = vrot.slane %v1117_v39, 9  ;;  %v1749_v12 = vrot.slane %v10651_v57, %v10127_v58 }
 0x152   : > { %v2157_v29 = vsel %vm2152_vm7, 0.0, %v2069_v50  ;;  %v1084_v34 = vcombine.high %v860_v35, %v860_v35  ;;  %v1091_v2 = vrot.slane %v860_v35, %v10116_v48  ;;  %v10685_v33 = vmax.f32 %v10635_v4, %v8475_v52 }
 0x153   : > { %v2765_v17 = vcombine.high %v2157_v29, %v2157_v29  ;;  %v10682_v55 = vrot.slane %v2157_v29, %v10116_v48  ;;  %v10688_v28 = vmax.f32 %v10638_v1, %v8477_v41  ;;  %v10691_v19 = vmax.f32 %v10651_v57, %v8476_v14 }
 0x154   : > { %v1098_v10 = vrot.slane %v1084_v34, %v10116_v48  ;;  %v1099_v27 = vcombine.high %v1091_v2, %v1091_v2  ;;  %v10697_v3 = vmax.f32 %v10463_v15, %v2984_v6  ;;  %v10707_v43 = vmax.f32 %v1117_v39, %v8478_v32  ;;  %v9336_v15 = vpop.f32.mrf.mxu0 }
 0x155   : > { %v10700_v59 = vrot.slane %v2765_v17, %v10116_v48  ;;  %v10704_v4 = vcombine.high %v10682_v55, %v10682_v55  ;;  %v2985_v1 = vrot.slane %v10682_v55, 1  ;;  %v1729_v13 = vrot.slane %v1091_v2, %v10127_v58 }
 0x156   : > { %v1100_v57 = vcombine.high %v1098_v10, %v1098_v10  ;;  %v1733_v52 = vrot.slane %v1099_v27, %v10127_v58  ;;  %v1737_v45 = vrot.slane %v1098_v10, %v10127_v58  ;;  %v3404_v39 = vrot.slane %v10536_v51, %v10139_v8 }
 0x157   : > { %v10714_v6 = vcombine.high %v10700_v59, %v10700_v59  ;;  %v2986_v41 = vrot.slane %v10704_v4, 1  ;;  %v2987_v54 = vrot.slane %v10700_v59, 1  ;;  %v3408_v50 = vrot.slane %v10697_v3, %v10139_v8 }
 0x158   : > { %v1741_v14 = vrot.slane %v1100_v57, %v10127_v58  ;;  %v2070_v35 = vsel %vm2034_vm1, %v1733_v52, %v1729_v13  ;;  %v3581_v32 = vsel %vm2040_vm4, %v3400_v22, %v10591_v23  ;;  %v10731_v34 = vmax.f32 %v2586_v61, %v2985_v1  ;;  %v8569_v13 = vld [vmem:[%s14374_s4 + $0xd0] sm:$0xff]  ;;  %v673_v61 = vpop.f32.mrf.mxu0 }
 0x159   : > { %v8471_v17 = vrot.slane %v1091_v2, 9  ;;  %v8472_v51 = vrot.slane %v1099_v27, 9  ;;  %v8587_v52 = vld [vmem:[%s14374_s4 + $0x150] sm:$0xff]  ;;  %v2988_v46 = vrot.slane %v10714_v6, 1  ;;  %v2071_v23 = vsel %vm2036_vm2, %v1737_v45, %v2070_v35  ;;  %9374 = vmatprep.subr.mxu1 %v8569_v13 }
 0x15a   : > { %9468 = vmatprep.subr.mxu0 %v8587_v52  ;;  %v10745_v1 = vmax.f32 %v2588_v11, %v2986_v41  ;;  %v10748_v29 = vmax.f32 %v10632_v26, %v2987_v54  ;;  %v2072_v44 = vsel %vm2038_vm3, %v1741_v14, %v2071_v23  ;;  %v3582_v24 = vsel %vm2042_vm5, %v3404_v39, %v3581_v32  ;;  %v9339_v14 = vpop.f32.mrf.mxu0 }
 0x15b   : > { %9375 = vmatpush3.msra.mxu1 %v8569_v13  ;;  %v2073_v62 = vsel %vm2040_vm4, %v1745_v18, %v2072_v44  ;;  %v8473_v30 = vrot.slane %v1098_v10, 9  ;;  %v8474_v7 = vrot.slane %v1100_v57, 9  ;;  %v3583_v22 = vsel %vm2044_vm6, %v3408_v50, %v3582_v24  ;;  %9469 = vmatpush3.msra.mxu0 %v8587_v52 }
 0x15c   : > { %v3199_v45 = vmax.f32 %v10641_v25, %v10714_v6  ;;  %v2074_v11 = vsel %vm2042_vm5, %v1749_v12, %v2073_v62  ;;  %v3718_v41 = vcombine.high %v3583_v22, %v3583_v22  ;;  %v10758_v26 = vrot.slane %v3583_v22, %v10116_v48 }
 0x15d   : > { %v10761_v54 = vmax.f32 %v10646_v36, %v2988_v46  ;;  %v2075_v39 = vsel %vm2044_vm6, %v1753_v53, %v2074_v11  ;;  %v2593_v44 = vmax.f32 %v1091_v2, %v8471_v17  ;;  %v792_v18 = vmul.f32 %v9336_v15, %v10105_v42  ;;  %v10776_v42 = vld [vmem:[%s14418_s2] ss:$0 sm:$0xff] }
 0x15e   : > { %v2158_v24 = vsel %vm2152_vm7, 0.0, %v2075_v39  ;;  %v2594_v35 = vmax.f32 %v1099_v27, %v8472_v51  ;;  %v3732_v25 = vrot.slane %v3718_v41, %v10116_v48  ;;  %v3733_v12 = vcombine.high %v10758_v26, %v10758_v26 }
 0x15f   : > { %v2595_v6 = vmax.f32 %v1098_v10, %v8473_v30  ;;  %v2596_v50 = vmax.f32 %v1100_v57, %v8474_v7  ;;  %v2782_v32 = vcombine.high %v2158_v24, %v2158_v24  ;;  %v2789_v36 = vrot.slane %v2158_v24, %v10116_v48 }
 0x160   : > { %v3634_v46 = vmax.f32 %v10504_v5, %v10697_v3  ;;  %v3828_v53 = vrot.slane %v10758_v26, 1  ;;  %v791_v2 = vmul.f32 %v10776_v42, %v673_v61  ;;  %v10780_v27 = vmul.f32 %v10776_v42, %v9339_v14  ;;  %v10786_v5 = vld [vmem:[%s14373_s3] ss:$0 sm:$0xff] }
 0x161   : > { %v2796_v30 = vrot.slane %v2782_v32, %v10116_v48  ;;  %v2797_v7 = vcombine.high %v2789_v36, %v2789_v36  ;;  %v2989_v10 = vrot.slane %v2789_v36, 1  ;;  %v831_v3 = vadd.f32 %v10786_v5, %v792_v18 }
 0x162   : > { %v3201_v57 = vmax.f32 %v2593_v44, %v2789_v36  ;;  %v10789_v15 = vcombine.high %v3732_v25, %v3732_v25  ;;  %v3829_v17 = vrot.slane %v3733_v12, 1  ;;  %v14427_v51 = vrot.slane %v10529_v0, 1 }
 0x163   : > { %v10795_v52 = vcombine.high %v2796_v30, %v2796_v30  ;;  %v2990_v62 = vrot.slane %v2797_v7, 1  ;;  %v2991_v22 = vrot.slane %v2796_v30, 1  ;;  %v3202_v23 = vmax.f32 %v2594_v35, %v2989_v10 }
 0x164   : > { %v10793_v13 = vmax.f32 %v3634_v46, %v14427_v51  ;;  %v3203_v61 = vmax.f32 %v2595_v6, %v2797_v7  ;;  %v3205_v11 = vmax.f32 %v10685_v33, %v2796_v30  ;;  %v3830_v41 = vrot.slane %v3732_v25, 1 }
 0x165   : > { %v830_v39 = vadd.f32 %v10786_v5, %v791_v2  ;;  %v3204_v18 = vmax.f32 %v2596_v50, %v2990_v62  ;;  %v10800_v44 = vmax.f32 %v10691_v19, %v2991_v22  ;;  %v10804_v0 = vmax.f32 %v10688_v28, %v10795_v52 }
 0x166   : > { %14428 = vst [vmem:[#allocation12_spill] sm:$0xff] %v10793_v13  ;;  %v863_v14 = vmax.f32 %v831_v3, 0.0  ;;  %v3412_v24 = vrot.slane %v3201_v57, %v10139_v8  ;;  %v3416_v32 = vrot.slane %v3202_v23, %v10139_v8  ;;  %v3420_v35 = vrot.slane %v3203_v61, %v10139_v8 }
 0x167   : > { %v14429_v33 = vmax.f32 %v10663_v21, %v10682_v55  ;;  %v3424_v50 = vrot.slane %v3204_v18, %v10139_v8  ;;  %v3636_v19 = vmax.f32 %v10731_v34, %v3202_v23  ;;  %v14430_v36 = vmax.f32 %v10665_v37, %v10704_v4 }
 0x168   : > { %v3638_v46 = vmax.f32 %v10745_v1, %v3204_v18  ;;  %v3584_v2 = vsel %vm3569_vm8, %v3416_v32, %v3412_v24  ;;  %v14431_v30 = vmax.f32 %v10619_v20, %v10700_v59  ;;  %v3640_v21 = vmax.f32 %v10748_v29, %v10800_v44 }
 0x169   : > { %v3635_v6 = vmax.f32 %v14429_v33, %v3201_v57  ;;  %v3637_v28 = vmax.f32 %v14430_v36, %v3203_v61  ;;  %v3641_v55 = vmax.f32 %v3199_v45, %v10804_v0  ;;  %v3585_v10 = vsel %vm2034_vm1, %v3420_v35, %v3584_v2  ;;  %v8568_v33 = vld [vmem:[%s14374_s4 + $0xc8] sm:$0xff] }
 0x16a   : > { %v3639_v7 = vmax.f32 %v14431_v30, %v3205_v11  ;;  %v3933_v3 = vmax.f32 %v3636_v19, %v3828_v53  ;;  %v3935_v4 = vmax.f32 %v3638_v46, %v3829_v17  ;;  %v3937_v1 = vmax.f32 %v3640_v21, %v3830_v41  ;;  %9376 = vmatprep.subr.mxu1 %v8568_v33 }
 0x16b   : > { %v3932_v34 = vmax.f32 %v3635_v6, %v10758_v26  ;;  %v3934_v37 = vmax.f32 %v3637_v28, %v3733_v12  ;;  %v862_v51 = vmax.f32 %v830_v39, 0.0  ;;  %v3938_v62 = vmax.f32 %v3641_v55, %v10789_v15  ;;  %9377 = vmatpush3.msra.mxu1 %v8568_v33 }
 0x16c   : > { %v3936_v57 = vmax.f32 %v3639_v7, %v3732_v25  ;;  %v4115_v29 = vrot.slane %v3933_v3, %v10139_v8  ;;  %v3428_v45 = vrot.slane %v3205_v11, %v10139_v8  ;;  %v3586_v22 = vsel %vm2036_vm2, %v3424_v50, %v3585_v10 }
 0x16d   : > { %v4111_v59 = vrot.slane %v3932_v34, %v10139_v8  ;;  %v4119_v26 = vrot.slane %v3934_v37, %v10139_v8  ;;  %v4123_v12 = vrot.slane %v3935_v4, %v10139_v8  ;;  %v1135_v17 = vcombine.high %v863_v14, %v863_v14 }
 0x16e   : > { %v4127_v25 = vrot.slane %v3936_v57, %v10139_v8  ;;  %v1142_v23 = vrot.slane %v863_v14, %v10116_v48  ;;  %v4131_v61 = vrot.slane %v3937_v1, %v10139_v8  ;;  %v1118_v39 = vcombine.high %v862_v51, %v862_v51  ;;  %v8586_v14 = vld [vmem:[%s14374_s4 + $0x148] sm:$0xff] }
 0x16f   : > { %v4312_v53 = vsel %vm2034_vm1, %v4115_v29, %v4111_v59  ;;  %v1125_v11 = vrot.slane %v862_v51, %v10116_v48  ;;  %v4135_v18 = vrot.slane %v3938_v62, %v10139_v8  ;;  %v1149_v32 = vrot.slane %v1135_v17, %v10116_v48  ;;  %9470 = vmatprep.subr.mxu0 %v8586_v14  ;;  %v683_v59 = vpop.f32.mrf.mxu0  ;;  %v8585_v29 = vld [vmem:[%s14374_s4 + $0x140] sm:$0xff] }
 0x170   : > { %v4313_v41 = vsel %vm2036_vm2, %v4119_v26, %v4312_v53  ;;  %v1150_v35 = vcombine.high %v1142_v23, %v1142_v23  ;;  %v2992_v6 = vrot.slane %v10795_v52, 1  ;;  %v1132_v19 = vrot.slane %v1118_v39, %v10116_v48  ;;  %9471 = vmatpush3.msra.mxu0 %v8586_v14 }
 0x171   : > { %v4314_v24 = vsel %vm2038_vm3, %v4123_v12, %v4313_v41  ;;  %v1133_v36 = vcombine.high %v1125_v11, %v1125_v11  ;;  %v3432_v28 = vrot.slane %v10800_v44, %v10139_v8  ;;  %v1151_v2 = vcombine.high %v1149_v32, %v1149_v32  ;;  %9472 = vmatprep.subr.mxu0 %v8585_v29 }
 0x172   : > { %v4315_v50 = vsel %vm2040_vm4, %v4127_v25, %v4314_v24  ;;  %v8483_v30 = vrot.slane %v1142_v23, 9  ;;  %v10858_v7 = vsel %vm2038_vm3, %v3428_v45, %v3586_v22  ;;  %v1773_v55 = vrot.slane %v1142_v23, %v10127_v58  ;;  %9473 = vmatpush3.msra.mxu0 %v8585_v29 }
 0x173   : > { %v4316_v46 = vsel %vm2042_vm5, %v4131_v61, %v4315_v50  ;;  %v833_v10 = vadd.f32 %v10786_v5, %v10780_v27  ;;  %v1777_v3 = vrot.slane %v1150_v35, %v10127_v58  ;;  %v1781_v37 = vrot.slane %v1149_v32, %v10127_v58  ;;  %v8567_v27 = vld [vmem:[%s14374_s4 + $0xc0] sm:$0xff] }
 0x174   : > { %v4317_v21 = vsel %vm2044_vm6, %v4135_v18, %v4316_v46  ;;  %v1134_v4 = vcombine.high %v1132_v19, %v1132_v19  ;;  %v8484_v57 = vrot.slane %v1150_v35, 9  ;;  %v8485_v1 = vrot.slane %v1149_v32, 9  ;;  %9378 = vmatprep.subr.mxu1 %v8567_v27 }
 0x175   : > { %v10865_v34 = vsel %vm2152_vm7, 0.0, %v4317_v21  ;;  %v1757_v51 = vrot.slane %v1125_v11, %v10127_v58  ;;  %v1761_v62 = vrot.slane %v1133_v36, %v10127_v58  ;;  %v8486_v45 = vrot.slane %v1151_v2, 9  ;;  %9379 = vmatpush3.msra.mxu1 %v8567_v27 }
 0x176   : > { %14432 = vst [vmem:[#allocation13_spill] sm:$0xff] %v10865_v34  ;;  %v10877_v22 = vmax.f32 %v1142_v23, %v8483_v30  ;;  %v1765_v26 = vrot.slane %v1132_v19, %v10127_v58  ;;  %v1769_v12 = vrot.slane %v1134_v4, %v10127_v58  ;;  %v8479_v17 = vrot.slane %v1125_v11, 9 }
 0x177   : > { %v2076_v53 = vsel %vm2034_vm1, %v1761_v62, %v1757_v51  ;;  %v8480_v61 = vrot.slane %v1133_v36, 9  ;;  %v8481_v39 = vrot.slane %v1132_v19, 9  ;;  %v865_v23 = vmax.f32 %v833_v10, 0.0 }
 0x178   : > { %v2077_v41 = vsel %vm2036_vm2, %v1765_v26, %v2076_v53  ;;  %v793_v18 = vmul.f32 %v10776_v42, %v683_v59  ;;  %v10886_v24 = vmax.f32 %v1150_v35, %v8484_v57  ;;  %v10888_v33 = vmax.f32 %v1149_v32, %v8485_v1 }
 0x179   : > { %v2078_v14 = vsel %vm2038_vm3, %v1769_v12, %v2077_v41  ;;  %v8482_v50 = vrot.slane %v1134_v4, 9  ;;  %v1169_v30 = vcombine.high %v865_v23, %v865_v23  ;;  %v10893_v21 = vrot.slane %v865_v23, %v10116_v48 }
 0x17a   : > { %v2079_v46 = vsel %vm2040_vm4, %v1773_v55, %v2078_v14  ;;  %v832_v51 = vadd.f32 %v10786_v5, %v793_v18  ;;  %v10896_v62 = vmax.f32 %v1151_v2, %v8486_v45  ;;  %v10899_v59 = vmax.f32 %v1125_v11, %v8479_v17  ;;  %v8566_v2 = vld [vmem:[%s14374_s4 + $0xb8] sm:$0xff] }
 0x17b   : > { %v2080_v10 = vsel %vm2042_vm5, %v1777_v3, %v2079_v46  ;;  %v2602_v35 = vmax.f32 %v1133_v36, %v8480_v61  ;;  %v10902_v57 = vmax.f32 %v1132_v19, %v8481_v39  ;;  %v10905_v1 = vrot.slane %v1169_v30, %v10116_v48  ;;  %v8584_v11 = vld [vmem:[%s14374_s4 + $0x138] sm:$0xff]  ;;  %9380 = vmatprep.subr.mxu1 %v8566_v2 }
 0x17c   : > { %v2081_v32 = vsel %vm2044_vm6, %v1781_v37, %v2080_v10  ;;  %v10909_v55 = vcombine.high %v10893_v21, %v10893_v21  ;;  %v2604_v3 = vmax.f32 %v1134_v4, %v8482_v50  ;;  %v864_v19 = vmax.f32 %v832_v51, 0.0  ;;  %9474 = vmatprep.subr.mxu0 %v8584_v11  ;;  %9381 = vmatpush3.msra.mxu1 %v8566_v2  ;;  %v9342_v51 = vpop.f32.mrf.mxu0 }
 0x17d   : > { %v2159_v36 = vsel %vm2152_vm7, 0.0, %v2081_v32  ;;  %v10921_v37 = vmax.f32 %v10707_v43, %v2992_v6  ;;  %v1185_v45 = vcombine.high %v10905_v1, %v10905_v1  ;;  %v8491_v26 = vrot.slane %v10893_v21, 9  ;;  %9475 = vmatpush3.msra.mxu0 %v8584_v11 }
 0x17e   : > { %v2799_v27 = vcombine.high %v2159_v36, %v2159_v36  ;;  %v10924_v29 = vrot.slane %v2159_v36, %v10116_v48  ;;  %v8492_v4 = vrot.slane %v10909_v55, 9  ;;  %v8493_v12 = vrot.slane %v10905_v1, 9 }
 0x17f   : > { %v3436_v43 = vrot.slane %v10804_v0, %v10139_v8  ;;  %v3588_v52 = vsel %vm2040_vm4, %v3432_v28, %v10858_v7  ;;  %v1801_v61 = vrot.slane %v10893_v21, %v10127_v58  ;;  %v1805_v0 = vrot.slane %v10909_v55, %v10127_v58 }
 0x180   : > { %v10939_v6 = vrot.slane %v2799_v27, %v10116_v48  ;;  %v10943_v53 = vcombine.high %v10924_v29, %v10924_v29  ;;  %v2993_v17 = vrot.slane %v10924_v29, 1  ;;  %v8494_v41 = vrot.slane %v1185_v45, 9 }
 0x181   : > { %v1152_v44 = vcombine.high %v864_v19, %v864_v19  ;;  %v3440_v28 = vrot.slane %v10921_v37, %v10139_v8  ;;  %v1809_v23 = vrot.slane %v10905_v1, %v10127_v58  ;;  %v10960_v18 = vmax.f32 %v10893_v21, %v8491_v26 }
 0x182   : > { %v10954_v7 = vcombine.high %v10939_v6, %v10939_v6  ;;  %v2994_v39 = vrot.slane %v10943_v53, 1  ;;  %v10965_v50 = vmax.f32 %v10909_v55, %v8492_v4  ;;  %v10968_v46 = vmax.f32 %v10905_v1, %v8493_v12  ;;  %v8565_v4 = vld [vmem:[%s14374_s4 + $0xb0] sm:$0xff] }
 0x183   : > { %v1159_v30 = vrot.slane %v864_v19, %v10116_v48  ;;  %v2995_v10 = vrot.slane %v10939_v6, 1  ;;  %v10972_v32 = vmax.f32 %v2602_v35, %v2993_v17  ;;  %v10979_v55 = vmax.f32 %v1185_v45, %v8494_v41  ;;  %v8583_v45 = vld [vmem:[%s14374_s4 + $0x130] sm:$0xff]  ;;  %9382 = vmatprep.subr.mxu1 %v8565_v4 }
 0x184   : > { %v2996_v11 = vrot.slane %v10954_v7, 1  ;;  %v1166_v1 = vrot.slane %v1152_v44, %v10116_v48  ;;  %v10982_v27 = vmax.f32 %v2604_v3, %v2994_v39  ;;  %v3589_v35 = vsel %vm2042_vm5, %v3436_v43, %v3588_v52  ;;  %v693_v44 = vpop.f32.mrf.mxu0  ;;  %9476 = vmatprep.subr.mxu0 %v8583_v45  ;;  %9383 = vmatpush3.msra.mxu1 %v8565_v4 }
 0x185   : > { %v1167_v36 = vcombine.high %v1159_v30, %v1159_v30  ;;  %v1785_v19 = vrot.slane %v1159_v30, %v10127_v58  ;;  %v796_v26 = vmul.f32 %v10776_v42, %v9342_v51  ;;  %v8487_v41 = vrot.slane %v1159_v30, 9  ;;  %9477 = vmatpush3.msra.mxu0 %v8583_v45 }
 0x186   : > { %v1168_v12 = vcombine.high %v1166_v1, %v1166_v1  ;;  %v1793_v3 = vrot.slane %v1166_v1, %v10127_v58  ;;  %v3831_v43 = vrot.slane %v10789_v15, 1  ;;  %v10997_v52 = vmax.f32 %v10886_v24, %v2995_v10 }
 0x187   : > { %v1789_v17 = vrot.slane %v1167_v36, %v10127_v58  ;;  %v3590_v51 = vsel %vm2044_vm6, %v3440_v28, %v3589_v35  ;;  %v8488_v2 = vrot.slane %v1167_v36, 9  ;;  %v3642_v21 = vmax.f32 %v10761_v54, %v10921_v37 }
 0x188   : > { %v1797_v25 = vrot.slane %v1168_v12, %v10127_v58  ;;  %v8489_v14 = vrot.slane %v1166_v1, 9  ;;  %v3735_v24 = vcombine.high %v3590_v51, %v3590_v51  ;;  %v11008_v10 = vrot.slane %v3590_v51, %v10116_v48 }
 0x189   : > { %v2082_v20 = vsel %vm2034_vm1, %v1789_v17, %v1785_v19  ;;  %v11011_v39 = vmax.f32 %v10896_v62, %v2996_v11  ;;  %v2609_v35 = vmax.f32 %v1159_v30, %v8487_v41  ;;  %v835_v4 = vadd.f32 %v10786_v5, %v796_v26  ;;  %v9345_v19 = vpop.f32.mrf.mxu0 }
 0x18a   : > { %v2083_v15 = vsel %vm2036_vm2, %v1793_v3, %v2082_v20  ;;  %v8490_v17 = vrot.slane %v1168_v12, 9  ;;  %v11017_v54 = vrot.slane %v3735_v24, %v10116_v48  ;;  %v11019_v20 = vmax.f32 %v3642_v21, %v3831_v43 }
 0x18b   : > { %v2084_v28 = vsel %vm2038_vm3, %v1797_v25, %v2083_v15  ;;  %v2610_v3 = vmax.f32 %v1167_v36, %v8488_v2  ;;  %v11024_v62 = vcombine.high %v11008_v10, %v11008_v10  ;;  %v867_v25 = vmax.f32 %v835_v4, 0.0 }
 0x18c   : > { %v2085_v45 = vsel %vm2040_vm4, %v1801_v61, %v2084_v28  ;;  %14433 = vst [vmem:[#allocation14_spill] sm:$0xff] %v11019_v20  ;;  %v2611_v11 = vmax.f32 %v1166_v1, %v8489_v14  ;;  %v795_v26 = vmul.f32 %v10776_v42, %v693_v44  ;;  %v798_v61 = vmul.f32 %v10776_v42, %v9345_v19 }
 0x18d   : > { %v2086_v37 = vsel %vm2042_vm5, %v1805_v0, %v2085_v45  ;;  %v11032_v21 = vcombine.high %v11017_v54, %v11017_v54  ;;  %v1203_v0 = vcombine.high %v867_v25, %v867_v25  ;;  %v11035_v2 = vrot.slane %v867_v25, %v10116_v48 }
 0x18e   : > { %v2087_v30 = vsel %vm2044_vm6, %v1809_v23, %v2086_v37  ;;  %v2612_v36 = vmax.f32 %v1168_v12, %v8490_v17  ;;  %v3832_v14 = vrot.slane %v11008_v10, 1  ;;  %v3833_v1 = vrot.slane %v11024_v62, 1 }
 0x18f   : > { %v2160_v41 = vsel %vm2152_vm7, 0.0, %v2087_v30  ;;  %v3834_v44 = vrot.slane %v11017_v54, 1  ;;  %v11044_v15 = vrot.slane %v1203_v0, %v10116_v48  ;;  %v11049_v12 = vcombine.high %v11035_v2, %v11035_v2 }
 0x190   : > { %v2816_v43 = vcombine.high %v2160_v41, %v2160_v41  ;;  %v2823_v51 = vrot.slane %v2160_v41, %v10116_v48  ;;  %v834_v17 = vadd.f32 %v10786_v5, %v795_v26  ;;  %v837_v37 = vadd.f32 %v10786_v5, %v798_v61 }
 0x191   : > { %v8499_v34 = vrot.slane %v11035_v2, 9  ;;  %v11065_v26 = vcombine.high %v11044_v15, %v11044_v15  ;;  %v14436_v61 = vmax.f32 %v10877_v22, %v10939_v6  ;;  %v1837_v22 = vrot.slane %v11044_v15, %v10127_v58 }
 0x192   : > { %v2830_v24 = vrot.slane %v2816_v43, %v10116_v48  ;;  %v2831_v28 = vcombine.high %v2823_v51, %v2823_v51  ;;  %v2997_v4 = vrot.slane %v2823_v51, 1  ;;  %v3217_v19 = vmax.f32 %v2609_v35, %v2823_v51 }
 0x194   : > { %v11054_v25 = vcombine.high %v2830_v24, %v2830_v24  ;;  %v2998_v30 = vrot.slane %v2831_v28, 1  ;;  %v2999_v41 = vrot.slane %v2830_v24, 1  ;;  %v3218_v0 = vmax.f32 %v2610_v3, %v2997_v4 }
 0x195   : > { %v3219_v23 = vmax.f32 %v2611_v11, %v2831_v28  ;;  %v3221_v43 = vmax.f32 %v10960_v18, %v2830_v24  ;;  %v3444_v18 = vrot.slane %v3217_v19, %v10139_v8  ;;  %v14434_v24 = vmax.f32 %v10899_v59, %v10924_v29 }
 0x196   : > { %v3220_v35 = vmax.f32 %v2612_v36, %v2998_v30  ;;  %v11061_v51 = vmax.f32 %v10965_v50, %v2999_v41  ;;  %v11071_v3 = vmax.f32 %v10968_v46, %v11054_v25  ;;  %v3448_v11 = vrot.slane %v3218_v0, %v10139_v8 }
 0x197   : > { %v3452_v36 = vrot.slane %v3219_v23, %v10139_v8  ;;  %v3643_v28 = vmax.f32 %v14434_v24, %v3217_v19  ;;  %v3644_v4 = vmax.f32 %v10972_v32, %v3218_v0  ;;  %v14435_v30 = vmax.f32 %v10902_v57, %v10943_v53 }
 0x198   : > { %v3456_v50 = vrot.slane %v3220_v35, %v10139_v8  ;;  %v3591_v46 = vsel %vm3569_vm8, %v3448_v11, %v3444_v18  ;;  %v3646_v45 = vmax.f32 %v10982_v27, %v3220_v35  ;;  %v3647_v20 = vmax.f32 %v14436_v61, %v3221_v43 }
 0x199   : > { %v3645_v41 = vmax.f32 %v14435_v30, %v3219_v23  ;;  %v3648_v13 = vmax.f32 %v10997_v52, %v11061_v51  ;;  %v3592_v59 = vsel %vm2034_vm1, %v3452_v36, %v3591_v46  ;;  %v3940_v29 = vmax.f32 %v3643_v28, %v11008_v10 }
 0x19a   : > { %v3941_v32 = vmax.f32 %v3644_v4, %v3832_v14  ;;  %v14437_v57 = vmax.f32 %v10888_v33, %v10954_v7  ;;  %v3943_v27 = vmax.f32 %v3646_v45, %v3833_v1  ;;  %v3944_v23 = vmax.f32 %v3647_v20, %v11017_v54  ;;  %v8582_v33 = vld [vmem:[%s14374_s4 + $0x128] sm:$0xff] }
 0x19b   : > { %v3942_v19 = vmax.f32 %v3645_v41, %v11024_v62  ;;  %v3593_v6 = vsel %vm2036_vm2, %v3456_v50, %v3592_v59  ;;  %v3945_v52 = vmax.f32 %v3648_v13, %v3834_v44  ;;  %v4143_v0 = vrot.slane %v3940_v29, %v10139_v8  ;;  %v8564_v62 = vld [vmem:[%s14374_s4 + $0xa8] sm:$0xff]  ;;  %9478 = vmatprep.subr.mxu0 %v8582_v33 }
 0x19c   : > { %v3649_v53 = vmax.f32 %v14437_v57, %v11071_v3  ;;  %v4147_v10 = vrot.slane %v3941_v32, %v10139_v8  ;;  %v3460_v7 = vrot.slane %v3221_v43, %v10139_v8  ;;  %v4155_v13 = vrot.slane %v3943_v27, %v10139_v8  ;;  %9384 = vmatprep.subr.mxu1 %v8564_v62  ;;  %v8563_v57 = vld [vmem:[%s14374_s4 + $0xa0] sm:$0xff] }
 0x19d   : > { %v4151_v20 = vrot.slane %v3942_v19, %v10139_v8  ;;  %v3000_v14 = vrot.slane %v11054_v25, 1  ;;  %v3464_v1 = vrot.slane %v11061_v51, %v10139_v8  ;;  %v8500_v45 = vrot.slane %v11049_v12, 9  ;;  %9385 = vmatpush3.msra.mxu1 %v8564_v62  ;;  %9479 = vmatpush3.msra.mxu0 %v8582_v33 }
 0x19e   : > { %v3946_v54 = vmax.f32 %v3649_v53, %v11032_v21  ;;  %v4318_v44 = vsel %vm2034_vm1, %v4147_v10, %v4143_v0  ;;  %v11120_v43 = vsel %vm2038_vm3, %v3460_v7, %v3593_v6  ;;  %v4159_v35 = vrot.slane %v3944_v23, %v10139_v8  ;;  %v703_v6 = vpop.f32.mrf.mxu0  ;;  %9386 = vmatprep.subr.mxu1 %v8563_v57 }
 0x19f   : > { %v4319_v61 = vsel %vm2036_vm2, %v4151_v20, %v4318_v44  ;;  %v866_v18 = vmax.f32 %v834_v17, 0.0  ;;  %v4163_v25 = vrot.slane %v3945_v52, %v10139_v8  ;;  %v8501_v36 = vrot.slane %v11044_v15, 9  ;;  %9387 = vmatpush3.msra.mxu1 %v8563_v57 }
 0x1a0   : > { %v4320_v11 = vsel %vm2038_vm3, %v4155_v13, %v4319_v61  ;;  %v869_v50 = vmax.f32 %v837_v37, 0.0  ;;  %v4167_v24 = vrot.slane %v3946_v54, %v10139_v8  ;;  %v8502_v46 = vrot.slane %v11065_v26, 9 }
 0x1a1   : > { %v4321_v28 = vsel %vm2040_vm4, %v4159_v35, %v4320_v11  ;;  %v1186_v4 = vcombine.high %v866_v18, %v866_v18  ;;  %v1193_v30 = vrot.slane %v866_v18, %v10116_v48  ;;  %v11133_v17 = vmax.f32 %v11035_v2, %v8499_v34 }
 0x1a2   : > { %v4322_v41 = vsel %vm2042_vm5, %v4163_v25, %v4321_v28  ;;  %v1237_v59 = vcombine.high %v869_v50, %v869_v50  ;;  %v11138_v19 = vrot.slane %v869_v50, %v10116_v48  ;;  %v11144_v53 = vmax.f32 %v11049_v12, %v8500_v45 }
 0x1a3   : > { %v4323_v29 = vsel %vm2044_vm6, %v4167_v24, %v4322_v41  ;;  %v1200_v32 = vrot.slane %v1186_v4, %v10116_v48  ;;  %v1201_v37 = vcombine.high %v1193_v30, %v1193_v30  ;;  %v11147_v27 = vmax.f32 %v11044_v15, %v8501_v36 }
 0x1a4   : > { %v1813_v34 = vrot.slane %v1193_v30, %v10127_v58  ;;  %v11151_v23 = vrot.slane %v1237_v59, %v10116_v48  ;;  %v8495_v62 = vrot.slane %v1193_v30, 9  ;;  %v11156_v33 = vsel %vm2152_vm7, 0.0, %v4323_v29 }
 0x1a5   : > { %v1202_v52 = vcombine.high %v1200_v32, %v1200_v32  ;;  %v1817_v0 = vrot.slane %v1201_v37, %v10127_v58  ;;  %v1821_v10 = vrot.slane %v1200_v32, %v10127_v58  ;;  %14438 = vst [vmem:[#allocation15_spill] sm:$0xff] %v11156_v33  ;;  %v11159_v7 = vmax.f32 %v11065_v26, %v8502_v46 }
 0x1a6   : > { %v8496_v54 = vrot.slane %v1201_v37, 9  ;;  %v8497_v20 = vrot.slane %v1200_v32, 9  ;;  %v11165_v45 = vcombine.high %v11138_v19, %v11138_v19  ;;  %v797_v35 = vmul.f32 %v10776_v42, %v703_v6 }
 0x1a7   : > { %v1825_v13 = vrot.slane %v1202_v52, %v10127_v58  ;;  %v2088_v44 = vsel %vm2034_vm1, %v1817_v0, %v1813_v34  ;;  %v8498_v18 = vrot.slane %v1202_v52, 9  ;;  %v1253_v25 = vcombine.high %v11151_v23, %v11151_v23 }
 0x1a8   : > { %v2089_v61 = vsel %vm2036_vm2, %v1821_v10, %v2088_v44  ;;  %v11172_v26 = vmax.f32 %v10979_v55, %v3000_v14  ;;  %v11177_v50 = vmax.f32 %v1193_v30, %v8495_v62  ;;  %v1857_v24 = vrot.slane %v11138_v19, %v10127_v58 }
 0x1a9   : > { %v2090_v36 = vsel %vm2038_vm3, %v1825_v13, %v2089_v61  ;;  %v14439_v28 = vrot.slane %v11035_v2, %v10127_v58  ;;  %v2618_v41 = vmax.f32 %v1201_v37, %v8496_v54  ;;  %v11185_v46 = vmax.f32 %v1200_v32, %v8497_v20 }
 0x1aa   : > { %v8507_v55 = vrot.slane %v11138_v19, 9  ;;  %v14440_v14 = vrot.slane %v11049_v12, %v10127_v58  ;;  %v1861_v30 = vrot.slane %v11165_v45, %v10127_v58  ;;  %v8508_v29 = vrot.slane %v11165_v45, 9 }
 0x1ab   : > { %v2091_v4 = vsel %vm2040_vm4, %v14439_v28, %v2090_v36  ;;  %v836_v57 = vadd.f32 %v10786_v5, %v797_v35  ;;  %v2620_v32 = vmax.f32 %v1202_v52, %v8498_v18  ;;  %v8509_v37 = vrot.slane %v11151_v23, 9  ;;  %v9348_v35 = vpop.f32.mrf.mxu0 }
 0x1ac   : > { %v2092_v59 = vsel %vm2042_vm5, %v14440_v14, %v2091_v4  ;;  %v8510_v34 = vrot.slane %v1253_v25, 9  ;;  %v3468_v0 = vrot.slane %v11071_v3, %v10139_v8  ;;  %v3595_v10 = vsel %vm2040_vm4, %v3464_v1, %v11120_v43 }
 0x1ad   : > { %v2093_v2 = vsel %vm2044_vm6, %v1837_v22, %v2092_v59  ;;  %v868_v6 = vmax.f32 %v836_v57, 0.0  ;;  %v1865_v22 = vrot.slane %v11151_v23, %v10127_v58  ;;  %v11215_v52 = vmax.f32 %v11138_v19, %v8507_v55 }
 0x1ae   : > { %v2161_v12 = vsel %vm2152_vm7, 0.0, %v2093_v2  ;;  %v11218_v54 = vmax.f32 %v11165_v45, %v8508_v29  ;;  %v3596_v51 = vsel %vm2042_vm5, %v3468_v0, %v3595_v10  ;;  %v3472_v44 = vrot.slane %v11172_v26, %v10139_v8  ;;  %v713_v10 = vpop.f32.mrf.mxu0 }
 0x1af   : > { %v2833_v62 = vcombine.high %v2161_v12, %v2161_v12  ;;  %v11210_v15 = vrot.slane %v2161_v12, %v10116_v48  ;;  %v1220_v3 = vcombine.high %v868_v6, %v868_v6  ;;  %v1227_v20 = vrot.slane %v868_v6, %v10116_v48 }
 0x1b0   : > { %v11233_v61 = vmax.f32 %v11151_v23, %v8509_v37  ;;  %v11235_v18 = vmax.f32 %v1253_v25, %v8510_v34  ;;  %v3597_v14 = vsel %vm2044_vm6, %v3472_v44, %v3596_v51  ;;  %v3650_v59 = vmax.f32 %v11011_v39, %v11172_v26 }
 0x1b1   : > { %v11223_v1 = vrot.slane %v2833_v62, %v10116_v48  ;;  %v11227_v43 = vcombine.high %v11210_v15, %v11210_v15  ;;  %v3001_v13 = vrot.slane %v11210_v15, 1  ;;  %v1234_v36 = vrot.slane %v1220_v3, %v10116_v48 }
 0x1b2   : > { %v1235_v28 = vcombine.high %v1227_v20, %v1227_v20  ;;  %v1841_v23 = vrot.slane %v1227_v20, %v10127_v58  ;;  %v800_v57 = vmul.f32 %v10776_v42, %v9348_v35  ;;  %v8503_v12 = vrot.slane %v1227_v20, 9 }
 0x1b3   : > { %v11240_v4 = vcombine.high %v11223_v1, %v11223_v1  ;;  %v3002_v55 = vrot.slane %v11227_v43, 1  ;;  %v1236_v29 = vcombine.high %v1234_v36, %v1234_v36  ;;  %v3003_v2 = vrot.slane %v11223_v1, 1 }
 0x1b4   : > { %v1845_v25 = vrot.slane %v1235_v28, %v10127_v58  ;;  %v11252_v34 = vmax.f32 %v2618_v41, %v3001_v13  ;;  %v1849_v0 = vrot.slane %v1234_v36, %v10127_v58  ;;  %v3227_v62 = vmax.f32 %v11185_v46, %v11227_v43 }
 0x1b5   : > { %v3004_v6 = vrot.slane %v11240_v4, 1  ;;  %v1853_v39 = vrot.slane %v1236_v29, %v10127_v58  ;;  %v11260_v3 = vmax.f32 %v2620_v32, %v3002_v55  ;;  %v8504_v41 = vrot.slane %v1235_v28, 9 }
 0x1b6   : > { %v2094_v26 = vsel %vm2034_vm1, %v1845_v25, %v1841_v23  ;;  %v8505_v44 = vrot.slane %v1234_v36, 9  ;;  %v3752_v35 = vcombine.high %v3597_v14, %v3597_v14  ;;  %v11266_v11 = vrot.slane %v3597_v14, %v10116_v48 }
 0x1b7   : > { %v2095_v13 = vsel %vm2036_vm2, %v1849_v0, %v2094_v26  ;;  %v11269_v37 = vmax.f32 %v11144_v53, %v3003_v2  ;;  %v3231_v23 = vmax.f32 %v11147_v27, %v11240_v4  ;;  %v8506_v55 = vrot.slane %v1236_v29, 9  ;;  %v9351_v26 = vpop.f32.mrf.mxu0 }
 0x1b8   : > { %v2096_v32 = vsel %vm2038_vm3, %v1853_v39, %v2095_v13  ;;  %v11275_v25 = vmax.f32 %v11159_v7, %v3004_v6  ;;  %v11282_v14 = vrot.slane %v3752_v35, %v10116_v48  ;;  %v14441_v53 = vrot.slane %v11032_v21, 1 }
 0x1b9   : > { %v2097_v0 = vsel %vm2040_vm4, %v1857_v24, %v2096_v32  ;;  %v11294_v7 = vcombine.high %v11266_v11, %v11266_v11  ;;  %v839_v19 = vadd.f32 %v10786_v5, %v800_v57  ;;  %v799_v24 = vmul.f32 %v10776_v42, %v713_v10  ;;  %v723_v10 = vpop.f32.mrf.mxu0 }
 0x1ba   : > { %v11286_v2 = vmax.f32 %v3650_v59, %v14441_v53  ;;  %v2098_v27 = vsel %vm2042_vm5, %v1861_v30, %v2097_v0  ;;  %v2625_v6 = vmax.f32 %v1227_v20, %v8503_v12  ;;  %v2626_v21 = vmax.f32 %v1235_v28, %v8504_v41 }
 0x1bb   : > { %v2099_v4 = vsel %vm2044_vm6, %v1865_v22, %v2098_v27  ;;  %v2627_v59 = vmax.f32 %v1234_v36, %v8505_v44  ;;  %v2628_v13 = vmax.f32 %v1236_v29, %v8506_v55  ;;  %v871_v35 = vmax.f32 %v839_v19, 0.0 }
 0x1bc   : > { %14442 = vst [vmem:[#allocation16_spill] sm:$0xff] %v11286_v2  ;;  %v2162_v39 = vsel %vm2152_vm7, 0.0, %v2099_v4  ;;  %v838_v45 = vadd.f32 %v10786_v5, %v799_v24  ;;  %v3836_v0 = vrot.slane %v11266_v11, 1  ;;  %v11307_v22 = vcombine.high %v11282_v14, %v11282_v14 }
 0x1bd   : > { %v2850_v30 = vcombine.high %v2162_v39, %v2162_v39  ;;  %v2857_v32 = vrot.slane %v2162_v39, %v10116_v48  ;;  %v3837_v20 = vrot.slane %v11294_v7, 1  ;;  %v1271_v36 = vcombine.high %v871_v35, %v871_v35 }
 0x1be   : > { %v802_v28 = vmul.f32 %v10776_v42, %v9351_v26  ;;  %v11313_v44 = vrot.slane %v871_v35, %v10116_v48  ;;  %v3838_v53 = vrot.slane %v11282_v14, 1  ;;  %v11316_v27 = vmax.f32 %v838_v45, 0.0 }
 0x1bf   : > { %v2864_v29 = vrot.slane %v2850_v30, %v10116_v48  ;;  %v2865_v12 = vcombine.high %v2857_v32, %v2857_v32  ;;  %v3005_v41 = vrot.slane %v2857_v32, 1  ;;  %v3233_v55 = vmax.f32 %v2625_v6, %v2857_v32 }
 0x1c0   : > { %v11319_v19 = vmul.f32 %v10776_v42, %v723_v10  ;;  %v11325_v51 = vrot.slane %v1271_v36, %v10116_v48  ;;  %v841_v6 = vadd.f32 %v10786_v5, %v802_v28  ;;  %v11337_v32 = vcombine.high %v11313_v44, %v11313_v44 }
 0x1c1   : > { %v11321_v24 = vcombine.high %v2864_v29, %v2864_v29  ;;  %v3006_v4 = vrot.slane %v2865_v12, 1  ;;  %v3007_v39 = vrot.slane %v2864_v29, 1  ;;  %v3234_v26 = vmax.f32 %v2626_v21, %v3005_v41 }
 0x1c2   : > { %v3235_v57 = vmax.f32 %v2627_v59, %v2865_v12  ;;  %v3237_v30 = vmax.f32 %v11215_v52, %v2864_v29  ;;  %v3476_v21 = vrot.slane %v3233_v55, %v10139_v8  ;;  %v14443_v5 = vmax.f32 %v11177_v50, %v11210_v15 }
 0x1c3   : > { %v3236_v35 = vmax.f32 %v2628_v13, %v3006_v4  ;;  %v11329_v45 = vmax.f32 %v11218_v54, %v3007_v39  ;;  %v11333_v42 = vmax.f32 %v11233_v61, %v11321_v24  ;;  %v3480_v52 = vrot.slane %v3234_v26, %v10139_v8 }
 0x1c4   : > { %v3484_v59 = vrot.slane %v3235_v57, %v10139_v8  ;;  %v3651_v13 = vmax.f32 %v14443_v5, %v3233_v55  ;;  %v3652_v10 = vmax.f32 %v11252_v34, %v3234_v26  ;;  %v3653_v61 = vmax.f32 %v3227_v62, %v3235_v57 }
 0x1c5   : > { %v3488_v54 = vrot.slane %v3236_v35, %v10139_v8  ;;  %v3654_v36 = vmax.f32 %v11260_v3, %v3236_v35  ;;  %v3598_v28 = vsel %vm3569_vm8, %v3480_v52, %v3476_v21  ;;  %v14444_v29 = vmax.f32 %v11133_v17, %v11223_v1 }
 0x1c6   : > { %v3656_v50 = vmax.f32 %v11269_v37, %v11329_v45  ;;  %v3657_v15 = vmax.f32 %v3231_v23, %v11333_v42  ;;  %v3599_v41 = vsel %vm2034_vm1, %v3484_v59, %v3598_v28  ;;  %v3948_v34 = vmax.f32 %v3651_v13, %v11266_v11 }
 0x1c7   : > { %v3655_v12 = vmax.f32 %v14444_v29, %v3237_v30  ;;  %v3949_v55 = vmax.f32 %v3652_v10, %v3836_v0  ;;  %v3950_v46 = vmax.f32 %v3653_v61, %v11294_v7  ;;  %v3600_v43 = vsel %vm2036_vm2, %v3488_v54, %v3599_v41  ;;  %v8581_v54 = vld [vmem:[%s14374_s4 + $0x120] sm:$0xff]  ;;  %v8562_v10 = vld [vmem:[%s14374_s4 + $0x98] sm:$0xff] }
 0x1c8   : > { %v3951_v62 = vmax.f32 %v3654_v36, %v3837_v20  ;;  %v3953_v57 = vmax.f32 %v3656_v50, %v3838_v53  ;;  %v3492_v17 = vrot.slane %v3237_v30, %v10139_v8  ;;  %v3954_v1 = vmax.f32 %v3657_v15, %v11307_v22  ;;  %v8580_v61 = vld [vmem:[%s14374_s4 + $0x118] sm:$0xff]  ;;  %9480 = vmatprep.subr.mxu0 %v8581_v54 }
 0x1c9   : > { %v3952_v3 = vmax.f32 %v3655_v12, %v11282_v14  ;;  %v4175_v37 = vrot.slane %v3948_v34, %v10139_v8  ;;  %v4179_v23 = vrot.slane %v3949_v55, %v10139_v8  ;;  %v4183_v4 = vrot.slane %v3950_v46, %v10139_v8  ;;  %9481 = vmatpush3.msra.mxu0 %v8581_v54 }
 0x1ca   : > { %v4187_v11 = vrot.slane %v3951_v62, %v10139_v8  ;;  %v1885_v7 = vrot.slane %v11313_v44, %v10127_v58  ;;  %v8515_v0 = vrot.slane %v11313_v44, 9  ;;  %v3496_v14 = vrot.slane %v11329_v45, %v10139_v8  ;;  %9388 = vmatprep.subr.mxu1 %v8562_v10  ;;  %9482 = vmatprep.subr.mxu0 %v8580_v61 }
 0x1cb   : > { %v11375_v20 = vsel %vm2038_vm3, %v3492_v17, %v3600_v43  ;;  %v4324_v53 = vsel %vm2034_vm1, %v4179_v23, %v4175_v37  ;;  %v1287_v39 = vcombine.high %v11325_v51, %v11325_v51  ;;  %v4191_v26 = vrot.slane %v3952_v3, %v10139_v8  ;;  %9389 = vmatpush3.msra.mxu1 %v8562_v10 }
 0x1cc   : > { %v4195_v30 = vrot.slane %v3953_v57, %v10139_v8  ;;  %v4199_v35 = vrot.slane %v3954_v1, %v10139_v8  ;;  %v4325_v21 = vsel %vm2036_vm2, %v4183_v4, %v4324_v53  ;;  %v1889_v59 = vrot.slane %v11337_v32, %v10127_v58  ;;  %9483 = vmatpush3.msra.mxu0 %v8580_v61  ;;  %v8561_v4 = vld [vmem:[%s14374_s4 + $0x90] sm:$0xff] }
 0x1cd   : > { %v4326_v52 = vsel %vm2038_vm3, %v4187_v11, %v4325_v21  ;;  %v8516_v5 = vrot.slane %v11337_v32, 9  ;;  %v1254_v13 = vcombine.high %v11316_v27, %v11316_v27  ;;  %v1893_v28 = vrot.slane %v11325_v51, %v10127_v58  ;;  %v8579_v11 = vld [vmem:[%s14374_s4 + $0x110] sm:$0xff]  ;;  %9390 = vmatprep.subr.mxu1 %v8561_v4 }
 0x1ce   : > { %v4327_v36 = vsel %vm2040_vm4, %v4191_v26, %v4326_v52  ;;  %v8517_v29 = vrot.slane %v11325_v51, 9  ;;  %v1261_v12 = vrot.slane %v11316_v27, %v10116_v48  ;;  %v8518_v15 = vrot.slane %v1287_v39, 9  ;;  %9484 = vmatprep.subr.mxu0 %v8579_v11  ;;  %9391 = vmatpush3.msra.mxu1 %v8561_v4 }
 0x1cf   : > { %v4328_v50 = vsel %vm2042_vm5, %v4195_v30, %v4327_v36  ;;  %v1268_v41 = vrot.slane %v1254_v13, %v10116_v48  ;;  %v873_v34 = vmax.f32 %v841_v6, 0.0  ;;  %v11410_v43 = vmax.f32 %v11313_v44, %v8515_v0  ;;  %v8578_v13 = vld [vmem:[%s14374_s4 + $0x108] sm:$0xff]  ;;  %v11452_v36 = vld [vmem:[%s14373_s3] ss:$0 sm:$0xff]  ;;  %9485 = vmatpush3.msra.mxu0 %v8579_v11 }
 0x1d0   : > { %v4329_v46 = vsel %vm2044_vm6, %v4199_v35, %v4328_v50  ;;  %v1269_v62 = vcombine.high %v1261_v12, %v1261_v12  ;;  %v11416_v3 = vmax.f32 %v11337_v32, %v8516_v5  ;;  %v11420_v17 = vmax.f32 %v11325_v51, %v8517_v29  ;;  %9486 = vmatprep.subr.mxu0 %v8578_v13 }
 0x1d1   : > { %v11413_v27 = vsel %vm2152_vm7, 0.0, %v4329_v46  ;;  %v1270_v57 = vcombine.high %v1268_v41, %v1268_v41  ;;  %v1877_v6 = vrot.slane %v1268_v41, %v10127_v58  ;;  %v1869_v1 = vrot.slane %v1261_v12, %v10127_v58  ;;  %9487 = vmatpush3.msra.mxu0 %v8578_v13 }
 0x1d2   : > { %14445 = vst [vmem:[#allocation17_spill] sm:$0xff] %v11413_v27  ;;  %v1873_v37 = vrot.slane %v1269_v62, %v10127_v58  ;;  %v8511_v23 = vrot.slane %v1261_v12, 9  ;;  %v11430_v0 = vmax.f32 %v1287_v39, %v8518_v15  ;;  %v8513_v26 = vrot.slane %v1268_v41, 9  ;;  %v8560_v39 = vld [vmem:[%s14374_s4 + $0x88] sm:$0xff] }
 0x1d3   : > { %v1881_v53 = vrot.slane %v1270_v57, %v10127_v58  ;;  %v1305_v30 = vcombine.high %v873_v34, %v873_v34  ;;  %v8512_v52 = vrot.slane %v1269_v62, 9  ;;  %v11437_v5 = vrot.slane %v873_v34, %v10116_v48  ;;  %9392 = vmatprep.subr.mxu1 %v8560_v39 }
 0x1d4   : > { %v2100_v21 = vsel %vm2034_vm1, %v1873_v37, %v1869_v1  ;;  %v8514_v10 = vrot.slane %v1270_v57, 9  ;;  %v840_v29 = vadd.f32 %v11452_v36, %v11319_v19  ;;  %v3008_v50 = vrot.slane %v11321_v24, 1  ;;  %v8577_v19 = vld [vmem:[%s14374_s4 + $0x100] sm:$0xff]  ;;  %9393 = vmatpush3.msra.mxu1 %v8560_v39 }
 0x1d5   : > { %v2101_v54 = vsel %vm2036_vm2, %v1877_v6, %v2100_v21  ;;  %v11447_v61 = vrot.slane %v1305_v30, %v10116_v48  ;;  %v11458_v34 = vmax.f32 %v1261_v12, %v8511_v23  ;;  %v11462_v46 = vcombine.high %v11437_v5, %v11437_v5  ;;  %v8559_v6 = vld [vmem:[%s14374_s4 + $0x80] sm:$0xff]  ;;  %9488 = vmatprep.subr.mxu0 %v8577_v19 }
 0x1d6   : > { %v2102_v15 = vsel %vm2038_vm3, %v1881_v53, %v2101_v54  ;;  %v11475_v1 = vmax.f32 %v1268_v41, %v8513_v26  ;;  %v2634_v4 = vmax.f32 %v1269_v62, %v8512_v52  ;;  %v8523_v11 = vrot.slane %v11437_v5, 9  ;;  %9394 = vmatprep.subr.mxu1 %v8559_v6  ;;  %9489 = vmatpush3.msra.mxu0 %v8577_v19 }
 0x1d7   : > { %v2103_v12 = vsel %vm2040_vm4, %v1885_v7, %v2102_v15  ;;  %v1321_v37 = vcombine.high %v11447_v61, %v11447_v61  ;;  %v8525_v53 = vrot.slane %v11447_v61, 9  ;;  %v2636_v7 = vmax.f32 %v1270_v57, %v8514_v10  ;;  %9395 = vmatpush3.msra.mxu1 %v8559_v6 }
 0x1d8   : > { %v2104_v23 = vsel %vm2042_vm5, %v1889_v59, %v2103_v12  ;;  %v8524_v41 = vrot.slane %v11462_v46, 9  ;;  %v872_v26 = vmax.f32 %v840_v29, 0.0  ;;  %v1913_v59 = vrot.slane %v11437_v5, %v10127_v58 }
 0x1d9   : > { %v2105_v44 = vsel %vm2044_vm6, %v1893_v28, %v2104_v23  ;;  %v1921_v62 = vrot.slane %v11447_v61, %v10127_v58  ;;  %v3240_v30 = vmax.f32 %v11235_v18, %v3008_v50  ;;  %v8526_v28 = vrot.slane %v1321_v37, 9 }
 0x1da   : > { %v2163_v32 = vsel %vm2152_vm7, 0.0, %v2105_v44  ;;  %v1288_v57 = vcombine.high %v872_v26, %v872_v26  ;;  %v1917_v52 = vrot.slane %v11462_v46, %v10127_v58  ;;  %v11502_v39 = vmax.f32 %v11437_v5, %v8523_v11  ;;  %v9354_v5 = vpop.f32.mrf.mxu0 }
 0x1db   : > { %v2867_v21 = vcombine.high %v2163_v32, %v2163_v32  ;;  %v11497_v51 = vrot.slane %v2163_v32, %v10116_v48  ;;  %v11505_v13 = vmax.f32 %v11447_v61, %v8525_v53  ;;  %v1295_v54 = vrot.slane %v872_v26, %v10116_v48 }
 0x1dc   : > { %v11516_v29 = vmax.f32 %v11462_v46, %v8524_v41  ;;  %v3500_v50 = vrot.slane %v11333_v42, %v10139_v8  ;;  %v1302_v61 = vrot.slane %v1288_v57, %v10116_v48  ;;  %v3504_v19 = vrot.slane %v3240_v30, %v10139_v8 }
 0x1dd   : > { %v11509_v10 = vrot.slane %v2867_v21, %v10116_v48  ;;  %v11513_v18 = vcombine.high %v11497_v51, %v11497_v51  ;;  %v3009_v15 = vrot.slane %v11497_v51, 1  ;;  %v1303_v6 = vcombine.high %v1295_v54, %v1295_v54  ;;  %v11544_v21 = vld [vmem:[%s14418_s2] ss:$0 sm:$0xff] }
 0x1de   : > { %v11528_v11 = vmax.f32 %v1321_v37, %v8526_v28  ;;  %v3602_v42 = vsel %vm2040_vm4, %v3496_v14, %v11375_v20  ;;  %v1304_v53 = vcombine.high %v1302_v61, %v1302_v61  ;;  %v1897_v44 = vrot.slane %v1295_v54, %v10127_v58  ;;  %v733_v14 = vpop.f32.mrf.mxu0 }
 0x1df   : > { %v11525_v12 = vcombine.high %v11509_v10, %v11509_v10  ;;  %v3010_v23 = vrot.slane %v11513_v18, 1  ;;  %v3011_v46 = vrot.slane %v11509_v10, 1  ;;  %v1901_v41 = vrot.slane %v1303_v6, %v10127_v58 }
 0x1e0   : > { %v8519_v32 = vrot.slane %v1295_v54, 9  ;;  %v3658_v37 = vmax.f32 %v11275_v25, %v3240_v30  ;;  %v804_v45 = vmul.f32 %v11544_v21, %v9354_v5  ;;  %v11547_v20 = vmax.f32 %v2634_v4, %v3009_v15 }
 0x1e1   : > { %v1905_v28 = vrot.slane %v1302_v61, %v10127_v58  ;;  %v1909_v57 = vrot.slane %v1304_v53, %v10127_v58  ;;  %v2106_v35 = vsel %vm2034_vm1, %v1901_v41, %v1897_v44  ;;  %v3012_v55 = vrot.slane %v11525_v12, 1 }
 0x1e2   : > { %v11555_v30 = vmax.f32 %v2636_v7, %v3010_v23  ;;  %v11560_v5 = vmax.f32 %v11416_v3, %v3011_v46  ;;  %v3603_v44 = vsel %vm2042_vm5, %v3500_v50, %v3602_v42  ;;  %v8520_v24 = vrot.slane %v1303_v6, 9  ;;  %v9357_v23 = vpop.f32.mrf.mxu0 }
 0x1e3   : > { %v2107_v15 = vsel %vm2036_vm2, %v1905_v28, %v2106_v35  ;;  %v8521_v27 = vrot.slane %v1302_v61, 9  ;;  %v3604_v7 = vsel %vm2044_vm6, %v3504_v19, %v3603_v44  ;;  %v8522_v26 = vrot.slane %v1304_v53, 9 }
 0x1e4   : > { %v2108_v41 = vsel %vm2038_vm3, %v1909_v57, %v2107_v15  ;;  %v3769_v2 = vcombine.high %v3604_v7, %v3604_v7  ;;  %v11570_v3 = vrot.slane %v3604_v7, %v10116_v48  ;;  %v14446_v35 = vrot.slane %v11307_v22, 1 }
 0x1e5   : > { %v2109_v25 = vsel %vm2040_vm4, %v1913_v59, %v2108_v41  ;;  %v843_v50 = vadd.f32 %v11452_v36, %v804_v45  ;;  %v803_v42 = vmul.f32 %v11544_v21, %v733_v14  ;;  %v11580_v19 = vmax.f32 %v11430_v0, %v3012_v55 }
 0x1e6   : > { %v2110_v46 = vsel %vm2042_vm5, %v1917_v52, %v2109_v25  ;;  %v11575_v28 = vmax.f32 %v3658_v37, %v14446_v35  ;;  %v2641_v57 = vmax.f32 %v1295_v54, %v8519_v32  ;;  %v806_v15 = vmul.f32 %v11544_v21, %v9357_v23 }
 0x1e7   : > { %v2111_v59 = vsel %vm2044_vm6, %v1921_v62, %v2110_v46  ;;  %v2642_v41 = vmax.f32 %v1303_v6, %v8520_v24  ;;  %v11586_v52 = vrot.slane %v3769_v2, %v10116_v48  ;;  %v3784_v22 = vcombine.high %v11570_v3, %v11570_v3 }
 0x1e8   : > { %14447 = vst [vmem:[#allocation18_spill] sm:$0xff] %v11575_v28  ;;  %v2164_v44 = vsel %vm2152_vm7, 0.0, %v2111_v59  ;;  %v2643_v37 = vmax.f32 %v1302_v61, %v8521_v27  ;;  %v2644_v45 = vmax.f32 %v1304_v53, %v8522_v26  ;;  %v3840_v0 = vrot.slane %v11570_v3, 1 }
 0x1e9   : > { %v2884_v14 = vcombine.high %v2164_v44, %v2164_v44  ;;  %v2891_v55 = vrot.slane %v2164_v44, %v10116_v48  ;;  %v875_v54 = vmax.f32 %v843_v50, 0.0  ;;  %v842_v32 = vadd.f32 %v11452_v36, %v803_v42  ;;  %v11609_v50 = vld [vmem:[%s14374_s4 + $0x78] sm:$0xff] }
 0x1ea   : > { %v11597_v25 = vadd.f32 %v11452_v36, %v806_v15  ;;  %v11601_v61 = vcombine.high %v11586_v52, %v11586_v52  ;;  %v3841_v53 = vrot.slane %v3784_v22, 1  ;;  %v3842_v26 = vrot.slane %v11586_v52, 1  ;;  %v11614_v42 = vld [vmem:[%s14374_s4 + $0x278] sm:$0xff]  ;;  %9411 = vmatprep.subr.mxu1 %v11609_v50 }
 0x1eb   : > { %v2898_v24 = vrot.slane %v2884_v14, %v10116_v48  ;;  %v2899_v2 = vcombine.high %v2891_v55, %v2891_v55  ;;  %v3013_v6 = vrot.slane %v2891_v55, 1  ;;  %v3249_v27 = vmax.f32 %v2641_v57, %v2891_v55  ;;  %9552 = vmatprep.subr.mxu0 %v11614_v42 }
 0x1ec   : > { %v1339_v15 = vcombine.high %v875_v54, %v875_v54  ;;  %v11618_v44 = vrot.slane %v875_v54, %v10116_v48  ;;  %v14450_v4 = vmax.f32 %v11410_v43, %v11509_v10 }
 0x1ed   : > { %v11604_v7 = vcombine.high %v2898_v24, %v2898_v24  ;;  %v3014_v23 = vrot.slane %v2899_v2, 1  ;;  %v3015_v46 = vrot.slane %v2898_v24, 1  ;;  %v3250_v35 = vmax.f32 %v2642_v41, %v3013_v6 }
 0x1ee   : > { %v3251_v59 = vmax.f32 %v2643_v37, %v2899_v2  ;;  %v3253_v57 = vmax.f32 %v11502_v39, %v2898_v24  ;;  %v874_v6 = vmax.f32 %v842_v32, 0.0  ;;  %v3508_v37 = vrot.slane %v3249_v27, %v10139_v8 }
 0x1ef   : > { %v3252_v41 = vmax.f32 %v2644_v45, %v3014_v23  ;;  %v11622_v14 = vmax.f32 %v11516_v29, %v3015_v46  ;;  %v11626_v55 = vmax.f32 %v11505_v13, %v11604_v7  ;;  %v3512_v39 = vrot.slane %v3250_v35, %v10139_v8 }
 0x1f0   : > { %v3516_v54 = vrot.slane %v3251_v59, %v10139_v8  ;;  %v14448_v29 = vmax.f32 %v11458_v34, %v11497_v51  ;;  %v3660_v13 = vmax.f32 %v11547_v20, %v3250_v35  ;;  %v14449_v32 = vmax.f32 %v11475_v1, %v11513_v18 }
 0x1f1   : > { %v3520_v45 = vrot.slane %v3252_v41, %v10139_v8  ;;  %v3605_v46 = vsel %vm3569_vm8, %v3512_v39, %v3508_v37  ;;  %v3662_v62 = vmax.f32 %v11555_v30, %v3252_v41  ;;  %v3663_v24 = vmax.f32 %v14450_v4, %v3253_v57 }
 0x1f2   : > { %v3659_v2 = vmax.f32 %v14448_v29, %v3249_v27  ;;  %v3661_v23 = vmax.f32 %v14449_v32, %v3251_v59  ;;  %v3664_v28 = vmax.f32 %v11560_v5, %v11622_v14  ;;  %v14451_v34 = vmax.f32 %v11420_v17, %v11525_v12 }
 0x1f3   : > { %v3957_v1 = vmax.f32 %v3660_v13, %v3840_v0  ;;  %v3606_v27 = vsel %vm2034_vm1, %v3516_v54, %v3605_v46  ;;  %v3959_v35 = vmax.f32 %v3662_v62, %v3841_v53  ;;  %v3960_v30 = vmax.f32 %v3663_v24, %v11586_v52 }
 0x1f4   : > { %v3665_v51 = vmax.f32 %v14451_v34, %v11626_v55  ;;  %v3956_v20 = vmax.f32 %v3659_v2, %v11570_v3  ;;  %v3958_v18 = vmax.f32 %v3661_v23, %v3784_v22  ;;  %v3961_v59 = vmax.f32 %v3664_v28, %v3842_v26 }
 0x1f5   : > { %v4211_v5 = vrot.slane %v3957_v1, %v10139_v8  ;;  %v11659_v4 = vrot.slane %v1339_v15, %v10116_v48  ;;  %v4219_v12 = vrot.slane %v3959_v35, %v10139_v8  ;;  %v1354_v3 = vcombine.high %v11618_v44, %v11618_v44 }
 0x1f6   : > { %v3962_v43 = vmax.f32 %v3665_v51, %v11601_v61  ;;  %v4207_v10 = vrot.slane %v3956_v20, %v10139_v8  ;;  %v4215_v17 = vrot.slane %v3958_v18, %v10139_v8  ;;  %v1941_v52 = vrot.slane %v11618_v44, %v10127_v58 }
 0x1f7   : > { %v3016_v28 = vrot.slane %v11604_v7, 1  ;;  %v3524_v22 = vrot.slane %v3253_v57, %v10139_v8  ;;  %v3607_v0 = vsel %vm2036_vm2, %v3520_v45, %v3606_v27  ;;  %v4223_v53 = vrot.slane %v3960_v30, %v10139_v8  ;;  %v743_v27 = vpop.f32.mrf.mxu0 }
 0x1f8   : > { %v4330_v62 = vsel %vm2034_vm1, %v4211_v5, %v4207_v10  ;;  %v4227_v26 = vrot.slane %v3961_v59, %v10139_v8  ;;  %v4231_v15 = vrot.slane %v3962_v43, %v10139_v8  ;;  %v1355_v39 = vcombine.high %v11659_v4, %v11659_v4 }
 0x1f9   : > { %v4331_v41 = vsel %vm2036_vm2, %v4215_v17, %v4330_v62  ;;  %v8531_v7 = vrot.slane %v11618_v44, 9  ;;  %v1322_v57 = vcombine.high %v874_v6, %v874_v6  ;;  %v8532_v24 = vrot.slane %v1354_v3, 9 }
 0x1fa   : > { %v4332_v37 = vsel %vm2038_vm3, %v4219_v12, %v4331_v41  ;;  %v8533_v45 = vrot.slane %v11659_v4, 9  ;;  %v1329_v29 = vrot.slane %v874_v6, %v10116_v48  ;;  %v3528_v2 = vrot.slane %v11622_v14, %v10139_v8 }
 0x1fb   : > { %v4333_v54 = vsel %vm2040_vm4, %v4223_v53, %v4332_v37  ;;  %v3608_v13 = vsel %vm2038_vm3, %v3524_v22, %v3607_v0  ;;  %v1336_v23 = vrot.slane %v1322_v57, %v10116_v48  ;;  %v1945_v34 = vrot.slane %v1354_v3, %v10127_v58 }
 0x1fc   : > { %v4334_v32 = vsel %vm2042_vm5, %v4227_v26, %v4333_v54  ;;  %v1949_v51 = vrot.slane %v11659_v4, %v10127_v58  ;;  %v1337_v20 = vcombine.high %v1329_v29, %v1329_v29  ;;  %v8534_v1 = vrot.slane %v1355_v39, 9 }
 0x1fd   : > { %v4335_v46 = vsel %vm2044_vm6, %v4231_v15, %v4334_v32  ;;  %v11692_v6 = vmax.f32 %v11618_v44, %v8531_v7  ;;  %v1338_v18 = vcombine.high %v1336_v23, %v1336_v23  ;;  %v1933_v14 = vrot.slane %v1336_v23, %v10127_v58 }
 0x1fe   : > { %v11695_v35 = vmax.f32 %v1354_v3, %v8532_v24  ;;  %v11698_v30 = vmax.f32 %v11659_v4, %v8533_v45  ;;  %v1925_v59 = vrot.slane %v1329_v29, %v10127_v58  ;;  %v1929_v43 = vrot.slane %v1337_v20, %v10127_v58 }
 0x1ff   : > { %v11703_v10 = vsel %vm2152_vm7, 0.0, %v4335_v46  ;;  %v1937_v5 = vrot.slane %v1338_v18, %v10127_v58  ;;  %v8527_v44 = vrot.slane %v1329_v29, 9  ;;  %v877_v17 = vmax.f32 %v11597_v25, 0.0 }
 0x200   : > { %14452 = vst [vmem:[#allocation19_spill] sm:$0xff] %v11703_v10  ;;  %v2112_v12 = vsel %vm2034_vm1, %v1929_v43, %v1925_v59  ;;  %v8528_v22 = vrot.slane %v1337_v20, 9  ;;  %v8529_v3 = vrot.slane %v1336_v23, 9  ;;  %v805_v0 = vmul.f32 %v11544_v21, %v743_v27 }
 0x201   : > { %v2113_v4 = vsel %vm2036_vm2, %v1933_v14, %v2112_v12  ;;  %v8530_v62 = vrot.slane %v1338_v18, 9  ;;  %v1373_v53 = vcombine.high %v877_v17, %v877_v17  ;;  %v11711_v26 = vrot.slane %v877_v17, %v10116_v48 }
 0x202   : > { %v11713_v15 = vmax.f32 %v1355_v39, %v8534_v1  ;;  %v2114_v41 = vsel %vm2038_vm3, %v1937_v5, %v2113_v4  ;;  %v844_v37 = vadd.f32 %v11452_v36, %v805_v0  ;;  %v11718_v25 = vmax.f32 %v11528_v11, %v3016_v28 }
 0x203   : > { %v2115_v57 = vsel %vm2040_vm4, %v1941_v52, %v2114_v41  ;;  %v11724_v54 = vrot.slane %v1373_v53, %v10116_v48  ;;  %v11728_v24 = vcombine.high %v11711_v26, %v11711_v26  ;;  %v11731_v45 = vmax.f32 %v1329_v29, %v8527_v44 }
 0x204   : > { %v2116_v39 = vsel %vm2042_vm5, %v1945_v34, %v2115_v57  ;;  %v11733_v32 = vmax.f32 %v1336_v23, %v8529_v3  ;;  %v876_v11 = vmax.f32 %v844_v37, 0.0  ;;  %v2650_v46 = vmax.f32 %v1337_v20, %v8528_v22 }
 0x205   : > { %v2117_v28 = vsel %vm2044_vm6, %v1949_v51, %v2116_v39  ;;  %v2652_v1 = vmax.f32 %v1338_v18, %v8530_v62  ;;  %v1389_v52 = vcombine.high %v11724_v54, %v11724_v54  ;;  %v8539_v27 = vrot.slane %v11711_v26, 9 }
 0x206   : > { %v2165_v14 = vsel %vm2152_vm7, 0.0, %v2117_v28  ;;  %v3532_v59 = vrot.slane %v11626_v55, %v10139_v8  ;;  %v3536_v29 = vrot.slane %v11718_v25, %v10139_v8  ;;  %v8540_v51 = vrot.slane %v11728_v24, 9  ;;  %v9360_v28 = vpop.f32.mrf.mxu0 }
 0x207   : > { %v2901_v23 = vcombine.high %v2165_v14, %v2165_v14  ;;  %v11745_v34 = vrot.slane %v2165_v14, %v10116_v48  ;;  %v1356_v20 = vcombine.high %v876_v11, %v876_v11  ;;  %v1969_v18 = vrot.slane %v11711_v26, %v10127_v58 }
 0x208   : > { %v1973_v43 = vrot.slane %v11728_v24, %v10127_v58  ;;  %v1363_v5 = vrot.slane %v876_v11, %v10116_v48  ;;  %v3609_v55 = vsel %vm2040_vm4, %v3528_v2, %v3608_v13  ;;  %v8541_v12 = vrot.slane %v11724_v54, 9 }
 0x209   : > { %v11755_v44 = vrot.slane %v2901_v23, %v10116_v48  ;;  %v11759_v17 = vcombine.high %v11745_v34, %v11745_v34  ;;  %v8542_v22 = vrot.slane %v1389_v52, 9  ;;  %v3017_v3 = vrot.slane %v11745_v34, 1 }
 0x20a   : > { %v1977_v0 = vrot.slane %v11724_v54, %v10127_v58  ;;  %v1370_v4 = vrot.slane %v1356_v20, %v10116_v48  ;;  %v1371_v62 = vcombine.high %v1363_v5, %v1363_v5  ;;  %v11772_v53 = vmax.f32 %v11711_v26, %v8539_v27 }
 0x20b   : > { %v11768_v2 = vcombine.high %v11755_v44, %v11755_v44  ;;  %v3018_v13 = vrot.slane %v11759_v17, 1  ;;  %v11775_v41 = vmax.f32 %v11728_v24, %v8540_v51  ;;  %v3019_v37 = vrot.slane %v11755_v44, 1 }
 0x20c   : > { %v1372_v57 = vcombine.high %v1370_v4, %v1370_v4  ;;  %v1953_v39 = vrot.slane %v1363_v5, %v10127_v58  ;;  %v1957_v11 = vrot.slane %v1371_v62, %v10127_v58  ;;  %v11783_v23 = vmax.f32 %v11724_v54, %v8541_v12  ;;  %v753_v12 = vpop.f32.mrf.mxu0 }
 0x20d   : > { %v11785_v20 = vmax.f32 %v1389_v52, %v8542_v22  ;;  %v3610_v26 = vsel %vm2042_vm5, %v3532_v59, %v3609_v55  ;;  %v11788_v24 = vmax.f32 %v2650_v46, %v3017_v3  ;;  %v1961_v27 = vrot.slane %v1370_v4, %v10127_v58 }
 0x20e   : > { %v1965_v51 = vrot.slane %v1372_v57, %v10127_v58  ;;  %v2118_v7 = vsel %vm2034_vm1, %v1957_v11, %v1953_v39  ;;  %v3020_v10 = vrot.slane %v11768_v2, 1  ;;  %v3259_v14 = vmax.f32 %v11733_v32, %v11759_v17 }
 0x20f   : > { %v11796_v33 = vmax.f32 %v2652_v1, %v3018_v13  ;;  %v3261_v54 = vmax.f32 %v11692_v6, %v11755_v44  ;;  %v11801_v52 = vmax.f32 %v11695_v35, %v3019_v37  ;;  %v2119_v46 = vsel %vm2036_vm2, %v1961_v27, %v2118_v7 }
 0x210   : > { %v8535_v59 = vrot.slane %v1363_v5, 9  ;;  %v3611_v55 = vsel %vm2044_vm6, %v3536_v29, %v3610_v26  ;;  %v3263_v22 = vmax.f32 %v11698_v30, %v11768_v2  ;;  %v2120_v3 = vsel %vm2038_vm3, %v1965_v51, %v2119_v46 }
 0x211   : > { %v8536_v32 = vrot.slane %v1371_v62, 9  ;;  %v8537_v1 = vrot.slane %v1370_v4, 9  ;;  %v2121_v17 = vsel %vm2040_vm4, %v1969_v18, %v2120_v3  ;;  %v3666_v13 = vmax.f32 %v11580_v19, %v11718_v25 }
 0x212   : > { %v3786_v35 = vcombine.high %v3611_v55, %v3611_v55  ;;  %v11812_v37 = vrot.slane %v3611_v55, %v10116_v48  ;;  %v2122_v7 = vsel %vm2042_vm5, %v1973_v43, %v2121_v17  ;;  %v8538_v29 = vrot.slane %v1372_v57, 9 }
 0x213   : > { %v808_v39 = vmul.f32 %v11544_v21, %v9360_v28  ;;  %v807_v11 = vmul.f32 %v11544_v21, %v753_v12  ;;  %v11818_v26 = vmax.f32 %v11713_v15, %v3020_v10  ;;  %v2123_v27 = vsel %vm2044_vm6, %v1977_v0, %v2122_v7 }
 0x214   : > { %v2657_v18 = vmax.f32 %v1363_v5, %v8535_v59  ;;  %v14453_v51 = vrot.slane %v11601_v61, 1  ;;  %v2166_v25 = vsel %vm2152_vm7, 0.0, %v2123_v27  ;;  %v3800_v46 = vrot.slane %v3786_v35, %v10116_v48 }
 0x215   : > { %v3801_v43 = vcombine.high %v11812_v37, %v11812_v37  ;;  %v847_v28 = vadd.f32 %v11452_v36, %v808_v39  ;;  %v2658_v55 = vmax.f32 %v1371_v62, %v8536_v32  ;;  %v2659_v12 = vmax.f32 %v1370_v4, %v8537_v1 }
 0x216   : > { %v11823_v19 = vmax.f32 %v3666_v13, %v14453_v51  ;;  %v2918_v10 = vcombine.high %v2166_v25, %v2166_v25  ;;  %v2925_v15 = vrot.slane %v2166_v25, %v10116_v48  ;;  %v2660_v0 = vmax.f32 %v1372_v57, %v8538_v29 }
 0x217   : > { %v3844_v5 = vrot.slane %v11812_v37, 1  ;;  %v846_v61 = vadd.f32 %v11452_v36, %v807_v11  ;;  %v879_v35 = vmax.f32 %v847_v28, 0.0  ;;  %v11836_v39 = vcombine.high %v3800_v46, %v3800_v46 }
 0x218   : > { %v2932_v3 = vrot.slane %v2918_v10, %v10116_v48  ;;  %v2933_v17 = vcombine.high %v2925_v15, %v2925_v15  ;;  %v3021_v13 = vrot.slane %v2925_v15, 1  ;;  %v3265_v7 = vmax.f32 %v2657_v18, %v2925_v15 }
 0x219   : > { %v3845_v4 = vrot.slane %v3801_v43, 1  ;;  %v3846_v51 = vrot.slane %v3800_v46, 1  ;;  %v878_v25 = vmax.f32 %v846_v61, 0.0  ;;  %v1407_v18 = vcombine.high %v879_v35, %v879_v35 }
 0x21a   : > { %v11840_v57 = vcombine.high %v2932_v3, %v2932_v3  ;;  %v3022_v32 = vrot.slane %v2933_v17, 1  ;;  %v3023_v1 = vrot.slane %v2932_v3, 1  ;;  %v3266_v29 = vmax.f32 %v2658_v55, %v3021_v13 }
 0x21b   : > { %v3267_v11 = vmax.f32 %v2659_v12, %v2933_v17  ;;  %v3269_v27 = vmax.f32 %v11772_v53, %v2932_v3  ;;  %v14454_v15 = vrot.slane %v10224_v31, 1  ;;  %v3540_v55 = vrot.slane %v3265_v7, %v10139_v8 }
 0x21c   : > { %v3268_v10 = vmax.f32 %v2660_v0, %v3022_v32  ;;  %v11844_v28 = vmax.f32 %v11775_v41, %v3023_v1  ;;  %v11853_v62 = vmax.f32 %v11783_v23, %v11840_v57  ;;  %v3544_v53 = vrot.slane %v3266_v29, %v10139_v8 }
 0x21d   : > { %v11849_v59 = vmax.f32 %v10172_v47, %v14454_v15  ;;  %v3548_v12 = vrot.slane %v3267_v11, %v10139_v8  ;;  %v14455_v41 = vmax.f32 %v11731_v45, %v11745_v34  ;;  %v3668_v61 = vmax.f32 %v11788_v24, %v3266_v29 }
 0x21e   : > { %v3669_v3 = vmax.f32 %v3259_v14, %v3267_v11  ;;  %v11863_v47 = vrot.slane %v879_v35, %v10116_v48  ;;  %v3552_v17 = vrot.slane %v3268_v10, %v10139_v8  ;;  %v3612_v23 = vsel %vm3569_vm8, %v3544_v53, %v3540_v55 }
 0x21f   : > { %v3667_v0 = vmax.f32 %v14455_v41, %v3265_v7  ;;  %v3670_v13 = vmax.f32 %v11796_v33, %v3268_v10  ;;  %v3671_v32 = vmax.f32 %v3261_v54, %v3269_v27  ;;  %v3672_v45 = vmax.f32 %v11801_v52, %v11844_v28 }
 0x220   : > { %v3965_v24 = vmax.f32 %v3668_v61, %v3844_v5  ;;  %v3966_v14 = vmax.f32 %v3669_v3, %v3801_v43  ;;  %v3613_v35 = vsel %vm2034_vm1, %v3548_v12, %v3612_v23  ;;  %v3673_v7 = vmax.f32 %v3263_v22, %v11853_v62 }
 0x221   : > { %v3964_v34 = vmax.f32 %v3667_v0, %v11812_v37  ;;  %v3967_v1 = vmax.f32 %v3670_v13, %v3845_v4  ;;  %v3968_v33 = vmax.f32 %v3671_v32, %v3800_v46  ;;  %v3847_v29 = vrot.slane %v11836_v39, 1 }
 0x222   : > { %v3969_v6 = vmax.f32 %v3672_v45, %v3846_v51  ;;  %v4243_v54 = vrot.slane %v3965_v24, %v10139_v8  ;;  %v3970_v52 = vmax.f32 %v3673_v7, %v11836_v39  ;;  %v4247_v37 = vrot.slane %v3966_v14, %v10139_v8 }
 0x223   : > { %v4239_v44 = vrot.slane %v3964_v34, %v10139_v8  ;;  %v4251_v43 = vrot.slane %v3967_v1, %v10139_v8  ;;  %v1390_v5 = vcombine.high %v878_v25, %v878_v25  ;;  %v3556_v11 = vrot.slane %v3269_v27, %v10139_v8 }
 0x224   : > { %v3614_v30 = vsel %vm2036_vm2, %v3552_v17, %v3613_v35  ;;  %v4255_v2 = vrot.slane %v3968_v33, %v10139_v8  ;;  %v1421_v4 = vrot.slane %v1407_v18, %v10116_v48  ;;  %v1422_v51 = vcombine.high %v11863_v47, %v11863_v47 }
 0x225   : > { %v4336_v22 = vsel %vm2034_vm1, %v4243_v54, %v4239_v44  ;;  %v1397_v10 = vrot.slane %v878_v25, %v10116_v48  ;;  %v3024_v15 = vrot.slane %v11840_v57, 1  ;;  %v3560_v27 = vrot.slane %v11844_v28, %v10139_v8 }
 0x226   : > { %v4337_v46 = vsel %vm2036_vm2, %v4247_v37, %v4336_v22  ;;  %v4259_v55 = vrot.slane %v3969_v6, %v10139_v8  ;;  %v11900_v12 = vsel %vm2038_vm3, %v3556_v11, %v3614_v30  ;;  %v4263_v41 = vrot.slane %v3970_v52, %v10139_v8 }
 0x227   : > { %v4338_v53 = vsel %vm2038_vm3, %v4251_v43, %v4337_v46  ;;  %v1997_v0 = vrot.slane %v11863_v47, %v10127_v58  ;;  %v8547_v61 = vrot.slane %v11863_v47, 9  ;;  %v1404_v3 = vrot.slane %v1390_v5, %v10116_v48 }
 0x228   : > { %v4339_v18 = vsel %vm2040_vm4, %v4255_v2, %v4338_v53  ;;  %v1405_v17 = vcombine.high %v1397_v10, %v1397_v10  ;;  %v11910_v13 = vcombine.high %v1421_v4, %v1421_v4  ;;  %v8548_v32 = vrot.slane %v1422_v51, 9 }
 0x229   : > { %v4340_v25 = vsel %vm2042_vm5, %v4259_v55, %v4339_v18  ;;  %v1981_v45 = vrot.slane %v1397_v10, %v10127_v58  ;;  %v2001_v34 = vrot.slane %v1422_v51, %v10127_v58  ;;  %v8549_v24 = vrot.slane %v1421_v4, 9 }
 0x22a   : > { %v4341_v23 = vsel %vm2044_vm6, %v4263_v41, %v4340_v25  ;;  %v1406_v14 = vcombine.high %v1404_v3, %v1404_v3  ;;  %v1985_v35 = vrot.slane %v1405_v17, %v10127_v58  ;;  %v1989_v1 = vrot.slane %v1404_v3, %v10127_v58 }
 0x22b   : > { %v11916_v7 = vsel %vm2152_vm7, 0.0, %v4341_v23  ;;  %v8543_v33 = vrot.slane %v1397_v10, 9  ;;  %v8544_v6 = vrot.slane %v1405_v17, 9  ;;  %v8545_v52 = vrot.slane %v1404_v3, 9 }
 0x22c   : > { %v1993_v44 = vrot.slane %v1406_v14, %v10127_v58  ;;  %v2124_v54 = vsel %vm2034_vm1, %v1985_v35, %v1981_v45  ;;  %v8546_v37 = vrot.slane %v1406_v14, 9  ;;  %v2005_v43 = vrot.slane %v1421_v4, %v10127_v58  ;;  %v14458_v35 = vld [vmem:[#allocation11_spill] sm:$0xff] }
 0x22d   : > { %v11923_v5 = vmax.f32 %v11863_v47, %v8547_v61  ;;  %v2670_v11 = vmax.f32 %v1422_v51, %v8548_v32  ;;  %v2125_v30 = vsel %vm2036_vm2, %v1989_v1, %v2124_v54  ;;  %v11928_v22 = vmax.f32 %v1421_v4, %v8549_v24 }
 0x22e   : > { %v2126_v46 = vsel %vm2038_vm3, %v1993_v44, %v2125_v30  ;;  %v11931_v55 = vmax.f32 %v1397_v10, %v8543_v33  ;;  %v2666_v41 = vmax.f32 %v1405_v17, %v8544_v6  ;;  %v3624_v18 = vmax.f32 %v10245_v63, %v10297_v16  ;;  %v14460_v33 = vld [vmem:[#allocation9_spill] sm:$0xff] }
 0x22f   : > { %v2127_v53 = vsel %vm2040_vm4, %v1997_v0, %v2126_v46  ;;  %v14456_v47 = vmov 0.0   ;;  %v11939_v61 = vmax.f32 %v1404_v3, %v8545_v52  ;;  %v2668_v23 = vmax.f32 %v1406_v14, %v8546_v37 }
 0x230   : > { %v3684_v51 = vcombine.high %v14456_v47, %v14456_v47  ;;  %v2128_v25 = vsel %vm2042_vm5, %v2001_v34, %v2127_v53  ;;  %v4311_v4 = vsel %vm2044_vm6, %v10599_v60, %v10616_v56  ;;  %v4301_v63 = vsel %vm2036_vm2, %v10335_v38, %v10348_v49  ;;  %v14459_v49 = vld [vmem:[#allocation10_spill] sm:$0xff] }
 0x231   : > { %v2129_v10 = vsel %vm2044_vm6, %v2005_v43, %v2128_v25  ;;  %v4365_v16 = vsel %vm2152_vm7, 0.0, %v4311_v4  ;;  %v14457_v3 = vmax.f32 %v10165_v40, %v10224_v31  ;;  %v3626_v38 = vmax.f32 %v11849_v59, %v14458_v35 }
 0x232   : > { %v3698_v0 = vrot.slane %v3684_v51, %v10116_v48  ;;  %v2167_v17 = vsel %vm2152_vm7, 0.0, %v2129_v10  ;;  %v4420_v45 = vcombine.high %v4365_v16, %v4365_v16  ;;  %v4427_v60 = vrot.slane %v4365_v16, %v10116_v48 }
 0x233   : > { %v3625_v32 = vmax.f32 %v14457_v3, %v10320_v9  ;;  %v2935_v56 = vcombine.high %v2167_v17, %v2167_v17  ;;  %v11957_v34 = vrot.slane %v2167_v17, %v10116_v48  ;;  %v14461_v6 = vrot.slane %v14460_v33, %v10139_v8  ;;  %v9363_v9 = vpop.f32.mrf.mxu0 }
 0x234   : > { %v3700_v24 = vcombine.high %v3698_v0, %v3698_v0  ;;  %v3822_v14 = vrot.slane %v3698_v0, 1  ;;  %v3920_v1 = vmax.f32 %v14459_v49, %v3698_v0  ;;  %v11967_v31 = vrot.slane %v14456_v47, 1 }
 0x235   : > { %v4302_v40 = vsel %vm2038_vm3, %v14461_v6, %v4301_v63  ;;  %v11970_v44 = vrot.slane %v2935_v56, %v10116_v48  ;;  %v11974_v54 = vcombine.high %v11957_v34, %v11957_v34  ;;  %v3025_v59 = vrot.slane %v11957_v34, 1  ;;  %v763_v16 = vpop.f32.mrf.mxu0 }
 0x236   : > { %v11978_v52 = vrot.slane %v4420_v45, %v10116_v48  ;;  %v3823_v37 = vrot.slane %v3700_v24, 1  ;;  %v3921_v43 = vmax.f32 %v3624_v18, %v3822_v14  ;;  %v3922_v30 = vmax.f32 %v3625_v32, %v3700_v24 }
 0x237   : > { %v4435_v46 = vcombine.high %v4427_v60, %v4427_v60  ;;  %v11982_v53 = vcombine.high %v11970_v44, %v11970_v44  ;;  %v3026_v51 = vrot.slane %v11974_v54, 1  ;;  %v3027_v25 = vrot.slane %v11970_v44, 1 }
 0x238   : > { %v3273_v4 = vmax.f32 %v11931_v55, %v11957_v34  ;;  %v11988_v10 = vmax.f32 %v2666_v41, %v3025_v59  ;;  %v3275_v0 = vmax.f32 %v11939_v61, %v11974_v54  ;;  %v3923_v63 = vmax.f32 %v3626_v38, %v3823_v37 }
 0x239   : > { %v4063_v18 = vrot.slane %v3920_v1, %v10139_v8  ;;  %v11993_v17 = vmax.f32 %v2668_v23, %v3026_v51  ;;  %v3277_v3 = vmax.f32 %v11923_v5, %v11970_v44  ;;  %v11997_v32 = vmax.f32 %v2670_v11, %v3027_v25 }
 0x23a   : > { %v4067_v45 = vrot.slane %v3921_v43, %v10139_v8  ;;  %v4071_v56 = vrot.slane %v3922_v30, %v10139_v8  ;;  %v4075_v41 = vrot.slane %v3923_v63, %v10139_v8  ;;  %v4606_v14 = vcombine.low %v4427_v60, %v4435_v46 }
 0x23b   : > { %v4303_v24 = vsel %vm2040_vm4, %v4063_v18, %v4302_v40  ;;  %v810_v38 = vmul.f32 %v11544_v21, %v9363_v9  ;;  %v809_v49 = vmul.f32 %v11544_v21, %v763_v16  ;;  %v4436_v33 = vcombine.high %v11978_v52, %v11978_v52 }
 0x23c   : > { %v4304_v23 = vsel %vm2042_vm5, %v4067_v45, %v4303_v24  ;;  %v4372_v1 = vsel %vm2152_vm7, %v4075_v41, 0.0  ;;  %v12015_v60 = vmax.f32 %v11785_v20, %v3024_v15  ;;  %v5092_v40 = vrot.slane %v14456_v47, 2 }
 0x23d   : > { %v4305_v11 = vsel %vm2044_vm6, %v4071_v56, %v4304_v23  ;;  %v849_v9 = vadd.f32 %v11452_v36, %v810_v38  ;;  %v848_v21 = vadd.f32 %v11452_v36, %v809_v49  ;;  %v4419_v43 = vrot.slane %v4372_v1, %v10116_v48 }
 0x23e   : > { %v4364_v6 = vsel %vm2152_vm7, 0.0, %v4305_v11  ;;  %v4620_v30 = vrot.slane %v4606_v14, %v10116_v48  ;;  %v3564_v20 = vrot.slane %v11853_v62, %v10139_v8  ;;  %v3616_v15 = vsel %vm2040_vm4, %v3560_v27, %v11900_v12 }
 0x23f   : > { %v4396_v59 = vcombine.high %v4364_v6, %v4364_v6  ;;  %v4403_v37 = vrot.slane %v4364_v6, %v10116_v48  ;;  %v881_v57 = vmax.f32 %v849_v9, 0.0  ;;  %v880_v46 = vmax.f32 %v848_v21, 0.0 }
 0x240   : > { %v3568_v63 = vrot.slane %v12015_v60, %v10139_v8  ;;  %v3617_v28 = vsel %vm2042_vm5, %v3564_v20, %v3616_v15  ;;  %v3674_v27 = vmax.f32 %v11818_v26, %v12015_v60  ;;  %v14468_v61 = vmax.f32 %v11928_v22, %v11982_v53  ;;  %v4789_v22 = vld [vmem:[%s14374_s4 + $0x58] sm:$0xff] }
 0x241   : > { %v4410_v36 = vrot.slane %v4396_v59, %v10116_v48  ;;  %v4411_v51 = vcombine.high %v4403_v37, %v4403_v37  ;;  %v4588_v25 = vcombine.low %v4403_v37, %v4403_v37  ;;  %v1441_v18 = vcombine.high %v881_v57, %v881_v57 }
 0x242   : > { %v1448_v16 = vrot.slane %v881_v57, %v10116_v48  ;;  %v1424_v45 = vcombine.high %v880_v46, %v880_v46  ;;  %v1431_v62 = vrot.slane %v880_v46, %v10116_v48  ;;  %v3618_v59 = vsel %vm2044_vm6, %v3568_v63, %v3617_v28 }
 0x243   : > { %v4412_v56 = vcombine.high %v4410_v36, %v4410_v36  ;;  %v4589_v41 = vcombine.low %v4411_v51, %v4410_v36  ;;  %v4596_v12 = vrot.slane %v4588_v25, %v10116_v48  ;;  %v1455_v24 = vrot.slane %v1441_v18, %v10116_v48 }
 0x244   : > { %v1456_v14 = vcombine.high %v1448_v16, %v1448_v16  ;;  %v8555_v23 = vrot.slane %v1448_v16, 9  ;;  %v1438_v11 = vrot.slane %v1424_v45, %v10116_v48  ;;  %v1439_v1 = vcombine.high %v1431_v62, %v1431_v62 }
 0x245   : > { %v4603_v38 = vrot.slane %v4589_v41, %v10116_v48  ;;  %v4605_v49 = vcombine.low %v4412_v56, %v4419_v43  ;;  %v12043_v6 = vcombine.high %v1455_v24, %v1455_v24  ;;  %v2025_v9 = vrot.slane %v1448_v16, %v10127_v58 }
 0x246   : > { %v8556_v21 = vrot.slane %v1456_v14, 9  ;;  %v2029_v37 = vrot.slane %v1456_v14, %v10127_v58  ;;  %v8557_v57 = vrot.slane %v1455_v24, 9  ;;  %v2033_v46 = vrot.slane %v1455_v24, %v10127_v58 }
 0x247   : > { %v12047_v26 = vcombine.low %v4596_v12, %v4603_v38  ;;  %v4613_v60 = vrot.slane %v4605_v49, %v10116_v48  ;;  %v12052_v43 = vmax.f32 %v1448_v16, %v8555_v23  ;;  %v1440_v20 = vcombine.high %v1438_v11, %v1438_v11 }
 0x248   : > { %v2009_v15 = vrot.slane %v1431_v62, %v10127_v58  ;;  %v12061_v25 = vmax.f32 %v1456_v14, %v8556_v21  ;;  %v2013_v63 = vrot.slane %v1439_v1, %v10127_v58  ;;  %v12066_v56 = vmax.f32 %v1455_v24, %v8557_v57 }
 0x249   : > { %v12055_v36 = vcombine.low %v4613_v60, %v4620_v30  ;;  %v12059_v51 = vsel %vm4775_vm9, 0.0, %v12047_v26  ;;  %v2017_v16 = vrot.slane %v1438_v11, %v10127_v58  ;;  %v2021_v41 = vrot.slane %v1440_v20, %v10127_v58 }
 0x24a   : > { %v4814_v18 = vrot.slane %v12059_v51, 1  ;;  %v5093_v45 = vrot.slane %v12059_v51, 2  ;;  %v2130_v30 = vsel %vm2034_vm1, %v2013_v63, %v2009_v15  ;;  %v8551_v28 = vrot.slane %v1431_v62, 9 }
 0x24b   : > { %v8552_v12 = vrot.slane %v1439_v1, 9  ;;  %v2131_v38 = vsel %vm2036_vm2, %v2017_v16, %v2130_v30  ;;  %v8553_v49 = vrot.slane %v1438_v11, 9  ;;  %v8554_v21 = vrot.slane %v1440_v20, 9 }
 0x24c   : > { %v4815_v14 = vsel %vm4812_vm10, %v11967_v31, %v4814_v18  ;;  %v5094_v23 = vsel %vm5091_vm11, %v5092_v40, %v5093_v45  ;;  %v2132_v24 = vsel %vm2038_vm3, %v2021_v41, %v2131_v38  ;;  %v2673_v60 = vmax.f32 %v1431_v62, %v8551_v28  ;;  %v14464_v38 = vld [vmem:[#allocation13_spill] sm:$0xff] }
 0x24d   : > { %9396 = vmatprep.mubr.f32.mxu1 %v4815_v14  ;;  %9490 = vmatprep.mubr.f32.mxu0 %v5094_v23  ;;  %v2674_v57 = vmax.f32 %v1439_v1, %v8552_v12  ;;  %v2133_v2 = vsel %vm2040_vm4, %v2025_v9, %v2132_v24  ;;  %v2675_v15 = vmax.f32 %v1438_v11, %v8553_v49  ;;  %v4816_v30 = vrot.slane %v12055_v36, 1  ;;  %v4792_v9 = vld [vmem:[%s14374_s4 + $0x70] sm:$0xff]  ;;  %v14462_v12 = vld [vmem:[#allocation12_spill] sm:$0xff] }
 0x24e   : > { %v3803_v63 = vcombine.high %v3618_v59, %v3618_v59  ;;  %v12078_v35 = vrot.slane %v3618_v59, %v10116_v48  ;;  %v2134_v31 = vsel %vm2042_vm5, %v2029_v37, %v2133_v2  ;;  %v2676_v40 = vmax.f32 %v1440_v20, %v8554_v21  ;;  %v8623_v24 = vld [vmem:[%s14374_s4 + $0x270] sm:$0xff] }
 0x24f   : > { %v12083_v16 = vmax.f32 %v3674_v27, %v3847_v29  ;;  %v2135_v41 = vsel %vm2044_vm6, %v2033_v46, %v2134_v31  ;;  %v4817_v29 = vsel %vm4812_vm10, %v4814_v18, %v4816_v30  ;;  %v14400_v27 = vrot.slane %v12055_v36, 2 }
 0x250   : > { %v12088_v62 = vrot.slane %v3803_v63, %v10116_v48  ;;  %v12092_v11 = vcombine.high %v12078_v35, %v12078_v35  ;;  %v3848_v1 = vrot.slane %v12078_v35, 1  ;;  %v2168_v2 = vsel %vm2152_vm7, 0.0, %v2135_v41  ;;  %9397 = vmatmul.mubr.f32.vlgmr.msra.gmra.mxu1 %v4817_v29  ;;  %v14465_v29 = vld [vmem:[#allocation14_spill] sm:$0xff] }
 0x251   : > { %v2952_v59 = vcombine.high %v2168_v2, %v2168_v2  ;;  %v2959_v37 = vrot.slane %v2168_v2, %v10116_v48  ;;  %v12115_v18 = vsel %vm5091_vm11, %v5093_v45, %v14400_v27  ;;  %v14463_v14 = vrot.slane %v14462_v12, %v10139_v8  ;;  %9412 = vmatpush3.msra.mxu1 %v11609_v50  ;;  %v4791_v45 = vld [vmem:[%s14374_s4 + $0x68] sm:$0xff] }
 0x252   : > { %v12108_v46 = vcombine.high %v12088_v62, %v12088_v62  ;;  %v3849_v20 = vrot.slane %v12092_v11, 1  ;;  %v3850_v28 = vrot.slane %v12088_v62, 1  ;;  %v12123_v49 = vrot.slane %v14464_v38, %v10116_v48  ;;  %9491 = vmatmul.mubr.f32.vlgmr.msra.gmra.mxu0 %v12115_v18  ;;  %9413 = vmatprep.subr.mxu1 %v4792_v9 }
 0x253   : > { %v4373_v23 = vsel %vm2152_vm7, %v14463_v14, 0.0  ;;  %v2966_v21 = vrot.slane %v2952_v59, %v10116_v48  ;;  %v2967_v63 = vcombine.high %v2959_v37, %v2959_v37  ;;  %v3029_v31 = vrot.slane %v2959_v37, 1  ;;  %9553 = vmatpush3.msra.mxu0 %v11614_v42  ;;  %9414 = vmatpush3.msra.mxu1 %v4792_v9 }
 0x254   : > { %v3281_v41 = vmax.f32 %v2673_v60, %v2959_v37  ;;  %v4443_v2 = vrot.slane %v4373_v23, %v10116_v48  ;;  %v4622_v50 = vcombine.low %v11978_v52, %v4436_v33  ;;  %v14466_v12 = vrot.slane %v14465_v29, %v10139_v8  ;;  %v8622_v37 = vld [vmem:[%s14374_s4 + $0x268] sm:$0xff]  ;;  %9554 = vmatprep.subr.mxu0 %v8623_v24 }
 0x255   : > { %v14467_v60 = vcombine.high %v14464_v38, %v14464_v38  ;;  %v12155_v52 = vcombine.high %v2966_v21, %v2966_v21  ;;  %v3030_v33 = vrot.slane %v2967_v63, 1  ;;  %v3031_v23 = vrot.slane %v2966_v21, 1  ;;  %9415 = vmatprep.subr.mxu1 %v4791_v45  ;;  %9555 = vmatpush3.msra.mxu0 %v8623_v24 }
 0x256   : > { %v12143_v14 = vsel %vm2152_vm7, %v14466_v12, 0.0  ;;  %v3282_v29 = vmax.f32 %v2674_v57, %v3029_v31  ;;  %v3283_v12 = vmax.f32 %v2675_v15, %v2967_v63  ;;  %v3285_v39 = vmax.f32 %v12052_v43, %v2966_v21  ;;  %9556 = vmatprep.subr.mxu0 %v8622_v37  ;;  %v4790_v43 = vld [vmem:[%s14374_s4 + $0x60] sm:$0xff]  ;;  %9416 = vmatpush3.msra.mxu1 %v4791_v45 }
 0x257   : > { %v12149_v59 = vrot.slane %v14467_v60, %v10116_v48  ;;  %v3675_v38 = vmax.f32 %v3273_v4, %v3281_v41  ;;  %v4623_v42 = vcombine.low %v4443_v2, %v12123_v49  ;;  %v3284_v9 = vmax.f32 %v2676_v40, %v3030_v33  ;;  %9557 = vmatpush3.msra.mxu0 %v8622_v37  ;;  %v14469_v33 = vld [vmem:[#allocation15_spill] sm:$0xff] }
 0x258   : > { %v3286_v60 = vmax.f32 %v12061_v25, %v3031_v23  ;;  %v3287_v27 = vmax.f32 %v12066_v56, %v12155_v52  ;;  %v3676_v57 = vmax.f32 %v11988_v10, %v3282_v29  ;;  %v3677_v55 = vmax.f32 %v3275_v0, %v3283_v12  ;;  %v8621_v10 = vld [vmem:[%s14374_s4 + $0x260] sm:$0xff]  ;;  %9417 = vmatprep.subr.mxu1 %v4790_v43  ;;  %v4788_v29 = vld [vmem:[%s14374_s4 + $0x50] sm:$0xff] }
 0x259   : > { %v3679_v34 = vmax.f32 %v3277_v3, %v3285_v39  ;;  %v3972_v4 = vmax.f32 %v3675_v38, %v12078_v35  ;;  %v4630_v25 = vrot.slane %v4622_v50, %v10116_v48  ;;  %v3678_v56 = vmax.f32 %v11993_v17, %v3284_v9  ;;  %9558 = vmatprep.subr.mxu0 %v8621_v10 }
 0x25a   : > { %v3680_v15 = vmax.f32 %v11997_v32, %v3286_v60  ;;  %v3681_v54 = vmax.f32 %v14468_v61, %v3287_v27  ;;  %v3973_v0 = vmax.f32 %v3676_v57, %v3848_v1  ;;  %v3974_v5 = vmax.f32 %v3677_v55, %v12092_v11  ;;  %9418 = vmatpush3.msra.mxu1 %v4790_v43  ;;  %v8619_v60 = vld [vmem:[%s14374_s4 + $0x250] sm:$0xff]  ;;  %v14472_v55 = vld [vmem:[#allocation16_spill] sm:$0xff] }
 0x25b   : > { %v3976_v44 = vmax.f32 %v3679_v34, %v12088_v62  ;;  %v4271_v3 = vrot.slane %v3972_v4, %v10139_v8  ;;  %v4637_v35 = vrot.slane %v4623_v42, %v10116_v48  ;;  %v3975_v40 = vmax.f32 %v3678_v56, %v3849_v20  ;;  %v8620_v62 = vld [vmem:[%s14374_s4 + $0x258] sm:$0xff]  ;;  %9559 = vmatpush3.msra.mxu0 %v8621_v10 }
 0x25c   : > { %v3977_v39 = vmax.f32 %v3680_v15, %v3850_v28  ;;  %v3978_v17 = vmax.f32 %v3681_v54, %v12108_v46  ;;  %v4275_v32 = vrot.slane %v3973_v0, %v10139_v8  ;;  %v4279_v11 = vrot.slane %v3974_v5, %v10139_v8  ;;  %9419 = vmatprep.subr.mxu1 %v4789_v22  ;;  %v14474_v15 = vld [vmem:[#allocation17_spill] sm:$0xff] }
 0x25d   : > { %v4287_v1 = vrot.slane %v3976_v44, %v10139_v8  ;;  %v12199_v27 = vcombine.low %v4630_v25, %v4637_v35  ;;  %v4459_v20 = vcombine.high %v12123_v49, %v12123_v49  ;;  %v4283_v28 = vrot.slane %v3975_v40, %v10139_v8  ;;  %9560 = vmatprep.subr.mxu0 %v8620_v62  ;;  %v4787_v54 = vld [vmem:[%s14374_s4 + $0x48] sm:$0xff] }
 0x25e   : > { %v4291_v24 = vrot.slane %v3977_v39, %v10139_v8  ;;  %v12206_v45 = vrot.slane %v3978_v17, %v10139_v8  ;;  %v4342_v21 = vsel %vm2034_vm1, %v4275_v32, %v4271_v3  ;;  %v4460_v49 = vcombine.high %v12149_v59, %v12149_v59  ;;  %9420 = vmatpush3.msra.mxu1 %v4789_v22  ;;  %v14476_v3 = vld [vmem:[#allocation18_spill] sm:$0xff]  ;;  %v14478_v39 = vld [vmem:[#allocation19_spill] sm:$0xff] }
 0x25f   : > { %v4343_v63 = vsel %vm2036_vm2, %v4279_v11, %v4342_v21  ;;  %v4818_v31 = vrot.slane %v12199_v27, 1  ;;  %v5097_v41 = vrot.slane %v12199_v27, 2  ;;  %v4467_v50 = vrot.slane %v12143_v14, %v10116_v48  ;;  %9561 = vmatpush3.msra.mxu0 %v8620_v62  ;;  %9421 = vmatprep.subr.mxu1 %v4788_v29  ;;  %v8618_v32 = vld [vmem:[%s14374_s4 + $0x248] sm:$0xff] }
 0x260   : > { %v4344_v2 = vsel %vm2038_vm3, %v4283_v28, %v4343_v63  ;;  %v4639_v37 = vcombine.low %v4459_v20, %v12149_v59  ;;  %v4475_v23 = vrot.slane %v14469_v33, %v10116_v48  ;;  %v14470_v14 = vrot.slane %v12055_v36, 2  ;;  %9562 = vmatprep.subr.mxu0 %v8619_v60  ;;  %9422 = vmatpush3.msra.mxu1 %v4788_v29  ;;  %v4786_v63 = vld [vmem:[%s14374_s4 + $0x40] sm:$0xff] }
 0x261   : > { %v4345_v12 = vsel %vm2040_vm4, %v4287_v1, %v4344_v2  ;;  %v4819_v38 = vsel %vm4812_vm10, %v4816_v30, %v4818_v31  ;;  %v14471_v42 = vcombine.high %v14469_v33, %v14469_v33  ;;  %v4640_v30 = vcombine.low %v4460_v49, %v4467_v50  ;;  %9563 = vmatpush3.msra.mxu0 %v8619_v60  ;;  %v8617_v49 = vld [vmem:[%s14374_s4 + $0x240] sm:$0xff] }
 0x262   : > { %v12234_v59 = vsel %vm5091_vm11, %v14470_v14, %v5097_v41  ;;  %v12244_v57 = vsel %vm2042_vm5, %v4291_v24, %v4345_v12  ;;  %9399 = vmatprep.mubr.f32.mxu1 %v4819_v38  ;;  %v4647_v43 = vrot.slane %v4639_v37, %v10116_v48  ;;  %v14473_v34 = vrot.slane %v14472_v55, %v10139_v8 }
 0x263   : > { %v4482_v9 = vrot.slane %v14471_v42, %v10116_v48  ;;  %9493 = vmatprep.mubr.f32.mxu0 %v12234_v59  ;;  %v4483_v25 = vcombine.high %v4475_v23, %v4475_v23  ;;  %v4499_v61 = vrot.slane %v14474_v15, %v10116_v48  ;;  %v4654_v0 = vrot.slane %v4640_v30, %v10116_v48 }
 0x264   : > { %v4375_v4 = vsel %vm2152_vm7, %v14473_v34, 0.0  ;;  %v14475_v5 = vcombine.high %v14474_v15, %v14474_v15  ;;  %v14477_v35 = vrot.slane %v14476_v3, %v10139_v8  ;;  %v4523_v17 = vrot.slane %v14478_v39, %v10116_v48  ;;  %9423 = vmatprep.subr.mxu1 %v4787_v54  ;;  %9564 = vmatprep.subr.mxu0 %v8618_v32 }
 0x265   : > { %v4484_v10 = vcombine.high %v4482_v9, %v4482_v9  ;;  %v4491_v56 = vrot.slane %v4375_v4, %v10116_v48  ;;  %v4656_v22 = vcombine.low %v4475_v23, %v4483_v25  ;;  %v4507_v11 = vcombine.high %v4499_v61, %v4499_v61  ;;  %9424 = vmatpush3.msra.mxu1 %v4787_v54 }
 0x266   : > { %v4506_v44 = vrot.slane %v14475_v5, %v10116_v48  ;;  %v4376_v40 = vsel %vm2152_vm7, %v14477_v35, 0.0  ;;  %v12272_v20 = vcombine.low %v4647_v43, %v4654_v0  ;;  %v4531_v21 = vcombine.high %v4523_v17, %v4523_v17  ;;  %9565 = vmatpush3.msra.mxu0 %v8618_v32  ;;  %9425 = vmatprep.subr.mxu1 %v4786_v63  ;;  %v4784_v5 = vld [vmem:[%s14374_s4 + $0x30] sm:$0xff] }
 0x267   : > { %v4657_v62 = vcombine.low %v4482_v9, %v4484_v10  ;;  %v4673_v1 = vcombine.low %v4491_v56, %v4499_v61  ;;  %v4515_v24 = vrot.slane %v4376_v40, %v10116_v48  ;;  %v4664_v2 = vrot.slane %v4656_v22, %v10116_v48  ;;  %9566 = vmatprep.subr.mxu0 %v8617_v49  ;;  %v4785_v9 = vld [vmem:[%s14374_s4 + $0x38] sm:$0xff] }
 0x268   : > { %v4508_v28 = vcombine.high %v4506_v44, %v4506_v44  ;;  %v4674_v37 = vcombine.low %v4507_v11, %v4506_v44  ;;  %v4820_v23 = vrot.slane %v12272_v20, 1  ;;  %v5099_v29 = vrot.slane %v12272_v20, 2  ;;  %9426 = vmatpush3.msra.mxu1 %v4786_v63  ;;  %v8616_v10 = vld [vmem:[%s14374_s4 + $0x238] sm:$0xff]  ;;  %9567 = vmatpush3.msra.mxu0 %v8617_v49 }
 0x269   : > { %v4671_v50 = vrot.slane %v4657_v62, %v10116_v48  ;;  %v4681_v33 = vrot.slane %v4673_v1, %v10116_v48  ;;  %v4691_v38 = vcombine.low %v4523_v17, %v4531_v21  ;;  %v14479_v60 = vrot.slane %v11823_v19, %v10139_v8  ;;  %9427 = vmatprep.subr.mxu1 %v4785_v9  ;;  %v8615_v1 = vld [vmem:[%s14374_s4 + $0x230] sm:$0xff] }
 0x26a   : > { %v4690_v12 = vcombine.low %v4508_v28, %v4515_v24  ;;  %v4688_v42 = vrot.slane %v4674_v37, %v10116_v48  ;;  %v14480_v43 = vcombine.high %v14478_v39, %v14478_v39  ;;  %v4821_v34 = vsel %vm4812_vm10, %v4818_v31, %v4820_v23  ;;  %9568 = vmatprep.subr.mxu0 %v8616_v10  ;;  %v8614_v37 = vld [vmem:[%s14374_s4 + $0x228] sm:$0xff] }
 0x26b   : > { %v12286_v14 = vcombine.low %v4664_v2, %v4671_v50  ;;  %v4377_v30 = vsel %vm2152_vm7, %v14479_v60, 0.0  ;;  %v12306_v4 = vsel %vm5091_vm11, %v5097_v41, %v5099_v29  ;;  %v4705_v19 = vrot.slane %v4691_v38, %v10116_v48  ;;  %9400 = vmatmul.mubr.f32.gmra.mxu1 %v4821_v34  ;;  %9569 = vmatpush3.msra.mxu0 %v8616_v10 }
 0x26c   : > { %v4530_v55 = vrot.slane %v14480_v43, %v10116_v48  ;;  %v4698_v25 = vrot.slane %v4690_v12, %v10116_v48  ;;  %9494 = vmatmul.mubr.f32.gmra.mxu0 %v12306_v4  ;;  %v12316_v15 = vcombine.low %v4681_v33, %v4688_v42  ;;  %v4539_v54 = vrot.slane %v4377_v30, %v10116_v48  ;;  %v4782_v12 = vld [vmem:[%s14374_s4 + $0x20] sm:$0xff] }
 0x26d   : > { %v4822_v56 = vrot.slane %v12286_v14, 1  ;;  %v5101_v31 = vrot.slane %v12286_v14, 2  ;;  %v4547_v0 = vrot.slane %v11916_v7, %v10116_v48  ;;  %9428 = vmatpush3.msra.mxu1 %v4785_v9  ;;  %v14481_v28 = vrot.slane %v12083_v16, %v10139_v8  ;;  %v4783_v16 = vld [vmem:[%s14374_s4 + $0x28] sm:$0xff]  ;;  %9570 = vmatprep.subr.mxu0 %v8615_v1  ;;  %v8613_v30 = vld [vmem:[%s14374_s4 + $0x220] sm:$0xff] }
 0x26e   : > { %v4532_v41 = vcombine.high %v4530_v55, %v4530_v55  ;;  %v12318_v61 = vcombine.low %v4698_v25, %v4705_v19  ;;  %v4824_v35 = vrot.slane %v12316_v15, 1  ;;  %v5103_v40 = vrot.slane %v12316_v15, 2  ;;  %9429 = vmatprep.subr.mxu1 %v4784_v5  ;;  %9571 = vmatpush3.msra.mxu0 %v8615_v1 }
 0x26f   : > { %v4823_v44 = vsel %vm4812_vm10, %v4820_v23, %v4822_v56  ;;  %v12328_v3 = vsel %vm5091_vm11, %v5099_v29, %v5101_v31  ;;  %v4708_v22 = vcombine.low %v4539_v54, %v4547_v0  ;;  %v4378_v24 = vsel %vm2152_vm7, %v14481_v28, 0.0  ;;  %9430 = vmatpush3.msra.mxu1 %v4784_v5  ;;  %9572 = vmatprep.subr.mxu0 %v8614_v37 }
 0x270   : > { %9402 = vmatprep.mubr.f32.mxu1 %v4823_v44  ;;  %9496 = vmatprep.mubr.f32.mxu0 %v12328_v3  ;;  %v4826_v39 = vrot.slane %v12318_v61, 1  ;;  %v5105_v17 = vrot.slane %v12318_v61, 2  ;;  %v4707_v32 = vcombine.low %v4530_v55, %v4532_v41  ;;  %v4825_v62 = vsel %vm4812_vm10, %v4822_v56, %v4824_v35  ;;  %v8612_v41 = vld [vmem:[%s14374_s4 + $0x218] sm:$0xff] }
 0x271   : > { %v12337_v11 = vsel %vm5091_vm11, %v5101_v31, %v5103_v40  ;;  %v14482_v21 = vcombine.high %v11916_v7, %v11916_v7  ;;  %9403 = vmatmul.mubr.f32.gmra.mxu1 %v4825_v62  ;;  %v4722_v7 = vrot.slane %v4708_v22, %v10116_v48  ;;  %v4555_v33 = vcombine.high %v4547_v0, %v4547_v0  ;;  %v4779_v62 = vld [vmem:[%s14374_s4 + $0x8] sm:$0xff] }
 0x272   : > { %9497 = vmatmul.mubr.f32.gmra.mxu0 %v12337_v11  ;;  %v4827_v49 = vsel %vm4812_vm10, %v4824_v35, %v4826_v39  ;;  %v12353_v2 = vsel %vm5091_vm11, %v5103_v40, %v5105_v17  ;;  %v4715_v50 = vrot.slane %v4707_v32, %v10116_v48  ;;  %v4563_v29 = vrot.slane %v4378_v24, %v10116_v48  ;;  %v4780_v40 = vld [vmem:[%s14374_s4 + $0x10] sm:$0xff] }
 0x273   : > { %v4554_v63 = vrot.slane %v14482_v21, %v10116_v48  ;;  %9405 = vmatprep.mubr.f32.mxu1 %v4827_v49  ;;  %9499 = vmatprep.mubr.f32.mxu0 %v12353_v2  ;;  %v4347_v38 = vsel %vm2044_vm6, %v12206_v45, %v12244_v57  ;;  %v8550_v42 = vrot.slane %v11910_v13, 9  ;;  %v4781_v45 = vld [vmem:[%s14374_s4 + $0x18] sm:$0xff]  ;;  %v8558_v25 = vrot.slane %v12043_v6, 9  ;;  %v8610_v49 = vld [vmem:[%s14374_s4 + $0x208] sm:$0xff] }
 0x274   : > { %v12372_v9 = vcombine.low %v4715_v50, %v4722_v7  ;;  %9431 = vmatprep.subr.mxu1 %v4783_v16  ;;  %v4371_v43 = vsel %vm2152_vm7, 0.0, %v4347_v38  ;;  %9573 = vmatpush3.msra.mxu0 %v8614_v37  ;;  %v5412_v1 = vrot.slane %v12059_v51, 3  ;;  %v3028_v28 = vrot.slane %v11982_v53, 1 }
 0x275   : > { %v4556_v23 = vcombine.high %v4554_v63, %v4554_v63  ;;  %v4724_v60 = vcombine.low %v4555_v33, %v4554_v63  ;;  %9432 = vmatpush3.msra.mxu1 %v4783_v16  ;;  %v4564_v57 = vcombine.high %v4371_v43, %v4371_v43  ;;  %v4571_v34 = vrot.slane %v4371_v43, %v10116_v48  ;;  %v8608_v43 = vld [vmem:[%s14374_s4 + $0x1f8] sm:$0xff] }
 0x276   : > { %v4828_v19 = vrot.slane %v12372_v9, 1  ;;  %v5107_v10 = vrot.slane %v12372_v9, 2  ;;  %9433 = vmatprep.subr.mxu1 %v4782_v12  ;;  %9574 = vmatprep.subr.mxu0 %v8613_v30  ;;  %v2672_v5 = vmax.f32 %v11910_v13, %v8550_v42  ;;  %v8611_v13 = vld [vmem:[%s14374_s4 + $0x210] sm:$0xff]  ;;  %v5415_v16 = vrot.slane %v12199_v27, 3 }
 0x277   : > { %v4725_v55 = vcombine.low %v4556_v23, %v4563_v29  ;;  %v4732_v56 = vrot.slane %v4724_v60, %v10116_v48  ;;  %9434 = vmatpush3.msra.mxu1 %v4782_v12  ;;  %v4578_v54 = vrot.slane %v4564_v57, %v10116_v48  ;;  %v4579_v0 = vcombine.high %v4571_v34, %v4571_v34  ;;  %v4778_v29 = vld [vmem:[%s14374_s4] sm:$0xff] }
 0x278   : > { %v4829_v44 = vsel %vm4812_vm10, %v4826_v39, %v4828_v19  ;;  %v12394_v35 = vsel %vm5091_vm11, %v5105_v17, %v5107_v10  ;;  %9575 = vmatpush3.msra.mxu0 %v8613_v30  ;;  %9435 = vmatprep.subr.mxu1 %v4781_v45  ;;  %v2680_v17 = vmax.f32 %v12043_v6, %v8558_v25  ;;  %v5413_v6 = vrot.slane %v12055_v36, 3 }
 0x279   : > { %v4739_v31 = vrot.slane %v4725_v55, %v10116_v48  ;;  %9406 = vmatmul.mubr.f32.gmra.mxu1 %v4829_v44  ;;  %9500 = vmatmul.mubr.f32.gmra.mxu0 %v12394_v35  ;;  %v4580_v22 = vcombine.high %v4578_v54, %v4578_v54  ;;  %v4741_v39 = vcombine.low %v4571_v34, %v4579_v0  ;;  %v3032_v53 = vrot.slane %v12155_v52, 1  ;;  %v8609_v52 = vld [vmem:[%s14374_s4 + $0x200] sm:$0xff] }
 0x27a   : > { %9576 = vmatprep.subr.mxu0 %v8612_v41  ;;  %9436 = vmatpush3.msra.mxu1 %v4781_v45  ;;  %v3280_v7 = vmax.f32 %v2672_v5, %v3028_v28  ;;  %v5417_v12 = vrot.slane %v12272_v20, 3  ;;  %v3851_v42 = vrot.slane %v12108_v46, 1  ;;  %v5587_v60 = vrot.slane %v12055_v36, 4  ;;  %v8656_v46 = vld [vmem:[%s14374_s4 + $0x378] sm:$0xff] }
 0x27b   : > { %v12400_v32 = vcombine.low %v4732_v56, %v4739_v31  ;;  %9577 = vmatpush3.msra.mxu0 %v8612_v41  ;;  %9437 = vmatprep.subr.mxu1 %v4780_v40  ;;  %v4742_v63 = vcombine.low %v4578_v54, %v4580_v22  ;;  %v4749_v50 = vrot.slane %v4741_v39, %v10116_v48  ;;  %v5589_v55 = vrot.slane %v12199_v27, 4 }
 0x27c   : > { %9578 = vmatprep.subr.mxu0 %v8611_v13  ;;  %9438 = vmatpush3.msra.mxu1 %v4780_v40  ;;  %v3288_v38 = vmax.f32 %v2680_v17, %v3032_v53  ;;  %v5591_v45 = vrot.slane %v12272_v20, 4  ;;  %v5593_v57 = vrot.slane %v12286_v14, 4  ;;  %v5595_v25 = vrot.slane %v12316_v15, 4 }
 0x27d   : > { %v4830_v24 = vrot.slane %v12400_v32, 1  ;;  %v5109_v21 = vrot.slane %v12400_v32, 2  ;;  %9579 = vmatpush3.msra.mxu0 %v8611_v13  ;;  %9439 = vmatprep.subr.mxu1 %v4779_v62  ;;  %v4756_v23 = vrot.slane %v4742_v63, %v10116_v48  ;;  %v5414_v41 = vsel %vm5411_vm12, %v5412_v1, %v5413_v6 }
 0x27e   : > { %9580 = vmatprep.subr.mxu0 %v8610_v49  ;;  %9440 = vmatpush3.msra.mxu1 %v4779_v62  ;;  %v3682_v34 = vmax.f32 %v3280_v7, %v3288_v38  ;;  %v12455_v54 = vsel %vm5585_vm13, %v5587_v60, %v5589_v55  ;;  %v12458_v5 = vsel %vm5585_vm13, %v5589_v55, %v5591_v45  ;;  %v5601_v40 = vrot.slane %v12400_v32, 4 }
 0x27f   : > { %v4831_v37 = vsel %vm4812_vm10, %v4828_v19, %v4830_v24  ;;  %v12422_v33 = vsel %vm5091_vm11, %v5107_v10, %v5109_v21  ;;  %v12435_v30 = vcombine.low %v4749_v50, %v4756_v23  ;;  %9581 = vmatpush3.msra.mxu0 %v8610_v49  ;;  %9441 = vmatprep.subr.mxu1 %v4778_v29  ;;  %v5597_v19 = vrot.slane %v12318_v61, 4 }
 0x280   : > { %9408 = vmatprep.mubr.f32.mxu1 %v4831_v37  ;;  %9502 = vmatprep.mubr.f32.mxu0 %v12422_v33  ;;  %v5599_v10 = vrot.slane %v12372_v9, 4  ;;  %v3979_v0 = vmax.f32 %v3682_v34, %v3851_v42  ;;  %v12461_v44 = vsel %vm5585_vm13, %v5591_v45, %v5593_v57  ;;  %v5419_v39 = vrot.slane %v12286_v14, 3  ;;  %v8655_v42 = vld [vmem:[%s14374_s4 + $0x370] sm:$0xff] }
 0x281   : > { %v4832_v56 = vrot.slane %v12435_v30, 1  ;;  %v5111_v31 = vrot.slane %v12435_v30, 2  ;;  %9582 = vmatprep.subr.mxu0 %v8609_v52  ;;  %9442 = vmatpush3.msra.mxu1 %v4778_v29  ;;  %v12472_v17 = vsel %vm5585_vm13, %v5593_v57, %v5595_v25  ;;  %v12477_v1 = vsel %vm5585_vm13, %v5595_v25, %v5597_v19 }
 0x282   : > { %9583 = vmatpush3.msra.mxu0 %v8609_v52  ;;  %9505 = vmatprep.subr.mxu1 %v8608_v43  ;;  %v4299_v62 = vrot.slane %v3979_v0, %v10139_v8  ;;  %v12480_v28 = vsel %vm5585_vm13, %v5597_v19, %v5599_v10  ;;  %v12491_v63 = vsel %vm5585_vm13, %v5599_v10, %v5601_v40  ;;  %v5586_v49 = vrot.slane %v12059_v51, 4  ;;  %v8654_v10 = vld [vmem:[%s14374_s4 + $0x368] sm:$0xff] }
 0x283   : > { %v4833_v13 = vsel %vm4812_vm10, %v4830_v24, %v4832_v56  ;;  %v12468_v22 = vsel %vm5091_vm11, %v5109_v21, %v5111_v31  ;;  %9646 = vmatprep.subr.mxu0 %v8656_v46  ;;  %v5603_v24 = vrot.slane %v12435_v30, 4  ;;  %v5416_v21 = vsel %vm5411_vm12, %v5413_v6, %v5415_v16  ;;  %v8607_v6 = vld [vmem:[%s14374_s4 + $0x1f0] sm:$0xff] }
 0x284   : > { %9409 = vmatmul.mubr.f32.gmra.mxu1 %v4833_v13  ;;  %9503 = vmatmul.mubr.f32.gmra.mxu0 %v12468_v22  ;;  %v6078_v50 = vrot.slane %v12055_v36, 6  ;;  %v4379_v53 = vsel %vm2152_vm7, %v4299_v62, 0.0  ;;  %v6079_v37 = vrot.slane %v12199_v27, 6  ;;  %v6081_v23 = vrot.slane %v12272_v20, 6 }
 0x285   : > { %9584 = vmatprep.mubr.f32.mxu0 %v5414_v41  ;;  %9443 = vmatprep.mubr.f32.mxu1 %v14456_v47  ;;  %v12499_v7 = vsel %vm5585_vm13, %v5601_v40, %v5603_v24  ;;  %v4587_v29 = vrot.slane %v4379_v53, %v10116_v48  ;;  %v12508_v51 = vsel %vm5585_vm13, %v5586_v49, %v5587_v60  ;;  %v6083_v52 = vrot.slane %v12286_v14, 6  ;;  %v8605_v49 = vld [vmem:[%s14374_s4 + $0x1e0] sm:$0xff] }
 0x286   : > { %v6085_v38 = vrot.slane %v12316_v15, 6  ;;  %v12517_v55 = vsel %vm4775_vm9, %v6078_v50, %v6079_v37  ;;  %v12520_v45 = vsel %vm4775_vm9, %v6079_v37, %v6081_v23  ;;  %v6087_v60 = vrot.slane %v12318_v61, 6 }
 0x287   : > { %v6089_v57 = vrot.slane %v12372_v9, 6  ;;  %v4764_v34 = vrot.slane %v4587_v29, %v10116_v48  ;;  %v6091_v19 = vrot.slane %v12400_v32, 6  ;;  %v6093_v0 = vrot.slane %v12435_v30, 6 }
 0x288   : > { %9444 = vmatmul.mubr.msk.f32.vlgmr.msra.gmra.mxu1 %vm8575_vm14, %v12047_v26  ;;  %9585 = vmatmul.mubr.f32.vlgmr.msra.gmra.mxu0 %v5416_v21  ;;  %v12526_v26 = vsel %vm4775_vm9, %v6081_v23, %v6083_v52  ;;  %v12529_v25 = vsel %vm4775_vm9, %v6083_v52, %v6085_v38  ;;  %v12545_v56 = vsel %vm4775_vm9, %v6085_v38, %v6087_v60  ;;  %v5906_v53 = vrot.slane %v12199_v27, 5 }
 0x289   : > { %9506 = vmatpush3.msra.mxu1 %v8608_v43  ;;  %9647 = vmatpush3.msra.mxu0 %v8656_v46  ;;  %v5418_v43 = vsel %vm5411_vm12, %v5415_v16, %v5417_v12  ;;  %v8606_v46 = vld [vmem:[%s14374_s4 + $0x1e8] sm:$0xff]  ;;  %v12548_v41 = vsel %vm4775_vm9, %v6087_v60, %v6089_v57  ;;  %v5421_v16 = vrot.slane %v12316_v15, 3  ;;  %v12553_v40 = vsel %vm4775_vm9, %v4764_v34, 0.0 }
 0x28a   : > { %9446 = vmatprep.mubr.f32.mxu1 %v12055_v36  ;;  %9507 = vmatprep.subr.mxu1 %v8607_v6  ;;  %v12556_v13 = vsel %vm4775_vm9, %v6089_v57, %v6091_v19  ;;  %v5420_v62 = vsel %vm5411_vm12, %v5417_v12, %v5419_v39  ;;  %v12564_v21 = vsel %vm4775_vm9, %v6091_v19, %v6093_v0  ;;  %v6095_v50 = vrot.slane %v12553_v40, 6  ;;  %v8653_v12 = vld [vmem:[%s14374_s4 + $0x360] sm:$0xff] }
 0x28b   : > { %9587 = vmatprep.mubr.f32.mxu0 %v5418_v43  ;;  %9648 = vmatprep.subr.mxu0 %v8655_v42  ;;  %v5908_v37 = vrot.slane %v12272_v20, 5  ;;  %v5910_v23 = vrot.slane %v12286_v14, 5  ;;  %v5912_v29 = vrot.slane %v12316_v15, 5  ;;  %v5422_v52 = vsel %vm5411_vm12, %v5419_v39, %v5421_v16  ;;  %v8652_v39 = vld [vmem:[%s14374_s4 + $0x358] sm:$0xff] }
 0x28c   : > { %9508 = vmatpush3.msra.mxu1 %v8607_v6  ;;  %9649 = vmatpush3.msra.mxu0 %v8655_v42  ;;  %v5905_v6 = vrot.slane %v12055_v36, 5  ;;  %v5423_v38 = vrot.slane %v12318_v61, 3  ;;  %v5914_v42 = vrot.slane %v12318_v61, 5  ;;  %v8604_v36 = vld [vmem:[%s14374_s4 + $0x1d8] sm:$0xff] }
 0x28d   : > { %9509 = vmatprep.subr.mxu1 %v8606_v46  ;;  %9650 = vmatprep.subr.mxu0 %v8654_v10  ;;  %v12600_v57 = vsel %vm5904_vm15, %v5906_v53, %v5908_v37  ;;  %v12603_v34 = vsel %vm5904_vm15, %v5908_v37, %v5910_v23  ;;  %v12607_v19 = vsel %vm5904_vm15, %v5910_v23, %v5912_v29  ;;  %v8603_v23 = vld [vmem:[%s14374_s4 + $0x1d0] sm:$0xff] }
 0x28e   : > { %9447 = vmatmul.mubr.f32.gmra.mxu1 %v12199_v27  ;;  %9588 = vmatmul.mubr.f32.gmra.mxu0 %v5420_v62  ;;  %v12586_v27 = vsel %vm4775_vm9, %v6093_v0, %v6095_v50  ;;  %v12597_v60 = vsel %vm5904_vm15, %v5905_v6, %v5906_v53  ;;  %v12610_v43 = vsel %vm5904_vm15, %v5912_v29, %v5914_v42  ;;  %v5425_v0 = vrot.slane %v12372_v9, 3 }
 0x28f   : > { %9510 = vmatpush3.msra.mxu1 %v8606_v46  ;;  %9651 = vmatpush3.msra.mxu0 %v8654_v10  ;;  %v5918_v46 = vrot.slane %v12400_v32, 5  ;;  %v5920_v10 = vrot.slane %v12435_v30, 5  ;;  %v5922_v53 = vrot.slane %v12553_v40, 5  ;;  %v5424_v37 = vsel %vm5411_vm12, %v5421_v16, %v5423_v38 }
 0x290   : > { %9449 = vmatprep.mubr.f32.mxu1 %v12272_v20  ;;  %9511 = vmatprep.subr.mxu1 %v8605_v49  ;;  %v5916_v20 = vrot.slane %v12372_v9, 5  ;;  %v5427_v29 = vrot.slane %v12400_v32, 3 }
 0x291   : > { %9590 = vmatprep.mubr.f32.mxu0 %v5422_v52  ;;  %9652 = vmatprep.subr.mxu0 %v8653_v12  ;;  %v12636_v16 = vsel %vm5904_vm15, %v5920_v10, %v5922_v53  ;;  %v5426_v52 = vsel %vm5411_vm12, %v5423_v38, %v5425_v0  ;;  %v8601_v38 = vld [vmem:[%s14374_s4 + $0x1c0] sm:$0xff] }
 0x292   : > { %9512 = vmatpush3.msra.mxu1 %v8605_v49  ;;  %9653 = vmatpush3.msra.mxu0 %v8653_v12  ;;  %v12616_v62 = vsel %vm5904_vm15, %v5914_v42, %v5916_v20  ;;  %v12624_v6 = vsel %vm5904_vm15, %v5916_v20, %v5918_v46  ;;  %v12627_v49 = vsel %vm5904_vm15, %v5918_v46, %v5920_v10  ;;  %v8651_v12 = vld [vmem:[%s14374_s4 + $0x350] sm:$0xff]  ;;  %v8650_v42 = vld [vmem:[%s14374_s4 + $0x348] sm:$0xff]  ;;  %v8600_v46 = vld [vmem:[%s14374_s4 + $0x1b8] sm:$0xff]  ;;  %v5431_v10 = vrot.slane %v12553_v40, 3 }
 0x293   : > { %9513 = vmatprep.subr.mxu1 %v8604_v36  ;;  %9654 = vmatprep.subr.mxu0 %v8652_v39 }
 0x294   : > { %9450 = vmatmul.mubr.f32.gmra.mxu1 %v12286_v14  ;;  %9591 = vmatmul.mubr.f32.gmra.mxu0 %v5424_v37  ;;  %v8602_v14 = vld [vmem:[%s14374_s4 + $0x1c8] sm:$0xff]  ;;  %v8647_v37 = vld [vmem:[%s14374_s4 + $0x330] sm:$0xff] }
 0x295   : > { %9514 = vmatpush3.msra.mxu1 %v8604_v36  ;;  %9655 = vmatpush3.msra.mxu0 %v8652_v39  ;;  %v5429_v36 = vrot.slane %v12435_v30, 3  ;;  %v8649_v39 = vld [vmem:[%s14374_s4 + $0x340] sm:$0xff]  ;;  %v8630_v30 = vld [vmem:[%s14374_s4 + $0x2a8] sm:$0xff] }
 0x296   : > { %9452 = vmatprep.mubr.f32.mxu1 %v12316_v15  ;;  %9515 = vmatprep.subr.mxu1 %v8603_v23  ;;  %v5428_v15 = vsel %vm5411_vm12, %v5425_v0, %v5427_v29  ;;  %v8599_v0 = vld [vmem:[%s14374_s4 + $0x1b0] sm:$0xff] }
 0x297   : > { %9593 = vmatprep.mubr.f32.mxu0 %v5426_v52  ;;  %9656 = vmatprep.subr.mxu0 %v8651_v12  ;;  %v5430_v20 = vsel %vm5411_vm12, %v5427_v29, %v5429_v36  ;;  %v8596_v29 = vld [vmem:[%s14374_s4 + $0x198] sm:$0xff] }
 0x298   : > { %9516 = vmatpush3.msra.mxu1 %v8603_v23  ;;  %9657 = vmatpush3.msra.mxu0 %v8651_v12  ;;  %v8598_v23 = vld [vmem:[%s14374_s4 + $0x1a8] sm:$0xff]  ;;  %v8644_v52 = vld [vmem:[%s14374_s4 + $0x318] sm:$0xff] }
 0x299   : > { %9517 = vmatprep.subr.mxu1 %v8602_v14  ;;  %9658 = vmatprep.subr.mxu0 %v8650_v42  ;;  %v8646_v12 = vld [vmem:[%s14374_s4 + $0x328] sm:$0xff] }
 0x29a   : > { %9453 = vmatmul.mubr.f32.gmra.mxu1 %v12318_v61  ;;  %9594 = vmatmul.mubr.f32.gmra.mxu0 %v5428_v15  ;;  %v8648_v61 = vld [vmem:[%s14374_s4 + $0x338] sm:$0xff]  ;;  %v8642_v15 = vld [vmem:[%s14374_s4 + $0x308] sm:$0xff] }
 0x29b   : > { %9518 = vmatpush3.msra.mxu1 %v8602_v14  ;;  %9659 = vmatpush3.msra.mxu0 %v8650_v42  ;;  %v8595_v14 = vld [vmem:[%s14374_s4 + $0x190] sm:$0xff] }
 0x29c   : > { %9455 = vmatprep.mubr.f32.mxu1 %v12372_v9  ;;  %9519 = vmatprep.subr.mxu1 %v8601_v38  ;;  %v5432_v9 = vsel %vm5411_vm12, %v5429_v36, %v5431_v10  ;;  %v8643_v42 = vld [vmem:[%s14374_s4 + $0x310] sm:$0xff]  ;;  %v8594_v36 = vld [vmem:[%s14374_s4 + $0x188] sm:$0xff] }
 0x29d   : > { %9596 = vmatprep.mubr.f32.mxu0 %v5430_v20  ;;  %9660 = vmatprep.subr.mxu0 %v8649_v39  ;;  %v8640_v20 = vld [vmem:[%s14374_s4 + $0x2f8] sm:$0xff]  ;;  %v8687_v10 = vld [vmem:[%s14374_s4 + $0x470] sm:$0xff] }
 0x29e   : > { %9520 = vmatpush3.msra.mxu1 %v8601_v38  ;;  %9661 = vmatpush3.msra.mxu0 %v8649_v39  ;;  %v8593_v38 = vld [vmem:[%s14374_s4 + $0x180] sm:$0xff] }
 0x29f   : > { %9521 = vmatprep.subr.mxu1 %v8600_v46  ;;  %9662 = vmatprep.subr.mxu0 %v8648_v61  ;;  %v8641_v39 = vld [vmem:[%s14374_s4 + $0x300] sm:$0xff] }
 0x2a0   : > { %9456 = vmatmul.mubr.f32.gmra.mxu1 %v12400_v32  ;;  %9597 = vmatmul.mubr.f32.gmra.mxu0 %v5432_v9  ;;  %v8597_v32 = vld [vmem:[%s14374_s4 + $0x1a0] sm:$0xff]  ;;  %v8686_v9 = vld [vmem:[%s14374_s4 + $0x468] sm:$0xff] }
 0x2a1   : > { %9522 = vmatpush3.msra.mxu1 %v8600_v46  ;;  %9663 = vmatpush3.msra.mxu0 %v8648_v61  ;;  %v8688_v46 = vld [vmem:[%s14374_s4 + $0x478] sm:$0xff]  ;;  %v8639_v61 = vld [vmem:[%s14374_s4 + $0x2f0] sm:$0xff] }
 0x2a2   : > { %9523 = vmatprep.subr.mxu1 %v8599_v0  ;;  %9537 = vmatprep.mubr.f32.mxu1 %v12115_v18  ;;  %v8645_v18 = vld [vmem:[%s14374_s4 + $0x320] sm:$0xff] }
 0x2a3   : > { %9664 = vmatprep.subr.mxu0 %v8647_v37  ;;  %9678 = vmatprep.mubr.f32.mxu0 %v12455_v54 }
 0x2a4   : > { %9524 = vmatpush3.msra.mxu1 %v8599_v0  ;;  %9665 = vmatpush3.msra.mxu0 %v8647_v37  ;;  %v8685_v0 = vld [vmem:[%s14374_s4 + $0x460] sm:$0xff]  ;;  %v8684_v37 = vld [vmem:[%s14374_s4 + $0x458] sm:$0xff] }
 0x2a5   : > { %9525 = vmatprep.subr.mxu1 %v8598_v23  ;;  %9666 = vmatprep.subr.mxu0 %v8646_v12 }
 0x2a6   : > { %9526 = vmatpush3.msra.mxu1 %v8598_v23  ;;  %9667 = vmatpush3.msra.mxu0 %v8646_v12  ;;  %v8683_v23 = vld [vmem:[%s14374_s4 + $0x450] sm:$0xff]  ;;  %v8682_v12 = vld [vmem:[%s14374_s4 + $0x448] sm:$0xff] }
 0x2a7   : > { %9527 = vmatprep.subr.mxu1 %v8597_v32  ;;  %9668 = vmatprep.subr.mxu0 %v8645_v18 }
 0x2a8   : > { %9528 = vmatpush3.msra.mxu1 %v8597_v32  ;;  %9669 = vmatpush3.msra.mxu0 %v8645_v18  ;;  %v8633_v32 = vld [vmem:[%s14374_s4 + $0x2c0] sm:$0xff] }
 0x2a9   : > { %9529 = vmatprep.subr.mxu1 %v8596_v29  ;;  %9670 = vmatprep.subr.mxu0 %v8644_v52  ;;  %v8681_v18 = vld [vmem:[%s14374_s4 + $0x440] sm:$0xff] }
 0x2aa   : > { %9530 = vmatpush3.msra.mxu1 %v8596_v29  ;;  %9671 = vmatpush3.msra.mxu0 %v8644_v52  ;;  %v12781_v29 = vrot.slane %v14456_v47, 4  ;;  %v5266_v52 = vrot.slane %v12553_v40, 2 }
 0x2ab   : > { %9531 = vmatprep.subr.mxu1 %v8595_v14  ;;  %9672 = vmatprep.subr.mxu0 %v8643_v42 }
 0x2ac   : > { %9532 = vmatpush3.msra.mxu1 %v8595_v14  ;;  %9673 = vmatpush3.msra.mxu0 %v8643_v42  ;;  %14483 = vst [vmem:[#allocation11_spill] sm:$0xff] %v12781_v29  ;;  %v8632_v14 = vld [vmem:[%s14374_s4 + $0x2b8] sm:$0xff] }
 0x2ad   : > { %9533 = vmatprep.subr.mxu1 %v8594_v36  ;;  %9674 = vmatprep.subr.mxu0 %v8642_v15 }
 0x2ae   : > { %9534 = vmatpush3.msra.mxu1 %v8594_v36  ;;  %9675 = vmatpush3.msra.mxu0 %v8642_v15  ;;  %v8631_v36 = vld [vmem:[%s14374_s4 + $0x2b0] sm:$0xff] }
 0x2af   : > { %9535 = vmatprep.subr.mxu1 %v8593_v38  ;;  %9676 = vmatprep.subr.mxu0 %v8641_v39  ;;  %v8679_v15 = vld [vmem:[%s14374_s4 + $0x430] sm:$0xff] }
 0x2b0   : > { %9536 = vmatpush3.msra.mxu1 %v8593_v38  ;;  %9677 = vmatpush3.msra.mxu0 %v8641_v39  ;;  %v8629_v38 = vld [vmem:[%s14374_s4 + $0x2a0] sm:$0xff]  ;;  %v8676_v39 = vld [vmem:[%s14374_s4 + $0x418] sm:$0xff] }
 0x2b1   : > { %9538 = vmatmul.mubr.f32.vlgmr.msra.gmra.mxu1 %v12234_v59  ;;  %9599 = vmatprep.subr.mxu1 %v8640_v20  ;;  %v8638_v59 = vld [vmem:[%s14374_s4 + $0x2e8] sm:$0xff] }
 0x2b2   : > { %9679 = vmatmul.mubr.f32.vlgmr.msra.gmra.mxu0 %v12458_v5  ;;  %9740 = vmatprep.subr.mxu0 %v8688_v46 }
 0x2b3   : > { %9540 = vmatprep.mubr.f32.mxu1 %v12306_v4  ;;  %9600 = vmatpush3.msra.mxu1 %v8640_v20  ;;  %v8637_v4 = vld [vmem:[%s14374_s4 + $0x2e0] sm:$0xff]  ;;  %v8627_v20 = vld [vmem:[%s14374_s4 + $0x290] sm:$0xff] }
 0x2b4   : > { %9681 = vmatprep.mubr.f32.mxu0 %v12461_v44  ;;  %9741 = vmatpush3.msra.mxu0 %v8688_v46  ;;  %v8675_v46 = vld [vmem:[%s14374_s4 + $0x410] sm:$0xff] }
 0x2b5   : > { %9601 = vmatprep.subr.mxu1 %v8639_v61  ;;  %9742 = vmatprep.subr.mxu0 %v8687_v10 }
 0x2b6   : > { %9602 = vmatpush3.msra.mxu1 %v8639_v61  ;;  %9743 = vmatpush3.msra.mxu0 %v8687_v10  ;;  %v8626_v61 = vld [vmem:[%s14374_s4 + $0x288] sm:$0xff] }
 0x2b7   : > { %9541 = vmatmul.mubr.f32.gmra.mxu1 %v12328_v3  ;;  %9603 = vmatprep.subr.mxu1 %v8638_v59  ;;  %v8636_v3 = vld [vmem:[%s14374_s4 + $0x2d8] sm:$0xff]  ;;  %v8674_v10 = vld [vmem:[%s14374_s4 + $0x408] sm:$0xff] }
 0x2b8   : > { %9682 = vmatmul.mubr.f32.gmra.mxu0 %v12472_v17  ;;  %9744 = vmatprep.subr.mxu0 %v8686_v9 }
 0x2b9   : > { %9543 = vmatprep.mubr.f32.mxu1 %v12337_v11  ;;  %9604 = vmatpush3.msra.mxu1 %v8638_v59  ;;  %v8635_v11 = vld [vmem:[%s14374_s4 + $0x2d0] sm:$0xff]  ;;  %v8625_v59 = vld [vmem:[%s14374_s4 + $0x280] sm:$0xff] }
 0x2ba   : > { %9684 = vmatprep.mubr.f32.mxu0 %v12477_v1  ;;  %9745 = vmatpush3.msra.mxu0 %v8686_v9  ;;  %v8673_v9 = vld [vmem:[%s14374_s4 + $0x400] sm:$0xff] }
 0x2bb   : > { %9605 = vmatprep.subr.mxu1 %v8637_v4  ;;  %9746 = vmatprep.subr.mxu0 %v8685_v0 }
 0x2bc   : > { %9606 = vmatpush3.msra.mxu1 %v8637_v4  ;;  %9747 = vmatpush3.msra.mxu0 %v8685_v0  ;;  %v8672_v4 = vld [vmem:[%s14374_s4 + $0x3f8] sm:$0xff]  ;;  %v8671_v0 = vld [vmem:[%s14374_s4 + $0x3f0] sm:$0xff] }
 0x2bd   : > { %9544 = vmatmul.mubr.f32.gmra.mxu1 %v12353_v2  ;;  %9607 = vmatprep.subr.mxu1 %v8636_v3  ;;  %v8634_v2 = vld [vmem:[%s14374_s4 + $0x2c8] sm:$0xff] }
 0x2be   : > { %9685 = vmatmul.mubr.f32.gmra.mxu0 %v12480_v28  ;;  %9748 = vmatprep.subr.mxu0 %v8684_v37 }
 0x2bf   : > { %9546 = vmatprep.mubr.f32.mxu1 %v12394_v35  ;;  %9608 = vmatpush3.msra.mxu1 %v8636_v3  ;;  %v5605_v35 = vrot.slane %v12553_v40, 4  ;;  %v8670_v3 = vld [vmem:[%s14374_s4 + $0x3e8] sm:$0xff] }
 0x2c0   : > { %9687 = vmatprep.mubr.f32.mxu0 %v12491_v63  ;;  %9749 = vmatpush3.msra.mxu0 %v8684_v37 }
 0x2c1   : > { %9609 = vmatprep.subr.mxu1 %v8635_v11  ;;  %9750 = vmatprep.subr.mxu0 %v8683_v23  ;;  %v5760_v42 = vsel %vm5585_vm13, %v5605_v35, %v12781_v29 }
 0x2c2   : > { %9610 = vmatpush3.msra.mxu1 %v8635_v11  ;;  %9751 = vmatpush3.msra.mxu0 %v8683_v23 }
 0x2c3   : > { %9547 = vmatmul.mubr.f32.gmra.mxu1 %v12422_v33  ;;  %9611 = vmatprep.subr.mxu1 %v8634_v2  ;;  %v12778_v33 = vsel %vm5585_vm13, %v5603_v24, %v5605_v35  ;;  %v5267_v24 = vsel %vm5091_vm11, %v5111_v31, %v5266_v52  ;;  %v8678_v31 = vld [vmem:[%s14374_s4 + $0x428] sm:$0xff] }
 0x2c4   : > { %9688 = vmatmul.mubr.f32.gmra.mxu0 %v12499_v7  ;;  %9752 = vmatprep.subr.mxu0 %v8682_v12 }
 0x2c5   : > { %9549 = vmatprep.mubr.f32.mxu1 %v12468_v22  ;;  %9612 = vmatpush3.msra.mxu1 %v8634_v2  ;;  %v8680_v22 = vld [vmem:[%s14374_s4 + $0x438] sm:$0xff] }
 0x2c6   : > { %9690 = vmatprep.mubr.f32.mxu0 %v12778_v33  ;;  %9753 = vmatpush3.msra.mxu0 %v8682_v12 }
 0x2c7   : > { %9613 = vmatprep.subr.mxu1 %v8633_v32  ;;  %9754 = vmatprep.subr.mxu0 %v8681_v18 }
 0x2c8   : > { %9614 = vmatpush3.msra.mxu1 %v8633_v32  ;;  %9755 = vmatpush3.msra.mxu0 %v8681_v18  ;;  %v6898_v32 = vld [vmem:[%s14377_s7 + $0xf8] sm:$0xff] }
 0x2c9   : > { %9550 = vmatmul.mubr.f32.gmra.mxu1 %v5267_v24  ;;  %9615 = vmatprep.subr.mxu1 %v8632_v14 }
 0x2ca   : > { %9691 = vmatmul.mubr.f32.gmra.mxu0 %v5760_v42  ;;  %9756 = vmatprep.subr.mxu0 %v8680_v22  ;;  %v6897_v42 = vld [vmem:[%s14377_s7 + $0xf0] sm:$0xff] }
 0x2cb   : > { %9616 = vmatpush3.msra.mxu1 %v8632_v14  ;;  %9631 = vmatprep.mubr.f32.mxu1 %v12508_v51  ;;  %v8677_v51 = vld [vmem:[%s14374_s4 + $0x420] sm:$0xff] }
 0x2cc   : > { %9757 = vmatpush3.msra.mxu0 %v8680_v22  ;;  %9772 = vmatprep.mubr.f32.mxu0 %v12517_v55  ;;  %v8628_v55 = vld [vmem:[%s14374_s4 + $0x298] sm:$0xff] }
 0x2cd   : > { %9617 = vmatprep.subr.mxu1 %v8631_v36  ;;  %9758 = vmatprep.subr.mxu0 %v8679_v15 }
 0x2ce   : > { %9618 = vmatpush3.msra.mxu1 %v8631_v36  ;;  %9759 = vmatpush3.msra.mxu0 %v8679_v15  ;;  %v6896_v36 = vld [vmem:[%s14377_s7 + $0xe8] sm:$0xff]  ;;  %v6895_v15 = vld [vmem:[%s14377_s7 + $0xe0] sm:$0xff] }
 0x2cf   : > { %9619 = vmatprep.subr.mxu1 %v8630_v30  ;;  %9760 = vmatprep.subr.mxu0 %v8678_v31 }
 0x2d0   : > { %9620 = vmatpush3.msra.mxu1 %v8630_v30  ;;  %9761 = vmatpush3.msra.mxu0 %v8678_v31  ;;  %v6894_v31 = vld [vmem:[%s14377_s7 + $0xd8] sm:$0xff] }
 0x2d1   : > { %9621 = vmatprep.subr.mxu1 %v8629_v38  ;;  %9762 = vmatprep.subr.mxu0 %v8677_v51 }
 0x2d2   : > { %9622 = vmatpush3.msra.mxu1 %v8629_v38  ;;  %9763 = vmatpush3.msra.mxu0 %v8677_v51 }
 0x2d3   : > { %9623 = vmatprep.subr.mxu1 %v8628_v55  ;;  %9764 = vmatprep.subr.mxu0 %v8676_v39 }
 0x2d4   : > { %9624 = vmatpush3.msra.mxu1 %v8628_v55  ;;  %9765 = vmatpush3.msra.mxu0 %v8676_v39 }
 0x2d5   : > { %9625 = vmatprep.subr.mxu1 %v8627_v20  ;;  %9766 = vmatprep.subr.mxu0 %v8675_v46 }
 0x2d6   : > { %9626 = vmatpush3.msra.mxu1 %v8627_v20  ;;  %9767 = vmatpush3.msra.mxu0 %v8675_v46 }
 0x2d7   : > { %9627 = vmatprep.subr.mxu1 %v8626_v61  ;;  %9768 = vmatprep.subr.mxu0 %v8674_v10 }
 0x2d8   : > { %9628 = vmatpush3.msra.mxu1 %v8626_v61  ;;  %9769 = vmatpush3.msra.mxu0 %v8674_v10  ;;  %v6893_v61 = vld [vmem:[%s14377_s7 + $0xd0] sm:$0xff]  ;;  %v6892_v10 = vld [vmem:[%s14377_s7 + $0xc8] sm:$0xff] }
 0x2d9   : > { %9629 = vmatprep.subr.mxu1 %v8625_v59  ;;  %9770 = vmatprep.subr.mxu0 %v8673_v9 }
 0x2da   : > { %9630 = vmatpush3.msra.mxu1 %v8625_v59  ;;  %9771 = vmatpush3.msra.mxu0 %v8673_v9  ;;  %v6891_v9 = vld [vmem:[%s14377_s7 + $0xc0] sm:$0xff] }
 0x2db   : > { %9632 = vmatmul.mubr.f32.vlgmr.msra.gmra.mxu1 %v12455_v54  ;;  %9693 = vmatprep.subr.mxu1 %v8672_v4  ;;  %v8669_v54 = vld [vmem:[%s14374_s4 + $0x3e0] sm:$0xff] }
 0x2dc   : > { %9773 = vmatmul.mubr.f32.vlgmr.msra.gmra.mxu0 %v12520_v45  ;;  %9634 = vmatprep.mubr.f32.mxu1 %v12458_v5  ;;  %v8668_v5 = vld [vmem:[%s14374_s4 + $0x3d8] sm:$0xff] }
 0x2dd   : > { %9694 = vmatpush3.msra.mxu1 %v8672_v4  ;;  %9775 = vmatprep.mubr.f32.mxu0 %v12526_v26  ;;  %v8664_v45 = vld [vmem:[%s14374_s4 + $0x3b8] sm:$0xff]  ;;  %v8662_v26 = vld [vmem:[%s14374_s4 + $0x3a8] sm:$0xff] }
 0x2de   : > { %9695 = vmatprep.subr.mxu1 %v8671_v0  ;;  %7027 = vmatprep.subr.mxu0 %v6898_v32  ;;  %v6882_v32 = vld [vmem:[%s14377_s7 + $0x78] sm:$0xff] }
 0x2df   : > { %9696 = vmatpush3.msra.mxu1 %v8671_v0  ;;  %7028 = vmatpush1.msra.mxu0 %v6897_v42  ;;  %v6890_v0 = vld [vmem:[%s14377_s7 + $0xb8] sm:$0xff]  ;;  %v8749_v42 = vld [vmem:[%s14377_s7 + $0x1d0] sm:$0xff] }
 0x2e0   : > { %9635 = vmatmul.mubr.f32.gmra.mxu1 %v12461_v44  ;;  %9697 = vmatprep.subr.mxu1 %v8670_v3  ;;  %v8667_v44 = vld [vmem:[%s14374_s4 + $0x3d0] sm:$0xff] }
 0x2e1   : > { %9776 = vmatmul.mubr.f32.gmra.mxu0 %v12529_v25  ;;  %9637 = vmatprep.mubr.f32.mxu1 %v12472_v17  ;;  %v8666_v17 = vld [vmem:[%s14374_s4 + $0x3c8] sm:$0xff]  ;;  %v8661_v25 = vld [vmem:[%s14374_s4 + $0x3a0] sm:$0xff] }
 0x2e2   : > { %9698 = vmatpush3.msra.mxu1 %v8670_v3  ;;  %9778 = vmatprep.mubr.f32.mxu0 %v12545_v56  ;;  %v8660_v56 = vld [vmem:[%s14374_s4 + $0x398] sm:$0xff]  ;;  %v6889_v3 = vld [vmem:[%s14377_s7 + $0xb0] sm:$0xff] }
 0x2e3   : > { %9699 = vmatprep.subr.mxu1 %v8669_v54  ;;  %7029 = vmatprep.subr.mxu0 %v6896_v36  ;;  %v6881_v36 = vld [vmem:[%s14377_s7 + $0x70] sm:$0xff] }
 0x2e4   : > { %9700 = vmatpush3.msra.mxu1 %v8669_v54  ;;  %7030 = vmatpush1.msra.mxu0 %v6895_v15 }
 0x2e5   : > { %9638 = vmatmul.mubr.f32.gmra.mxu1 %v12477_v1  ;;  %9701 = vmatprep.subr.mxu1 %v8668_v5  ;;  %v8665_v1 = vld [vmem:[%s14374_s4 + $0x3c0] sm:$0xff] }
 0x2e6   : > { %9779 = vmatmul.mubr.f32.gmra.mxu0 %v12548_v41  ;;  %9640 = vmatprep.mubr.f32.mxu1 %v12480_v28  ;;  %v12880_v28 = vrot.slane %v14456_v47, 6  ;;  %v8659_v41 = vld [vmem:[%s14374_s4 + $0x390] sm:$0xff] }
 0x2e7   : > { %9702 = vmatpush3.msra.mxu1 %v8668_v5  ;;  %9781 = vmatprep.mubr.f32.mxu0 %v12556_v13  ;;  %v8658_v13 = vld [vmem:[%s14374_s4 + $0x388] sm:$0xff] }
 0x2e8   : > { %9703 = vmatprep.subr.mxu1 %v8667_v44  ;;  %14484 = vst [vmem:[#allocation10_spill] sm:$0xff] %v12880_v28  ;;  %7031 = vmatprep.subr.mxu0 %v6894_v31  ;;  %v6888_v5 = vld [vmem:[%s14377_s7 + $0xa8] sm:$0xff] }
 0x2e9   : > { %9704 = vmatpush3.msra.mxu1 %v8667_v44  ;;  %7032 = vmatpush1.msra.mxu0 %v6893_v61  ;;  %v8748_v31 = vld [vmem:[%s14377_s7 + $0x1c8] sm:$0xff] }
 0x2ea   : > { %9641 = vmatmul.mubr.f32.gmra.mxu1 %v12491_v63  ;;  %9705 = vmatprep.subr.mxu1 %v8666_v17  ;;  %v8663_v63 = vld [vmem:[%s14374_s4 + $0x3b0] sm:$0xff]  ;;  %v6880_v61 = vld [vmem:[%s14377_s7 + $0x68] sm:$0xff] }
 0x2eb   : > { %9782 = vmatmul.mubr.f32.gmra.mxu0 %v12564_v21  ;;  %9643 = vmatprep.mubr.f32.mxu1 %v12499_v7  ;;  %v6098_v7 = vsel %vm4775_vm9, %v6095_v50, %v12880_v28  ;;  %v8657_v21 = vld [vmem:[%s14374_s4 + $0x380] sm:$0xff]  ;;  %v12921_v50 = vrot.slane %v14456_v47, 5 }
 0x2ec   : > { %9706 = vmatpush3.msra.mxu1 %v8666_v17  ;;  %9784 = vmatprep.mubr.f32.mxu0 %v12586_v27  ;;  %v6887_v17 = vld [vmem:[%s14377_s7 + $0xa0] sm:$0xff] }
 0x2ed   : > { %9707 = vmatprep.subr.mxu1 %v8665_v1  ;;  %14485 = vst [vmem:[#allocation9_spill] sm:$0xff] %v12921_v50  ;;  %v5925_v27 = vsel %vm5904_vm15, %v5922_v53, %v12921_v50  ;;  %7033 = vmatprep.subr.mxu0 %v6892_v10 }
 0x2ee   : > { %9708 = vmatpush3.msra.mxu1 %v8665_v1  ;;  %7034 = vmatpush1.msra.mxu0 %v6891_v9  ;;  %v8754_v1 = vld [vmem:[%s14377_s7 + $0x1f8] sm:$0xff]  ;;  %v8747_v9 = vld [vmem:[%s14377_s7 + $0x1c0] sm:$0xff] }
 0x2ef   : > { %9644 = vmatmul.mubr.f32.gmra.mxu1 %v12778_v33  ;;  %9709 = vmatprep.subr.mxu1 %v8664_v45 }
 0x2f0   : > { %9785 = vmatmul.mubr.f32.gmra.mxu0 %v6098_v7  ;;  %9710 = vmatpush3.msra.mxu1 %v8664_v45  ;;  %v6886_v45 = vld [vmem:[%s14377_s7 + $0x98] sm:$0xff]  ;;  %v6885_v7 = vld [vmem:[%s14377_s7 + $0x90] sm:$0xff] }
 0x2f1   : > { %9725 = vmatprep.mubr.f32.mxu1 %v12597_v60  ;;  %9711 = vmatprep.subr.mxu1 %v8663_v63 }
 0x2f2   : > { %9712 = vmatpush3.msra.mxu1 %v8663_v63  ;;  %7091 = vmatprep.mubr.f32.mxu0 %v14456_v47  ;;  %v8753_v63 = vld [vmem:[%s14377_s7 + $0x1f0] sm:$0xff] }
 0x2f3   : > { %9713 = vmatprep.subr.mxu1 %v8662_v26  ;;  %7035 = vmatprep.subr.mxu0 %v6890_v0  ;;  %v6879_v0 = vld [vmem:[%s14377_s7 + $0x60] sm:$0xff] }
 0x2f4   : > { %9714 = vmatpush3.msra.mxu1 %v8662_v26  ;;  %7036 = vmatpush1.msra.mxu0 %v6889_v3  ;;  %v8746_v3 = vld [vmem:[%s14377_s7 + $0x1b8] sm:$0xff] }
 0x2f5   : > { %9715 = vmatprep.subr.mxu1 %v8661_v25  ;;  %7037 = vmatprep.subr.mxu0 %v6888_v5  ;;  %v6878_v5 = vld [vmem:[%s14377_s7 + $0x58] sm:$0xff] }
 0x2f6   : > { %9716 = vmatpush3.msra.mxu1 %v8661_v25  ;;  %7038 = vmatpush1.msra.mxu0 %v6887_v17  ;;  %v8752_v25 = vld [vmem:[%s14377_s7 + $0x1e8] sm:$0xff]  ;;  %v8745_v17 = vld [vmem:[%s14377_s7 + $0x1b0] sm:$0xff] }
 0x2f7   : > { %9717 = vmatprep.subr.mxu1 %v8660_v56  ;;  %7039 = vmatprep.subr.mxu0 %v6886_v45 }
 0x2f8   : > { %9718 = vmatpush3.msra.mxu1 %v8660_v56  ;;  %7040 = vmatpush1.msra.mxu0 %v6885_v7  ;;  %v6884_v56 = vld [vmem:[%s14377_s7 + $0x88] sm:$0xff] }
 0x2f9   : > { %9719 = vmatprep.subr.mxu1 %v8659_v41  ;;  %7041 = vmatprep.subr.mxu0 %v6884_v56  ;;  %v6876_v7 = vld [vmem:[%s14377_s7 + $0x48] sm:$0xff]  ;;  %v8743_v56 = vld [vmem:[%s14377_s7 + $0x1a0] sm:$0xff] }
 0x2fa   : > { %9720 = vmatpush3.msra.mxu1 %v8659_v41 }
 0x2fb   : > { %9721 = vmatprep.subr.mxu1 %v8658_v13 }
 0x2fc   : > { %9722 = vmatpush3.msra.mxu1 %v8658_v13  ;;  %v8751_v13 = vld [vmem:[%s14377_s7 + $0x1e0] sm:$0xff] }
 0x2fd   : > { %9723 = vmatprep.subr.mxu1 %v8657_v21 }
 0x2fe   : > { %9724 = vmatpush3.msra.mxu1 %v8657_v21  ;;  %v6883_v21 = vld [vmem:[%s14377_s7 + $0x80] sm:$0xff] }
 0x2ff   : > { %9726 = vmatmul.mubr.f32.vlgmr.msra.gmra.mxu1 %v12600_v57  ;;  %6944 = vmatprep.subr.mxu1 %v8754_v1  ;;  %v6877_v1 = vld [vmem:[%s14377_s7 + $0x50] sm:$0xff] }
 0x300   : > { %9728 = vmatprep.mubr.f32.mxu1 %v12603_v34  ;;  %6945 = vmatpush1.msra.mxu1 %v8753_v63  ;;  %v8744_v63 = vld [vmem:[%s14377_s7 + $0x1a8] sm:$0xff] }
 0x301   : > { %6946 = vmatprep.subr.mxu1 %v8752_v25  ;;  %7042 = vmatpush1.msra.mxu0 %v6883_v21  ;;  %v8742_v21 = vld [vmem:[%s14377_s7 + $0x198] sm:$0xff] }
 0x302   : > { %6947 = vmatpush1.msra.mxu1 %v8751_v13  ;;  %7043 = vmatprep.subr.mxu0 %v6882_v32  ;;  %v6875_v13 = vld [vmem:[%s14377_s7 + $0x40] sm:$0xff]  ;;  %v8741_v32 = vld [vmem:[%s14377_s7 + $0x190] sm:$0xff] }
 0x303   : > { %9729 = vmatmul.mubr.f32.gmra.mxu1 %v12607_v19  ;;  %7044 = vmatpush1.msra.mxu0 %v6881_v36 }
 0x304   : > { %9731 = vmatprep.mubr.f32.mxu1 %v12610_v43  ;;  %7045 = vmatprep.subr.mxu0 %v6880_v61  ;;  %v6872_v61 = vld [vmem:[%s14377_s7 + $0x28] sm:$0xff] }
 0x305   : > { %7046 = vmatpush1.msra.mxu0 %v6879_v0 }
 0x306   : > { %7047 = vmatprep.subr.mxu0 %v6878_v5  ;;  %v8738_v5 = vld [vmem:[%s14377_s7 + $0x178] sm:$0xff] }
 0x307   : > { %9732 = vmatmul.mubr.f32.gmra.mxu1 %v12616_v62  ;;  %7048 = vmatpush1.msra.mxu0 %v6877_v1  ;;  %v8737_v1 = vld [vmem:[%s14377_s7 + $0x170] sm:$0xff] }
 0x308   : > { %9734 = vmatprep.mubr.f32.mxu1 %v12624_v6  ;;  %7049 = vmatprep.subr.mxu0 %v6876_v7  ;;  %v8736_v7 = vld [vmem:[%s14377_s7 + $0x168] sm:$0xff] }
 0x309   : > { %7050 = vmatpush1.msra.mxu0 %v6875_v13  ;;  %v8735_v13 = vld [vmem:[%s14377_s7 + $0x160] sm:$0xff] }
 0x30b   : > { %9735 = vmatmul.mubr.f32.gmra.mxu1 %v12627_v49 }
 0x30c   : > { %9737 = vmatprep.mubr.f32.mxu1 %v12636_v16 }
 0x30f   : > { %9738 = vmatmul.mubr.f32.gmra.mxu1 %v5925_v27  ;;  %v8750_v27 = vld [vmem:[%s14377_s7 + $0x1d8] sm:$0xff] }
 0x310   : > { %7008 = vmatprep.mubr.f32.mxu1 %v14456_v47  ;;  %v12930_v60 = vpop.f32.mrf.mxu1  ;;  %6948 = vmatprep.subr.mxu1 %v8750_v27  ;;  %v6874_v27 = vld [vmem:[%s14377_s7 + $0x38] sm:$0xff] }
 0x311   : > { %6949 = vmatpush1.msra.mxu1 %v8749_v42  ;;  %7051 = vmatprep.subr.mxu0 %v6874_v27  ;;  %v6873_v42 = vld [vmem:[%s14377_s7 + $0x30] sm:$0xff] }
 0x312   : > { %v12932_v57 = vpop.f32.mrf.mxu1  ;;  %v12950_v16 = vpop.f32.mrf.mxu0  ;;  %6950 = vmatprep.subr.mxu1 %v8748_v31  ;;  %7052 = vmatpush1.msra.mxu0 %v6873_v42  ;;  %v8740_v31 = vld [vmem:[%s14377_s7 + $0x188] sm:$0xff]  ;;  %v8820_v42 = vld [vmem:[%s14377_s7 + $0x3f8] sm:$0xff] }
 0x313   : > { %6951 = vmatpush1.msra.mxu1 %v8747_v9  ;;  %v8739_v9 = vld [vmem:[%s14377_s7 + $0x180] sm:$0xff]  ;;  %7053 = vmatprep.subr.mxu0 %v6872_v61  ;;  %v8733_v61 = vld [vmem:[%s14377_s7 + $0x150] sm:$0xff] }
 0x314   : > { %v12954_v11 = vpop.f32.mrf.mxu0  ;;  %6952 = vmatprep.subr.mxu1 %v8746_v3  ;;  %v6871_v3 = vld [vmem:[%s14377_s7 + $0x20] sm:$0xff] }
 0x315   : > { %6953 = vmatpush1.msra.mxu1 %v8745_v17  ;;  %v6870_v17 = vld [vmem:[%s14377_s7 + $0x18] sm:$0xff]  ;;  %7054 = vmatpush1.msra.mxu0 %v6871_v3  ;;  %v8731_v3 = vld [vmem:[%s14377_s7 + $0x140] sm:$0xff] }
 0x316   : > { %6954 = vmatprep.subr.mxu1 %v8744_v63  ;;  %v6869_v63 = vld [vmem:[%s14377_s7 + $0x10] sm:$0xff]  ;;  %7055 = vmatprep.subr.mxu0 %v6870_v17  ;;  %v8730_v17 = vld [vmem:[%s14377_s7 + $0x138] sm:$0xff] }
 0x317   : > { %6955 = vmatpush1.msra.mxu1 %v8743_v56  ;;  %v6868_v56 = vld [vmem:[%s14377_s7 + $0x8] sm:$0xff]  ;;  %7056 = vmatpush1.msra.mxu0 %v6869_v63  ;;  %v8729_v63 = vld [vmem:[%s14377_s7 + $0x130] sm:$0xff] }
 0x318   : > { %6956 = vmatprep.subr.mxu1 %v8742_v21  ;;  %v6867_v21 = vld [vmem:[%s14377_s7] sm:$0xff]  ;;  %7057 = vmatprep.subr.mxu0 %v6868_v56 }
 0x319   : > { %6957 = vmatpush1.msra.mxu1 %v8741_v32  ;;  %v8734_v32 = vld [vmem:[%s14377_s7 + $0x158] sm:$0xff]  ;;  %7058 = vmatpush1.msra.mxu0 %v6867_v21  ;;  %v8727_v56 = vld [vmem:[%s14377_s7 + $0x120] sm:$0xff] }
 0x31a   : > { %6958 = vmatprep.subr.mxu1 %v8740_v31  ;;  %7285 = vmatprep.subr.mxu0 %v8820_v42  ;;  %v8726_v21 = vld [vmem:[%s14377_s7 + $0x118] sm:$0xff]  ;;  %v8725_v42 = vld [vmem:[%s14377_s7 + $0x110] sm:$0xff] }
 0x31b   : > { %6959 = vmatpush1.msra.mxu1 %v8739_v9  ;;  %v8732_v9 = vld [vmem:[%s14377_s7 + $0x148] sm:$0xff] }
 0x31c   : > { %6960 = vmatprep.subr.mxu1 %v8738_v5 }
 0x31d   : > { %6961 = vmatpush1.msra.mxu1 %v8737_v1 }
 0x31e   : > { %6962 = vmatprep.subr.mxu1 %v8736_v7  ;;  %v8728_v7 = vld [vmem:[%s14377_s7 + $0x128] sm:$0xff] }
 0x31f   : > { %6963 = vmatpush1.msra.mxu1 %v8735_v13 }
 0x320   : > { %6964 = vmatprep.subr.mxu1 %v8734_v32 }
 0x321   : > { %6965 = vmatpush1.msra.mxu1 %v8733_v61  ;;  %v8724_v61 = vld [vmem:[%s14377_s7 + $0x108] sm:$0xff] }
 0x322   : > { %6966 = vmatprep.subr.mxu1 %v8732_v9 }
 0x323   : > { %6967 = vmatpush1.msra.mxu1 %v8731_v3  ;;  %v8723_v3 = vld [vmem:[%s14377_s7 + $0x100] sm:$0xff] }
 0x324   : > { %6968 = vmatprep.subr.mxu1 %v8730_v17 }
 0x325   : > { %6969 = vmatpush1.msra.mxu1 %v8729_v63  ;;  %v8788_v63 = vld [vmem:[%s14377_s7 + $0x2f8] sm:$0xff] }
 0x326   : > { %6970 = vmatprep.subr.mxu1 %v8728_v7 }
 0x327   : > { %6971 = vmatpush1.msra.mxu1 %v8727_v56 }
 0x328   : > { %6972 = vmatprep.subr.mxu1 %v8726_v21 }
 0x329   : > { %6973 = vmatpush1.msra.mxu1 %v8725_v42 }
 0x32a   : > { %6974 = vmatprep.subr.mxu1 %v8724_v61 }
 0x32b   : > { %v12934_v34 = vpop.f32.mrf.mxu1  ;;  %6975 = vmatpush1.msra.mxu1 %v8723_v3 }
 0x32c   : > { %v12958_v2 = vpop.f32.mrf.mxu0  ;;  %7153 = vmatprep.subr.mxu1 %v8788_v63 }
 0x32d   : > { %v12936_v19 = vpop.f32.mrf.mxu1 }
 0x32e   : > { %v12962_v35 = vpop.f32.mrf.mxu0 }
 0x331   : > { %v12938_v43 = vpop.f32.mrf.mxu1 }
 0x332   : > { %v12967_v18 = vpop.f32.mrf.mxu0 }
 0x333   : > { %v12940_v62 = vpop.f32.mrf.mxu1 }
 0x334   : > { %v12971_v52 = vpop.f32.mrf.mxu0 }
 0x339   : > { %v12942_v6 = vpop.f32.mrf.mxu1  ;;  %v12975_v22 = vpop.f32.mrf.mxu0 }
 0x33b   : > { %v12944_v40 = vpop.f32.mrf.mxu1  ;;  %v12988_v30 = vpop.f32.mrf.mxu0 }
 0x344   : > { %v12946_v53 = vpop.f32.mrf.mxu1  ;;  %v12993_v38 = vpop.f32.mrf.mxu0 }
 0x346   : > { %v12948_v49 = vpop.f32.mrf.mxu1  ;;  %v12997_v55 = vpop.f32.mrf.mxu0 }
 0x348   : > { %v12952_v37 = vpop.f32.mrf.mxu1  ;;  %v13001_v20 = vpop.f32.mrf.mxu0 }
 0x349   : > { %v5031_v3 = vadd.f32 %v12952_v37, %v12930_v60 }
 0x34a   : > { %v12956_v23 = vpop.f32.mrf.mxu1  ;;  %v13011_v59 = vpop.f32.mrf.mxu0 }
 0x34b   : > { %v5026_v63 = vadd.f32 %v12956_v23, %v12932_v57 }
 0x34e   : > { %v12960_v12 = vpop.f32.mrf.mxu1  ;;  %v13029_v44 = vpop.f32.mrf.mxu0 }
 0x350   : > { %v12969_v33 = vpop.f32.mrf.mxu1  ;;  %v13054_v41 = vpop.f32.mrf.mxu0 }
 0x354   : > { %v12973_v14 = vpop.f32.mrf.mxu1  ;;  %v13082_v10 = vpop.f32.mrf.mxu0 }
 0x356   : > { %v12977_v24 = vpop.f32.mrf.mxu1  ;;  %v13110_v25 = vpop.f32.mrf.mxu0 }
 0x35a   : > { %v12995_v51 = vpop.f32.mrf.mxu1  ;;  %v13141_v0 = vpop.f32.mrf.mxu0 }
 0x35c   : > { %v12999_v39 = vpop.f32.mrf.mxu1  ;;  %v13178_v31 = vpop.f32.mrf.mxu0 }
 0x35d   : > { %14486 = vst [vmem:[#allocation12_spill] sm:$0xff] %v13178_v31 }
 0x360   : > { %v13003_v46 = vpop.f32.mrf.mxu1  ;;  %v13194_v1 = vpop.f32.mrf.mxu0 }
 0x361   : > { %14487 = vst [vmem:[#allocation13_spill] sm:$0xff] %v13194_v1 }
 0x362   : > { %v13016_v4 = vpop.f32.mrf.mxu1  ;;  %v13210_v32 = vpop.f32.mrf.mxu0 }
 0x363   : > { %14488 = vst [vmem:[#allocation14_spill] sm:$0xff] %v13210_v32 }
 0x371   : > { %v13024_v54 = vpop.f32.mrf.mxu1 }
 0x372   : > { %v9680_v9 = vpop.f32.mrf.mxu0 }
 0x373   : > { %v13046_v26 = vpop.f32.mrf.mxu1 }
 0x374   : > { %v5828_v7 = vpop.f32.mrf.mxu0 }
 0x377   : > { %v13074_v15 = vpop.f32.mrf.mxu1 }
 0x378   : > { %v13228_v28 = vpop.f32.mrf.mxu0 }
 0x379   : > { %v13102_v45 = vpop.f32.mrf.mxu1 }
 0x37a   : > { %v13230_v29 = vpop.f32.mrf.mxu0 }
 0x37b   : > { %14489 = vst [vmem:[#allocation15_spill] sm:$0xff] %v13230_v29  ;;  %v5238_v29 = vadd.f32 %v12954_v11, %v5026_v63 }
 0x37d   : > { %v13130_v36 = vpop.f32.mrf.mxu1  ;;  %v5384_v57 = vadd.f32 %v13046_v26, %v5238_v29 }
 0x37e   : > { %v13232_v47 = vpop.f32.mrf.mxu0 }
 0x37f   : > { %v13170_v27 = vpop.f32.mrf.mxu1  ;;  %14490 = vst [vmem:[#allocation16_spill] sm:$0xff] %v13232_v47  ;;  %v5041_v47 = vadd.f32 %v12960_v12, %v12934_v34  ;;  %v5051_v34 = vadd.f32 %v12973_v14, %v12938_v43  ;;  %v5558_v14 = vadd.f32 %v13011_v59, %v5384_v57 }
 0x380   : > { %v13234_v8 = vpop.f32.mrf.mxu0 }
 0x381   : > { %14491 = vst [vmem:[#allocation17_spill] sm:$0xff] %v13234_v8  ;;  %v5239_v8 = vadd.f32 %v12950_v16, %v5031_v3  ;;  %v5241_v23 = vadd.f32 %v12958_v2, %v5041_v47  ;;  %v5046_v16 = vadd.f32 %v12977_v24, %v12940_v62  ;;  %v5056_v62 = vadd.f32 %v12999_v39, %v12944_v40 }
 0x382   : > { %v14494_v57 = vld [vmem:[#allocation15_spill] sm:$0xff] }
 0x383   : > { %v13189_v5 = vpop.f32.mrf.mxu1  ;;  %v5242_v24 = vadd.f32 %v12971_v52, %v5046_v16 }
 0x384   : > { %v13236_v32 = vpop.f32.mrf.mxu0 }
 0x385   : > { %v13205_v13 = vpop.f32.mrf.mxu1  ;;  %14492 = vst [vmem:[#allocation18_spill] sm:$0xff] %v13236_v32  ;;  %v5036_v32 = vadd.f32 %v12969_v33, %v12936_v19  ;;  %v5387_v19 = vadd.f32 %v13074_v15, %v5241_v23  ;;  %v5061_v33 = vadd.f32 %v12995_v51, %v12942_v6  ;;  %v5071_v6 = vadd.f32 %v13003_v46, %v12946_v53 }
 0x386   : > { %v13244_v1 = vpop.f32.mrf.mxu0  ;;  %v5066_v51 = vadd.f32 %v13016_v4, %v12948_v49  ;;  %v5388_v40 = vadd.f32 %v13170_v27, %v5242_v24 }
 0x387   : > { %v5245_v59 = vadd.f32 %v12975_v22, %v5061_v33  ;;  %v5247_v22 = vadd.f32 %v12993_v38, %v5071_v6 }
 0x389   : > { %v13221_v17 = vpop.f32.mrf.mxu1 }
 0x38a   : > { %v13255_v60 = vpop.f32.mrf.mxu0 }
 0x38b   : > { %v13226_v56 = vpop.f32.mrf.mxu1 }
 0x38c   : > { %v13267_v12 = vpop.f32.mrf.mxu0 }
 0x39b   : > { %v9633_v58 = vpop.f32.mrf.mxu1 }
 0x39c   : > { %v9774_v43 = vpop.f32.mrf.mxu0 }
 0x39d   : > { %v5683_v21 = vpop.f32.mrf.mxu1 }
 0x39e   : > { %v6175_v39 = vpop.f32.mrf.mxu0 }
 0x3a0   : > { %v9636_v50 = vpop.f32.mrf.mxu1 }
 0x3a2   : > { %v5693_v42 = vpop.f32.mrf.mxu1 }
 0x3a5   : > { %v9639_v48 = vpop.f32.mrf.mxu1 }
 0x3a7   : > { %v13238_v61 = vpop.f32.mrf.mxu1 }
 0x3a8   : > { %14493 = vst [vmem:[#allocation19_spill] sm:$0xff] %v13238_v61  ;;  %v5385_v61 = vadd.f32 %v13024_v54, %v5239_v8  ;;  %v5240_v8 = vadd.f32 %v12962_v35, %v5036_v32  ;;  %v5243_v35 = vadd.f32 %v12967_v18, %v5051_v34  ;;  %v5732_v54 = vadd.f32 %v5683_v21, %v5558_v14  ;;  %v14498_v14 = vld [vmem:[#allocation14_spill] sm:$0xff] }
 0x3aa   : > { %v13246_v31 = vpop.f32.mrf.mxu1  ;;  %v5559_v11 = vadd.f32 %v13001_v20, %v5385_v61  ;;  %v5386_v47 = vadd.f32 %v13102_v45, %v5240_v8  ;;  %v5561_v20 = vadd.f32 %v13029_v44, %v5387_v19  ;;  %v5391_v44 = vadd.f32 %v13189_v5, %v5245_v59  ;;  %v9777_v5 = vpop.f32.mrf.mxu0 }
 0x3ab   : > { %v5244_v45 = vadd.f32 %v12988_v30, %v5056_v62  ;;  %v5877_v49 = vadd.f32 %v5828_v7, %v5732_v54  ;;  %v5562_v30 = vadd.f32 %v13110_v25, %v5388_v40  ;;  %v14500_v40 = vld [vmem:[#allocation17_spill] sm:$0xff] }
 0x3ac   : > { %v13257_v37 = vpop.f32.mrf.mxu1  ;;  %v5733_v2 = vadd.f32 %v9633_v58, %v5559_v11  ;;  %v5389_v58 = vadd.f32 %v13130_v36, %v5243_v35  ;;  %v5735_v18 = vadd.f32 %v9636_v50, %v5561_v20  ;;  %v5560_v52 = vadd.f32 %v13054_v41, %v5386_v47  ;;  %v13298_v50 = vld [vmem:[%s14375_s5] ss:$0 sm:$0xff] }
 0x3ad   : > { %v5390_v4 = vadd.f32 %v13205_v13, %v5244_v45  ;;  %v5246_v36 = vadd.f32 %v12997_v55, %v5066_v51  ;;  %v5393_v13 = vadd.f32 %v13221_v17, %v5247_v22  ;;  %v14499_v35 = vld [vmem:[#allocation16_spill] sm:$0xff] }
 0x3ae   : > { %v5878_v15 = vadd.f32 %v9680_v9, %v5733_v2  ;;  %v5734_v46 = vadd.f32 %v5693_v42, %v5560_v52  ;;  %v5563_v27 = vadd.f32 %v13082_v10, %v5389_v58  ;;  %v5880_v7 = vadd.f32 %v13228_v28, %v5735_v18  ;;  %v13308_v42 = vld [vmem:[%s14376_s6] ss:$0 sm:$0xff]  ;;  %v14497_v2 = vld [vmem:[#allocation13_spill] sm:$0xff]  ;;  %v14501_v18 = vld [vmem:[#allocation18_spill] sm:$0xff] }
 0x3af   : > { %v13272_v29 = vpop.f32.mrf.mxu1  ;;  %v5392_v38 = vadd.f32 %v13226_v56, %v5246_v36  ;;  %v5565_v10 = vadd.f32 %v13141_v0, %v5391_v44  ;;  %v14495_v28 = vld [vmem:[#allocation19_spill] sm:$0xff]  ;;  %v14496_v56 = vld [vmem:[#allocation12_spill] sm:$0xff]  ;;  %v6185_v0 = vpop.f32.mrf.mxu0  ;;  %v14502_v44 = vld [vmem:[#allocation6_spill] sm:$0xff] }
 0x3b0   : > { %v5737_v55 = vadd.f32 %v9639_v48, %v5563_v27  ;;  %v5879_v23 = vadd.f32 %v14494_v57, %v5734_v46  ;;  %v5736_v34 = vadd.f32 %v14495_v28, %v5562_v30  ;;  %v5564_v48 = vadd.f32 %v14496_v56, %v5390_v4 }
 0x3b1   : > { %v5723_v26 = vpop.f32.mrf.mxu1  ;;  %v5739_v17 = vadd.f32 %v13246_v31, %v5565_v10  ;;  %v5566_v62 = vadd.f32 %v14498_v14, %v5392_v38  ;;  %v9780_v52 = vpop.f32.mrf.mxu0 }
 0x3b2   : > { %v5738_v47 = vadd.f32 %v13257_v37, %v5564_v48  ;;  %v5882_v24 = vadd.f32 %v14499_v35, %v5737_v55 }
 0x3b3   : > { %v13326_v37 = vadd.f32 %v14501_v18, %v5739_v17 }
 0x3bf   : > { %v9727_v53 = vpop.f32.mrf.mxu1 }
 0x3c0   : > { %v6052_v32 = vadd.f32 %v9727_v53, %v5878_v15 }
 0x3c1   : > { %v6002_v41 = vpop.f32.mrf.mxu1 }
 0x3c2   : > { %v6225_v9 = vadd.f32 %v9774_v43, %v6052_v32  ;;  %v6051_v21 = vadd.f32 %v6002_v41, %v5877_v49  ;;  %v5567_v43 = vadd.f32 %v14497_v2, %v5393_v13  ;;  %v13330_v49 = vadd.f32 %v5723_v26, %v5566_v62 }
 0x3c3   : > { %v9730_v61 = vpop.f32.mrf.mxu1 }
 0x3c4   : > { %v6242_v3 = vmul.f32 %v13298_v50, %v6225_v9  ;;  %v6224_v25 = vadd.f32 %v6175_v39, %v6051_v21  ;;  %v6054_v63 = vadd.f32 %v9730_v61, %v5880_v7  ;;  %v5741_v58 = vadd.f32 %v13272_v29, %v5567_v43 }
 0x3c5   : > { %v6012_v16 = vpop.f32.mrf.mxu1  ;;  %v5881_v39 = vadd.f32 %v14500_v40, %v5736_v34  ;;  %v13334_v29 = vadd.f32 %v13244_v1, %v5738_v47 }
 0x3c6   : > { %v6259_v19 = vadd.f32 %v13308_v42, %v6242_v3  ;;  %v6241_v8 = vmul.f32 %v13298_v50, %v6224_v25  ;;  %v6227_v11 = vadd.f32 %v9777_v5, %v6054_v63  ;;  %v6053_v33 = vadd.f32 %v6012_v16, %v5879_v23 }
 0x3c7   : > { %v9733_v54 = vpop.f32.mrf.mxu1  ;;  %v13340_v7 = vadd.f32 %v13255_v60, %v5741_v58 }
 0x3c8   : > { %v6269_v31 = vmax.f32 %v6259_v19, 0.0  ;;  %v6258_v20 = vadd.f32 %v13308_v42, %v6241_v8  ;;  %v6244_v6 = vmul.f32 %v13298_v50, %v6227_v11  ;;  %v6226_v51 = vadd.f32 %v6185_v0, %v6053_v33  ;;  %v6195_v19 = vpop.f32.mrf.mxu0 }
 0x3c9   : > { %v6056_v59 = vadd.f32 %v9733_v54, %v5882_v24  ;;  %v6022_v32 = vpop.f32.mrf.mxu1 }
 0x3ca   : > { %v6305_v15 = vcombine.high %v6269_v31, %v6269_v31  ;;  %v6312_v45 = vrot.slane %v6269_v31, %v14502_v44  ;;  %v6268_v53 = vmax.f32 %v6258_v20, 0.0  ;;  %v6261_v46 = vadd.f32 %v13308_v42, %v6244_v6  ;;  %v14503_v6 = vld [vmem:[#allocation8_spill] sm:$0xff] }
 0x3cb   : > { %v6243_v4 = vmul.f32 %v13298_v50, %v6226_v51  ;;  %v6229_v22 = vadd.f32 %v9780_v52, %v6056_v59  ;;  %v6055_v21 = vadd.f32 %v6022_v32, %v5881_v39  ;;  %v9736_v20 = vpop.f32.mrf.mxu1 }
 0x3cc   : > { %v6319_v36 = vrot.slane %v6305_v15, %v14502_v44  ;;  %v6320_v27 = vcombine.high %v6312_v45, %v6312_v45  ;;  %v6288_v41 = vcombine.high %v6268_v53, %v6268_v53  ;;  %v6295_v5 = vrot.slane %v6268_v53, %v14502_v44 }
 0x3cd   : > { %v6271_v30 = vmax.f32 %v6261_v46, 0.0  ;;  %v6260_v9 = vadd.f32 %v13308_v42, %v6243_v4  ;;  %v6246_v23 = vmul.f32 %v13298_v50, %v6229_v22  ;;  %v6228_v62 = vadd.f32 %v6195_v19, %v6055_v21 }
 0x3ce   : > { %v6321_v26 = vcombine.high %v6319_v36, %v6319_v36  ;;  %v8695_v13 = vrot.slane %v6320_v27, 9  ;;  %v8696_v38 = vrot.slane %v6319_v36, 9  ;;  %v6302_v55 = vrot.slane %v6288_v41, %v14502_v44  ;;  %v6032_v41 = vpop.f32.mrf.mxu1 }
 0x3cf   : > { %v6303_v1 = vcombine.high %v6295_v5, %v6295_v5  ;;  %v8691_v10 = vrot.slane %v6295_v5, 9  ;;  %v6338_v61 = vcombine.high %v6271_v30, %v6271_v30  ;;  %v6345_v3 = vrot.slane %v6271_v30, %v14502_v44 }
 0x3d0   : > { %v8697_v25 = vrot.slane %v6321_v26, 9  ;;  %v6586_v63 = vmax.f32 %v6320_v27, %v8695_v13  ;;  %v6587_v57 = vmax.f32 %v6319_v36, %v8696_v38  ;;  %v8693_v34 = vrot.slane %v6302_v55, 9 }
 0x3d1   : > { %v8692_v28 = vrot.slane %v6303_v1, 9  ;;  %v6582_v17 = vmax.f32 %v6295_v5, %v8691_v10  ;;  %v6352_v60 = vrot.slane %v6338_v61, %v14502_v44  ;;  %v6304_v48 = vcombine.high %v6302_v55, %v6302_v55  ;;  %v9783_v5 = vpop.f32.mrf.mxu0 }
 0x3d2   : > { %v6588_v56 = vmax.f32 %v6321_v26, %v8697_v25  ;;  %v6353_v16 = vcombine.high %v6345_v3, %v6345_v3  ;;  %v6270_v0 = vmax.f32 %v6260_v9, 0.0  ;;  %v6584_v11 = vmax.f32 %v6302_v55, %v8693_v34 }
 0x3d3   : > { %v6583_v8 = vmax.f32 %v6303_v1, %v8692_v28  ;;  %v6614_v33 = vmax.f32 %v6582_v17, %v6586_v63  ;;  %v6354_v47 = vcombine.high %v6352_v60, %v6352_v60  ;;  %v8701_v2 = vrot.slane %v6345_v3, 9  ;;  %v6205_v34 = vpop.f32.mrf.mxu0 }
 0x3d4   : > { %v6322_v43 = vcombine.high %v6270_v0, %v6270_v0  ;;  %v6329_v14 = vrot.slane %v6270_v0, %v14502_v44  ;;  %v6616_v24 = vmax.f32 %v6584_v11, %v6588_v56  ;;  %v8702_v54 = vrot.slane %v6353_v16, 9  ;;  %v9739_v11 = vpop.f32.mrf.mxu1 }
 0x3d5   : > { %v6615_v35 = vmax.f32 %v6583_v8, %v6587_v57  ;;  %v8703_v31 = vrot.slane %v6354_v47, 9  ;;  %v6649_v51 = vrot.slane %v6614_v33, %v14503_v6  ;;  %v8694_v59 = vrot.slane %v6304_v48, 9 }
 0x3d6   : > { %v6336_v58 = vrot.slane %v6322_v43, %v14502_v44  ;;  %v8698_v40 = vrot.slane %v6329_v14, 9  ;;  %v6657_v18 = vrot.slane %v6616_v24, %v14503_v6  ;;  %v6263_v15 = vadd.f32 %v13308_v42, %v6246_v23 }
 0x3d7   : > { %v6653_v39 = vrot.slane %v6615_v35, %v14503_v6  ;;  %v6594_v52 = vmax.f32 %v6354_v47, %v8703_v31  ;;  %v6585_v46 = vmax.f32 %v6304_v48, %v8694_v59  ;;  %v6245_v36 = vmul.f32 %v13298_v50, %v6228_v62  ;;  %v6042_v59 = vpop.f32.mrf.mxu1 }
 0x3d8   : > { %v6337_v45 = vcombine.high %v6336_v58, %v6336_v58  ;;  %v8699_v53 = vrot.slane %v6336_v58, 9  ;;  %v6589_v32 = vmax.f32 %v6329_v14, %v8698_v40  ;;  %v6273_v22 = vmax.f32 %v6263_v15, 0.0 }
 0x3d9   : > { %v6710_v4 = vsel %vm2034_vm1, %v6653_v39, %v6649_v51  ;;  %v6058_v27 = vadd.f32 %v9736_v20, %v13326_v37  ;;  %v6262_v55 = vadd.f32 %v13308_v42, %v6245_v36  ;;  %v6057_v25 = vadd.f32 %v6032_v41, %v13334_v29 }
 0x3da   : > { %v8700_v30 = vrot.slane %v6337_v45, 9  ;;  %v6590_v9 = vmax.f32 %v6336_v58, %v8699_v53  ;;  %v6617_v21 = vmax.f32 %v6585_v46, %v6589_v32  ;;  %v6711_v26 = vsel %vm2036_vm2, %v6657_v18, %v6710_v4 }
 0x3db   : > { %v6371_v13 = vcombine.high %v6273_v22, %v6273_v22  ;;  %v6378_v38 = vrot.slane %v6273_v22, %v14502_v44  ;;  %v6231_v1 = vadd.f32 %v9783_v5, %v6058_v27  ;;  %v5885_v37 = vadd.f32 %v13267_v12, %v13330_v49 }
 0x3dc   : > { %v6618_v10 = vmax.f32 %v6590_v9, %v6594_v52  ;;  %v6661_v61 = vrot.slane %v6617_v21, %v14503_v6  ;;  %v6272_v28 = vmax.f32 %v6262_v55, 0.0  ;;  %v6592_v17 = vmax.f32 %v6345_v3, %v8701_v2 }
 0x3dd   : > { %v6385_v63 = vrot.slane %v6371_v13, %v14502_v44  ;;  %v6386_v57 = vcombine.high %v6378_v38, %v6378_v38  ;;  %v8707_v23 = vrot.slane %v6378_v38, 9  ;;  %v6593_v60 = vmax.f32 %v6353_v16, %v8702_v54  ;;  %v9786_v54 = vpop.f32.mrf.mxu0 }
 0x3de   : > { %v6712_v56 = vsel %vm2038_vm3, %v6661_v61, %v6711_v26  ;;  %v6248_v48 = vmul.f32 %v13298_v50, %v6231_v1  ;;  %v6591_v8 = vmax.f32 %v6337_v45, %v8700_v30  ;;  %v6230_v29 = vadd.f32 %v6205_v34, %v6057_v25 }
 0x3df   : > { %v6726_v0 = vsel %vm2152_vm7, 0.0, %v6712_v56  ;;  %v6387_v19 = vcombine.high %v6385_v63, %v6385_v63  ;;  %v6665_v12 = vrot.slane %v6618_v10, %v14503_v6  ;;  %v6355_v33 = vcombine.high %v6272_v28, %v6272_v28  ;;  %v6215_v27 = vpop.f32.mrf.mxu0 }
 0x3e0   : > { %v13368_v49 = vsel %vm5411_vm12, %v6726_v0, 0.0  ;;  %v6362_v47 = vrot.slane %v6272_v28, %v14502_v44  ;;  %v8708_v3 = vrot.slane %v6386_v57, 9  ;;  %v8709_v16 = vrot.slane %v6385_v63, 9 }
 0x3e1   : > { %v13371_v2 = vmax.f32 %v6378_v38, %v8707_v23  ;;  %v6265_v43 = vadd.f32 %v13308_v42, %v6248_v48  ;;  %v6369_v14 = vrot.slane %v6355_v33, %v14502_v44  ;;  %v8710_v24 = vrot.slane %v6387_v19, 9 }
 0x3e2   : > { %v6370_v62 = vcombine.high %v6362_v47, %v6362_v47  ;;  %v8704_v35 = vrot.slane %v6362_v47, 9  ;;  %v6738_v31 = vcombine.high %v13368_v49, %v13368_v49  ;;  %v6247_v51 = vmul.f32 %v13298_v50, %v6230_v29 }
 0x3e3   : > { %v6275_v20 = vmax.f32 %v6265_v43, 0.0  ;;  %v6060_v58 = vadd.f32 %v9739_v11, %v13340_v7  ;;  %v8706_v39 = vrot.slane %v6369_v14, 9  ;;  %v13379_v52 = vmax.f32 %v6387_v19, %v8710_v24 }
 0x3e4   : > { %v8705_v40 = vrot.slane %v6370_v62, 9  ;;  %v6595_v18 = vmax.f32 %v6362_v47, %v8704_v35  ;;  %v6264_v53 = vadd.f32 %v13308_v42, %v6247_v51  ;;  %v6059_v36 = vadd.f32 %v6042_v59, %v5885_v37 }
 0x3e5   : > { %v6405_v15 = vcombine.high %v6275_v20, %v6275_v20  ;;  %v6412_v45 = vrot.slane %v6275_v20, %v14502_v44  ;;  %v6233_v46 = vadd.f32 %v9786_v54, %v6060_v58  ;;  %v6597_v4 = vmax.f32 %v6369_v14, %v8706_v39 }
 0x3e6   : > { %v6596_v32 = vmax.f32 %v6370_v62, %v8705_v40  ;;  %v6619_v22 = vmax.f32 %v6591_v8, %v6595_v18  ;;  %v6274_v5 = vmax.f32 %v6264_v53, 0.0  ;;  %v6232_v13 = vadd.f32 %v6215_v27, %v6059_v36 }
 0x3e7   : > { %v6419_v41 = vrot.slane %v6405_v15, %v14502_v44  ;;  %v8714_v7 = vrot.slane %v6412_v45, 9  ;;  %v6250_v30 = vmul.f32 %v13298_v50, %v6233_v46  ;;  %v6621_v21 = vmax.f32 %v6593_v60, %v6597_v4 }
 0x3e8   : > { %v6620_v9 = vmax.f32 %v6592_v17, %v6596_v32  ;;  %v6669_v26 = vrot.slane %v6619_v22, %v14503_v6  ;;  %v6599_v38 = vmax.f32 %v6386_v57, %v8708_v3  ;;  %v6388_v10 = vcombine.high %v6274_v5, %v6274_v5 }
 0x3e9   : > { %v6420_v55 = vcombine.high %v6419_v41, %v6419_v41  ;;  %v6605_v1 = vmax.f32 %v6412_v45, %v8714_v7  ;;  %v6677_v25 = vrot.slane %v6621_v21, %v14503_v6  ;;  %v6395_v23 = vrot.slane %v6274_v5, %v14502_v44 }
 0x3ea   : > { %v6673_v61 = vrot.slane %v6620_v9, %v14503_v6  ;;  %v6713_v37 = vsel %vm2034_vm1, %v6669_v26, %v6665_v12  ;;  %v6600_v28 = vmax.f32 %v6385_v63, %v8709_v16  ;;  %v8715_v34 = vrot.slane %v6419_v41, 9 }
 0x3eb   : > { %v6625_v17 = vmax.f32 %v13379_v52, %v6605_v1  ;;  %v6402_v60 = vrot.slane %v6388_v10, %v14502_v44  ;;  %v6403_v57 = vcombine.high %v6395_v23, %v6395_v23  ;;  %v6267_v48 = vadd.f32 %v13308_v42, %v6250_v30 }
 0x3ec   : > { %v6714_v56 = vsel %vm2036_vm2, %v6673_v61, %v6713_v37  ;;  %v6249_v0 = vmul.f32 %v13298_v50, %v6232_v13  ;;  %v13396_v19 = vrot.slane %v6738_v31, %v14502_v44  ;;  %v8716_v12 = vrot.slane %v6420_v55, 9 }
 0x3ed   : > { %v6715_v8 = vsel %vm2038_vm3, %v6677_v25, %v6714_v56  ;;  %v6404_v29 = vcombine.high %v6402_v60, %v6402_v60  ;;  %v8712_v11 = vrot.slane %v6402_v60, 9  ;;  %v8711_v33 = vrot.slane %v6403_v57, 9 }
 0x3ee   : > { %v6727_v63 = vsel %vm2152_vm7, 0.0, %v6715_v8  ;;  %v6277_v47 = vmax.f32 %v6267_v48, 0.0  ;;  %v6266_v14 = vadd.f32 %v13308_v42, %v6249_v0  ;;  %v6606_v62 = vmax.f32 %v6419_v41, %v8715_v34 }
 0x3ef   : > { %v6731_v3 = vsel %vm5411_vm12, %v6727_v63, 0.0  ;;  %v8713_v16 = vrot.slane %v6404_v29, 9  ;;  %v6603_v43 = vmax.f32 %v6402_v60, %v8712_v11  ;;  %v6602_v35 = vmax.f32 %v6403_v57, %v8711_v33 }
 0x3f0   : > { %v6761_v50 = vrot.slane %v6731_v3, %v14502_v44  ;;  %v6438_v24 = vcombine.high %v6277_v47, %v6277_v47  ;;  %v6445_v20 = vrot.slane %v6277_v47, %v14502_v44  ;;  %v6276_v51 = vmax.f32 %v6266_v14, 0.0 }
 0x3f1   : > { %v6604_v54 = vmax.f32 %v6404_v29, %v8713_v16  ;;  %v6623_v31 = vmax.f32 %v6599_v38, %v6603_v43  ;;  %v6622_v59 = vmax.f32 %v13371_v2, %v6602_v35  ;;  %v6607_v39 = vmax.f32 %v6420_v55, %v8716_v12 }
 0x3f2   : > { %v6769_v58 = vcombine.high %v6761_v50, %v6761_v50  ;;  %v6452_v40 = vrot.slane %v6438_v24, %v14502_v44  ;;  %v6453_v42 = vcombine.high %v6445_v20, %v6445_v20  ;;  %v8720_v15 = vrot.slane %v6445_v20, 9 }
 0x3f3   : > { %v6624_v18 = vmax.f32 %v6600_v28, %v6604_v54  ;;  %v6685_v52 = vrot.slane %v6623_v31, %v14503_v6  ;;  %v6754_v45 = vcombine.high %v6731_v3, %v6731_v3  ;;  %v6681_v53 = vrot.slane %v6622_v59, %v14503_v6  ;;  %v8818_v31 = vld [vmem:[%s14377_s7 + $0x3e8] sm:$0xff]  ;;  %v8817_v59 = vld [vmem:[%s14377_s7 + $0x3e0] sm:$0xff] }
 0x3f4   : > { %v8722_v46 = vrot.slane %v6452_v40, 9  ;;  %v6421_v32 = vcombine.high %v6276_v51, %v6276_v51  ;;  %v8721_v22 = vrot.slane %v6453_v42, 9  ;;  %v6611_v36 = vmax.f32 %v6445_v20, %v8720_v15 }
 0x3f5   : > { %v6689_v4 = vrot.slane %v6624_v18, %v14503_v6  ;;  %v6428_v27 = vrot.slane %v6276_v51, %v14502_v44  ;;  %v6812_v2 = vcombine.low %v6761_v50, %v6769_v58  ;;  %v6693_v41 = vrot.slane %v6625_v17, %v14503_v6 }
 0x3f6   : > { %v6716_v7 = vsel %vm2034_vm1, %v6685_v52, %v6681_v53  ;;  %v6435_v5 = vrot.slane %v6421_v32, %v14502_v44  ;;  %v6612_v9 = vmax.f32 %v6453_v42, %v8721_v22  ;;  %v6627_v21 = vmax.f32 %v6607_v39, %v6611_v36  ;;  %v8816_v52 = vld [vmem:[%s14377_s7 + $0x3d8] sm:$0xff]  ;;  %v8787_v36 = vld [vmem:[%s14377_s7 + $0x2f0] sm:$0xff] }
 0x3f7   : > { %v6717_v30 = vsel %vm2036_vm2, %v6689_v4, %v6716_v7  ;;  %v6436_v26 = vcombine.high %v6428_v27, %v6428_v27  ;;  %v8717_v55 = vrot.slane %v6428_v27, 9  ;;  %v6745_v1 = vrot.slane %v13368_v49, %v14502_v44  ;;  %v8814_v4 = vld [vmem:[%s14377_s7 + $0x3c8] sm:$0xff]  ;;  %v8812_v7 = vld [vmem:[%s14377_s7 + $0x3b8] sm:$0xff] }
 0x3f8   : > { %v6718_v13 = vsel %vm2038_vm3, %v6693_v41, %v6717_v30  ;;  %v6437_v38 = vcombine.high %v6435_v5, %v6435_v5  ;;  %v6768_v10 = vrot.slane %v6754_v45, %v14502_v44  ;;  %v6613_v25 = vmax.f32 %v6452_v40, %v8722_v46  ;;  %v8815_v46 = vld [vmem:[%s14377_s7 + $0x3d0] sm:$0xff] }
 0x3f9   : > { %v6728_v61 = vsel %vm2152_vm7, 0.0, %v6718_v13  ;;  %v8718_v37 = vrot.slane %v6436_v26, 9  ;;  %v6608_v34 = vmax.f32 %v6428_v27, %v8717_v55  ;;  %v6753_v17 = vcombine.high %v6745_v1, %v6745_v1  ;;  %v8813_v27 = vld [vmem:[%s14377_s7 + $0x3c0] sm:$0xff] }
 0x3fa   : > { %v6732_v23 = vsel %vm5411_vm12, %v6728_v61, 0.0  ;;  %v8719_v28 = vrot.slane %v6437_v38, 9  ;;  %v6802_v48 = vcombine.low %v6745_v1, %v6745_v1  ;;  %v6826_v0 = vrot.slane %v6812_v2, %v14502_v44  ;;  %v8786_v2 = vld [vmem:[%s14377_s7 + $0x2e8] sm:$0xff]  ;;  %v8809_v55 = vld [vmem:[%s14377_s7 + $0x3a0] sm:$0xff]  ;;  %v8784_v1 = vld [vmem:[%s14377_s7 + $0x2d8] sm:$0xff] }
 0x3fb   : > { %v6770_v60 = vcombine.high %v6732_v23, %v6732_v23  ;;  %v6777_v56 = vrot.slane %v6732_v23, %v14502_v44  ;;  %v6609_v57 = vmax.f32 %v6436_v26, %v8718_v37  ;;  %v6628_v49 = vmax.f32 %v6608_v34, %v6612_v9  ;;  %v8811_v9 = vld [vmem:[%s14377_s7 + $0x3b0] sm:$0xff]  ;;  %v8810_v26 = vld [vmem:[%s14377_s7 + $0x3a8] sm:$0xff]  ;;  %v8808_v61 = vld [vmem:[%s14377_s7 + $0x398] sm:$0xff] }
 0x3fc   : > { %v6610_v8 = vmax.f32 %v6437_v38, %v8719_v28  ;;  %v6811_v29 = vcombine.low %v6753_v17, %v13396_v19  ;;  %v6809_v3 = vrot.slane %v6802_v48, %v14502_v44  ;;  %v6701_v14 = vrot.slane %v6627_v21, %v14503_v6  ;;  %v8819_v19 = vld [vmem:[%s14377_s7 + $0x3f0] sm:$0xff]  ;;  %v8785_v21 = vld [vmem:[%s14377_s7 + $0x2e0] sm:$0xff]  ;;  %v8806_v28 = vld [vmem:[%s14377_s7 + $0x388] sm:$0xff] }
 0x3fd   : > { %v6784_v11 = vrot.slane %v6770_v60, %v14502_v44  ;;  %v6785_v63 = vcombine.high %v6777_v56, %v6777_v56  ;;  %v6828_v12 = vcombine.low %v6768_v10, %v6777_v56  ;;  %v6629_v33 = vmax.f32 %v6609_v57, %v6613_v25  ;;  %v8783_v25 = vld [vmem:[%s14377_s7 + $0x2d0] sm:$0xff]  ;;  %v8782_v34 = vld [vmem:[%s14377_s7 + $0x2c8] sm:$0xff]  ;;  %v8805_v56 = vld [vmem:[%s14377_s7 + $0x380] sm:$0xff] }
 0x3fe   : > { %v6626_v47 = vmax.f32 %v6606_v62, %v6610_v8  ;;  %v6819_v16 = vrot.slane %v6811_v29, %v14502_v44  ;;  %v6810_v35 = vcombine.low %v6809_v3, %v6809_v3  ;;  %v6705_v54 = vrot.slane %v6628_v49, %v14503_v6  ;;  %v8807_v23 = vld [vmem:[%s14377_s7 + $0x390] sm:$0xff]  ;;  %v8804_v48 = vld [vmem:[%s14377_s7 + $0x378] sm:$0xff] }
 0x3ff   : > { %v6829_v43 = vcombine.low %v6785_v63, %v6784_v11  ;;  %v6836_v62 = vrot.slane %v6828_v12, %v14502_v44  ;;  %v6709_v51 = vrot.slane %v6629_v33, %v14503_v6  ;;  %v14504_v42 = vmov 0.0   ;;  %v8803_v49 = vld [vmem:[%s14377_s7 + $0x370] sm:$0xff]  ;;  %v8780_v29 = vld [vmem:[%s14377_s7 + $0x2b8] sm:$0xff]  ;;  %v8802_v11 = vld [vmem:[%s14377_s7 + $0x368] sm:$0xff] }
 0x400   : > { %v6697_v50 = vrot.slane %v6626_v47, %v14503_v6  ;;  %v13429_v24 = vcombine.low %v6819_v16, %v6826_v0  ;;  %8756 = vmatmul.mubr.msk.f32.vlgmr.msra.gmra.mxu0 %vm8755_vm0, %v6810_v35  ;;  %v13446_v40 = vsel %vm5091_vm11, 0.0, %v6810_v35  ;;  %v8781_v0 = vld [vmem:[%s14377_s7 + $0x2c0] sm:$0xff]  ;;  %v8779_v63 = vld [vmem:[%s14377_s7 + $0x2b0] sm:$0xff]  ;;  %v8778_v47 = vld [vmem:[%s14377_s7 + $0x2a8] sm:$0xff] }
 0x401   : > { %v6843_v20 = vrot.slane %v6829_v43, %v14502_v44  ;;  %7286 = vmatpush1.msra.mxu0 %v8819_v19  ;;  %7097 = vmatprep.mubr.f32.mxu0 %v14504_v42  ;;  %v6934_v15 = vrot.slane %v13446_v40, 1  ;;  %v8801_v33 = vld [vmem:[%s14377_s7 + $0x360] sm:$0xff]  ;;  %v8800_v16 = vld [vmem:[%s14377_s7 + $0x358] sm:$0xff] }
 0x402   : > { %v6719_v58 = vsel %vm2034_vm1, %v6701_v14, %v6697_v50  ;;  %v6935_v39 = vrot.slane %v13429_v24, 1  ;;  %7287 = vmatprep.subr.mxu0 %v8818_v31  ;;  %v8777_v43 = vld [vmem:[%s14377_s7 + $0x2a0] sm:$0xff]  ;;  %v8799_v14 = vld [vmem:[%s14377_s7 + $0x350] sm:$0xff]  ;;  %v8798_v50 = vld [vmem:[%s14377_s7 + $0x348] sm:$0xff] }
 0x403   : > { %v6720_v18 = vsel %vm2036_vm2, %v6705_v54, %v6719_v58  ;;  %v13455_v45 = vcombine.low %v6836_v62, %v6843_v20  ;;  %7288 = vmatpush1.msra.mxu0 %v8817_v59  ;;  %v8776_v35 = vld [vmem:[%s14377_s7 + $0x298] sm:$0xff]  ;;  %v8797_v19 = vld [vmem:[%s14377_s7 + $0x340] sm:$0xff]  ;;  %v8775_v31 = vld [vmem:[%s14377_s7 + $0x290] sm:$0xff] }
 0x404   : > { %v6721_v53 = vsel %vm2038_vm3, %v6709_v51, %v6720_v18  ;;  %v6936_v22 = vsel %vm4812_vm10, %v6934_v15, %v6935_v39  ;;  %7289 = vmatprep.subr.mxu0 %v8816_v52  ;;  %7098 = vmatmul.mubr.f32.gmra.mxu0 %v13429_v24  ;;  %v8796_v54 = vld [vmem:[%s14377_s7 + $0x338] sm:$0xff]  ;;  %v8795_v20 = vld [vmem:[%s14377_s7 + $0x330] sm:$0xff]  ;;  %v8774_v51 = vld [vmem:[%s14377_s7 + $0x288] sm:$0xff] }
 0x405   : > { %v6729_v32 = vsel %vm2152_vm7, 0.0, %v6721_v53  ;;  %7290 = vmatpush1.msra.mxu0 %v8815_v46  ;;  %7009 = vmatmul.mubr.f32.vlgmr.msra.gmra.mxu1 %v6936_v22  ;;  %v6937_v10 = vrot.slane %v13455_v45, 1  ;;  %v8794_v58 = vld [vmem:[%s14377_s7 + $0x328] sm:$0xff]  ;;  %v8773_v59 = vld [vmem:[%s14377_s7 + $0x280] sm:$0xff]  ;;  %v8772_v18 = vld [vmem:[%s14377_s7 + $0x278] sm:$0xff]  ;;  %v7276_v22 = vrot.slane %v13429_v24, 6 }
 0x406   : > { %v6733_v41 = vsel %vm5411_vm12, %v6729_v32, 0.0  ;;  %7291 = vmatprep.subr.mxu0 %v8814_v4  ;;  %7154 = vmatpush1.msra.mxu1 %v8787_v36  ;;  %v8792_v52 = vld [vmem:[%s14377_s7 + $0x318] sm:$0xff]  ;;  %v8771_v15 = vld [vmem:[%s14377_s7 + $0x270] sm:$0xff]  ;;  %v8770_v46 = vld [vmem:[%s14377_s7 + $0x268] sm:$0xff] }
 0x407   : > { %v6786_v5 = vcombine.high %v6733_v41, %v6733_v41  ;;  %v6793_v30 = vrot.slane %v6733_v41, %v14502_v44  ;;  %7292 = vmatpush1.msra.mxu0 %v8813_v27  ;;  %7155 = vmatprep.subr.mxu1 %v8786_v2  ;;  %v6938_v57 = vsel %vm4812_vm10, %v6935_v39, %v6937_v10  ;;  %v8793_v39 = vld [vmem:[%s14377_s7 + $0x320] sm:$0xff]  ;;  %v8791_v53 = vld [vmem:[%s14377_s7 + $0x310] sm:$0xff]  ;;  %v8790_v32 = vld [vmem:[%s14377_s7 + $0x308] sm:$0xff]  ;;  %v7275_v2 = vrot.slane %v13446_v40, 6 }
 0x408   : > { %7293 = vmatprep.subr.mxu0 %v8812_v7  ;;  %7103 = vmatprep.mubr.f32.mxu0 %v14504_v42  ;;  %v8769_v4 = vld [vmem:[%s14377_s7 + $0x260] sm:$0xff]  ;;  %v8768_v27 = vld [vmem:[%s14377_s7 + $0x258] sm:$0xff]  ;;  %v8767_v7 = vld [vmem:[%s14377_s7 + $0x250] sm:$0xff] }
 0x409   : > { %v6800_v13 = vrot.slane %v6786_v5, %v14502_v44  ;;  %v6801_v38 = vcombine.high %v6793_v30, %v6793_v30  ;;  %7294 = vmatpush1.msra.mxu0 %v8811_v9  ;;  %7156 = vmatpush1.msra.mxu1 %v8785_v21  ;;  %v8789_v36 = vld [vmem:[%s14377_s7 + $0x300] sm:$0xff]  ;;  %v8884_v41 = vld [vmem:[%s14377_s7 + $0x5f8] sm:$0xff]  ;;  %v7277_v5 = vsel %vm4775_vm9, %v7275_v2, %v7276_v22  ;;  %v8766_v9 = vld [vmem:[%s14377_s7 + $0x248] sm:$0xff] }
 0x40a   : > { %7295 = vmatprep.subr.mxu0 %v8810_v26  ;;  %7104 = vmatmul.mubr.f32.gmra.mxu0 %v13455_v45  ;;  %v8882_v21 = vld [vmem:[%s14377_s7 + $0x5e8] sm:$0xff]  ;;  %v8765_v26 = vld [vmem:[%s14377_s7 + $0x240] sm:$0xff] }
 0x40b   : > { %v6845_v37 = vcombine.low %v6793_v30, %v6801_v38  ;;  %7296 = vmatpush1.msra.mxu0 %v8809_v55  ;;  %7157 = vmatprep.subr.mxu1 %v8784_v1  ;;  %v6859_v60 = vrot.slane %v6800_v13, %v14502_v44  ;;  %v8883_v30 = vld [vmem:[%s14377_s7 + $0x5f0] sm:$0xff]  ;;  %v7278_v13 = vrot.slane %v13455_v45, 6  ;;  %v8881_v38 = vld [vmem:[%s14377_s7 + $0x5e0] sm:$0xff]  ;;  %v8764_v55 = vld [vmem:[%s14377_s7 + $0x238] sm:$0xff] }
 0x40c   : > { %7297 = vmatprep.subr.mxu0 %v8808_v61  ;;  %7158 = vmatpush1.msra.mxu1 %v8783_v25  ;;  %v8880_v1 = vld [vmem:[%s14377_s7 + $0x5d8] sm:$0xff]  ;;  %v8879_v25 = vld [vmem:[%s14377_s7 + $0x5d0] sm:$0xff]  ;;  %v8842_v2 = vld [vmem:[%s14377_s7 + $0x4a8] sm:$0xff] }
 0x40d   : > { %v6852_v17 = vrot.slane %v6845_v37, %v14502_v44  ;;  %7298 = vmatpush1.msra.mxu0 %v8807_v23  ;;  %7014 = vmatprep.mubr.f32.mxu1 %v14504_v42  ;;  %v13658_v61 = vsel %vm4775_vm9, %v7276_v22, %v7278_v13  ;;  %v8762_v37 = vld [vmem:[%s14377_s7 + $0x228] sm:$0xff]  ;;  %v8843_v22 = vld [vmem:[%s14377_s7 + $0x4b0] sm:$0xff] }
 0x40e   : > { %7299 = vmatprep.subr.mxu0 %v8806_v28  ;;  %7159 = vmatprep.subr.mxu1 %v8782_v34  ;;  %v8878_v23 = vld [vmem:[%s14377_s7 + $0x5c8] sm:$0xff]  ;;  %v8761_v28 = vld [vmem:[%s14377_s7 + $0x220] sm:$0xff] }
 0x40f   : > { %v13528_v8 = vcombine.low %v6852_v17, %v6859_v60  ;;  %7300 = vmatpush1.msra.mxu0 %v8805_v56  ;;  %7015 = vmatmul.mubr.f32.gmra.mxu1 %v6938_v57  ;;  %v8877_v17 = vld [vmem:[%s14377_s7 + $0x5c0] sm:$0xff]  ;;  %v8760_v60 = vld [vmem:[%s14377_s7 + $0x218] sm:$0xff]  ;;  %v8759_v57 = vld [vmem:[%s14377_s7 + $0x210] sm:$0xff] }
 0x410   : > { %7301 = vmatprep.subr.mxu0 %v8804_v48  ;;  %7160 = vmatpush1.msra.mxu1 %v8781_v0  ;;  %v8876_v56 = vld [vmem:[%s14377_s7 + $0x5b8] sm:$0xff]  ;;  %v8875_v0 = vld [vmem:[%s14377_s7 + $0x5b0] sm:$0xff] }
 0x411   : > { %v13544_v12 = vsel %vm5091_vm11, %v13528_v8, 0.0  ;;  %7302 = vmatpush1.msra.mxu0 %v8803_v49  ;;  %7161 = vmatprep.subr.mxu1 %v8780_v29  ;;  %v8758_v49 = vld [vmem:[%s14377_s7 + $0x208] sm:$0xff] }
 0x412   : > { %v6939_v3 = vrot.slane %v13544_v12, 1  ;;  %7303 = vmatprep.subr.mxu0 %v8802_v11  ;;  %7162 = vmatpush1.msra.mxu1 %v8779_v63  ;;  %v7280_v34 = vrot.slane %v13544_v12, 6  ;;  %v8874_v29 = vld [vmem:[%s14377_s7 + $0x5a8] sm:$0xff]  ;;  %v8757_v11 = vld [vmem:[%s14377_s7 + $0x200] sm:$0xff]  ;;  %v7144_v63 = vrot.slane %v13429_v24, 2 }
 0x413   : > { %7304 = vmatpush1.msra.mxu0 %v8801_v33  ;;  %7163 = vmatprep.subr.mxu1 %v8778_v47  ;;  %v8873_v33 = vld [vmem:[%s14377_s7 + $0x5a0] sm:$0xff]  ;;  %v7143_v47 = vrot.slane %v13446_v40, 2 }
 0x414   : > { %7305 = vmatprep.subr.mxu0 %v8800_v16  ;;  %7164 = vmatpush1.msra.mxu1 %v8777_v43  ;;  %v6940_v62 = vsel %vm4812_vm10, %v6937_v10, %v6939_v3  ;;  %v8763_v10 = vld [vmem:[%s14377_s7 + $0x230] sm:$0xff]  ;;  %v13690_v48 = vsel %vm4775_vm9, %v7278_v13, %v7280_v34  ;;  %v8852_v3 = vld [vmem:[%s14377_s7 + $0x4f8] sm:$0xff]  ;;  %v8838_v13 = vld [vmem:[%s14377_s7 + $0x488] sm:$0xff] }
 0x415   : > { %7306 = vmatpush1.msra.mxu0 %v8799_v14  ;;  %7020 = vmatprep.mubr.f32.mxu1 %v14504_v42  ;;  %v8872_v16 = vld [vmem:[%s14377_s7 + $0x598] sm:$0xff]  ;;  %v8851_v43 = vld [vmem:[%s14377_s7 + $0x4f0] sm:$0xff]  ;;  %v7145_v14 = vsel %vm5091_vm11, %v7143_v47, %v7144_v63  ;;  %v8946_v47 = vld [vmem:[%s14377_s7 + $0x7e0] sm:$0xff] }
 0x416   : > { %7307 = vmatprep.subr.mxu0 %v8798_v50  ;;  %7165 = vmatprep.subr.mxu1 %v8776_v35  ;;  %v8871_v50 = vld [vmem:[%s14377_s7 + $0x590] sm:$0xff]  ;;  %v8850_v35 = vld [vmem:[%s14377_s7 + $0x4e8] sm:$0xff] }
 0x417   : > { %7308 = vmatpush1.msra.mxu0 %v8797_v19  ;;  %7021 = vmatmul.mubr.f32.gmra.mxu1 %v6940_v62  ;;  %v8870_v19 = vld [vmem:[%s14377_s7 + $0x588] sm:$0xff]  ;;  %v7146_v62 = vrot.slane %v13455_v45, 2 }
 0x418   : > { %7309 = vmatprep.subr.mxu0 %v8796_v54  ;;  %7166 = vmatpush1.msra.mxu1 %v8775_v31  ;;  %v8849_v54 = vld [vmem:[%s14377_s7 + $0x4e0] sm:$0xff] }
 0x419   : > { %7310 = vmatpush1.msra.mxu0 %v8795_v20  ;;  %7167 = vmatprep.subr.mxu1 %v8774_v51  ;;  %v8869_v31 = vld [vmem:[%s14377_s7 + $0x580] sm:$0xff]  ;;  %v8848_v20 = vld [vmem:[%s14377_s7 + $0x4d8] sm:$0xff] }
 0x41a   : > { %7311 = vmatprep.subr.mxu0 %v8794_v58  ;;  %7168 = vmatpush1.msra.mxu1 %v8773_v59  ;;  %v8868_v51 = vld [vmem:[%s14377_s7 + $0x578] sm:$0xff]  ;;  %v8847_v58 = vld [vmem:[%s14377_s7 + $0x4d0] sm:$0xff]  ;;  %v7147_v59 = vsel %vm5091_vm11, %v7144_v63, %v7146_v62  ;;  %v8947_v63 = vld [vmem:[%s14377_s7 + $0x7e8] sm:$0xff] }
 0x41b   : > { %7312 = vmatpush1.msra.mxu0 %v8793_v39  ;;  %7169 = vmatprep.subr.mxu1 %v8772_v18  ;;  %v8867_v39 = vld [vmem:[%s14377_s7 + $0x570] sm:$0xff]  ;;  %v8846_v18 = vld [vmem:[%s14377_s7 + $0x4c8] sm:$0xff] }
 0x41c   : > { %7313 = vmatprep.subr.mxu0 %v8792_v52  ;;  %7170 = vmatpush1.msra.mxu1 %v8771_v15  ;;  %v8866_v52 = vld [vmem:[%s14377_s7 + $0x568] sm:$0xff]  ;;  %v7148_v15 = vrot.slane %v13544_v12, 2 }
 0x41d   : > { %7314 = vmatpush1.msra.mxu0 %v8791_v53  ;;  %7171 = vmatprep.subr.mxu1 %v8770_v46  ;;  %v8845_v53 = vld [vmem:[%s14377_s7 + $0x4c0] sm:$0xff] }
 0x41e   : > { %7315 = vmatprep.subr.mxu0 %v8790_v32  ;;  %7172 = vmatpush1.msra.mxu1 %v8769_v4  ;;  %v8865_v46 = vld [vmem:[%s14377_s7 + $0x560] sm:$0xff]  ;;  %v8844_v32 = vld [vmem:[%s14377_s7 + $0x4b8] sm:$0xff] }
 0x41f   : > { %7316 = vmatpush1.msra.mxu0 %v8789_v36  ;;  %7349 = vmatprep.mubr.f32.mxu0 %v14504_v42  ;;  %v8864_v4 = vld [vmem:[%s14377_s7 + $0x558] sm:$0xff]  ;;  %v7149_v36 = vsel %vm5091_vm11, %v7146_v62, %v7148_v15  ;;  %v8942_v62 = vld [vmem:[%s14377_s7 + $0x7c0] sm:$0xff] }
 0x420   : > { %7173 = vmatprep.subr.mxu1 %v8768_v27  ;;  %7350 = vmatmul.mubr.f32.vlgmr.msra.gmra.mxu0 %v7277_v5  ;;  %v8863_v27 = vld [vmem:[%s14377_s7 + $0x550] sm:$0xff]  ;;  %v8861_v5 = vld [vmem:[%s14377_s7 + $0x540] sm:$0xff]  ;;  %v8917_v15 = vld [vmem:[%s14377_s7 + $0x6f8] sm:$0xff] }
 0x421   : > { %7539 = vmatprep.subr.mxu0 %v8884_v41  ;;  %7174 = vmatpush1.msra.mxu1 %v8767_v7  ;;  %v8862_v41 = vld [vmem:[%s14377_s7 + $0x548] sm:$0xff]  ;;  %v8841_v7 = vld [vmem:[%s14377_s7 + $0x4a0] sm:$0xff] }
 0x422   : > { %7540 = vmatpush1.msra.mxu0 %v8883_v30  ;;  %7175 = vmatprep.subr.mxu1 %v8766_v9  ;;  %v8840_v30 = vld [vmem:[%s14377_s7 + $0x498] sm:$0xff] }
 0x423   : > { %7541 = vmatprep.subr.mxu0 %v8882_v21  ;;  %7176 = vmatpush1.msra.mxu1 %v8765_v26  ;;  %v8860_v9 = vld [vmem:[%s14377_s7 + $0x538] sm:$0xff]  ;;  %v8839_v21 = vld [vmem:[%s14377_s7 + $0x490] sm:$0xff] }
 0x424   : > { %7355 = vmatprep.mubr.f32.mxu0 %v14504_v42  ;;  %7542 = vmatpush1.msra.mxu0 %v8881_v38  ;;  %v8859_v26 = vld [vmem:[%s14377_s7 + $0x530] sm:$0xff]  ;;  %v8858_v38 = vld [vmem:[%s14377_s7 + $0x528] sm:$0xff] }
 0x425   : > { %7177 = vmatprep.subr.mxu1 %v8764_v55  ;;  %7356 = vmatmul.mubr.f32.gmra.mxu0 %v13658_v61  ;;  %v8837_v55 = vld [vmem:[%s14377_s7 + $0x480] sm:$0xff] }
 0x426   : > { %7543 = vmatprep.subr.mxu0 %v8880_v1  ;;  %7178 = vmatpush1.msra.mxu1 %v8763_v10  ;;  %v8857_v1 = vld [vmem:[%s14377_s7 + $0x520] sm:$0xff]  ;;  %v8836_v10 = vld [vmem:[%s14377_s7 + $0x478] sm:$0xff] }
 0x427   : > { %7544 = vmatpush1.msra.mxu0 %v8879_v25  ;;  %7179 = vmatprep.subr.mxu1 %v8762_v37  ;;  %v8856_v25 = vld [vmem:[%s14377_s7 + $0x518] sm:$0xff]  ;;  %v8835_v37 = vld [vmem:[%s14377_s7 + $0x470] sm:$0xff] }
 0x428   : > { %7545 = vmatprep.subr.mxu0 %v8878_v23  ;;  %7180 = vmatpush1.msra.mxu1 %v8761_v28  ;;  %v8855_v23 = vld [vmem:[%s14377_s7 + $0x510] sm:$0xff]  ;;  %v8834_v28 = vld [vmem:[%s14377_s7 + $0x468] sm:$0xff] }
 0x429   : > { %7361 = vmatprep.mubr.f32.mxu0 %v14504_v42  ;;  %7546 = vmatpush1.msra.mxu0 %v8877_v17  ;;  %v8854_v17 = vld [vmem:[%s14377_s7 + $0x508] sm:$0xff] }
 0x42a   : > { %7181 = vmatprep.subr.mxu1 %v8760_v60  ;;  %7362 = vmatmul.mubr.f32.gmra.mxu0 %v13690_v48  ;;  %v8833_v60 = vld [vmem:[%s14377_s7 + $0x460] sm:$0xff] }
 0x42b   : > { %7547 = vmatprep.subr.mxu0 %v8876_v56  ;;  %7182 = vmatpush1.msra.mxu1 %v8759_v57  ;;  %v8853_v56 = vld [vmem:[%s14377_s7 + $0x500] sm:$0xff]  ;;  %v8832_v57 = vld [vmem:[%s14377_s7 + $0x458] sm:$0xff] }
 0x42c   : > { %7548 = vmatpush1.msra.mxu0 %v8875_v0  ;;  %7183 = vmatprep.subr.mxu1 %v8758_v49  ;;  %v8949_v0 = vld [vmem:[%s14377_s7 + $0x7f8] sm:$0xff]  ;;  %v8831_v49 = vld [vmem:[%s14377_s7 + $0x450] sm:$0xff] }
 0x42d   : > { %7549 = vmatprep.subr.mxu0 %v8874_v29  ;;  %7184 = vmatpush1.msra.mxu1 %v8757_v11  ;;  %v8948_v29 = vld [vmem:[%s14377_s7 + $0x7f0] sm:$0xff]  ;;  %v8830_v11 = vld [vmem:[%s14377_s7 + $0x448] sm:$0xff] }
 0x42e   : > { %7217 = vmatprep.mubr.f32.mxu1 %v14504_v42  ;;  %7550 = vmatpush1.msra.mxu0 %v8873_v33  ;;  %v8829_v33 = vld [vmem:[%s14377_s7 + $0x440] sm:$0xff] }
 0x42f   : > { %7218 = vmatmul.mubr.f32.vlgmr.msra.gmra.mxu1 %v7145_v14  ;;  %7417 = vmatprep.subr.mxu1 %v8852_v3  ;;  %v8828_v3 = vld [vmem:[%s14377_s7 + $0x438] sm:$0xff]  ;;  %v8944_v14 = vld [vmem:[%s14377_s7 + $0x7d0] sm:$0xff] }
 0x430   : > { %7551 = vmatprep.subr.mxu0 %v8872_v16  ;;  %7418 = vmatpush1.msra.mxu1 %v8851_v43  ;;  %v8945_v16 = vld [vmem:[%s14377_s7 + $0x7d8] sm:$0xff]  ;;  %v8827_v43 = vld [vmem:[%s14377_s7 + $0x430] sm:$0xff] }
 0x431   : > { %7552 = vmatpush1.msra.mxu0 %v8871_v50  ;;  %7419 = vmatprep.subr.mxu1 %v8850_v35  ;;  %v8826_v50 = vld [vmem:[%s14377_s7 + $0x428] sm:$0xff] }
 0x432   : > { %7553 = vmatprep.subr.mxu0 %v8870_v19  ;;  %7223 = vmatprep.mubr.f32.mxu1 %v14504_v42  ;;  %v8943_v35 = vld [vmem:[%s14377_s7 + $0x7c8] sm:$0xff]  ;;  %v8825_v19 = vld [vmem:[%s14377_s7 + $0x420] sm:$0xff] }
 0x433   : > { %7420 = vmatpush1.msra.mxu1 %v8849_v54  ;;  %7554 = vmatpush1.msra.mxu0 %v8869_v31  ;;  %v8824_v54 = vld [vmem:[%s14377_s7 + $0x418] sm:$0xff] }
 0x434   : > { %7224 = vmatmul.mubr.f32.gmra.mxu1 %v7147_v59  ;;  %7421 = vmatprep.subr.mxu1 %v8848_v20  ;;  %v8941_v31 = vld [vmem:[%s14377_s7 + $0x7b8] sm:$0xff]  ;;  %v8823_v20 = vld [vmem:[%s14377_s7 + $0x410] sm:$0xff]  ;;  %v8939_v59 = vld [vmem:[%s14377_s7 + $0x7a8] sm:$0xff] }
 0x435   : > { %7555 = vmatprep.subr.mxu0 %v8868_v51  ;;  %7422 = vmatpush1.msra.mxu1 %v8847_v58  ;;  %v8940_v51 = vld [vmem:[%s14377_s7 + $0x7b0] sm:$0xff]  ;;  %v8822_v58 = vld [vmem:[%s14377_s7 + $0x408] sm:$0xff] }
 0x436   : > { %7556 = vmatpush1.msra.mxu0 %v8867_v39  ;;  %7423 = vmatprep.subr.mxu1 %v8846_v18  ;;  %v8821_v39 = vld [vmem:[%s14377_s7 + $0x400] sm:$0xff]  ;;  %v7408_v18 = vrot.slane %v13429_v24, 7 }
 0x437   : > { %7557 = vmatprep.subr.mxu0 %v8866_v52  ;;  %7229 = vmatprep.mubr.f32.mxu1 %v14504_v42  ;;  %v8938_v52 = vld [vmem:[%s14377_s7 + $0x7a0] sm:$0xff] }
 0x438   : > { %7424 = vmatpush1.msra.mxu1 %v8845_v53  ;;  %7558 = vmatpush1.msra.mxu0 %v8865_v46  ;;  %v8937_v53 = vld [vmem:[%s14377_s7 + $0x798] sm:$0xff]  ;;  %v8916_v46 = vld [vmem:[%s14377_s7 + $0x6f0] sm:$0xff] }
 0x439   : > { %7230 = vmatmul.mubr.f32.gmra.mxu1 %v7149_v36  ;;  %7425 = vmatprep.subr.mxu1 %v8844_v32  ;;  %v7410_v36 = vrot.slane %v13455_v45, 7 }
 0x43a   : > { %7559 = vmatprep.subr.mxu0 %v8864_v4  ;;  %7426 = vmatpush1.msra.mxu1 %v8843_v22  ;;  %v8915_v4 = vld [vmem:[%s14377_s7 + $0x6e8] sm:$0xff] }
 0x43b   : > { %7560 = vmatpush1.msra.mxu0 %v8863_v27  ;;  %7427 = vmatprep.subr.mxu1 %v8842_v2  ;;  %v8935_v22 = vld [vmem:[%s14377_s7 + $0x788] sm:$0xff]  ;;  %v8914_v27 = vld [vmem:[%s14377_s7 + $0x6e0] sm:$0xff] }
 0x43c   : > { %7561 = vmatprep.subr.mxu0 %v8862_v41  ;;  %7428 = vmatpush1.msra.mxu1 %v8841_v7  ;;  %v8934_v2 = vld [vmem:[%s14377_s7 + $0x780] sm:$0xff]  ;;  %v8913_v41 = vld [vmem:[%s14377_s7 + $0x6d8] sm:$0xff] }
 0x43d   : > { %7562 = vmatpush1.msra.mxu0 %v8861_v5  ;;  %7429 = vmatprep.subr.mxu1 %v8840_v30  ;;  %v8933_v7 = vld [vmem:[%s14377_s7 + $0x778] sm:$0xff]  ;;  %v8912_v5 = vld [vmem:[%s14377_s7 + $0x6d0] sm:$0xff]  ;;  %v7411_v30 = vsel %vm2152_vm7, %v7408_v18, %v7410_v36 }
 0x43e   : > { %7563 = vmatprep.subr.mxu0 %v8860_v9  ;;  %7430 = vmatpush1.msra.mxu1 %v8839_v21  ;;  %v8932_v9 = vld [vmem:[%s14377_s7 + $0x770] sm:$0xff]  ;;  %v8911_v21 = vld [vmem:[%s14377_s7 + $0x6c8] sm:$0xff] }
 0x43f   : > { %7564 = vmatpush1.msra.mxu0 %v8859_v26  ;;  %7431 = vmatprep.subr.mxu1 %v8838_v13  ;;  %v8931_v26 = vld [vmem:[%s14377_s7 + $0x768] sm:$0xff]  ;;  %v7412_v13 = vrot.slane %v13544_v12, 7 }
 0x440   : > { %7565 = vmatprep.subr.mxu0 %v8858_v38  ;;  %7432 = vmatpush1.msra.mxu1 %v8837_v55  ;;  %v8910_v38 = vld [vmem:[%s14377_s7 + $0x6c0] sm:$0xff] }
 0x441   : > { %7566 = vmatpush1.msra.mxu0 %v8857_v1  ;;  %7433 = vmatprep.subr.mxu1 %v8836_v10  ;;  %v8930_v55 = vld [vmem:[%s14377_s7 + $0x760] sm:$0xff]  ;;  %v8909_v1 = vld [vmem:[%s14377_s7 + $0x6b8] sm:$0xff] }
 0x442   : > { %7567 = vmatprep.subr.mxu0 %v8856_v25  ;;  %7434 = vmatpush1.msra.mxu1 %v8835_v37  ;;  %v8929_v10 = vld [vmem:[%s14377_s7 + $0x758] sm:$0xff]  ;;  %v8908_v25 = vld [vmem:[%s14377_s7 + $0x6b0] sm:$0xff]  ;;  %v7413_v37 = vsel %vm2152_vm7, %v7410_v36, %v7412_v13  ;;  %v8887_v36 = vld [vmem:[%s14377_s7 + $0x608] sm:$0xff] }
 0x443   : > { %7568 = vmatpush1.msra.mxu0 %v8855_v23  ;;  %7435 = vmatprep.subr.mxu1 %v8834_v28  ;;  %v8928_v23 = vld [vmem:[%s14377_s7 + $0x750] sm:$0xff]  ;;  %v8907_v28 = vld [vmem:[%s14377_s7 + $0x6a8] sm:$0xff] }
 0x444   : > { %7569 = vmatprep.subr.mxu0 %v8854_v17  ;;  %7436 = vmatpush1.msra.mxu1 %v8833_v60  ;;  %v8927_v17 = vld [vmem:[%s14377_s7 + $0x748] sm:$0xff]  ;;  %v8906_v60 = vld [vmem:[%s14377_s7 + $0x6a0] sm:$0xff] }
 0x445   : > { %7570 = vmatpush1.msra.mxu0 %v8853_v56  ;;  %7603 = vmatprep.mubr.f32.mxu0 %v14504_v42  ;;  %v8926_v56 = vld [vmem:[%s14377_s7 + $0x740] sm:$0xff] }
 0x446   : > { %7437 = vmatprep.subr.mxu1 %v8832_v57  ;;  %7604 = vmatmul.mubr.f32.vlgmr.msra.gmra.mxu0 %v13429_v24  ;;  %v8905_v57 = vld [vmem:[%s14377_s7 + $0x698] sm:$0xff] }
 0x447   : > { %7801 = vmatprep.subr.mxu0 %v8949_v0  ;;  %7438 = vmatpush1.msra.mxu1 %v8831_v49  ;;  %v8925_v0 = vld [vmem:[%s14377_s7 + $0x738] sm:$0xff]  ;;  %v8904_v49 = vld [vmem:[%s14377_s7 + $0x690] sm:$0xff] }
 0x448   : > { %7802 = vmatpush1.msra.mxu0 %v8948_v29  ;;  %7439 = vmatprep.subr.mxu1 %v8830_v11  ;;  %v8924_v29 = vld [vmem:[%s14377_s7 + $0x730] sm:$0xff]  ;;  %v8903_v11 = vld [vmem:[%s14377_s7 + $0x688] sm:$0xff] }
 0x449   : > { %7803 = vmatprep.subr.mxu0 %v8947_v63  ;;  %7440 = vmatpush1.msra.mxu1 %v8829_v33  ;;  %v8923_v63 = vld [vmem:[%s14377_s7 + $0x728] sm:$0xff]  ;;  %v8902_v33 = vld [vmem:[%s14377_s7 + $0x680] sm:$0xff] }
 0x44a   : > { %7609 = vmatprep.mubr.f32.mxu0 %v14504_v42  ;;  %7804 = vmatpush1.msra.mxu0 %v8946_v47  ;;  %v8922_v47 = vld [vmem:[%s14377_s7 + $0x720] sm:$0xff] }
 0x44b   : > { %7441 = vmatprep.subr.mxu1 %v8828_v3  ;;  %7610 = vmatmul.mubr.f32.gmra.mxu0 %v13455_v45  ;;  %v8901_v3 = vld [vmem:[%s14377_s7 + $0x678] sm:$0xff] }
 0x44c   : > { %7805 = vmatprep.subr.mxu0 %v8945_v16  ;;  %7442 = vmatpush1.msra.mxu1 %v8827_v43  ;;  %v8921_v16 = vld [vmem:[%s14377_s7 + $0x718] sm:$0xff]  ;;  %v8900_v43 = vld [vmem:[%s14377_s7 + $0x670] sm:$0xff] }
 0x44d   : > { %7806 = vmatpush1.msra.mxu0 %v8944_v14  ;;  %7443 = vmatprep.subr.mxu1 %v8826_v50  ;;  %v8920_v14 = vld [vmem:[%s14377_s7 + $0x710] sm:$0xff]  ;;  %v8899_v50 = vld [vmem:[%s14377_s7 + $0x668] sm:$0xff] }
 0x44e   : > { %7807 = vmatprep.subr.mxu0 %v8943_v35  ;;  %7444 = vmatpush1.msra.mxu1 %v8825_v19  ;;  %v8919_v35 = vld [vmem:[%s14377_s7 + $0x708] sm:$0xff]  ;;  %v8898_v19 = vld [vmem:[%s14377_s7 + $0x660] sm:$0xff] }
 0x44f   : > { %7615 = vmatprep.mubr.f32.mxu0 %v14504_v42  ;;  %7808 = vmatpush1.msra.mxu0 %v8942_v62  ;;  %v7793_v62 = vrot.slane %v13455_v45, 5 }
 0x450   : > { %7445 = vmatprep.subr.mxu1 %v8824_v54  ;;  %8885 = vmatmul.mubr.msk.f32.gmra.mxu0 %vm5091_vm11, %v13528_v8  ;;  %v7407_v8 = vrot.slane %v13446_v40, 7  ;;  %v8936_v40 = vld [vmem:[%s14377_s7 + $0x790] sm:$0xff]  ;;  %v8918_v54 = vld [vmem:[%s14377_s7 + $0x700] sm:$0xff] }
 0x451   : > { %7809 = vmatprep.subr.mxu0 %v8941_v31  ;;  %7446 = vmatpush1.msra.mxu1 %v8823_v20  ;;  %v8897_v31 = vld [vmem:[%s14377_s7 + $0x658] sm:$0xff]  ;;  %v7792_v20 = vrot.slane %v13429_v24, 5 }
 0x452   : > { %7810 = vmatpush1.msra.mxu0 %v8940_v51  ;;  %7447 = vmatprep.subr.mxu1 %v8822_v58  ;;  %v7409_v32 = vsel %vm2152_vm7, %v7407_v8, %v7408_v18  ;;  %v8896_v51 = vld [vmem:[%s14377_s7 + $0x650] sm:$0xff]  ;;  %v8894_v18 = vld [vmem:[%s14377_s7 + $0x640] sm:$0xff] }
 0x453   : > { %7811 = vmatprep.subr.mxu0 %v8939_v59  ;;  %7448 = vmatpush1.msra.mxu1 %v8821_v39  ;;  %v7794_v58 = vsel %vm5904_vm15, %v7792_v20, %v7793_v62  ;;  %v8895_v59 = vld [vmem:[%s14377_s7 + $0x648] sm:$0xff]  ;;  %v7795_v39 = vrot.slane %v13544_v12, 5  ;;  %v8892_v8 = vld [vmem:[%s14377_s7 + $0x630] sm:$0xff] }
 0x454   : > { %7481 = vmatprep.mubr.f32.mxu1 %v14504_v42  ;;  %7812 = vmatpush1.msra.mxu0 %v8938_v52  ;;  %v8893_v52 = vld [vmem:[%s14377_s7 + $0x638] sm:$0xff] }
 0x455   : > { %7482 = vmatmul.mubr.f32.vlgmr.msra.gmra.mxu1 %v7409_v32  ;;  %7670 = vmatprep.subr.mxu1 %v8917_v15  ;;  %v7796_v15 = vsel %vm5904_vm15, %v7793_v62, %v7795_v39  ;;  %v8889_v32 = vld [vmem:[%s14377_s7 + $0x618] sm:$0xff]  ;;  %v8951_v62 = vld [vmem:[%s14377_s7 + $0x808] sm:$0xff] }
 0x456   : > { %7813 = vmatprep.subr.mxu0 %v8937_v53  ;;  %7671 = vmatpush1.msra.mxu1 %v8916_v46  ;;  %v8891_v53 = vld [vmem:[%s14377_s7 + $0x628] sm:$0xff]  ;;  %v8890_v46 = vld [vmem:[%s14377_s7 + $0x620] sm:$0xff] }
 0x457   : > { %7814 = vmatpush1.msra.mxu0 %v8936_v40  ;;  %7672 = vmatprep.subr.mxu1 %v8915_v4  ;;  %v8888_v40 = vld [vmem:[%s14377_s7 + $0x610] sm:$0xff]  ;;  %v14505_v4 = vld [vmem:[#allocation9_spill] sm:$0xff] }
 0x458   : > { %7815 = vmatprep.subr.mxu0 %v8935_v22  ;;  %7487 = vmatprep.mubr.f32.mxu1 %v14504_v42  ;;  %v7797_v22 = vsel %vm5904_vm15, %v7795_v39, %v14505_v4  ;;  %v8246_v39 = vld [vmem:[%s14380_s10 + $0xd8] sm:$0xff] }
 0x459   : > { %7673 = vmatpush1.msra.mxu1 %v8914_v27  ;;  %7816 = vmatpush1.msra.mxu0 %v8934_v2  ;;  %v7662_v27 = vrot.slane %v13455_v45, 4  ;;  %v8886_v2 = vld [vmem:[%s14377_s7 + $0x600] sm:$0xff]  ;;  %v8226_v4 = vld [vmem:[%s14380_s10 + $0x38] sm:$0xff] }
 0x45a   : > { %7488 = vmatmul.mubr.f32.gmra.mxu1 %v7411_v30  ;;  %7674 = vmatprep.subr.mxu1 %v8913_v41  ;;  %v7661_v41 = vrot.slane %v13429_v24, 4  ;;  %v8979_v30 = vld [vmem:[%s14377_s7 + $0x8e8] sm:$0xff]  ;;  %v8978_v24 = vld [vmem:[%s14377_s7 + $0x8e0] sm:$0xff] }
 0x45b   : > { %7817 = vmatprep.subr.mxu0 %v8933_v7  ;;  %7675 = vmatpush1.msra.mxu1 %v8912_v5  ;;  %v8981_v7 = vld [vmem:[%s14377_s7 + $0x8f8] sm:$0xff]  ;;  %v8980_v5 = vld [vmem:[%s14377_s7 + $0x8f0] sm:$0xff] }
 0x45c   : > { %7818 = vmatpush1.msra.mxu0 %v8932_v9  ;;  %7676 = vmatprep.subr.mxu1 %v8911_v21  ;;  %v7663_v45 = vsel %vm5585_vm13, %v7661_v41, %v7662_v27  ;;  %v7664_v9 = vrot.slane %v13544_v12, 4  ;;  %v8977_v21 = vld [vmem:[%s14377_s7 + $0x8d8] sm:$0xff]  ;;  %v8233_v12 = vld [vmem:[%s14380_s10 + $0x70] sm:$0xff]  ;;  %v8239_v41 = vld [vmem:[%s14380_s10 + $0xa0] sm:$0xff] }
 0x45d   : > { %7819 = vmatprep.subr.mxu0 %v8931_v26  ;;  %7493 = vmatprep.mubr.f32.mxu1 %v14504_v42  ;;  %v8976_v26 = vld [vmem:[%s14377_s7 + $0x8d0] sm:$0xff] }
 0x45e   : > { %7677 = vmatpush1.msra.mxu1 %v8910_v38  ;;  %7820 = vmatpush1.msra.mxu0 %v8930_v55  ;;  %v7665_v13 = vsel %vm5585_vm13, %v7662_v27, %v7664_v9  ;;  %v8975_v38 = vld [vmem:[%s14377_s7 + $0x8c8] sm:$0xff]  ;;  %v8974_v55 = vld [vmem:[%s14377_s7 + $0x8c0] sm:$0xff] }
 0x45f   : > { %7494 = vmatmul.mubr.f32.gmra.mxu1 %v7413_v37  ;;  %7678 = vmatprep.subr.mxu1 %v8909_v1  ;;  %v8973_v1 = vld [vmem:[%s14377_s7 + $0x8b8] sm:$0xff]  ;;  %v8240_v27 = vld [vmem:[%s14380_s10 + $0xa8] sm:$0xff] }
 0x460   : > { %7821 = vmatprep.subr.mxu0 %v8929_v10  ;;  %7679 = vmatpush1.msra.mxu1 %v8908_v25  ;;  %v8972_v10 = vld [vmem:[%s14377_s7 + $0x8b0] sm:$0xff] }
 0x461   : > { %7822 = vmatpush1.msra.mxu0 %v8928_v23  ;;  %7680 = vmatprep.subr.mxu1 %v8907_v28  ;;  %v14506_v25 = vld [vmem:[#allocation11_spill] sm:$0xff]  ;;  %v8971_v23 = vld [vmem:[%s14377_s7 + $0x8a8] sm:$0xff]  ;;  %v8970_v28 = vld [vmem:[%s14377_s7 + $0x8a0] sm:$0xff] }
 0x462   : > { %7823 = vmatprep.subr.mxu0 %v8927_v17  ;;  %7681 = vmatpush1.msra.mxu1 %v8906_v60  ;;  %v7666_v37 = vsel %vm5585_vm13, %v7664_v9, %v14506_v25  ;;  %v8969_v17 = vld [vmem:[%s14377_s7 + $0x898] sm:$0xff]  ;;  %v8968_v60 = vld [vmem:[%s14377_s7 + $0x890] sm:$0xff] }
 0x463   : > { %7824 = vmatpush1.msra.mxu0 %v8926_v56  ;;  %7682 = vmatprep.subr.mxu1 %v8905_v57  ;;  %v8967_v56 = vld [vmem:[%s14377_s7 + $0x888] sm:$0xff]  ;;  %v8966_v57 = vld [vmem:[%s14377_s7 + $0x880] sm:$0xff] }
 0x464   : > { %7825 = vmatprep.subr.mxu0 %v8925_v0  ;;  %7683 = vmatpush1.msra.mxu1 %v8904_v49  ;;  %v8965_v0 = vld [vmem:[%s14377_s7 + $0x878] sm:$0xff]  ;;  %v8964_v49 = vld [vmem:[%s14377_s7 + $0x870] sm:$0xff] }
 0x465   : > { %7826 = vmatpush1.msra.mxu0 %v8924_v29  ;;  %7684 = vmatprep.subr.mxu1 %v8903_v11  ;;  %v8963_v29 = vld [vmem:[%s14377_s7 + $0x868] sm:$0xff]  ;;  %v8962_v11 = vld [vmem:[%s14377_s7 + $0x860] sm:$0xff] }
 0x466   : > { %7827 = vmatprep.subr.mxu0 %v8923_v63  ;;  %7685 = vmatpush1.msra.mxu1 %v8902_v33  ;;  %v8961_v63 = vld [vmem:[%s14377_s7 + $0x858] sm:$0xff]  ;;  %v8960_v33 = vld [vmem:[%s14377_s7 + $0x850] sm:$0xff] }
 0x467   : > { %7828 = vmatpush1.msra.mxu0 %v8922_v47  ;;  %7686 = vmatprep.subr.mxu1 %v8901_v3  ;;  %v8959_v47 = vld [vmem:[%s14377_s7 + $0x848] sm:$0xff]  ;;  %v8958_v3 = vld [vmem:[%s14377_s7 + $0x840] sm:$0xff] }
 0x468   : > { %7829 = vmatprep.subr.mxu0 %v8921_v16  ;;  %7687 = vmatpush1.msra.mxu1 %v8900_v43  ;;  %v8957_v16 = vld [vmem:[%s14377_s7 + $0x838] sm:$0xff]  ;;  %v8956_v43 = vld [vmem:[%s14377_s7 + $0x830] sm:$0xff] }
 0x469   : > { %7830 = vmatpush1.msra.mxu0 %v8920_v14  ;;  %7688 = vmatprep.subr.mxu1 %v8899_v50  ;;  %v8955_v14 = vld [vmem:[%s14377_s7 + $0x828] sm:$0xff]  ;;  %v8954_v50 = vld [vmem:[%s14377_s7 + $0x820] sm:$0xff] }
 0x46a   : > { %7831 = vmatprep.subr.mxu0 %v8919_v35  ;;  %7689 = vmatpush1.msra.mxu1 %v8898_v19  ;;  %v8953_v35 = vld [vmem:[%s14377_s7 + $0x818] sm:$0xff]  ;;  %v8952_v19 = vld [vmem:[%s14377_s7 + $0x810] sm:$0xff] }
 0x46b   : > { %7832 = vmatpush1.msra.mxu0 %v8918_v54  ;;  %7865 = vmatprep.mubr.f32.mxu0 %v14504_v42  ;;  %v8950_v54 = vld [vmem:[%s14377_s7 + $0x800] sm:$0xff] }
 0x46c   : > { %7690 = vmatprep.subr.mxu1 %v8897_v31  ;;  %7866 = vmatmul.mubr.f32.vlgmr.msra.gmra.mxu0 %v7794_v58  ;;  %v14507_v31 = vld [vmem:[#allocation10_spill] sm:$0xff]  ;;  %v8247_v58 = vld [vmem:[%s14380_s10 + $0xe0] sm:$0xff] }
 0x46d   : > { %7691 = vmatpush1.msra.mxu1 %v8896_v51  ;;  %7871 = vmatprep.mubr.f32.mxu0 %v14504_v42  ;;  %v7923_v20 = vsel %vm4775_vm9, %v7280_v34, %v14507_v31  ;;  %v8250_v51 = vld [vmem:[%s14380_s10 + $0xf8] sm:$0xff]  ;;  %v8248_v34 = vld [vmem:[%s14380_s10 + $0xe8] sm:$0xff] }
 0x46e   : > { %7692 = vmatprep.subr.mxu1 %v8895_v59  ;;  %7734 = vmatprep.mubr.f32.mxu1 %v14504_v42  ;;  %v8231_v59 = vld [vmem:[%s14380_s10 + $0x60] sm:$0xff] }
 0x46f   : > { %7693 = vmatpush1.msra.mxu1 %v8894_v18  ;;  %9267 = vmatprep.subr.mxu0 %v8250_v51  ;;  %v8230_v18 = vld [vmem:[%s14380_s10 + $0x58] sm:$0xff] }
 0x470   : > { %7694 = vmatprep.subr.mxu1 %v8893_v52  ;;  %7872 = vmatmul.mubr.f32.gmra.mxu0 %v7796_v15  ;;  %v8245_v52 = vld [vmem:[%s14380_s10 + $0xd0] sm:$0xff]  ;;  %v8244_v15 = vld [vmem:[%s14380_s10 + $0xc8] sm:$0xff] }
 0x471   : > { %7695 = vmatpush1.msra.mxu1 %v8892_v8  ;;  %7877 = vmatprep.mubr.f32.mxu0 %v14504_v42  ;;  %v8229_v8 = vld [vmem:[%s14380_s10 + $0x50] sm:$0xff] }
 0x472   : > { %7696 = vmatprep.subr.mxu1 %v8891_v53  ;;  %v8228_v53 = vld [vmem:[%s14380_s10 + $0x48] sm:$0xff] }
 0x473   : > { %7697 = vmatpush1.msra.mxu1 %v8890_v46  ;;  %v8243_v46 = vld [vmem:[%s14380_s10 + $0xc0] sm:$0xff] }
 0x474   : > { %7698 = vmatprep.subr.mxu1 %v8889_v32  ;;  %7878 = vmatmul.mubr.f32.gmra.mxu0 %v7797_v22  ;;  %v8227_v32 = vld [vmem:[%s14380_s10 + $0x40] sm:$0xff]  ;;  %v8241_v22 = vld [vmem:[%s14380_s10 + $0xb0] sm:$0xff] }
 0x475   : > { %7699 = vmatpush1.msra.mxu1 %v8888_v40  ;;  %v8242_v40 = vld [vmem:[%s14380_s10 + $0xb8] sm:$0xff] }
 0x476   : > { %7700 = vmatprep.subr.mxu1 %v8887_v36  ;;  %v8225_v36 = vld [vmem:[%s14380_s10 + $0x30] sm:$0xff] }
 0x477   : > { %7701 = vmatpush1.msra.mxu1 %v8886_v2  ;;  %v8224_v2 = vld [vmem:[%s14380_s10 + $0x28] sm:$0xff] }
 0x478   : > { %7735 = vmatmul.mubr.f32.vlgmr.msra.gmra.mxu1 %v7663_v45  ;;  %7925 = vmatprep.subr.mxu1 %v8981_v7  ;;  %v8223_v7 = vld [vmem:[%s14380_s10 + $0x20] sm:$0xff]  ;;  %v8222_v45 = vld [vmem:[%s14380_s10 + $0x18] sm:$0xff] }
 0x479   : > { %7926 = vmatpush1.msra.mxu1 %v8980_v5  ;;  %7740 = vmatprep.mubr.f32.mxu1 %v14504_v42  ;;  %v8238_v5 = vld [vmem:[%s14380_s10 + $0x98] sm:$0xff] }
 0x47a   : > { %7927 = vmatprep.subr.mxu1 %v8979_v30  ;;  %v8237_v30 = vld [vmem:[%s14380_s10 + $0x90] sm:$0xff] }
 0x47b   : > { %7928 = vmatpush1.msra.mxu1 %v8978_v24  ;;  %v8221_v24 = vld [vmem:[%s14380_s10 + $0x10] sm:$0xff] }
 0x47c   : > { %7741 = vmatmul.mubr.f32.gmra.mxu1 %v7665_v13  ;;  %7929 = vmatprep.subr.mxu1 %v8977_v21  ;;  %v8236_v21 = vld [vmem:[%s14380_s10 + $0x88] sm:$0xff]  ;;  %v8235_v13 = vld [vmem:[%s14380_s10 + $0x80] sm:$0xff] }
 0x47d   : > { %7930 = vmatpush1.msra.mxu1 %v8976_v26  ;;  %7746 = vmatprep.mubr.f32.mxu1 %v14504_v42  ;;  %v8220_v26 = vld [vmem:[%s14380_s10 + $0x8] sm:$0xff] }
 0x47e   : > { %7931 = vmatprep.subr.mxu1 %v8975_v38 }
 0x47f   : > { %7932 = vmatpush1.msra.mxu1 %v8974_v55  ;;  %v8219_v55 = vld [vmem:[%s14380_s10] sm:$0xff] }
 0x480   : > { %7747 = vmatmul.mubr.f32.gmra.mxu1 %v7666_v37  ;;  %7933 = vmatprep.subr.mxu1 %v8973_v1 }
 0x481   : > { %7934 = vmatpush1.msra.mxu1 %v8972_v10  ;;  %7989 = vmatprep.mubr.f32.mxu1 %v14504_v42 }
 0x482   : > { %7935 = vmatprep.subr.mxu1 %v8971_v23 }
 0x483   : > { %7936 = vmatpush1.msra.mxu1 %v8970_v28 }
 0x484   : > { %7937 = vmatprep.subr.mxu1 %v8969_v17 }
 0x485   : > { %7938 = vmatpush1.msra.mxu1 %v8968_v60 }
 0x486   : > { %7939 = vmatprep.subr.mxu1 %v8967_v56 }
 0x487   : > { %7940 = vmatpush1.msra.mxu1 %v8966_v57 }
 0x488   : > { %7941 = vmatprep.subr.mxu1 %v8965_v0 }
 0x489   : > { %7942 = vmatpush1.msra.mxu1 %v8964_v49 }
 0x48a   : > { %7943 = vmatprep.subr.mxu1 %v8963_v29 }
 0x48b   : > { %7944 = vmatpush1.msra.mxu1 %v8962_v11 }
 0x48c   : > { %7945 = vmatprep.subr.mxu1 %v8961_v63 }
 0x48d   : > { %7946 = vmatpush1.msra.mxu1 %v8960_v33 }
 0x48e   : > { %7947 = vmatprep.subr.mxu1 %v8959_v47 }
 0x48f   : > { %7948 = vmatpush1.msra.mxu1 %v8958_v3 }
 0x490   : > { %7949 = vmatprep.subr.mxu1 %v8957_v16 }
 0x491   : > { %7950 = vmatpush1.msra.mxu1 %v8956_v43 }
 0x492   : > { %7951 = vmatprep.subr.mxu1 %v8955_v14 }
 0x493   : > { %7952 = vmatpush1.msra.mxu1 %v8954_v50 }
 0x494   : > { %7953 = vmatprep.subr.mxu1 %v8953_v35 }
 0x495   : > { %7954 = vmatpush1.msra.mxu1 %v8952_v19 }
 0x496   : > { %7955 = vmatprep.subr.mxu1 %v8951_v62 }
 0x497   : > { %7956 = vmatpush1.msra.mxu1 %v8950_v54 }
 0x498   : > { %7990 = vmatmul.mubr.f32.vlgmr.msra.gmra.mxu1 %v13658_v61  ;;  %v8234_v61 = vld [vmem:[%s14380_s10 + $0x78] sm:$0xff] }
 0x499   : > { %7995 = vmatprep.mubr.f32.mxu1 %v14504_v42  ;;  %9268 = vmatpush3.msra.mxu0 %v8234_v61 }
 0x49c   : > { %7996 = vmatmul.mubr.f32.gmra.mxu1 %v13690_v48  ;;  %v8232_v48 = vld [vmem:[%s14380_s10 + $0x68] sm:$0xff] }
 0x49d   : > { %8001 = vmatprep.mubr.f32.mxu1 %v14504_v42  ;;  %v8249_v42 = vld [vmem:[%s14380_s10 + $0xf0] sm:$0xff] }
 0x49e   : > { %9269 = vmatprep.subr.mxu0 %v8249_v42 }
 0x49f   : > { %9270 = vmatpush3.msra.mxu0 %v8233_v12 }
 0x4a0   : > { %8002 = vmatmul.mubr.f32.gmra.mxu1 %v7923_v20  ;;  %9271 = vmatprep.subr.mxu0 %v8248_v34 }
 0x4a1   : > { %9272 = vmatpush3.msra.mxu0 %v8232_v48 }
 0x4a2   : > { %9273 = vmatprep.subr.mxu0 %v8247_v58 }
 0x4a3   : > { %9274 = vmatpush3.msra.mxu0 %v8231_v59 }
 0x4a4   : > { %9275 = vmatprep.subr.mxu0 %v8246_v39 }
 0x4a5   : > { %9276 = vmatpush3.msra.mxu0 %v8230_v18 }
 0x4a6   : > { %9277 = vmatprep.subr.mxu0 %v8245_v52 }
 0x4a7   : > { %9278 = vmatpush3.msra.mxu0 %v8229_v8 }
 0x4a8   : > { %9279 = vmatprep.subr.mxu0 %v8244_v15 }
 0x4a9   : > { %9280 = vmatpush3.msra.mxu0 %v8228_v53 }
 0x4aa   : > { %9281 = vmatprep.subr.mxu0 %v8243_v46 }
 0x4ab   : > { %9282 = vmatpush3.msra.mxu0 %v8227_v32 }
 0x4ac   : > { %9283 = vmatprep.subr.mxu0 %v8242_v40 }
 0x4ad   : > { %9284 = vmatpush3.msra.mxu0 %v8226_v4 }
 0x4ae   : > { %9285 = vmatprep.subr.mxu0 %v8241_v22 }
 0x4af   : > { %9286 = vmatpush3.msra.mxu0 %v8225_v36 }
 0x4b0   : > { %9287 = vmatprep.subr.mxu0 %v8240_v27 }
 0x4b1   : > { %9288 = vmatpush3.msra.mxu0 %v8224_v2 }
 0x4b2   : > { %9289 = vmatprep.subr.mxu0 %v8239_v41 }
 0x4b3   : > { %9290 = vmatpush3.msra.mxu0 %v8223_v7 }
 0x4b4   : > { %9291 = vmatprep.subr.mxu0 %v8238_v5 }
 0x4b5   : > { %9292 = vmatpush3.msra.mxu0 %v8222_v45 }
 0x4b6   : > { %9293 = vmatprep.subr.mxu0 %v8237_v30 }
 0x4b7   : > { %9294 = vmatpush3.msra.mxu0 %v8221_v24 }
 0x4b8   : > { %9295 = vmatprep.subr.mxu0 %v8236_v21 }
 0x4b9   : > { %9296 = vmatpush3.msra.mxu0 %v8220_v26 }
 0x4ba   : > { %9297 = vmatprep.subr.mxu0 %v8235_v13 }
 0x4bb   : > { %9298 = vmatpush3.msra.mxu0 %v8219_v55 }
 0x4c0   : > { %v7093_v25 = vpop.f32.mrf.mxu0 }
 0x4c2   : > { %v7095_v23 = vpop.f32.mrf.mxu0 }
 0x4c4   : > { %v7099_v17 = vpop.f32.mrf.mxu0 }
 0x4c5   : > { %v7010_v9 = vpop.f32.mrf.mxu1 }
 0x4c6   : > { %v7101_v56 = vpop.f32.mrf.mxu0  ;;  %v7094_v48 = vadd.f32 %v7093_v25, %v7010_v9 }
 0x4c7   : > { %v7012_v38 = vpop.f32.mrf.mxu1 }
 0x4c8   : > { %v7096_v59 = vadd.f32 %v7095_v23, %v7012_v38 }
 0x4ca   : > { %v7105_v0 = vpop.f32.mrf.mxu0 }
 0x4cc   : > { %v7107_v29 = vpop.f32.mrf.mxu0 }
 0x4cf   : > { %v7016_v1 = vpop.f32.mrf.mxu1 }
 0x4d0   : > { %v7100_v52 = vadd.f32 %v7099_v17, %v7016_v1 }
 0x4d1   : > { %v7018_v10 = vpop.f32.mrf.mxu1 }
 0x4d2   : > { %v7102_v53 = vadd.f32 %v7101_v56, %v7018_v10 }
 0x4d7   : > { %v7022_v37 = vpop.f32.mrf.mxu1 }
 0x4d8   : > { %v7106_v4 = vadd.f32 %v7105_v0, %v7022_v37  ;;  %v8014_v37 = vld [vmem:[%s14378_s8] sm:$0x3] }
 0x4d9   : > { %v7024_v28 = vpop.f32.mrf.mxu1 }
 0x4da   : > { %v7108_v30 = vadd.f32 %v7107_v29, %v7024_v28  ;;  %v8032_v28 = vld [vmem:[%s14379_s9] sm:$0x3] }
 0x4e0   : > { %v7351_v11 = vpop.f32.mrf.mxu0 }
 0x4e2   : > { %v7353_v33 = vpop.f32.mrf.mxu0 }
 0x4e5   : > { %v7357_v3 = vpop.f32.mrf.mxu0 }
 0x4e7   : > { %v7359_v14 = vpop.f32.mrf.mxu0 }
 0x4ea   : > { %v7363_v35 = vpop.f32.mrf.mxu0 }
 0x4ec   : > { %v7365_v62 = vpop.f32.mrf.mxu0 }
 0x4ef   : > { %v7219_v60 = vpop.f32.mrf.mxu1 }
 0x4f0   : > { %v7236_v39 = vadd.f32 %v7219_v60, %v7094_v48 }
 0x4f1   : > { %v7221_v57 = vpop.f32.mrf.mxu1 }
 0x4f2   : > { %v7237_v8 = vadd.f32 %v7221_v57, %v7096_v59  ;;  %v7368_v40 = vadd.f32 %v7351_v11, %v7236_v39 }
 0x4f4   : > { %v7225_v49 = vpop.f32.mrf.mxu1  ;;  %v7369_v27 = vadd.f32 %v7353_v33, %v7237_v8 }
 0x4f5   : > { %v7238_v46 = vadd.f32 %v7225_v49, %v7100_v52 }
 0x4f6   : > { %v7227_v63 = vpop.f32.mrf.mxu1 }
 0x4f7   : > { %v7239_v22 = vadd.f32 %v7227_v63, %v7102_v53  ;;  %v7370_v45 = vadd.f32 %v7357_v3, %v7238_v46  ;;  %v8019_v63 = vrot.slane %v8014_v37, %v14503_v6  ;;  %v8037_v3 = vrot.slane %v8032_v28, %v14503_v6 }
 0x4f9   : > { %v7231_v47 = vpop.f32.mrf.mxu1  ;;  %v7371_v24 = vadd.f32 %v7359_v14, %v7239_v22 }
 0x4fa   : > { %v7240_v7 = vadd.f32 %v7231_v47, %v7106_v4 }
 0x4fb   : > { %v7233_v16 = vpop.f32.mrf.mxu1 }
 0x4fc   : > { %v7241_v13 = vadd.f32 %v7233_v16, %v7108_v30  ;;  %v7372_v1 = vadd.f32 %v7363_v35, %v7240_v7  ;;  %v14508_v16 = vld [vmem:[#allocation7_spill] sm:$0xff] }
 0x4fe   : > { %v7373_v57 = vadd.f32 %v7365_v62, %v7241_v13  ;;  %v8041_v62 = vrot.slane %v8032_v28, %v14508_v16 }
 0x506   : > { %v7605_v54 = vpop.f32.mrf.mxu0 }
 0x508   : > { %v7607_v20 = vpop.f32.mrf.mxu0 }
 0x50b   : > { %v7611_v61 = vpop.f32.mrf.mxu0 }
 0x50d   : > { %v7613_v34 = vpop.f32.mrf.mxu0 }
 0x510   : > { %v7617_v18 = vpop.f32.mrf.mxu0 }
 0x512   : > { %v7619_v32 = vpop.f32.mrf.mxu0 }
 0x515   : > { %v7483_v43 = vpop.f32.mrf.mxu1 }
 0x516   : > { %v7500_v36 = vadd.f32 %v7483_v43, %v7368_v40  ;;  %v8023_v43 = vrot.slane %v8014_v37, %v14508_v16 }
 0x517   : > { %v7485_v50 = vpop.f32.mrf.mxu1 }
 0x518   : > { %v7501_v5 = vadd.f32 %v7485_v50, %v7369_v27  ;;  %v7622_v26 = vadd.f32 %v7605_v54, %v7500_v36 }
 0x51a   : > { %v7489_v19 = vpop.f32.mrf.mxu1  ;;  %v7623_v25 = vadd.f32 %v7607_v20, %v7501_v5 }
 0x51b   : > { %v7502_v9 = vadd.f32 %v7489_v19, %v7370_v45 }
 0x51c   : > { %v7491_v31 = vpop.f32.mrf.mxu1 }
 0x51d   : > { %v7503_v55 = vadd.f32 %v7491_v31, %v7371_v24  ;;  %v7624_v56 = vadd.f32 %v7611_v61, %v7502_v9 }
 0x51f   : > { %v7495_v51 = vpop.f32.mrf.mxu1  ;;  %v7625_v29 = vadd.f32 %v7613_v34, %v7503_v55 }
 0x520   : > { %v7504_v23 = vadd.f32 %v7495_v51, %v7372_v1 }
 0x521   : > { %v7497_v42 = vpop.f32.mrf.mxu1 }
 0x522   : > { %v7505_v33 = vadd.f32 %v7497_v42, %v7373_v57  ;;  %v7626_v35 = vadd.f32 %v7617_v18, %v7504_v23 }
 0x524   : > { %v7627_v34 = vadd.f32 %v7619_v32, %v7505_v33 }
 0x52c   : > { %v7867_v2 = vpop.f32.mrf.mxu0 }
 0x52e   : > { %v7869_v21 = vpop.f32.mrf.mxu0 }
 0x530   : > { %v7873_v17 = vpop.f32.mrf.mxu0 }
 0x532   : > { %v7875_v14 = vpop.f32.mrf.mxu0 }
 0x534   : > { %v7879_v42 = vpop.f32.mrf.mxu0 }
 0x536   : > { %v7881_v36 = vpop.f32.mrf.mxu0 }
 0x538   : > { %v7736_v12 = vpop.f32.mrf.mxu1 }
 0x539   : > { %v7753_v10 = vadd.f32 %v7736_v12, %v7622_v26 }
 0x53a   : > { %v7738_v58 = vpop.f32.mrf.mxu1 }
 0x53b   : > { %v7754_v60 = vadd.f32 %v7738_v58, %v7623_v25  ;;  %v7884_v11 = vadd.f32 %v7867_v2, %v7753_v10 }
 0x53c   : > { %v7742_v15 = vpop.f32.mrf.mxu1 }
 0x53d   : > { %v7755_v49 = vadd.f32 %v7742_v15, %v7624_v56  ;;  %v7885_v54 = vadd.f32 %v7869_v21, %v7754_v60 }
 0x53e   : > { %v7744_v41 = vpop.f32.mrf.mxu1 }
 0x53f   : > { %v7756_v50 = vadd.f32 %v7744_v41, %v7625_v29  ;;  %v7886_v12 = vadd.f32 %v7873_v17, %v7755_v49 }
 0x540   : > { %v7748_v38 = vpop.f32.mrf.mxu1 }
 0x541   : > { %v7757_v20 = vadd.f32 %v7748_v38, %v7626_v35  ;;  %v7887_v52 = vadd.f32 %v7875_v14, %v7756_v50 }
 0x542   : > { %v7750_v0 = vpop.f32.mrf.mxu1 }
 0x543   : > { %v7758_v8 = vadd.f32 %v7750_v0, %v7627_v34  ;;  %v7888_v40 = vadd.f32 %v7879_v42, %v7757_v20 }
 0x545   : > { %v7889_v32 = vadd.f32 %v7881_v36, %v7758_v8 }
 0x558   : > { %v7991_v47 = vpop.f32.mrf.mxu1 }
 0x559   : > { %v8008_v19 = vadd.f32 %v7991_v47, %v7884_v11 }
 0x55a   : > { %v7993_v31 = vpop.f32.mrf.mxu1 }
 0x55b   : > { %v8026_v51 = vmul.f32 %v8019_v63, %v8008_v19  ;;  %v8009_v61 = vadd.f32 %v7993_v31, %v7885_v54 }
 0x55c   : > { %v7997_v48 = vpop.f32.mrf.mxu1 }
 0x55d   : > { %v8044_v58 = vadd.f32 %v8037_v3, %v8026_v51  ;;  %v8027_v59 = vmul.f32 %v8023_v43, %v8009_v61  ;;  %v8010_v39 = vadd.f32 %v7997_v48, %v7886_v12  ;;  %v14509_v48 = vld [vmem:[#allocation5_spill] sm:$0xff] }
 0x55e   : > { %v7999_v15 = vpop.f32.mrf.mxu1  ;;  %v8168_v42 = vsub.s32 2, %v14509_v48 }
 0x55f   : > { %v8045_v53 = vadd.f32 %v8041_v62, %v8027_v59  ;;  %v8028_v18 = vmul.f32 %v8019_v63, %v8010_v39  ;;  %v8011_v46 = vadd.f32 %v7999_v15, %v7887_v52  ;;  %v8050_v4 = vmax.f32 %v8044_v58, 0.0 }
 0x560   : > { %v8003_v22 = vpop.f32.mrf.mxu1 }
 0x561   : > { %v8051_v27 = vmax.f32 %v8045_v53, 0.0  ;;  %v8046_v2 = vadd.f32 %v8037_v3, %v8028_v18  ;;  %v8029_v41 = vmul.f32 %v8023_v43, %v8011_v46  ;;  %v8012_v7 = vadd.f32 %v8003_v22, %v7888_v40 }
 0x562   : > { %v8005_v5 = vpop.f32.mrf.mxu1 }
 0x563   : > { %v8062_v45 = vcombine.low %v8050_v4, %v8051_v27  ;;  %v8063_v30 = vcombine.high %v8050_v4, %v8051_v27  ;;  %v8047_v9 = vadd.f32 %v8041_v62, %v8029_v41  ;;  %v8030_v24 = vmul.f32 %v8019_v63, %v8012_v7 }
 0x564   : > { %v8013_v21 = vadd.f32 %v8005_v5, %v7889_v32  ;;  %v8052_v38 = vmax.f32 %v8046_v2, 0.0 }
 0x565   : > { %v8070_v26 = vrot.slane %v8062_v45, %v14502_v44  ;;  %v8077_v13 = vrot.slane %v8063_v30, %v14502_v44  ;;  %v8053_v55 = vmax.f32 %v8047_v9, 0.0  ;;  %v8048_v1 = vadd.f32 %v8037_v3, %v8030_v24 }
 0x566   : > { %v8031_v10 = vmul.f32 %v8023_v43, %v8013_v21 }
 0x567   : > { %v8078_v25 = vcombine.high %v8070_v26, %v8070_v26  ;;  %v8079_v37 = vcombine.high %v8077_v13, %v8077_v13  ;;  %v8080_v23 = vcombine.low %v8052_v38, %v8053_v55  ;;  %v8081_v17 = vcombine.high %v8052_v38, %v8053_v55 }
 0x568   : > { %v8049_v60 = vadd.f32 %v8041_v62, %v8031_v10  ;;  %v8054_v57 = vmax.f32 %v8048_v1, 0.0  ;;  %v8982_v16 = vrot.slane %v8070_v26, 9 }
 0x569   : > { %v8088_v56 = vrot.slane %v8080_v23, %v14502_v44  ;;  %v8095_v28 = vrot.slane %v8081_v17, %v14502_v44  ;;  %v8983_v49 = vrot.slane %v8078_v25, 9  ;;  %v8984_v29 = vrot.slane %v8079_v37, 9 }
 0x56a   : > { %v8055_v0 = vmax.f32 %v8049_v60, 0.0  ;;  %v8146_v20 = vmax.f32 %v8070_v26, %v8982_v16  ;;  %v8251_v60 = vld [vmem:[%s14381_s11] sm:$0x1] }
 0x56b   : > { %v8985_v11 = vrot.slane %v8088_v56, 9  ;;  %v8096_v63 = vcombine.high %v8095_v28, %v8095_v28  ;;  %v8148_v50 = vmax.f32 %v8079_v37, %v8984_v29  ;;  %v8147_v19 = vmax.f32 %v8078_v25, %v8983_v49 }
 0x56c   : > { %v8097_v33 = vcombine.low %v8054_v57, %v8055_v0  ;;  %v8098_v47 = vcombine.high %v8054_v57, %v8055_v0  ;;  %v8986_v54 = vrot.slane %v8095_v28, 9 }
 0x56d   : > { %v8149_v3 = vmax.f32 %v8088_v56, %v8985_v11  ;;  %v8987_v35 = vrot.slane %v8096_v63, 9  ;;  %v8154_v34 = vmax.f32 %v8146_v20, %v8148_v50 }
 0x56e   : > { %v8105_v43 = vrot.slane %v8097_v33, %v14502_v44  ;;  %v8112_v14 = vrot.slane %v8098_v47, %v14502_v44  ;;  %v8150_v59 = vmax.f32 %v8095_v28, %v8986_v54 }
 0x56f   : > { %v8155_v51 = vmax.f32 %v8147_v19, %v8149_v3  ;;  %v8151_v58 = vmax.f32 %v8096_v63, %v8987_v35  ;;  %v8165_v53 = vrot.slane %v8154_v34, %v14503_v6  ;;  %v8169_v18 = vrot.slane %v8154_v34, %v8168_v42 }
 0x570   : > { %v8113_v31 = vcombine.high %v8105_v43, %v8105_v43  ;;  %v8989_v62 = vrot.slane %v8112_v14, 9 }
 0x571   : > { %v8173_v52 = vrot.slane %v8155_v51, %v14503_v6  ;;  %v8177_v8 = vrot.slane %v8155_v51, %v8168_v42 }
 0x572   : > { %v8988_v61 = vrot.slane %v8113_v31, 9  ;;  %v8153_v12 = vmax.f32 %v8112_v14, %v8989_v62 }
 0x573   : > { %v8194_v4 = vsel %vm3569_vm8, %v8173_v52, %v8165_v53  ;;  %v8197_v27 = vsel %vm3569_vm8, %v8177_v8, %v8169_v18 }
 0x574   : > { %v8152_v39 = vmax.f32 %v8113_v31, %v8988_v61  ;;  %v8157_v44 = vmax.f32 %v8151_v58, %v8153_v12 }
 0x576   : > { %v8156_v15 = vmax.f32 %v8150_v59, %v8152_v39  ;;  %v8189_v22 = vrot.slane %v8157_v44, %v14503_v6  ;;  %v8193_v36 = vrot.slane %v8157_v44, %v8168_v42 }
 0x578   : > { %v8181_v46 = vrot.slane %v8156_v15, %v14503_v6  ;;  %v8185_v40 = vrot.slane %v8156_v15, %v8168_v42 }
 0x57a   : > { %v8195_v2 = vsel %vm2034_vm1, %v8181_v46, %v8194_v4  ;;  %v8198_v41 = vsel %vm2034_vm1, %v8185_v40, %v8197_v27 }
 0x57b   : > { %v8199_v7 = vsel %vm2036_vm2, %v8193_v36, %v8198_v41  ;;  %v8196_v32 = vsel %vm2036_vm2, %v8189_v22, %v8195_v2 }
 0x57c   : > { %v8209_v5 = vsel %vm5585_vm13, %v8199_v7, 0.0  ;;  %v8202_v45 = vsel %vm5585_vm13, %v8196_v32, 0.0 }
 0x57d   : > { %v8210_v30 = vrot.slane %v8209_v5, 4  ;;  %v8203_v9 = vrot.slane %v8202_v45, 4 }
 0x57f   : > { %v8211_v24 = vadd.f32 %v8210_v30, %v8209_v5  ;;  %v8204_v6 = vadd.f32 %v8203_v9, %v8202_v45 }
 0x581   : > { %v8212_v21 = vrot.slane %v8211_v24, 2  ;;  %v8205_v26 = vrot.slane %v8204_v6, 2 }
 0x583   : > { %v8213_v13 = vadd.f32 %v8212_v21, %v8211_v24  ;;  %v8206_v38 = vadd.f32 %v8205_v26, %v8204_v6 }
 0x585   : > { %v8214_v55 = vrot.slane %v8213_v13, 1  ;;  %v8207_v1 = vrot.slane %v8206_v38, 1 }
 0x587   : > { %v8215_v10 = vadd.f32 %v8214_v55, %v8213_v13  ;;  %v8208_v25 = vadd.f32 %v8207_v1, %v8206_v38 }
 0x589   : > { %v8218_v37 = vmul.f32 0.25, %v8215_v10  ;;  %v8217_v23 = vmul.f32 0.25, %v8208_v25 }
 0x58b   : > { %8316 = vmatprep.mubr.f32.mxu0 %v8218_v37 }
 0x58c   : > { %8317 = vmatmul.mubr.f32.vlgmr.msra.gmra.mxu0 %v8217_v23 }
 0x64c   : > { %v9299_v17 = vpop.f32.mrf.mxu0 }
 0x64e   : > { %v9300_v56 = vpop.f32.mrf.mxu0 }
 0x64f   : > { %v9301_v28 = vadd.f32 %v9300_v56, %v9299_v17 }
 0x651   : > { %v8319_v57 = vadd.f32 %v9301_v28, %v8251_v60 }
 0x653   : > { %8322 = vst [vmem:[%s405_s29] sm:$0x1] %v8319_v57 }
 0x654   : > { %9845 = shalt.err (!%p9842_p3)
}
 0x655   : > { %s9846_s2 = scalar_lea.hbm %s8334_s19, 16  ;;  %s9850_s29 = scalar_lea.hbm %s14382_s12, 32 }
 0x656   : > { %p9847_p4 = scmp.ne.s32.totalorder %s8334_s19, %s9846_s2  ;;  %p9851_p9 = scmp.lt.s32.totalorder %s8334_s19, %s14382_s12 }
 0x657   : > { %p9852_p10 = scmp.lt.s32.totalorder %s9850_s29, %s9846_s2 }
 0x658   : > { %p9848_p7 = pnand %p9847_p4, %p10000_p5 }
 0x659   : > { %p9853_p11 = por %p9852_p10, %p9851_p9 }
 0x65a   : > { %p9849_p8 = pneg %p9848_p7 }
 0x65c   : > { %p9854_p12 = pnand %p9853_p11, %p9849_p8 }
 0x65e   : > { %9857 = shalt.err (!%p9854_p12)
}
 0x65f   : > { %9787 = dma.vmem_to_hbm [thread:$0]  (%p10000_p5), %s8337_s15, 16, %s8334_s19, %s8324_s20  }
 0x660 PF: > { %p9793_p13 = scmp.ge.s32.totalorder %s9892_s24, 2  ;;  %s8348_s1 = sand.u32 1, %s9880_s21  }
 0x661   : > { %s8349_s18 = scalar_lea.sflag [#allocation3], %s8348_s1 }
 0x662   : > { %p9790_p0 = pnand %p9793_p13, %p10004_p6 }
 0x664   : > { %p9791_p1 = pneg %p9790_p0 }
 0x666   : > { %9875 = dma.done.wait (%p9791_p1), %s8349_s18, 16  }
 0x667   : > { %9877 = vsyncadd (%p9791_p1), %s8349_s18, 4294967280  ;;  %p22_p2 = scmp.ge.s32.totalorder %s9987_s27, 4   ;;  %s14510_s21 = smov %s9884_s22 }
 0x668   : > { %s14511_s22 = smov %s9888_s23  ;;  %s14512_s23 = smov %s9998_s30 }
 0x669   : > { %s14513_s24 = smov %s9987_s27  ;;  %24 = sbr.rel (!%p22_p2) target bundleno = 7 (0x7), region = 119 }
 0x66e   :  { %8353 = vsyncpa [#allocation3], 1 }
 0x66f   :  { %8355 = vsyncpa [#allocation3 + $0x1], 1 }

</bundles_post_ra>
